<compile_context>
chip_gen: v6e
topology: v6e:2x2x1
jax: 0.10.0
libtpu: 0.0.40
codegen_flags: <defaults>
</compile_context>

<pallas_src>
import jax
import jax.numpy as jnp
from jax import lax
from jax.experimental import pallas as pl
from jax.experimental.pallas import tpu as pltpu
import numpy as np

# ---------------- problem configuration (small, module-consistent) ------------
N_BLOCKS = 3                 # LatentTranslator(n_blocks=...)  (default 9)
N, H, W, C = 2, 8, 8, 32     # batch, height, width, n_channels (default 256)
N_CONVS = 2 * N_BLOCKS
EPS = 1e-5

R = N * H                    # rows of the lane-dense layout
WC = W * C                   # lanes of the lane-dense layout (256 = 2 lane tiles)
K3 = 3 * WC                  # contraction dim of the fused conv matmul (768)
INV_M = 1.0 / (N * H * W)    # 1 / #spatial positions per channel (BN stats)


# ------------------------------- Pallas kernel --------------------------------
def latent_translator_kernel(x_ref, w_ref, g_ref, b_ref, q_ref, o_ref):
    """All ResnetBlocks fused; everything resident in VMEM.

    x_ref: (R, WC)              activation, lane-dense (N*H, W*C)
    w_ref: (N_CONVS, 3*WC, WC)  per-conv dense weights (W-reflect pad folded in)
    g_ref: (N_CONVS, WC)        BatchNorm gamma, tiled W times along lanes
    b_ref: (N_CONVS, WC)        BatchNorm beta,  tiled W times along lanes
    q_ref: (WC, WC)             channel-group sum/replicate matrix (i%C == j%C)
    o_ref: (R, WC)              output, lane-dense
    """
    x = x_ref[...]
    q = q_ref[...]

    # Row masks for the height-direction ReflectionPad2d(1).
    row = lax.broadcasted_iota(jnp.int32, (R, 1), 0)
    h_id = row % H
    is_h0 = h_id == 0
    is_hl = h_id == H - 1

    def shift_rows(z, k):
        # Static row rotation: result[r] = z[r - k].  Rows that wrap across a
        # batch (or array) boundary are only ever used at positions the reflect
        # select below masks out.
        k = k % R
        return jnp.concatenate([z[R - k:], z[:R - k]], axis=0)

    def conv_bn(z, idx, relu):
        # ---- 3x3 reflect-pad conv as ONE matmul --------------------------
        up = shift_rows(z, 1)                     # value at h-1 (interior)
        dn = shift_rows(z, -1)                    # value at h+1 (interior)
        z_m1 = jnp.where(is_h0, dn, up)           # row h-1 with reflect(1)
        z_p1 = jnp.where(is_hl, up, dn)           # row h+1 with reflect(1)
        patch = jnp.concatenate([z_m1, z, z_p1], axis=1)       # (R, 3*WC)
        y = jnp.dot(patch, w_ref[idx],
                    preferred_element_type=jnp.float32)         # (R, WC)

        # ---- training-mode BatchNorm2d folded to scale/shift --------------
        # channel sums over (N, H, W), replicated across the W lane groups
        mean = jnp.sum(jnp.dot(y, q, preferred_element_type=jnp.float32),
                       axis=0, keepdims=True) * INV_M           # (1, WC)
        d = y - mean
        var = jnp.sum(jnp.dot(d * d, q, preferred_element_type=jnp.float32),
                      axis=0, keepdims=True) * INV_M            # biased var
        scale = g_ref[idx:idx + 1, :] * lax.rsqrt(var + EPS)
        out = d * scale + b_ref[idx:idx + 1, :]
        if relu:
            out = jnp.maximum(out, 0.0)
        return out

    cur = x
    for blk in range(N_BLOCKS):
        hid = conv_bn(cur, 2 * blk, relu=True)        # conv + BN + ReLU
        cur = cur + conv_bn(hid, 2 * blk + 1, relu=False)  # conv + BN + skip
    o_ref[...] = cur


@jax.jit
def latent_translator(x_dense, w_dense, g_rep, b_rep, q):
    return pl.pallas_call(
        latent_translator_kernel,
        out_shape=jax.ShapeDtypeStruct((R, WC), jnp.float32),
        in_specs=[pl.BlockSpec(memory_space=pltpu.MemorySpace.VMEM)] * 5,
        out_specs=pl.BlockSpec(memory_space=pltpu.MemorySpace.VMEM),
        # x is fully consumed before the (lane-dense) output store, so reuse it.
        input_output_aliases={0: 0},
        # NOTE: at the production config (n_blocks=9, C=256) switch to a grid
        # over blocks with a per-block weight BlockSpec (streamed/double-
        # buffered) + raised vmem_limit_bytes; C=256 is already lane-dense, so
        # the plain (9*C, C) im2col weight layout is preferable there.  On v7x,
        # additionally shard the batch over the two TensorCores with a
        # cross-core BN-stat exchange.
    )(x_dense, w_dense, g_rep, b_rep, q)


# --------------------- host-side packing into kernel layouts ------------------
def prepare_inputs(x, w_base, gamma, beta):
    x = np.asarray(x, np.float32)
    w_base = np.asarray(w_base, np.float32)      # (N_CONVS, 3, 3, C, C)  HWIO
    gamma = np.asarray(gamma, np.float32)
    beta = np.asarray(beta, np.float32)

    # Fold the width-direction ReflectionPad2d(1) into a banded dense weight:
    # w_dense[k, dy*W*C + w_src*C + ci, w_dst*C + co] =
    #   sum over dx with reflect(w_dst + dx - 1) == w_src of w_base[k,dy,dx,ci,co]
    wd = np.zeros((N_CONVS, 3, W, C, W, C), np.float32)
    for dy in range(3):
        for dx in range(3):
            for w_dst in range(W):
                w_src = w_dst + dx - 1
                if w_src < 0:
                    w_src = -w_src
                elif w_src > W - 1:
                    w_src = 2 * (W - 1) - w_src
                wd[:, dy, w_src, :, w_dst, :] += w_base[:, dy, dx, :, :]
    w_dense = wd.reshape(N_CONVS, 3 * W * C, W * C)

    g_rep = np.tile(gamma, (1, W))               # (N_CONVS, W*C)
    b_rep = np.tile(beta, (1, W))
    lane = np.arange(W * C)
    q = (lane[:, None] % C == lane[None, :] % C).astype(np.float32)
    x_dense = x.reshape(N * H, W * C)
    return (jnp.asarray(x_dense), jnp.asarray(w_dense),
            jnp.asarray(g_rep), jnp.asarray(b_rep), jnp.asarray(q))


# ------------------------------ pure-JAX reference ----------------------------
def reference_forward(x, w_base, gamma, beta):
    cur = x
    for blk in range(N_BLOCKS):
        def conv_bn(a, idx):
            ap = jnp.pad(a, ((0, 0), (1, 1), (1, 1), (0, 0)), mode='reflect')
            y = lax.conv_general_dilated(
                ap, w_base[idx], window_strides=(1, 1), padding='VALID',
                dimension_numbers=('NHWC', 'HWIO', 'NHWC'),
                precision=lax.Precision.HIGHEST)
            mean = y.mean(axis=(0, 1, 2), keepdims=True)
            var = jnp.square(y - mean).mean(axis=(0, 1, 2), keepdims=True)
            return (y - mean) * lax.rsqrt(var + EPS) * gamma[idx] + beta[idx]

        hid = jnp.maximum(conv_bn(cur, 2 * blk), 0.0)
        cur = cur + conv_bn(hid, 2 * blk + 1)
    return cur


# ------------------------------------ main -------------------------------------
if __name__ == "__main__":
    key = jax.random.PRNGKey(0)
    kx, kw, kg, kb = jax.random.split(key, 4)

    x = jax.random.normal(kx, (N, H, W, C), dtype=jnp.float32)
    # Conv weights (no bias, BatchNorm): (n_convs, 3, 3, Cin, Cout) HWIO.
    w_base = jax.random.normal(kw, (N_CONVS, 3, 3, C, C), dtype=jnp.float32) * (
        1.0 / np.sqrt(9.0 * C))
    # BatchNorm affine parameters (one pair per conv).
    gamma = 1.0 + 0.1 * jax.random.normal(kg, (N_CONVS, C), dtype=jnp.float32)
    beta = 0.1 * jax.random.normal(kb, (N_CONVS, C), dtype=jnp.float32)

    inputs = prepare_inputs(x, w_base, gamma, beta)
    out_dense = jax.block_until_ready(latent_translator(*inputs))
    out = np.asarray(out_dense).reshape(N, H, W, C)

    ref = np.asarray(jax.block_until_ready(
        reference_forward(x, w_base, gamma, beta)))
    np.testing.assert_allclose(out, ref, rtol=1e-3, atol=1e-3)

    print("KERNEL_OK")
</pallas_src>

<mosaic_0001>
module attributes {stable_mosaic.version = 11 : i64} {
  func.func @latent_translator_kernel(%arg0: memref<16x256xf32, #tpu.memory_space<vmem>>, %arg1: memref<6x768x256xf32, #tpu.memory_space<vmem>>, %arg2: memref<6x256xf32, #tpu.memory_space<vmem>>, %arg3: memref<6x256xf32, #tpu.memory_space<vmem>>, %arg4: memref<256x256xf32, #tpu.memory_space<vmem>>, %arg5: memref<16x256xf32, #tpu.memory_space<vmem>>) attributes {dimension_semantics = [], scalar_prefetch = 0 : i64, scratch_operands = 0 : i64, tpu.core_type = #tpu.core_type<tc>} {
    %c0 = arith.constant 0 : index
    %c0_0 = arith.constant 0 : index
    %0 = vector.load %arg0[%c0, %c0_0] : memref<16x256xf32, #tpu.memory_space<vmem>>, vector<16x256xf32>
    %c0_1 = arith.constant 0 : index
    %c0_2 = arith.constant 0 : index
    %1 = vector.load %arg4[%c0_1, %c0_2] : memref<256x256xf32, #tpu.memory_space<vmem>>, vector<256x256xf32>
    %2 = tpu.iota {dimensions = array<i32: 0>} : vector<16x1xi32>
    %c8_i32 = arith.constant 8 : i32
    %c0_i32 = arith.constant 0 : i32
    %3 = arith.cmpi eq, %c8_i32, %c0_i32 : i32
    %c1_i32 = arith.constant 1 : i32
    %4 = arith.select %3, %c1_i32, %c8_i32 : i32
    %5 = vector.broadcast %4 : i32 to vector<16x1xi32>
    %6 = arith.remsi %2, %5 : vector<16x1xi32>
    %c0_i32_3 = arith.constant 0 : i32
    %7 = vector.broadcast %c0_i32_3 : i32 to vector<16x1xi32>
    %8 = arith.cmpi ne, %6, %7 : vector<16x1xi32>
    %c0_i32_4 = arith.constant 0 : i32
    %9 = vector.broadcast %c0_i32_4 : i32 to vector<16x1xi32>
    %10 = arith.cmpi slt, %6, %9 : vector<16x1xi32>
    %c0_i32_5 = arith.constant 0 : i32
    %11 = arith.cmpi slt, %4, %c0_i32_5 : i32
    %12 = vector.broadcast %11 : i1 to vector<16x1xi1>
    %13 = vector.broadcast %12 : vector<16x1xi1> to vector<16x1xi1>
    %14 = arith.xori %10, %13 : vector<16x1xi1>
    %15 = arith.andi %14, %8 : vector<16x1xi1>
    %16 = vector.broadcast %4 : i32 to vector<16x1xi32>
    %17 = arith.addi %6, %16 : vector<16x1xi32>
    %18 = arith.select %15, %17, %6 : vector<16x1xi1>, vector<16x1xi32>
    %c0_i32_6 = arith.constant 0 : i32
    %19 = vector.broadcast %c0_i32_6 : i32 to vector<16x1xi32>
    %20 = arith.cmpi eq, %18, %19 : vector<16x1xi32>
    %c7_i32 = arith.constant 7 : i32
    %21 = vector.broadcast %c7_i32 : i32 to vector<16x1xi32>
    %22 = arith.cmpi eq, %18, %21 : vector<16x1xi32>
    %23 = vector.extract_strided_slice %0 {offsets = [15, 0], sizes = [1, 256], strides = [1, 1]} : vector<16x256xf32> to vector<1x256xf32>
    %24 = vector.extract_strided_slice %0 {offsets = [0, 0], sizes = [15, 256], strides = [1, 1]} : vector<16x256xf32> to vector<15x256xf32>
    %25 = tpu.concatenate %23, %24 in 0 : vector<1x256xf32>, vector<15x256xf32> -> vector<16x256xf32>
    %26 = vector.extract_strided_slice %0 {offsets = [1, 0], sizes = [15, 256], strides = [1, 1]} : vector<16x256xf32> to vector<15x256xf32>
    %27 = vector.extract_strided_slice %0 {offsets = [0, 0], sizes = [1, 256], strides = [1, 1]} : vector<16x256xf32> to vector<1x256xf32>
    %28 = tpu.concatenate %26, %27 in 0 : vector<15x256xf32>, vector<1x256xf32> -> vector<16x256xf32>
    %29 = vector.shape_cast %20 : vector<16x1xi1> to vector<16x1xi1>
    %30 = vector.broadcast %29 : vector<16x1xi1> to vector<16x256xi1>
    %31 = arith.select %30, %28, %25 : vector<16x256xi1>, vector<16x256xf32>
    %32 = vector.shape_cast %22 : vector<16x1xi1> to vector<16x1xi1>
    %33 = vector.broadcast %32 : vector<16x1xi1> to vector<16x256xi1>
    %34 = arith.select %33, %25, %28 : vector<16x256xi1>, vector<16x256xf32>
    %35 = tpu.concatenate %31, %0, %34 in 1 : vector<16x256xf32>, vector<16x256xf32>, vector<16x256xf32> -> vector<16x768xf32>
    %c0_7 = arith.constant 0 : index
    %c0_8 = arith.constant 0 : index
    %c0_9 = arith.constant 0 : index
    %36 = vector.load %arg1[%c0_7, %c0_8, %c0_9] : memref<6x768x256xf32, #tpu.memory_space<vmem>>, vector<1x768x256xf32>
    %37 = vector.shape_cast %36 : vector<1x768x256xf32> to vector<768x256xf32>
    %cst = arith.constant dense<0.000000e+00> : vector<16x256xf32>
    %38 = tpu.matmul %35, %37, %cst {dimension_numbers = #tpu.dot_dimension_numbers<[1], [0], [0], [1], [0, 0, 1, 1], [], []>} : vector<16x768xf32>, vector<768x256xf32>, vector<16x256xf32> -> vector<16x256xf32>
    %cst_10 = arith.constant dense<0.000000e+00> : vector<16x256xf32>
    %39 = tpu.matmul %38, %1, %cst_10 {dimension_numbers = #tpu.dot_dimension_numbers<[1], [0], [0], [1], [0, 0, 1, 1], [], []>} : vector<16x256xf32>, vector<256x256xf32>, vector<16x256xf32> -> vector<16x256xf32>
    %cst_11 = arith.constant dense<0.000000e+00> : vector<256xf32>
    %40 = vector.multi_reduction <add>, %39, %cst_11 [0] : vector<16x256xf32> to vector<256xf32>
    %41 = vector.shape_cast %40 : vector<256xf32> to vector<1x256xf32>
    %cst_12 = arith.constant 7.812500e-03 : f32
    %42 = vector.broadcast %cst_12 : f32 to vector<1x256xf32>
    %43 = arith.mulf %41, %42 : vector<1x256xf32>
    %44 = vector.broadcast %43 : vector<1x256xf32> to vector<16x256xf32>
    %45 = arith.subf %38, %44 : vector<16x256xf32>
    %46 = arith.mulf %45, %45 : vector<16x256xf32>
    %cst_13 = arith.constant dense<0.000000e+00> : vector<16x256xf32>
    %47 = tpu.matmul %46, %1, %cst_13 {dimension_numbers = #tpu.dot_dimension_numbers<[1], [0], [0], [1], [0, 0, 1, 1], [], []>} : vector<16x256xf32>, vector<256x256xf32>, vector<16x256xf32> -> vector<16x256xf32>
    %cst_14 = arith.constant dense<0.000000e+00> : vector<256xf32>
    %48 = vector.multi_reduction <add>, %47, %cst_14 [0] : vector<16x256xf32> to vector<256xf32>
    %49 = vector.shape_cast %48 : vector<256xf32> to vector<1x256xf32>
    %cst_15 = arith.constant 7.812500e-03 : f32
    %50 = vector.broadcast %cst_15 : f32 to vector<1x256xf32>
    %51 = arith.mulf %49, %50 : vector<1x256xf32>
    %c0_16 = arith.constant 0 : index
    %c0_17 = arith.constant 0 : index
    %52 = vector.load %arg2[%c0_16, %c0_17] : memref<6x256xf32, #tpu.memory_space<vmem>>, vector<1x256xf32>
    %cst_18 = arith.constant 9.99999974E-6 : f32
    %53 = vector.broadcast %cst_18 : f32 to vector<1x256xf32>
    %54 = arith.addf %51, %53 : vector<1x256xf32>
    %55 = math.rsqrt %54 : vector<1x256xf32>
    %56 = arith.mulf %52, %55 : vector<1x256xf32>
    %57 = vector.broadcast %56 : vector<1x256xf32> to vector<16x256xf32>
    %58 = arith.mulf %45, %57 : vector<16x256xf32>
    %c0_19 = arith.constant 0 : index
    %c0_20 = arith.constant 0 : index
    %59 = vector.load %arg3[%c0_19, %c0_20] : memref<6x256xf32, #tpu.memory_space<vmem>>, vector<1x256xf32>
    %60 = vector.broadcast %59 : vector<1x256xf32> to vector<16x256xf32>
    %61 = arith.addf %58, %60 : vector<16x256xf32>
    %cst_21 = arith.constant 0.000000e+00 : f32
    %62 = vector.broadcast %cst_21 : f32 to vector<16x256xf32>
    %63 = arith.maximumf %61, %62 : vector<16x256xf32>
    %64 = vector.extract_strided_slice %63 {offsets = [15, 0], sizes = [1, 256], strides = [1, 1]} : vector<16x256xf32> to vector<1x256xf32>
    %65 = vector.extract_strided_slice %63 {offsets = [0, 0], sizes = [15, 256], strides = [1, 1]} : vector<16x256xf32> to vector<15x256xf32>
    %66 = tpu.concatenate %64, %65 in 0 : vector<1x256xf32>, vector<15x256xf32> -> vector<16x256xf32>
    %67 = vector.extract_strided_slice %63 {offsets = [1, 0], sizes = [15, 256], strides = [1, 1]} : vector<16x256xf32> to vector<15x256xf32>
    %68 = vector.extract_strided_slice %63 {offsets = [0, 0], sizes = [1, 256], strides = [1, 1]} : vector<16x256xf32> to vector<1x256xf32>
    %69 = tpu.concatenate %67, %68 in 0 : vector<15x256xf32>, vector<1x256xf32> -> vector<16x256xf32>
    %70 = vector.shape_cast %20 : vector<16x1xi1> to vector<16x1xi1>
    %71 = vector.broadcast %70 : vector<16x1xi1> to vector<16x256xi1>
    %72 = arith.select %71, %69, %66 : vector<16x256xi1>, vector<16x256xf32>
    %73 = vector.shape_cast %22 : vector<16x1xi1> to vector<16x1xi1>
    %74 = vector.broadcast %73 : vector<16x1xi1> to vector<16x256xi1>
    %75 = arith.select %74, %66, %69 : vector<16x256xi1>, vector<16x256xf32>
    %76 = tpu.concatenate %72, %63, %75 in 1 : vector<16x256xf32>, vector<16x256xf32>, vector<16x256xf32> -> vector<16x768xf32>
    %c1 = arith.constant 1 : index
    %c0_22 = arith.constant 0 : index
    %c0_23 = arith.constant 0 : index
    %77 = vector.load %arg1[%c1, %c0_22, %c0_23] : memref<6x768x256xf32, #tpu.memory_space<vmem>>, vector<1x768x256xf32>
    %78 = vector.shape_cast %77 : vector<1x768x256xf32> to vector<768x256xf32>
    %cst_24 = arith.constant dense<0.000000e+00> : vector<16x256xf32>
    %79 = tpu.matmul %76, %78, %cst_24 {dimension_numbers = #tpu.dot_dimension_numbers<[1], [0], [0], [1], [0, 0, 1, 1], [], []>} : vector<16x768xf32>, vector<768x256xf32>, vector<16x256xf32> -> vector<16x256xf32>
    %cst_25 = arith.constant dense<0.000000e+00> : vector<16x256xf32>
    %80 = tpu.matmul %79, %1, %cst_25 {dimension_numbers = #tpu.dot_dimension_numbers<[1], [0], [0], [1], [0, 0, 1, 1], [], []>} : vector<16x256xf32>, vector<256x256xf32>, vector<16x256xf32> -> vector<16x256xf32>
    %cst_26 = arith.constant dense<0.000000e+00> : vector<256xf32>
    %81 = vector.multi_reduction <add>, %80, %cst_26 [0] : vector<16x256xf32> to vector<256xf32>
    %82 = vector.shape_cast %81 : vector<256xf32> to vector<1x256xf32>
    %cst_27 = arith.constant 7.812500e-03 : f32
    %83 = vector.broadcast %cst_27 : f32 to vector<1x256xf32>
    %84 = arith.mulf %82, %83 : vector<1x256xf32>
    %85 = vector.broadcast %84 : vector<1x256xf32> to vector<16x256xf32>
    %86 = arith.subf %79, %85 : vector<16x256xf32>
    %87 = arith.mulf %86, %86 : vector<16x256xf32>
    %cst_28 = arith.constant dense<0.000000e+00> : vector<16x256xf32>
    %88 = tpu.matmul %87, %1, %cst_28 {dimension_numbers = #tpu.dot_dimension_numbers<[1], [0], [0], [1], [0, 0, 1, 1], [], []>} : vector<16x256xf32>, vector<256x256xf32>, vector<16x256xf32> -> vector<16x256xf32>
    %cst_29 = arith.constant dense<0.000000e+00> : vector<256xf32>
    %89 = vector.multi_reduction <add>, %88, %cst_29 [0] : vector<16x256xf32> to vector<256xf32>
    %90 = vector.shape_cast %89 : vector<256xf32> to vector<1x256xf32>
    %cst_30 = arith.constant 7.812500e-03 : f32
    %91 = vector.broadcast %cst_30 : f32 to vector<1x256xf32>
    %92 = arith.mulf %90, %91 : vector<1x256xf32>
    %c1_31 = arith.constant 1 : index
    %c0_32 = arith.constant 0 : index
    %93 = vector.load %arg2[%c1_31, %c0_32] : memref<6x256xf32, #tpu.memory_space<vmem>>, vector<1x256xf32>
    %cst_33 = arith.constant 9.99999974E-6 : f32
    %94 = vector.broadcast %cst_33 : f32 to vector<1x256xf32>
    %95 = arith.addf %92, %94 : vector<1x256xf32>
    %96 = math.rsqrt %95 : vector<1x256xf32>
    %97 = arith.mulf %93, %96 : vector<1x256xf32>
    %98 = vector.broadcast %97 : vector<1x256xf32> to vector<16x256xf32>
    %99 = arith.mulf %86, %98 : vector<16x256xf32>
    %c1_34 = arith.constant 1 : index
    %c0_35 = arith.constant 0 : index
    %100 = vector.load %arg3[%c1_34, %c0_35] : memref<6x256xf32, #tpu.memory_space<vmem>>, vector<1x256xf32>
    %101 = vector.broadcast %100 : vector<1x256xf32> to vector<16x256xf32>
    %102 = arith.addf %99, %101 : vector<16x256xf32>
    %103 = arith.addf %0, %102 : vector<16x256xf32>
    %104 = vector.extract_strided_slice %103 {offsets = [15, 0], sizes = [1, 256], strides = [1, 1]} : vector<16x256xf32> to vector<1x256xf32>
    %105 = vector.extract_strided_slice %103 {offsets = [0, 0], sizes = [15, 256], strides = [1, 1]} : vector<16x256xf32> to vector<15x256xf32>
    %106 = tpu.concatenate %104, %105 in 0 : vector<1x256xf32>, vector<15x256xf32> -> vector<16x256xf32>
    %107 = vector.extract_strided_slice %103 {offsets = [1, 0], sizes = [15, 256], strides = [1, 1]} : vector<16x256xf32> to vector<15x256xf32>
    %108 = vector.extract_strided_slice %103 {offsets = [0, 0], sizes = [1, 256], strides = [1, 1]} : vector<16x256xf32> to vector<1x256xf32>
    %109 = tpu.concatenate %107, %108 in 0 : vector<15x256xf32>, vector<1x256xf32> -> vector<16x256xf32>
    %110 = vector.shape_cast %20 : vector<16x1xi1> to vector<16x1xi1>
    %111 = vector.broadcast %110 : vector<16x1xi1> to vector<16x256xi1>
    %112 = arith.select %111, %109, %106 : vector<16x256xi1>, vector<16x256xf32>
    %113 = vector.shape_cast %22 : vector<16x1xi1> to vector<16x1xi1>
    %114 = vector.broadcast %113 : vector<16x1xi1> to vector<16x256xi1>
    %115 = arith.select %114, %106, %109 : vector<16x256xi1>, vector<16x256xf32>
    %116 = tpu.concatenate %112, %103, %115 in 1 : vector<16x256xf32>, vector<16x256xf32>, vector<16x256xf32> -> vector<16x768xf32>
    %c2 = arith.constant 2 : index
    %c0_36 = arith.constant 0 : index
    %c0_37 = arith.constant 0 : index
    %117 = vector.load %arg1[%c2, %c0_36, %c0_37] : memref<6x768x256xf32, #tpu.memory_space<vmem>>, vector<1x768x256xf32>
    %118 = vector.shape_cast %117 : vector<1x768x256xf32> to vector<768x256xf32>
    %cst_38 = arith.constant dense<0.000000e+00> : vector<16x256xf32>
    %119 = tpu.matmul %116, %118, %cst_38 {dimension_numbers = #tpu.dot_dimension_numbers<[1], [0], [0], [1], [0, 0, 1, 1], [], []>} : vector<16x768xf32>, vector<768x256xf32>, vector<16x256xf32> -> vector<16x256xf32>
    %cst_39 = arith.constant dense<0.000000e+00> : vector<16x256xf32>
    %120 = tpu.matmul %119, %1, %cst_39 {dimension_numbers = #tpu.dot_dimension_numbers<[1], [0], [0], [1], [0, 0, 1, 1], [], []>} : vector<16x256xf32>, vector<256x256xf32>, vector<16x256xf32> -> vector<16x256xf32>
    %cst_40 = arith.constant dense<0.000000e+00> : vector<256xf32>
    %121 = vector.multi_reduction <add>, %120, %cst_40 [0] : vector<16x256xf32> to vector<256xf32>
    %122 = vector.shape_cast %121 : vector<256xf32> to vector<1x256xf32>
    %cst_41 = arith.constant 7.812500e-03 : f32
    %123 = vector.broadcast %cst_41 : f32 to vector<1x256xf32>
    %124 = arith.mulf %122, %123 : vector<1x256xf32>
    %125 = vector.broadcast %124 : vector<1x256xf32> to vector<16x256xf32>
    %126 = arith.subf %119, %125 : vector<16x256xf32>
    %127 = arith.mulf %126, %126 : vector<16x256xf32>
    %cst_42 = arith.constant dense<0.000000e+00> : vector<16x256xf32>
    %128 = tpu.matmul %127, %1, %cst_42 {dimension_numbers = #tpu.dot_dimension_numbers<[1], [0], [0], [1], [0, 0, 1, 1], [], []>} : vector<16x256xf32>, vector<256x256xf32>, vector<16x256xf32> -> vector<16x256xf32>
    %cst_43 = arith.constant dense<0.000000e+00> : vector<256xf32>
    %129 = vector.multi_reduction <add>, %128, %cst_43 [0] : vector<16x256xf32> to vector<256xf32>
    %130 = vector.shape_cast %129 : vector<256xf32> to vector<1x256xf32>
    %cst_44 = arith.constant 7.812500e-03 : f32
    %131 = vector.broadcast %cst_44 : f32 to vector<1x256xf32>
    %132 = arith.mulf %130, %131 : vector<1x256xf32>
    %c2_45 = arith.constant 2 : index
    %c0_46 = arith.constant 0 : index
    %133 = vector.load %arg2[%c2_45, %c0_46] : memref<6x256xf32, #tpu.memory_space<vmem>>, vector<1x256xf32>
    %cst_47 = arith.constant 9.99999974E-6 : f32
    %134 = vector.broadcast %cst_47 : f32 to vector<1x256xf32>
    %135 = arith.addf %132, %134 : vector<1x256xf32>
    %136 = math.rsqrt %135 : vector<1x256xf32>
    %137 = arith.mulf %133, %136 : vector<1x256xf32>
    %138 = vector.broadcast %137 : vector<1x256xf32> to vector<16x256xf32>
    %139 = arith.mulf %126, %138 : vector<16x256xf32>
    %c2_48 = arith.constant 2 : index
    %c0_49 = arith.constant 0 : index
    %140 = vector.load %arg3[%c2_48, %c0_49] : memref<6x256xf32, #tpu.memory_space<vmem>>, vector<1x256xf32>
    %141 = vector.broadcast %140 : vector<1x256xf32> to vector<16x256xf32>
    %142 = arith.addf %139, %141 : vector<16x256xf32>
    %cst_50 = arith.constant 0.000000e+00 : f32
    %143 = vector.broadcast %cst_50 : f32 to vector<16x256xf32>
    %144 = arith.maximumf %142, %143 : vector<16x256xf32>
    %145 = vector.extract_strided_slice %144 {offsets = [15, 0], sizes = [1, 256], strides = [1, 1]} : vector<16x256xf32> to vector<1x256xf32>
    %146 = vector.extract_strided_slice %144 {offsets = [0, 0], sizes = [15, 256], strides = [1, 1]} : vector<16x256xf32> to vector<15x256xf32>
    %147 = tpu.concatenate %145, %146 in 0 : vector<1x256xf32>, vector<15x256xf32> -> vector<16x256xf32>
    %148 = vector.extract_strided_slice %144 {offsets = [1, 0], sizes = [15, 256], strides = [1, 1]} : vector<16x256xf32> to vector<15x256xf32>
    %149 = vector.extract_strided_slice %144 {offsets = [0, 0], sizes = [1, 256], strides = [1, 1]} : vector<16x256xf32> to vector<1x256xf32>
    %150 = tpu.concatenate %148, %149 in 0 : vector<15x256xf32>, vector<1x256xf32> -> vector<16x256xf32>
    %151 = vector.shape_cast %20 : vector<16x1xi1> to vector<16x1xi1>
    %152 = vector.broadcast %151 : vector<16x1xi1> to vector<16x256xi1>
    %153 = arith.select %152, %150, %147 : vector<16x256xi1>, vector<16x256xf32>
    %154 = vector.shape_cast %22 : vector<16x1xi1> to vector<16x1xi1>
    %155 = vector.broadcast %154 : vector<16x1xi1> to vector<16x256xi1>
    %156 = arith.select %155, %147, %150 : vector<16x256xi1>, vector<16x256xf32>
    %157 = tpu.concatenate %153, %144, %156 in 1 : vector<16x256xf32>, vector<16x256xf32>, vector<16x256xf32> -> vector<16x768xf32>
    %c3 = arith.constant 3 : index
    %c0_51 = arith.constant 0 : index
    %c0_52 = arith.constant 0 : index
    %158 = vector.load %arg1[%c3, %c0_51, %c0_52] : memref<6x768x256xf32, #tpu.memory_space<vmem>>, vector<1x768x256xf32>
    %159 = vector.shape_cast %158 : vector<1x768x256xf32> to vector<768x256xf32>
    %cst_53 = arith.constant dense<0.000000e+00> : vector<16x256xf32>
    %160 = tpu.matmul %157, %159, %cst_53 {dimension_numbers = #tpu.dot_dimension_numbers<[1], [0], [0], [1], [0, 0, 1, 1], [], []>} : vector<16x768xf32>, vector<768x256xf32>, vector<16x256xf32> -> vector<16x256xf32>
    %cst_54 = arith.constant dense<0.000000e+00> : vector<16x256xf32>
    %161 = tpu.matmul %160, %1, %cst_54 {dimension_numbers = #tpu.dot_dimension_numbers<[1], [0], [0], [1], [0, 0, 1, 1], [], []>} : vector<16x256xf32>, vector<256x256xf32>, vector<16x256xf32> -> vector<16x256xf32>
    %cst_55 = arith.constant dense<0.000000e+00> : vector<256xf32>
    %162 = vector.multi_reduction <add>, %161, %cst_55 [0] : vector<16x256xf32> to vector<256xf32>
    %163 = vector.shape_cast %162 : vector<256xf32> to vector<1x256xf32>
    %cst_56 = arith.constant 7.812500e-03 : f32
    %164 = vector.broadcast %cst_56 : f32 to vector<1x256xf32>
    %165 = arith.mulf %163, %164 : vector<1x256xf32>
    %166 = vector.broadcast %165 : vector<1x256xf32> to vector<16x256xf32>
    %167 = arith.subf %160, %166 : vector<16x256xf32>
    %168 = arith.mulf %167, %167 : vector<16x256xf32>
    %cst_57 = arith.constant dense<0.000000e+00> : vector<16x256xf32>
    %169 = tpu.matmul %168, %1, %cst_57 {dimension_numbers = #tpu.dot_dimension_numbers<[1], [0], [0], [1], [0, 0, 1, 1], [], []>} : vector<16x256xf32>, vector<256x256xf32>, vector<16x256xf32> -> vector<16x256xf32>
    %cst_58 = arith.constant dense<0.000000e+00> : vector<256xf32>
    %170 = vector.multi_reduction <add>, %169, %cst_58 [0] : vector<16x256xf32> to vector<256xf32>
    %171 = vector.shape_cast %170 : vector<256xf32> to vector<1x256xf32>
    %cst_59 = arith.constant 7.812500e-03 : f32
    %172 = vector.broadcast %cst_59 : f32 to vector<1x256xf32>
    %173 = arith.mulf %171, %172 : vector<1x256xf32>
    %c3_60 = arith.constant 3 : index
    %c0_61 = arith.constant 0 : index
    %174 = vector.load %arg2[%c3_60, %c0_61] : memref<6x256xf32, #tpu.memory_space<vmem>>, vector<1x256xf32>
    %cst_62 = arith.constant 9.99999974E-6 : f32
    %175 = vector.broadcast %cst_62 : f32 to vector<1x256xf32>
    %176 = arith.addf %173, %175 : vector<1x256xf32>
    %177 = math.rsqrt %176 : vector<1x256xf32>
    %178 = arith.mulf %174, %177 : vector<1x256xf32>
    %179 = vector.broadcast %178 : vector<1x256xf32> to vector<16x256xf32>
    %180 = arith.mulf %167, %179 : vector<16x256xf32>
    %c3_63 = arith.constant 3 : index
    %c0_64 = arith.constant 0 : index
    %181 = vector.load %arg3[%c3_63, %c0_64] : memref<6x256xf32, #tpu.memory_space<vmem>>, vector<1x256xf32>
    %182 = vector.broadcast %181 : vector<1x256xf32> to vector<16x256xf32>
    %183 = arith.addf %180, %182 : vector<16x256xf32>
    %184 = arith.addf %103, %183 : vector<16x256xf32>
    %185 = vector.extract_strided_slice %184 {offsets = [15, 0], sizes = [1, 256], strides = [1, 1]} : vector<16x256xf32> to vector<1x256xf32>
    %186 = vector.extract_strided_slice %184 {offsets = [0, 0], sizes = [15, 256], strides = [1, 1]} : vector<16x256xf32> to vector<15x256xf32>
    %187 = tpu.concatenate %185, %186 in 0 : vector<1x256xf32>, vector<15x256xf32> -> vector<16x256xf32>
    %188 = vector.extract_strided_slice %184 {offsets = [1, 0], sizes = [15, 256], strides = [1, 1]} : vector<16x256xf32> to vector<15x256xf32>
    %189 = vector.extract_strided_slice %184 {offsets = [0, 0], sizes = [1, 256], strides = [1, 1]} : vector<16x256xf32> to vector<1x256xf32>
    %190 = tpu.concatenate %188, %189 in 0 : vector<15x256xf32>, vector<1x256xf32> -> vector<16x256xf32>
    %191 = vector.shape_cast %20 : vector<16x1xi1> to vector<16x1xi1>
    %192 = vector.broadcast %191 : vector<16x1xi1> to vector<16x256xi1>
    %193 = arith.select %192, %190, %187 : vector<16x256xi1>, vector<16x256xf32>
    %194 = vector.shape_cast %22 : vector<16x1xi1> to vector<16x1xi1>
    %195 = vector.broadcast %194 : vector<16x1xi1> to vector<16x256xi1>
    %196 = arith.select %195, %187, %190 : vector<16x256xi1>, vector<16x256xf32>
    %197 = tpu.concatenate %193, %184, %196 in 1 : vector<16x256xf32>, vector<16x256xf32>, vector<16x256xf32> -> vector<16x768xf32>
    %c4 = arith.constant 4 : index
    %c0_65 = arith.constant 0 : index
    %c0_66 = arith.constant 0 : index
    %198 = vector.load %arg1[%c4, %c0_65, %c0_66] : memref<6x768x256xf32, #tpu.memory_space<vmem>>, vector<1x768x256xf32>
    %199 = vector.shape_cast %198 : vector<1x768x256xf32> to vector<768x256xf32>
    %cst_67 = arith.constant dense<0.000000e+00> : vector<16x256xf32>
    %200 = tpu.matmul %197, %199, %cst_67 {dimension_numbers = #tpu.dot_dimension_numbers<[1], [0], [0], [1], [0, 0, 1, 1], [], []>} : vector<16x768xf32>, vector<768x256xf32>, vector<16x256xf32> -> vector<16x256xf32>
    %cst_68 = arith.constant dense<0.000000e+00> : vector<16x256xf32>
    %201 = tpu.matmul %200, %1, %cst_68 {dimension_numbers = #tpu.dot_dimension_numbers<[1], [0], [0], [1], [0, 0, 1, 1], [], []>} : vector<16x256xf32>, vector<256x256xf32>, vector<16x256xf32> -> vector<16x256xf32>
    %cst_69 = arith.constant dense<0.000000e+00> : vector<256xf32>
    %202 = vector.multi_reduction <add>, %201, %cst_69 [0] : vector<16x256xf32> to vector<256xf32>
    %203 = vector.shape_cast %202 : vector<256xf32> to vector<1x256xf32>
    %cst_70 = arith.constant 7.812500e-03 : f32
    %204 = vector.broadcast %cst_70 : f32 to vector<1x256xf32>
    %205 = arith.mulf %203, %204 : vector<1x256xf32>
    %206 = vector.broadcast %205 : vector<1x256xf32> to vector<16x256xf32>
    %207 = arith.subf %200, %206 : vector<16x256xf32>
    %208 = arith.mulf %207, %207 : vector<16x256xf32>
    %cst_71 = arith.constant dense<0.000000e+00> : vector<16x256xf32>
    %209 = tpu.matmul %208, %1, %cst_71 {dimension_numbers = #tpu.dot_dimension_numbers<[1], [0], [0], [1], [0, 0, 1, 1], [], []>} : vector<16x256xf32>, vector<256x256xf32>, vector<16x256xf32> -> vector<16x256xf32>
    %cst_72 = arith.constant dense<0.000000e+00> : vector<256xf32>
    %210 = vector.multi_reduction <add>, %209, %cst_72 [0] : vector<16x256xf32> to vector<256xf32>
    %211 = vector.shape_cast %210 : vector<256xf32> to vector<1x256xf32>
    %cst_73 = arith.constant 7.812500e-03 : f32
    %212 = vector.broadcast %cst_73 : f32 to vector<1x256xf32>
    %213 = arith.mulf %211, %212 : vector<1x256xf32>
    %c4_74 = arith.constant 4 : index
    %c0_75 = arith.constant 0 : index
    %214 = vector.load %arg2[%c4_74, %c0_75] : memref<6x256xf32, #tpu.memory_space<vmem>>, vector<1x256xf32>
    %cst_76 = arith.constant 9.99999974E-6 : f32
    %215 = vector.broadcast %cst_76 : f32 to vector<1x256xf32>
    %216 = arith.addf %213, %215 : vector<1x256xf32>
    %217 = math.rsqrt %216 : vector<1x256xf32>
    %218 = arith.mulf %214, %217 : vector<1x256xf32>
    %219 = vector.broadcast %218 : vector<1x256xf32> to vector<16x256xf32>
    %220 = arith.mulf %207, %219 : vector<16x256xf32>
    %c4_77 = arith.constant 4 : index
    %c0_78 = arith.constant 0 : index
    %221 = vector.load %arg3[%c4_77, %c0_78] : memref<6x256xf32, #tpu.memory_space<vmem>>, vector<1x256xf32>
    %222 = vector.broadcast %221 : vector<1x256xf32> to vector<16x256xf32>
    %223 = arith.addf %220, %222 : vector<16x256xf32>
    %cst_79 = arith.constant 0.000000e+00 : f32
    %224 = vector.broadcast %cst_79 : f32 to vector<16x256xf32>
    %225 = arith.maximumf %223, %224 : vector<16x256xf32>
    %226 = vector.extract_strided_slice %225 {offsets = [15, 0], sizes = [1, 256], strides = [1, 1]} : vector<16x256xf32> to vector<1x256xf32>
    %227 = vector.extract_strided_slice %225 {offsets = [0, 0], sizes = [15, 256], strides = [1, 1]} : vector<16x256xf32> to vector<15x256xf32>
    %228 = tpu.concatenate %226, %227 in 0 : vector<1x256xf32>, vector<15x256xf32> -> vector<16x256xf32>
    %229 = vector.extract_strided_slice %225 {offsets = [1, 0], sizes = [15, 256], strides = [1, 1]} : vector<16x256xf32> to vector<15x256xf32>
    %230 = vector.extract_strided_slice %225 {offsets = [0, 0], sizes = [1, 256], strides = [1, 1]} : vector<16x256xf32> to vector<1x256xf32>
    %231 = tpu.concatenate %229, %230 in 0 : vector<15x256xf32>, vector<1x256xf32> -> vector<16x256xf32>
    %232 = vector.shape_cast %20 : vector<16x1xi1> to vector<16x1xi1>
    %233 = vector.broadcast %232 : vector<16x1xi1> to vector<16x256xi1>
    %234 = arith.select %233, %231, %228 : vector<16x256xi1>, vector<16x256xf32>
    %235 = vector.shape_cast %22 : vector<16x1xi1> to vector<16x1xi1>
    %236 = vector.broadcast %235 : vector<16x1xi1> to vector<16x256xi1>
    %237 = arith.select %236, %228, %231 : vector<16x256xi1>, vector<16x256xf32>
    %238 = tpu.concatenate %234, %225, %237 in 1 : vector<16x256xf32>, vector<16x256xf32>, vector<16x256xf32> -> vector<16x768xf32>
    %c5 = arith.constant 5 : index
    %c0_80 = arith.constant 0 : index
    %c0_81 = arith.constant 0 : index
    %239 = vector.load %arg1[%c5, %c0_80, %c0_81] : memref<6x768x256xf32, #tpu.memory_space<vmem>>, vector<1x768x256xf32>
    %240 = vector.shape_cast %239 : vector<1x768x256xf32> to vector<768x256xf32>
    %cst_82 = arith.constant dense<0.000000e+00> : vector<16x256xf32>
    %241 = tpu.matmul %238, %240, %cst_82 {dimension_numbers = #tpu.dot_dimension_numbers<[1], [0], [0], [1], [0, 0, 1, 1], [], []>} : vector<16x768xf32>, vector<768x256xf32>, vector<16x256xf32> -> vector<16x256xf32>
    %cst_83 = arith.constant dense<0.000000e+00> : vector<16x256xf32>
    %242 = tpu.matmul %241, %1, %cst_83 {dimension_numbers = #tpu.dot_dimension_numbers<[1], [0], [0], [1], [0, 0, 1, 1], [], []>} : vector<16x256xf32>, vector<256x256xf32>, vector<16x256xf32> -> vector<16x256xf32>
    %cst_84 = arith.constant dense<0.000000e+00> : vector<256xf32>
    %243 = vector.multi_reduction <add>, %242, %cst_84 [0] : vector<16x256xf32> to vector<256xf32>
    %244 = vector.shape_cast %243 : vector<256xf32> to vector<1x256xf32>
    %cst_85 = arith.constant 7.812500e-03 : f32
    %245 = vector.broadcast %cst_85 : f32 to vector<1x256xf32>
    %246 = arith.mulf %244, %245 : vector<1x256xf32>
    %247 = vector.broadcast %246 : vector<1x256xf32> to vector<16x256xf32>
    %248 = arith.subf %241, %247 : vector<16x256xf32>
    %249 = arith.mulf %248, %248 : vector<16x256xf32>
    %cst_86 = arith.constant dense<0.000000e+00> : vector<16x256xf32>
    %250 = tpu.matmul %249, %1, %cst_86 {dimension_numbers = #tpu.dot_dimension_numbers<[1], [0], [0], [1], [0, 0, 1, 1], [], []>} : vector<16x256xf32>, vector<256x256xf32>, vector<16x256xf32> -> vector<16x256xf32>
    %cst_87 = arith.constant dense<0.000000e+00> : vector<256xf32>
    %251 = vector.multi_reduction <add>, %250, %cst_87 [0] : vector<16x256xf32> to vector<256xf32>
    %252 = vector.shape_cast %251 : vector<256xf32> to vector<1x256xf32>
    %cst_88 = arith.constant 7.812500e-03 : f32
    %253 = vector.broadcast %cst_88 : f32 to vector<1x256xf32>
    %254 = arith.mulf %252, %253 : vector<1x256xf32>
    %c5_89 = arith.constant 5 : index
    %c0_90 = arith.constant 0 : index
    %255 = vector.load %arg2[%c5_89, %c0_90] : memref<6x256xf32, #tpu.memory_space<vmem>>, vector<1x256xf32>
    %cst_91 = arith.constant 9.99999974E-6 : f32
    %256 = vector.broadcast %cst_91 : f32 to vector<1x256xf32>
    %257 = arith.addf %254, %256 : vector<1x256xf32>
    %258 = math.rsqrt %257 : vector<1x256xf32>
    %259 = arith.mulf %255, %258 : vector<1x256xf32>
    %260 = vector.broadcast %259 : vector<1x256xf32> to vector<16x256xf32>
    %261 = arith.mulf %248, %260 : vector<16x256xf32>
    %c5_92 = arith.constant 5 : index
    %c0_93 = arith.constant 0 : index
    %262 = vector.load %arg3[%c5_92, %c0_93] : memref<6x256xf32, #tpu.memory_space<vmem>>, vector<1x256xf32>
    %263 = vector.broadcast %262 : vector<1x256xf32> to vector<16x256xf32>
    %264 = arith.addf %261, %263 : vector<16x256xf32>
    %265 = arith.addf %184, %264 : vector<16x256xf32>
    %c0_94 = arith.constant 0 : index
    %c0_95 = arith.constant 0 : index
    %266 = vector.load %arg5[%c0_94, %c0_95] : memref<16x256xf32, #tpu.memory_space<vmem>>, vector<16x256xf32>
    tpu.vector_store %arg5[%c0_94, %c0_95], %265 {strides = array<i32>} : memref<16x256xf32, #tpu.memory_space<vmem>>, vector<16x256xf32>,
    return
  }
}

</mosaic_0001>

<bundles_post_ra>
// kernel: latent_translator.1
= control target key start
LH: loop header
LB: loop body
LE: loop exit
PB: predicated region body
PF: predicated region fallthrough
CT: control target
= control target key end

     0   :  { %10 = vsyncpa [#allocation3], 0  ;;  %s7001_s0 = inlined_call_operand.hbm [shape: f32[16,256], index: 0, kind: input, shape index: {}, may-alias: {0,5}]   ;;  %s7002_s1 = inlined_call_operand.hbm [shape: f32[6,768,256], index: 1, kind: input, shape index: {}]   ;;  %s7003_s2 = inlined_call_operand.hbm [shape: f32[6,256], index: 2, kind: input, shape index: {}]   ;;  %s7004_s3 = inlined_call_operand.hbm [shape: f32[6,256], index: 3, kind: input, shape index: {}]   ;;  %s7005_s4 = inlined_call_operand.hbm [shape: f32[256,256], index: 4, kind: input, shape index: {}]   ;;  %s7006_s5 = inlined_call_operand.hbm [shape: f32[16,256], index: 5, kind: output, shape index: {}, may-alias: {0,5}]  }
   0x1   :  { %11 = vsyncpa [#allocation6], 0 }
   0x2   :  { %12 = vsyncpa [#allocation9], 0 }
   0x3   :  { %13 = vsyncpa [#allocation4], 0  ;;  %s5013_s18 = smov [#allocation5]   ;;  %s5014_s20 = smov [#allocation8]  }
   0x4   :  { %s31_s19 = sshll.u32 %s5013_s18, 4  ;;  %s54_s21 = sshll.u32 %s5014_s20, 4  ;;  %s32_s19 = int_to_ptr.vmem [resolvable:$true] %s31_s19  ;;  %s55_s21 = int_to_ptr.vmem [resolvable:$true] %s54_s21 }
   0x5   :  { %s4893_s22 = scalar_lea.vmem %s32_s19, 147456  ;;  %p4898_p1 = scmp.lt.s32.totalorder %s32_s19, %s32_s19 }
   0x6   :  { %p4894_p0 = scmp.ne.s32.totalorder %s32_s19, %s4893_s22  ;;  %p4899_p2 = scmp.lt.s32.totalorder %s4893_s22, %s4893_s22 }
   0x8   :  { %p4900_p3 = por %p4899_p2, %p4898_p1 }
   0xa   :  { %p4901_p4 = pnand %p4900_p3, %p4894_p0 }
   0xc   :  { %4904 = shalt.err (!%p4901_p4)
}
   0xd   :  { %s5015_s23 = smov 256   ;;  %s5016_s24 = smov 16  }
   0xe   :  { %37 = dma.hbm_to_vmem [thread:$0]  %s7002_s1, 147456, %s32_s19, [#allocation6], %s5015_s23, %s5015_s23, %s5016_s24  }
   0xf   :  { %s4913_s27 = scalar_lea.vmem %s55_s21, 256  ;;  %p4918_p6 = scmp.lt.s32.totalorder %s55_s21, %s55_s21 }
  0x10   :  { %p4914_p5 = scmp.ne.s32.totalorder %s55_s21, %s4913_s27  ;;  %p4919_p7 = scmp.lt.s32.totalorder %s4913_s27, %s4913_s27 }
  0x12   :  { %p4920_p8 = por %p4919_p7, %p4918_p6 }
  0x14   :  { %p4921_p9 = pnand %p4920_p8, %p4914_p5 }
  0x16   :  { %4924 = shalt.err (!%p4921_p9)
}
  0x17   :  { %57 = dma.hbm_to_vmem [thread:$0]  %s7004_s3, 256, %s55_s21, [#allocation9]  }
  0x18   :  { %s5017_s30 = smov [#allocation2]   ;;  %s5018_s7 = smov [#allocation7]  }
  0x19   :  { %s19_s6 = sshll.u32 %s5017_s30, 4  ;;  %s44_s8 = sshll.u32 %s5018_s7, 4  ;;  %s20_s6 = int_to_ptr.vmem [resolvable:$true] %s19_s6  ;;  %s45_s8 = int_to_ptr.vmem [resolvable:$true] %s44_s8 }
  0x1a   :  { %s4933_s9 = scalar_lea.vmem %s20_s6, 512  ;;  %p4938_p11 = scmp.lt.s32.totalorder %s20_s6, %s20_s6 }
  0x1b   :  { %p4934_p10 = scmp.ne.s32.totalorder %s20_s6, %s4933_s9  ;;  %p4939_p12 = scmp.lt.s32.totalorder %s4933_s9, %s4933_s9 }
  0x1d   :  { %p4940_p13 = por %p4939_p12, %p4938_p11 }
  0x1f   :  { %p4941_p0 = pnand %p4940_p13, %p4934_p10 }
  0x21   :  { %4944 = shalt.err (!%p4941_p0)
}
  0x22   :  { %25 = dma.hbm_to_vmem [thread:$0]  %s7001_s0, 512, %s20_s6, [#allocation3], %s5015_s23, %s5015_s23, %s5016_s24  }
  0x23   :  { %s4953_s3 = scalar_lea.vmem %s45_s8, 256  ;;  %p4958_p2 = scmp.lt.s32.totalorder %s45_s8, %s45_s8 }
  0x24   :  { %p4954_p1 = scmp.ne.s32.totalorder %s45_s8, %s4953_s3  ;;  %p4959_p3 = scmp.lt.s32.totalorder %s4953_s3, %s4953_s3 }
  0x26   :  { %p4960_p4 = por %p4959_p3, %p4958_p2 }
  0x28   :  { %p4961_p5 = pnand %p4960_p4, %p4954_p1 }
  0x2a   :  { %4964 = shalt.err (!%p4961_p5)
}
  0x2b   :  { %47 = dma.hbm_to_vmem [thread:$0]  %s7003_s2, 256, %s45_s8, [#allocation6]  }
  0x2c   :  { %s5019_s13 = smov [#allocation10]  }
  0x2d   :  { %s63_s14 = sshll.u32 %s5019_s13, 4  ;;  %s64_s14 = int_to_ptr.vmem [resolvable:$true] %s63_s14 }
  0x2e   :  { %s4973_s15 = scalar_lea.vmem %s64_s14, 8192  ;;  %p4978_p7 = scmp.lt.s32.totalorder %s64_s14, %s64_s14 }
  0x2f   :  { %p4974_p6 = scmp.ne.s32.totalorder %s64_s14, %s4973_s15  ;;  %p4979_p8 = scmp.lt.s32.totalorder %s4973_s15, %s4973_s15 }
  0x31   :  { %p4980_p9 = por %p4979_p8, %p4978_p7 }
  0x33   :  { %p4981_p10 = pnand %p4980_p9, %p4974_p6 }
  0x35   :  { %4984 = shalt.err (!%p4981_p10)
}
  0x36   :  { %69 = dma.hbm_to_vmem [thread:$0]  %s7005_s4, 8192, %s64_s14, [#allocation9], %s5015_s23, %s5015_s23, %s5016_s24  }
  0x37   :  { %5005 = dma.done.wait [#allocation3], 512  }
  0x38   :  { %5006 = vsyncadd [#allocation3], 4294966784 }
  0x39   :  { %5007 = dma.done.wait [#allocation6], 147712  }
  0x3a   :  { %5008 = vsyncadd [#allocation6], 4294819584 }
  0x3b   :  { %5009 = dma.done.wait [#allocation9], 8448  }
  0x3c   :  { %5010 = vsyncadd [#allocation9], 4294958848  ;;  %v265_v0 = vld [vmem:[#allocation5 + $0xf8] sm:$0xff]  ;;  %v264_v2 = vld [vmem:[#allocation5 + $0xf0] sm:$0xff]  ;;  %vm192_vm0 = vcmask 1040384   ;;  %vm203_vm1 = vcmask 1046528  }
  0x3d   :  { %v329_v1 = vld [vmem:[#allocation5 + $0x2f8] sm:$0xff]  ;;  %426 = vmatprep.subr.mxu0 %v265_v0  ;;  %v328_v3 = vld [vmem:[#allocation5 + $0x2f0] sm:$0xff]  ;;  %v263_v4 = vld [vmem:[#allocation5 + $0xe8] sm:$0xff]  ;;  %s5021_s2 = smov [#allocation11]  }
  0x3e   :  { %503 = vmatprep.subr.mxu1 %v329_v1  ;;  %v327_v5 = vld [vmem:[#allocation5 + $0x2e8] sm:$0xff]  ;;  %427 = vmatpush1.msra.mxu0 %v264_v2  ;;  %v262_v6 = vld [vmem:[#allocation5 + $0xe0] sm:$0xff]  ;;  %v261_v8 = vld [vmem:[#allocation5 + $0xd8] sm:$0xff]  ;;  %s4514_s4 = sshll.u32 %s5021_s2, 4  ;;  %s4515_s4 = int_to_ptr.vmem [resolvable:$true] %s4514_s4 }
  0x3f   :  { %504 = vmatpush1.msra.mxu1 %v328_v3  ;;  %v326_v7 = vld [vmem:[#allocation5 + $0x2e0] sm:$0xff]  ;;  %428 = vmatprep.subr.mxu0 %v263_v4  ;;  %v325_v9 = vld [vmem:[#allocation5 + $0x2d8] sm:$0xff]  ;;  %v260_v10 = vld [vmem:[#allocation5 + $0xd0] sm:$0xff]  ;;  %s4985_s17 = scalar_lea.vmem %s4515_s4, 512  ;;  %p4990_p12 = scmp.lt.s32.totalorder %s4515_s4, %s4515_s4 }
  0x40   :  { %505 = vmatprep.subr.mxu1 %v327_v5  ;;  %v324_v11 = vld [vmem:[#allocation5 + $0x2d0] sm:$0xff]  ;;  %429 = vmatpush1.msra.mxu0 %v262_v6  ;;  %v259_v12 = vld [vmem:[#allocation5 + $0xc8] sm:$0xff]  ;;  %v258_v14 = vld [vmem:[#allocation5 + $0xc0] sm:$0xff]  ;;  %p4986_p11 = scmp.ne.s32.totalorder %s4515_s4, %s4985_s17  ;;  %p4991_p13 = scmp.lt.s32.totalorder %s4985_s17, %s4985_s17 }
  0x41   :  { %506 = vmatpush1.msra.mxu1 %v326_v7  ;;  %v323_v13 = vld [vmem:[#allocation5 + $0x2c8] sm:$0xff]  ;;  %430 = vmatprep.subr.mxu0 %v261_v8  ;;  %v322_v15 = vld [vmem:[#allocation5 + $0x2c0] sm:$0xff]  ;;  %v257_v16 = vld [vmem:[#allocation5 + $0xb8] sm:$0xff] }
  0x42   :  { %507 = vmatprep.subr.mxu1 %v325_v9  ;;  %431 = vmatpush1.msra.mxu0 %v260_v10  ;;  %v321_v17 = vld [vmem:[#allocation5 + $0x2b8] sm:$0xff]  ;;  %v256_v18 = vld [vmem:[#allocation5 + $0xb0] sm:$0xff]  ;;  %v255_v20 = vld [vmem:[#allocation5 + $0xa8] sm:$0xff]  ;;  %v153_v10 = vlaneseq  ;;  %p4992_p0 = por %p4991_p13, %p4990_p12 }
  0x43   :  { %508 = vmatpush1.msra.mxu1 %v324_v11  ;;  %432 = vmatprep.subr.mxu0 %v259_v12  ;;  %v320_v19 = vld [vmem:[#allocation5 + $0x2b0] sm:$0xff]  ;;  %v319_v21 = vld [vmem:[#allocation5 + $0x2a8] sm:$0xff]  ;;  %v254_v22 = vld [vmem:[#allocation5 + $0xa0] sm:$0xff] }
  0x44   :  { %509 = vmatprep.subr.mxu1 %v323_v13  ;;  %433 = vmatpush1.msra.mxu0 %v258_v14  ;;  %v318_v23 = vld [vmem:[#allocation5 + $0x2a0] sm:$0xff]  ;;  %v253_v24 = vld [vmem:[#allocation5 + $0x98] sm:$0xff]  ;;  %v252_v26 = vld [vmem:[#allocation5 + $0x90] sm:$0xff]  ;;  %p4993_p1 = pnand %p4992_p0, %p4986_p11 }
  0x45   :  { %510 = vmatpush1.msra.mxu1 %v322_v15  ;;  %434 = vmatprep.subr.mxu0 %v257_v16  ;;  %v317_v25 = vld [vmem:[#allocation5 + $0x298] sm:$0xff]  ;;  %v316_v27 = vld [vmem:[#allocation5 + $0x290] sm:$0xff]  ;;  %v251_v28 = vld [vmem:[#allocation5 + $0x88] sm:$0xff] }
  0x46   :  { %511 = vmatprep.subr.mxu1 %v321_v17  ;;  %435 = vmatpush1.msra.mxu0 %v256_v18  ;;  %v315_v29 = vld [vmem:[#allocation5 + $0x288] sm:$0xff]  ;;  %v250_v30 = vld [vmem:[#allocation5 + $0x80] sm:$0xff]  ;;  %v249_v32 = vld [vmem:[#allocation5 + $0x78] sm:$0xff] }
  0x47   :  { %512 = vmatpush1.msra.mxu1 %v320_v19  ;;  %436 = vmatprep.subr.mxu0 %v255_v20  ;;  %v314_v31 = vld [vmem:[#allocation5 + $0x280] sm:$0xff]  ;;  %v313_v33 = vld [vmem:[#allocation5 + $0x278] sm:$0xff]  ;;  %v248_v34 = vld [vmem:[#allocation5 + $0x70] sm:$0xff]  ;;  %v5076_v19 = vshrl.u32 %v153_v10, 7 }
  0x48   :  { %513 = vmatprep.subr.mxu1 %v319_v21  ;;  %437 = vmatpush1.msra.mxu0 %v254_v22  ;;  %v312_v35 = vld [vmem:[#allocation5 + $0x270] sm:$0xff]  ;;  %v247_v36 = vld [vmem:[#allocation5 + $0x68] sm:$0xff]  ;;  %v246_v38 = vld [vmem:[#allocation5 + $0x60] sm:$0xff] }
  0x49   :  { %514 = vmatpush1.msra.mxu1 %v318_v23  ;;  %438 = vmatprep.subr.mxu0 %v253_v24  ;;  %v311_v37 = vld [vmem:[#allocation5 + $0x268] sm:$0xff]  ;;  %v310_v39 = vld [vmem:[#allocation5 + $0x260] sm:$0xff]  ;;  %v245_v40 = vld [vmem:[#allocation5 + $0x58] sm:$0xff]  ;;  %v5079_v24 = vadd.s32 8, %v5076_v19 }
  0x4a   :  { %515 = vmatprep.subr.mxu1 %v317_v25  ;;  %439 = vmatpush1.msra.mxu0 %v252_v26  ;;  %v309_v41 = vld [vmem:[#allocation5 + $0x258] sm:$0xff]  ;;  %v244_v42 = vld [vmem:[#allocation5 + $0x50] sm:$0xff]  ;;  %v243_v44 = vld [vmem:[#allocation5 + $0x48] sm:$0xff] }
  0x4b   :  { %516 = vmatpush1.msra.mxu1 %v316_v27  ;;  %440 = vmatprep.subr.mxu0 %v251_v28  ;;  %v308_v43 = vld [vmem:[#allocation5 + $0x250] sm:$0xff]  ;;  %v307_v45 = vld [vmem:[#allocation5 + $0x248] sm:$0xff]  ;;  %v242_v46 = vld [vmem:[#allocation5 + $0x40] sm:$0xff] }
  0x4c   :  { %517 = vmatprep.subr.mxu1 %v315_v29  ;;  %441 = vmatpush1.msra.mxu0 %v250_v30  ;;  %v306_v47 = vld [vmem:[#allocation5 + $0x240] sm:$0xff]  ;;  %v241_v48 = vld [vmem:[#allocation5 + $0x38] sm:$0xff]  ;;  %v240_v50 = vld [vmem:[#allocation5 + $0x30] sm:$0xff] }
  0x4d   :  { %518 = vmatpush1.msra.mxu1 %v314_v31  ;;  %442 = vmatprep.subr.mxu0 %v249_v32  ;;  %v305_v49 = vld [vmem:[#allocation5 + $0x238] sm:$0xff]  ;;  %v304_v51 = vld [vmem:[#allocation5 + $0x230] sm:$0xff]  ;;  %v239_v52 = vld [vmem:[#allocation5 + $0x28] sm:$0xff] }
  0x4e   :  { %519 = vmatprep.subr.mxu1 %v313_v33  ;;  %443 = vmatpush1.msra.mxu0 %v248_v34  ;;  %v303_v53 = vld [vmem:[#allocation5 + $0x228] sm:$0xff]  ;;  %v238_v54 = vld [vmem:[#allocation5 + $0x20] sm:$0xff]  ;;  %v237_v56 = vld [vmem:[#allocation5 + $0x18] sm:$0xff]  ;;  %v160_v33 = vand.u32 7, %v5076_v19 }
  0x4f   :  { %520 = vmatpush1.msra.mxu1 %v312_v35  ;;  %444 = vmatprep.subr.mxu0 %v247_v36  ;;  %v302_v55 = vld [vmem:[#allocation5 + $0x220] sm:$0xff]  ;;  %v301_v57 = vld [vmem:[#allocation5 + $0x218] sm:$0xff]  ;;  %v236_v58 = vld [vmem:[#allocation5 + $0x10] sm:$0xff] }
  0x50   :  { %521 = vmatprep.subr.mxu1 %v311_v37  ;;  %445 = vmatpush1.msra.mxu0 %v246_v38  ;;  %v300_v59 = vld [vmem:[#allocation5 + $0x210] sm:$0xff]  ;;  %v235_v60 = vld [vmem:[#allocation5 + $0x8] sm:$0xff]  ;;  %v234_v62 = vld [vmem:[#allocation5] sm:$0xff]  ;;  %vm5101_vm2 = vcmp.eq.s32.totalorder %v160_v33, 7  ;;  %vm5151_vm4 = vcmp.eq.s32.totalorder %v160_v33, 0 }
  0x51   :  { %522 = vmatpush1.msra.mxu1 %v310_v39  ;;  %446 = vmatprep.subr.mxu0 %v245_v40  ;;  %v299_v61 = vld [vmem:[#allocation5 + $0x208] sm:$0xff]  ;;  %v298_v63 = vld [vmem:[#allocation5 + $0x200] sm:$0xff]  ;;  %v297_v0 = vld [vmem:[#allocation5 + $0x1f8] sm:$0xff]  ;;  %v167_v40 = vand.u32 7, %v5079_v24 }
  0x52   :  { %523 = vmatprep.subr.mxu1 %v309_v41  ;;  %447 = vmatpush1.msra.mxu0 %v244_v42  ;;  %v361_v1 = vld [vmem:[#allocation5 + $0x3f8] sm:$0xff]  ;;  %v296_v2 = vld [vmem:[#allocation5 + $0x1f0] sm:$0xff]  ;;  %v295_v4 = vld [vmem:[#allocation5 + $0x1e8] sm:$0xff] }
  0x53   :  { %524 = vmatpush1.msra.mxu1 %v308_v43  ;;  %448 = vmatprep.subr.mxu0 %v243_v44  ;;  %v360_v3 = vld [vmem:[#allocation5 + $0x3f0] sm:$0xff]  ;;  %v359_v5 = vld [vmem:[#allocation5 + $0x3e8] sm:$0xff]  ;;  %v294_v6 = vld [vmem:[#allocation5 + $0x1e0] sm:$0xff]  ;;  %vm5114_vm3 = vcmp.eq.s32.totalorder %v167_v40, 7  ;;  %vm5169_vm5 = vcmp.eq.s32.totalorder %v167_v40, 0 }
  0x54   :  { %525 = vmatprep.subr.mxu1 %v307_v45  ;;  %449 = vmatpush1.msra.mxu0 %v242_v46  ;;  %v358_v7 = vld [vmem:[#allocation5 + $0x3e0] sm:$0xff]  ;;  %v293_v8 = vld [vmem:[#allocation5 + $0x1d8] sm:$0xff]  ;;  %v292_v11 = vld [vmem:[#allocation5 + $0x1d0] sm:$0xff] }
  0x55   :  { %526 = vmatpush1.msra.mxu1 %v306_v47  ;;  %450 = vmatprep.subr.mxu0 %v241_v48  ;;  %v357_v9 = vld [vmem:[#allocation5 + $0x3d8] sm:$0xff]  ;;  %v356_v12 = vld [vmem:[#allocation5 + $0x3d0] sm:$0xff]  ;;  %v291_v13 = vld [vmem:[#allocation5 + $0x1c8] sm:$0xff] }
  0x56   :  { %527 = vmatprep.subr.mxu1 %v305_v49  ;;  %451 = vmatpush1.msra.mxu0 %v240_v50  ;;  %v355_v14 = vld [vmem:[#allocation5 + $0x3c8] sm:$0xff]  ;;  %v290_v15 = vld [vmem:[#allocation5 + $0x1c0] sm:$0xff]  ;;  %v289_v17 = vld [vmem:[#allocation5 + $0x1b8] sm:$0xff] }
  0x57   :  { %528 = vmatpush1.msra.mxu1 %v304_v51  ;;  %452 = vmatprep.subr.mxu0 %v239_v52  ;;  %v354_v16 = vld [vmem:[#allocation5 + $0x3c0] sm:$0xff]  ;;  %v353_v18 = vld [vmem:[#allocation5 + $0x3b8] sm:$0xff]  ;;  %v288_v20 = vld [vmem:[#allocation5 + $0x1b0] sm:$0xff] }
  0x58   :  { %529 = vmatprep.subr.mxu1 %v303_v53  ;;  %453 = vmatpush1.msra.mxu0 %v238_v54  ;;  %v352_v21 = vld [vmem:[#allocation5 + $0x3b0] sm:$0xff]  ;;  %v287_v22 = vld [vmem:[#allocation5 + $0x1a8] sm:$0xff]  ;;  %v286_v25 = vld [vmem:[#allocation5 + $0x1a0] sm:$0xff] }
  0x59   :  { %530 = vmatpush1.msra.mxu1 %v302_v55  ;;  %454 = vmatprep.subr.mxu0 %v237_v56  ;;  %v351_v23 = vld [vmem:[#allocation5 + $0x3a8] sm:$0xff]  ;;  %v350_v26 = vld [vmem:[#allocation5 + $0x3a0] sm:$0xff]  ;;  %v285_v27 = vld [vmem:[#allocation5 + $0x198] sm:$0xff] }
  0x5a   :  { %531 = vmatprep.subr.mxu1 %v301_v57  ;;  %455 = vmatpush1.msra.mxu0 %v236_v58  ;;  %v349_v28 = vld [vmem:[#allocation5 + $0x398] sm:$0xff]  ;;  %v5081_v29 = vld [vmem:[#allocation2 + $0x8] sm:$0xff]  ;;  %v284_v31 = vld [vmem:[#allocation5 + $0x190] sm:$0xff] }
  0x5b   :  { %532 = vmatpush1.msra.mxu1 %v300_v59  ;;  %456 = vmatprep.subr.mxu0 %v235_v60  ;;  %v5083_v30 = vld [vmem:[#allocation2 + $0x18] sm:$0xff]  ;;  %v348_v32 = vld [vmem:[#allocation5 + $0x390] sm:$0xff]  ;;  %v5086_v34 = vld [vmem:[#allocation2] sm:$0xff]  ;;  %v194_v44 = vrot.slane %v5081_v29, 7  ;;  %v207_v49 = vrot.slane %v5081_v29, 1 }
  0x5c   :  { %533 = vmatprep.subr.mxu1 %v299_v61  ;;  %457 = vmatpush1.msra.mxu0 %v234_v62  ;;  %v283_v35 = vld [vmem:[#allocation5 + $0x188] sm:$0xff]  ;;  %v5088_v37 = vld [vmem:[#allocation2 + $0x10] sm:$0xff]  ;;  %v193_v38 = vrot.slane %v5086_v34, 7  ;;  %v204_v39 = vrot.slane %v5086_v34, 1  ;;  %v282_v41 = vld [vmem:[#allocation5 + $0x180] sm:$0xff]  ;;  %v187_v43 = vrot.slane %v5083_v30, 7 }
  0x5d   :  { %534 = vmatpush1.msra.mxu1 %v298_v63  ;;  %458 = vmatprep.subr.mxu0 %v297_v0  ;;  %v347_v36 = vld [vmem:[#allocation5 + $0x388] sm:$0xff]  ;;  %v346_v42 = vld [vmem:[#allocation5 + $0x380] sm:$0xff]  ;;  %v186_v45 = vrot.slane %v5088_v37, 7  ;;  %v205_v46 = vrot.slane %v5088_v37, 1  ;;  %v281_v47 = vld [vmem:[#allocation5 + $0x178] sm:$0xff]  ;;  %v208_v50 = vrot.slane %v5083_v30, 1 }
  0x5e   :  { %535 = vmatprep.subr.mxu1 %v361_v1  ;;  %459 = vmatpush2.msra.mxu0 %v296_v2  ;;  %v345_v48 = vld [vmem:[#allocation5 + $0x378] sm:$0xff]  ;;  %v280_v52 = vld [vmem:[#allocation5 + $0x170] sm:$0xff]  ;;  %v5110_v54 = vsel %vm192_vm0, %v194_v44, %v187_v43  ;;  %v279_v56 = vld [vmem:[#allocation5 + $0x168] sm:$0xff] }
  0x5f   :  { %536 = vmatpush2.msra.mxu1 %v360_v3  ;;  %460 = vmatprep.subr.mxu0 %v295_v4  ;;  %v344_v53 = vld [vmem:[#allocation5 + $0x370] sm:$0xff]  ;;  %v343_v57 = vld [vmem:[#allocation5 + $0x368] sm:$0xff]  ;;  %v5119_v58 = vsel %vm192_vm0, %v186_v45, %v193_v38  ;;  %v5122_v59 = vsel %vm203_vm1, %v204_v39, %v205_v46  ;;  %v5129_v60 = vsel %vm203_vm1, %v208_v50, %v207_v49  ;;  %v278_v61 = vld [vmem:[#allocation5 + $0x160] sm:$0xff] }
  0x60   :  { %537 = vmatprep.subr.mxu1 %v359_v5  ;;  %461 = vmatpush2.msra.mxu0 %v294_v6  ;;  %v342_v62 = vld [vmem:[#allocation5 + $0x360] sm:$0xff]  ;;  %v5132_v63 = vsel %vm192_vm0, %v193_v38, %v186_v45  ;;  %v5135_v0 = vsel %vm203_vm1, %v205_v46, %v204_v39  ;;  %v230_v1 = vsel %vm5101_vm2, %v5119_v58, %v5122_v59  ;;  %v277_v2 = vld [vmem:[#allocation5 + $0x158] sm:$0xff]  ;;  %v276_v6 = vld [vmem:[#allocation5 + $0x150] sm:$0xff] }
  0x61   :  { %538 = vmatpush2.msra.mxu1 %v358_v7  ;;  %462 = vmatprep.subr.mxu0 %v293_v8  ;;  %v341_v3 = vld [vmem:[#allocation5 + $0x358] sm:$0xff]  ;;  %v233_v4 = vsel %vm5114_vm3, %v5110_v54, %v5129_v60  ;;  %v232_v5 = vsel %vm5114_vm3, %v5132_v63, %v5135_v0  ;;  %v340_v7 = vld [vmem:[#allocation5 + $0x350] sm:$0xff]  ;;  %v275_v8 = vld [vmem:[#allocation5 + $0x148] sm:$0xff]  ;;  %v222_v39 = vsel %vm5151_vm4, %v5122_v59, %v5119_v58 }
  0x62   :  { %539 = vmatprep.subr.mxu1 %v357_v9  ;;  %463 = vmatpush2.msra.mxu0 %v292_v11  ;;  %v339_v9 = vld [vmem:[#allocation5 + $0x348] sm:$0xff]  ;;  %v274_v10 = vld [vmem:[#allocation5 + $0x140] sm:$0xff]  ;;  %v225_v24 = vsel %vm5169_vm5, %v5129_v60, %v5110_v54  ;;  %v392_v40 = vld [vmem:[#allocation5 + $0x4f0] sm:$0xff]  ;;  %v224_v45 = vsel %vm5169_vm5, %v5135_v0, %v5132_v63 }
  0x63   :  { %540 = vmatpush2.msra.mxu1 %v356_v12  ;;  %464 = vmatprep.subr.mxu0 %v291_v13  ;;  %v338_v11 = vld [vmem:[#allocation5 + $0x340] sm:$0xff]  ;;  %v273_v12 = vld [vmem:[#allocation5 + $0x138] sm:$0xff]  ;;  %v388_v46 = vld [vmem:[#allocation5 + $0x4d0] sm:$0xff] }
  0x64   :  { %541 = vmatprep.subr.mxu1 %v355_v14  ;;  %465 = vmatpush2.msra.mxu0 %v290_v15  ;;  %v337_v13 = vld [vmem:[#allocation5 + $0x338] sm:$0xff]  ;;  %v272_v14 = vld [vmem:[#allocation5 + $0x130] sm:$0xff]  ;;  %v266_v33 = vld [vmem:[#allocation5 + $0x100] sm:$0xff] }
  0x65   :  { %542 = vmatpush2.msra.mxu1 %v354_v16  ;;  %466 = vmatprep.subr.mxu0 %v289_v17  ;;  %v336_v15 = vld [vmem:[#allocation5 + $0x330] sm:$0xff]  ;;  %v271_v16 = vld [vmem:[#allocation5 + $0x128] sm:$0xff]  ;;  %v330_v38 = vld [vmem:[#allocation5 + $0x300] sm:$0xff] }
  0x66   :  { %543 = vmatprep.subr.mxu1 %v353_v18  ;;  %467 = vmatpush2.msra.mxu0 %v288_v20  ;;  %v335_v17 = vld [vmem:[#allocation5 + $0x328] sm:$0xff]  ;;  %v270_v18 = vld [vmem:[#allocation5 + $0x120] sm:$0xff]  ;;  %v116_v58 = vld [vmem:[#allocation10 + $0xd8] sm:$0xff] }
  0x67   :  { %544 = vmatpush2.msra.mxu1 %v352_v21  ;;  %468 = vmatprep.subr.mxu0 %v287_v22  ;;  %v334_v20 = vld [vmem:[#allocation5 + $0x320] sm:$0xff]  ;;  %v269_v21 = vld [vmem:[#allocation5 + $0x118] sm:$0xff]  ;;  %v115_v54 = vld [vmem:[#allocation10 + $0xd0] sm:$0xff] }
  0x68   :  { %545 = vmatprep.subr.mxu1 %v351_v23  ;;  %469 = vmatpush2.msra.mxu0 %v286_v25  ;;  %v333_v22 = vld [vmem:[#allocation5 + $0x318] sm:$0xff]  ;;  %v7097_v23 = vmov 0  ;;  %v202_v25 = vsel %vm192_vm0, %v187_v43, %v194_v44  ;;  %v390_v43 = vld [vmem:[#allocation5 + $0x4e0] sm:$0xff]  ;;  %v114_v59 = vld [vmem:[#allocation10 + $0xc8] sm:$0xff] }
  0x69   :  { %546 = vmatpush2.msra.mxu1 %v350_v26  ;;  %470 = vmatprep.subr.mxu0 %v285_v27  ;;  %v7098_v23 = vsel %vm5151_vm4, 4294967295, %v7097_v23  ;;  %v209_v26 = vsel %vm203_vm1, %v207_v49, %v208_v50  ;;  %v268_v27 = vld [vmem:[#allocation5 + $0x110] sm:$0xff]  ;;  %v389_v44 = vld [vmem:[#allocation5 + $0x4d8] sm:$0xff]  ;;  %v383_v49 = vld [vmem:[#allocation5 + $0x4a8] sm:$0xff] }
  0x6a   :  { %547 = vmatprep.subr.mxu1 %v349_v28  ;;  %471 = vmatpush2.msra.mxu0 %v284_v31  ;;  %7099 = vst [vmem:[#allocation16_spill] sm:$0xff] %v7098_v23  ;;  %v332_v28 = vld [vmem:[#allocation5 + $0x310] sm:$0xff]  ;;  %v267_v31 = vld [vmem:[#allocation5 + $0x108] sm:$0xff]  ;;  %v382_v50 = vld [vmem:[#allocation5 + $0x4a0] sm:$0xff] }
  0x6b   :  { %548 = vmatpush2.msra.mxu1 %v348_v32  ;;  %472 = vmatprep.subr.mxu0 %v283_v35  ;;  %v331_v32 = vld [vmem:[#allocation5 + $0x308] sm:$0xff]  ;;  %v223_v35 = vsel %vm5151_vm4, %v209_v26, %v202_v25  ;;  %v113_v60 = vld [vmem:[#allocation10 + $0xc0] sm:$0xff]  ;;  %v1122_v23 = vld [vmem:[#allocation5 + $0xb58] sm:$0xff] }
  0x6c   :  { %549 = vmatprep.subr.mxu1 %v347_v36  ;;  %473 = vmatpush2.msra.mxu0 %v282_v41  ;;  %v7100_v36 = vmov 0  ;;  %v393_v41 = vld [vmem:[#allocation5 + $0x4f8] sm:$0xff]  ;;  %v110_v63 = vld [vmem:[#allocation10 + $0xa8] sm:$0xff]  ;;  %v109_v0 = vld [vmem:[#allocation10 + $0xa0] sm:$0xff] }
  0x6d   :  { %550 = vmatpush2.msra.mxu1 %v346_v42  ;;  %474 = vmatprep.subr.mxu0 %v281_v47  ;;  %v7101_v36 = vsel %vm5169_vm5, 4294967295, %v7100_v36  ;;  %v391_v42 = vld [vmem:[#allocation5 + $0x4e8] sm:$0xff]  ;;  %v386_v47 = vld [vmem:[#allocation5 + $0x4c0] sm:$0xff] }
  0x6e   :  { %551 = vmatprep.subr.mxu1 %v345_v48  ;;  %475 = vmatpush2.msra.mxu0 %v280_v52  ;;  %7102 = vst [vmem:[#allocation17_spill] sm:$0xff] %v7101_v36  ;;  %v385_v48 = vld [vmem:[#allocation5 + $0x4b8] sm:$0xff]  ;;  %v1123_v36 = vld [vmem:[#allocation5 + $0xb60] sm:$0xff] }
  0x6f   :  { %552 = vmatpush2.msra.mxu1 %v344_v53  ;;  %476 = vmatprep.subr.mxu0 %v279_v56  ;;  %v381_v52 = vld [vmem:[#allocation5 + $0x498] sm:$0xff]  ;;  %v380_v53 = vld [vmem:[#allocation5 + $0x490] sm:$0xff]  ;;  %v379_v56 = vld [vmem:[#allocation5 + $0x488] sm:$0xff] }
  0x70   :  { %553 = vmatprep.subr.mxu1 %v343_v57  ;;  %477 = vmatpush2.msra.mxu0 %v278_v61  ;;  %v377_v57 = vld [vmem:[#allocation5 + $0x478] sm:$0xff]  ;;  %v376_v61 = vld [vmem:[#allocation5 + $0x470] sm:$0xff] }
  0x71   :  { %554 = vmatpush2.msra.mxu1 %v342_v62  ;;  %478 = vmatprep.subr.mxu0 %v277_v2  ;;  %v375_v62 = vld [vmem:[#allocation5 + $0x468] sm:$0xff]  ;;  %v374_v2 = vld [vmem:[#allocation5 + $0x460] sm:$0xff] }
  0x72   :  { %555 = vmatprep.subr.mxu1 %v341_v3  ;;  %479 = vmatpush2.msra.mxu0 %v276_v6  ;;  %v373_v3 = vld [vmem:[#allocation5 + $0x458] sm:$0xff]  ;;  %v372_v6 = vld [vmem:[#allocation5 + $0x450] sm:$0xff] }
  0x73   :  { %556 = vmatpush2.msra.mxu1 %v340_v7  ;;  %480 = vmatprep.subr.mxu0 %v275_v8  ;;  %v371_v7 = vld [vmem:[#allocation5 + $0x448] sm:$0xff]  ;;  %v370_v8 = vld [vmem:[#allocation5 + $0x440] sm:$0xff] }
  0x74   :  { %557 = vmatprep.subr.mxu1 %v339_v9  ;;  %481 = vmatpush2.msra.mxu0 %v274_v10  ;;  %v369_v9 = vld [vmem:[#allocation5 + $0x438] sm:$0xff]  ;;  %v368_v10 = vld [vmem:[#allocation5 + $0x430] sm:$0xff] }
  0x75   :  { %558 = vmatpush2.msra.mxu1 %v338_v11  ;;  %482 = vmatprep.subr.mxu0 %v273_v12  ;;  %v367_v11 = vld [vmem:[#allocation5 + $0x428] sm:$0xff]  ;;  %v366_v12 = vld [vmem:[#allocation5 + $0x420] sm:$0xff] }
  0x76   :  { %559 = vmatprep.subr.mxu1 %v337_v13  ;;  %483 = vmatpush2.msra.mxu0 %v272_v14  ;;  %v365_v13 = vld [vmem:[#allocation5 + $0x418] sm:$0xff]  ;;  %v364_v14 = vld [vmem:[#allocation5 + $0x410] sm:$0xff] }
  0x77   :  { %560 = vmatpush2.msra.mxu1 %v336_v15  ;;  %484 = vmatprep.subr.mxu0 %v271_v16  ;;  %v363_v15 = vld [vmem:[#allocation5 + $0x408] sm:$0xff]  ;;  %v362_v16 = vld [vmem:[#allocation5 + $0x400] sm:$0xff] }
  0x78   :  { %561 = vmatprep.subr.mxu1 %v335_v17  ;;  %485 = vmatpush2.msra.mxu0 %v270_v18  ;;  %v425_v17 = vld [vmem:[#allocation5 + $0x5f8] sm:$0xff]  ;;  %v424_v18 = vld [vmem:[#allocation5 + $0x5f0] sm:$0xff] }
  0x79   :  { %562 = vmatpush2.msra.mxu1 %v334_v20  ;;  %486 = vmatprep.subr.mxu0 %v269_v21  ;;  %v423_v20 = vld [vmem:[#allocation5 + $0x5e8] sm:$0xff]  ;;  %v422_v21 = vld [vmem:[#allocation5 + $0x5e0] sm:$0xff] }
  0x7a   :  { %563 = vmatprep.subr.mxu1 %v333_v22  ;;  %487 = vmatpush2.msra.mxu0 %v268_v27  ;;  %v421_v22 = vld [vmem:[#allocation5 + $0x5d8] sm:$0xff]  ;;  %v418_v27 = vld [vmem:[#allocation5 + $0x5c0] sm:$0xff] }
  0x7b   :  { %564 = vmatpush2.msra.mxu1 %v332_v28  ;;  %488 = vmatprep.subr.mxu0 %v267_v31  ;;  %v417_v28 = vld [vmem:[#allocation5 + $0x5b8] sm:$0xff]  ;;  %v416_v31 = vld [vmem:[#allocation5 + $0x5b0] sm:$0xff] }
  0x7c   :  { %565 = vmatprep.subr.mxu1 %v331_v32  ;;  %489 = vmatpush2.msra.mxu0 %v266_v33  ;;  %v415_v32 = vld [vmem:[#allocation5 + $0x5a8] sm:$0xff]  ;;  %v414_v33 = vld [vmem:[#allocation5 + $0x5a0] sm:$0xff] }
  0x7d   :  { %490 = vmatprep.mubr.f32.mxu0 %v223_v35  ;;  %566 = vmatpush2.msra.mxu1 %v330_v38  ;;  %v413_v35 = vld [vmem:[#allocation5 + $0x598] sm:$0xff]  ;;  %v412_v38 = vld [vmem:[#allocation5 + $0x590] sm:$0xff] }
  0x7e   :  { %567 = vmatprep.mubr.f32.mxu1 %v5081_v29  ;;  %491 = vmatmul.mubr.f32.vlgmr.msra.gmra.mxu0 %v222_v39  ;;  %v231_v29 = vsel %vm5101_vm2, %v202_v25, %v209_v26  ;;  %v420_v25 = vld [vmem:[#allocation5 + $0x5d0] sm:$0xff]  ;;  %v419_v26 = vld [vmem:[#allocation5 + $0x5c8] sm:$0xff] }
  0x7f   :  { %568 = vmatmul.mubr.f32.vlgmr.msra.gmra.mxu1 %v5086_v34  ;;  %580 = vmatprep.subr.mxu0 %v393_v41  ;;  %v387_v34 = vld [vmem:[#allocation5 + $0x4c8] sm:$0xff]  ;;  %v410_v41 = vld [vmem:[#allocation5 + $0x580] sm:$0xff] }
  0x80   :  { %496 = vmatprep.mubr.f32.mxu0 %v225_v24  ;;  %581 = vmatpush1.msra.mxu0 %v392_v40  ;;  %v411_v39 = vld [vmem:[#allocation5 + $0x588] sm:$0xff]  ;;  %v409_v24 = vld [vmem:[#allocation5 + $0x578] sm:$0xff]  ;;  %v408_v40 = vld [vmem:[#allocation5 + $0x570] sm:$0xff] }
  0x81   :  { %573 = vmatprep.mubr.f32.mxu1 %v5083_v30  ;;  %582 = vmatprep.subr.mxu0 %v391_v42  ;;  %v384_v30 = vld [vmem:[#allocation5 + $0x4b0] sm:$0xff]  ;;  %v407_v42 = vld [vmem:[#allocation5 + $0x568] sm:$0xff] }
  0x82   :  { %583 = vmatpush1.msra.mxu0 %v390_v43  ;;  %v406_v43 = vld [vmem:[#allocation5 + $0x560] sm:$0xff] }
  0x83   :  { %574 = vmatmul.mubr.f32.gmra.mxu1 %v5088_v37  ;;  %584 = vmatprep.subr.mxu0 %v389_v44  ;;  %v378_v37 = vld [vmem:[#allocation5 + $0x480] sm:$0xff]  ;;  %v405_v44 = vld [vmem:[#allocation5 + $0x558] sm:$0xff] }
  0x84   :  { %497 = vmatmul.mubr.f32.gmra.mxu0 %v224_v45  ;;  %v404_v45 = vld [vmem:[#allocation5 + $0x550] sm:$0xff] }
  0x85   :  { %585 = vmatpush1.msra.mxu0 %v388_v46  ;;  %644 = vmatprep.mubr.f32.mxu0 %v231_v29  ;;  %v403_v46 = vld [vmem:[#allocation5 + $0x548] sm:$0xff]  ;;  %v402_v29 = vld [vmem:[#allocation5 + $0x540] sm:$0xff] }
  0x86   :  { %586 = vmatprep.subr.mxu0 %v387_v34  ;;  %v401_v34 = vld [vmem:[#allocation5 + $0x538] sm:$0xff] }
  0x87   :  { %587 = vmatpush1.msra.mxu0 %v386_v47  ;;  %v400_v47 = vld [vmem:[#allocation5 + $0x530] sm:$0xff] }
  0x88   :  { %588 = vmatprep.subr.mxu0 %v385_v48  ;;  %v399_v48 = vld [vmem:[#allocation5 + $0x528] sm:$0xff] }
  0x89   :  { %589 = vmatpush1.msra.mxu0 %v384_v30  ;;  %v398_v30 = vld [vmem:[#allocation5 + $0x520] sm:$0xff] }
  0x8a   :  { %590 = vmatprep.subr.mxu0 %v383_v49  ;;  %v397_v49 = vld [vmem:[#allocation5 + $0x518] sm:$0xff] }
  0x8b   :  { %591 = vmatpush1.msra.mxu0 %v382_v50  ;;  %v396_v50 = vld [vmem:[#allocation5 + $0x510] sm:$0xff] }
  0x8c   :  { %592 = vmatprep.subr.mxu0 %v381_v52  ;;  %v395_v52 = vld [vmem:[#allocation5 + $0x508] sm:$0xff] }
  0x8d   :  { %593 = vmatpush1.msra.mxu0 %v380_v53  ;;  %v394_v53 = vld [vmem:[#allocation5 + $0x500] sm:$0xff] }
  0x8e   :  { %594 = vmatprep.subr.mxu0 %v379_v56  ;;  %v5201_v56 = vld [vmem:[#allocation10 + $0xf8] sm:$0xff] }
  0x8f   :  { %595 = vmatpush1.msra.mxu0 %v378_v37  ;;  %v119_v37 = vld [vmem:[#allocation10 + $0xf0] sm:$0xff]  ;;  %657 = vmatprep.subr.mxu1 %v5201_v56 }
  0x90   :  { %596 = vmatprep.subr.mxu0 %v377_v57  ;;  %v118_v57 = vld [vmem:[#allocation10 + $0xe8] sm:$0xff]  ;;  %658 = vmatpush1.msra.mxu1 %v119_v37 }
  0x91   :  { %597 = vmatpush1.msra.mxu0 %v376_v61  ;;  %v117_v61 = vld [vmem:[#allocation10 + $0xe0] sm:$0xff]  ;;  %659 = vmatprep.subr.mxu1 %v118_v57 }
  0x92   :  { %598 = vmatprep.subr.mxu0 %v375_v62  ;;  %660 = vmatpush1.msra.mxu1 %v117_v61  ;;  %v107_v62 = vld [vmem:[#allocation10 + $0x90] sm:$0xff] }
  0x93   :  { %599 = vmatpush1.msra.mxu0 %v374_v2  ;;  %661 = vmatprep.subr.mxu1 %v116_v58  ;;  %v106_v2 = vld [vmem:[#allocation10 + $0x88] sm:$0xff] }
  0x94   :  { %600 = vmatprep.subr.mxu0 %v373_v3  ;;  %662 = vmatpush1.msra.mxu1 %v115_v54  ;;  %v105_v3 = vld [vmem:[#allocation10 + $0x80] sm:$0xff] }
  0x95   :  { %601 = vmatpush1.msra.mxu0 %v372_v6  ;;  %663 = vmatprep.subr.mxu1 %v114_v59  ;;  %v104_v6 = vld [vmem:[#allocation10 + $0x78] sm:$0xff] }
  0x96   :  { %602 = vmatprep.subr.mxu0 %v371_v7  ;;  %664 = vmatpush1.msra.mxu1 %v113_v60  ;;  %v103_v7 = vld [vmem:[#allocation10 + $0x70] sm:$0xff] }
  0x97   :  { %603 = vmatpush1.msra.mxu0 %v370_v8  ;;  %v102_v8 = vld [vmem:[#allocation10 + $0x68] sm:$0xff] }
  0x98   :  { %604 = vmatprep.subr.mxu0 %v369_v9  ;;  %v101_v9 = vld [vmem:[#allocation10 + $0x60] sm:$0xff] }
  0x99   :  { %605 = vmatpush1.msra.mxu0 %v368_v10  ;;  %v100_v10 = vld [vmem:[#allocation10 + $0x58] sm:$0xff] }
  0x9a   :  { %606 = vmatprep.subr.mxu0 %v367_v11  ;;  %v99_v11 = vld [vmem:[#allocation10 + $0x50] sm:$0xff] }
  0x9b   :  { %607 = vmatpush1.msra.mxu0 %v366_v12  ;;  %v98_v12 = vld [vmem:[#allocation10 + $0x48] sm:$0xff] }
  0x9c   :  { %608 = vmatprep.subr.mxu0 %v365_v13  ;;  %v97_v13 = vld [vmem:[#allocation10 + $0x40] sm:$0xff] }
  0x9d   :  { %609 = vmatpush1.msra.mxu0 %v364_v14  ;;  %v96_v14 = vld [vmem:[#allocation10 + $0x38] sm:$0xff] }
  0x9e   :  { %610 = vmatprep.subr.mxu0 %v363_v15  ;;  %v95_v15 = vld [vmem:[#allocation10 + $0x30] sm:$0xff] }
  0x9f   :  { %611 = vmatpush1.msra.mxu0 %v362_v16  ;;  %v94_v16 = vld [vmem:[#allocation10 + $0x28] sm:$0xff] }
  0xa0   :  { %612 = vmatprep.subr.mxu0 %v425_v17  ;;  %v93_v17 = vld [vmem:[#allocation10 + $0x20] sm:$0xff] }
  0xa1   :  { %613 = vmatpush2.msra.mxu0 %v424_v18  ;;  %v92_v18 = vld [vmem:[#allocation10 + $0x18] sm:$0xff] }
  0xa2   :  { %614 = vmatprep.subr.mxu0 %v423_v20  ;;  %v91_v20 = vld [vmem:[#allocation10 + $0x10] sm:$0xff] }
  0xa3   :  { %615 = vmatpush2.msra.mxu0 %v422_v21  ;;  %v90_v21 = vld [vmem:[#allocation10 + $0x8] sm:$0xff] }
  0xa4   :  { %616 = vmatprep.subr.mxu0 %v421_v22  ;;  %v89_v22 = vld [vmem:[#allocation10] sm:$0xff] }
  0xa5   :  { %617 = vmatpush2.msra.mxu0 %v420_v25  ;;  %v152_v25 = vld [vmem:[#allocation10 + $0x1f8] sm:$0xff] }
  0xa6   :  { %618 = vmatprep.subr.mxu0 %v419_v26  ;;  %v151_v26 = vld [vmem:[#allocation10 + $0x1f0] sm:$0xff] }
  0xa7   :  { %619 = vmatpush2.msra.mxu0 %v418_v27  ;;  %v150_v27 = vld [vmem:[#allocation10 + $0x1e8] sm:$0xff] }
  0xa8   :  { %620 = vmatprep.subr.mxu0 %v417_v28  ;;  %v149_v28 = vld [vmem:[#allocation10 + $0x1e0] sm:$0xff] }
  0xa9   :  { %621 = vmatpush2.msra.mxu0 %v416_v31  ;;  %v148_v31 = vld [vmem:[#allocation10 + $0x1d8] sm:$0xff] }
  0xaa   :  { %622 = vmatprep.subr.mxu0 %v415_v32  ;;  %v147_v32 = vld [vmem:[#allocation10 + $0x1d0] sm:$0xff] }
  0xab   :  { %623 = vmatpush2.msra.mxu0 %v414_v33  ;;  %v146_v33 = vld [vmem:[#allocation10 + $0x1c8] sm:$0xff] }
  0xac   :  { %624 = vmatprep.subr.mxu0 %v413_v35  ;;  %v145_v35 = vld [vmem:[#allocation10 + $0x1c0] sm:$0xff] }
  0xad   :  { %625 = vmatpush2.msra.mxu0 %v412_v38  ;;  %v144_v38 = vld [vmem:[#allocation10 + $0x1b8] sm:$0xff] }
  0xae   :  { %626 = vmatprep.subr.mxu0 %v411_v39  ;;  %v143_v39 = vld [vmem:[#allocation10 + $0x1b0] sm:$0xff] }
  0xaf   :  { %627 = vmatpush2.msra.mxu0 %v410_v41  ;;  %v142_v41 = vld [vmem:[#allocation10 + $0x1a8] sm:$0xff] }
  0xb0   :  { %628 = vmatprep.subr.mxu0 %v409_v24  ;;  %v141_v24 = vld [vmem:[#allocation10 + $0x1a0] sm:$0xff] }
  0xb1   :  { %629 = vmatpush2.msra.mxu0 %v408_v40  ;;  %v140_v40 = vld [vmem:[#allocation10 + $0x198] sm:$0xff] }
  0xb2   :  { %630 = vmatprep.subr.mxu0 %v407_v42  ;;  %v139_v42 = vld [vmem:[#allocation10 + $0x190] sm:$0xff] }
  0xb3   :  { %631 = vmatpush2.msra.mxu0 %v406_v43  ;;  %v138_v43 = vld [vmem:[#allocation10 + $0x188] sm:$0xff] }
  0xb4   :  { %632 = vmatprep.subr.mxu0 %v405_v44  ;;  %v137_v44 = vld [vmem:[#allocation10 + $0x180] sm:$0xff] }
  0xb5   :  { %633 = vmatpush2.msra.mxu0 %v404_v45  ;;  %v136_v45 = vld [vmem:[#allocation10 + $0x178] sm:$0xff] }
  0xb6   :  { %634 = vmatprep.subr.mxu0 %v403_v46  ;;  %v135_v46 = vld [vmem:[#allocation10 + $0x170] sm:$0xff] }
  0xb7   :  { %635 = vmatpush2.msra.mxu0 %v402_v29  ;;  %v134_v29 = vld [vmem:[#allocation10 + $0x168] sm:$0xff] }
  0xb8   :  { %636 = vmatprep.subr.mxu0 %v401_v34  ;;  %v133_v34 = vld [vmem:[#allocation10 + $0x160] sm:$0xff] }
  0xb9   :  { %637 = vmatpush2.msra.mxu0 %v400_v47  ;;  %v132_v47 = vld [vmem:[#allocation10 + $0x158] sm:$0xff] }
  0xba   :  { %638 = vmatprep.subr.mxu0 %v399_v48  ;;  %v131_v48 = vld [vmem:[#allocation10 + $0x150] sm:$0xff] }
  0xbb   :  { %639 = vmatpush2.msra.mxu0 %v398_v30  ;;  %v130_v30 = vld [vmem:[#allocation10 + $0x148] sm:$0xff] }
  0xbc   :  { %640 = vmatprep.subr.mxu0 %v397_v49  ;;  %v129_v49 = vld [vmem:[#allocation10 + $0x140] sm:$0xff] }
  0xbd   :  { %641 = vmatpush2.msra.mxu0 %v396_v50  ;;  %v128_v50 = vld [vmem:[#allocation10 + $0x138] sm:$0xff] }
  0xbe   :  { %642 = vmatprep.subr.mxu0 %v395_v52  ;;  %v127_v52 = vld [vmem:[#allocation10 + $0x130] sm:$0xff] }
  0xbf   :  { %643 = vmatpush2.msra.mxu0 %v394_v53  ;;  %v126_v53 = vld [vmem:[#allocation10 + $0x128] sm:$0xff] }
  0xc0   :  { %645 = vmatmul.mubr.f32.vlgmr.msra.gmra.mxu0 %v230_v1  ;;  %758 = vmatprep.subr.mxu0 %v5201_v56  ;;  %v112_v1 = vld [vmem:[#allocation10 + $0xb8] sm:$0xff] }
  0xc1   :  { %650 = vmatprep.mubr.f32.mxu0 %v233_v4  ;;  %759 = vmatpush1.msra.mxu0 %v119_v37  ;;  %v111_v4 = vld [vmem:[#allocation10 + $0xb0] sm:$0xff]  ;;  %v125_v37 = vld [vmem:[#allocation10 + $0x120] sm:$0xff] }
  0xc2   :  { %760 = vmatprep.subr.mxu0 %v118_v57  ;;  %665 = vmatprep.subr.mxu1 %v112_v1  ;;  %v124_v57 = vld [vmem:[#allocation10 + $0x118] sm:$0xff] }
  0xc3   :  { %761 = vmatpush1.msra.mxu0 %v117_v61  ;;  %666 = vmatpush1.msra.mxu1 %v111_v4  ;;  %v123_v61 = vld [vmem:[#allocation10 + $0x110] sm:$0xff] }
  0xc4   :  { %651 = vmatmul.mubr.f32.gmra.mxu0 %v232_v5  ;;  %762 = vmatprep.subr.mxu0 %v116_v58  ;;  %v108_v5 = vld [vmem:[#allocation10 + $0x98] sm:$0xff]  ;;  %v122_v58 = vld [vmem:[#allocation10 + $0x108] sm:$0xff] }
  0xc5   :  { %763 = vmatpush1.msra.mxu0 %v115_v54  ;;  %667 = vmatprep.subr.mxu1 %v110_v63  ;;  %v121_v54 = vld [vmem:[#allocation10 + $0x100] sm:$0xff] }
  0xc6   :  { %764 = vmatprep.subr.mxu0 %v114_v59  ;;  %668 = vmatpush1.msra.mxu1 %v109_v0 }
  0xc7   :  { %765 = vmatpush1.msra.mxu0 %v113_v60  ;;  %669 = vmatprep.subr.mxu1 %v108_v5 }
  0xc8   :  { %766 = vmatprep.subr.mxu0 %v112_v1  ;;  %670 = vmatpush1.msra.mxu1 %v107_v62 }
  0xc9   :  { %767 = vmatpush1.msra.mxu0 %v111_v4  ;;  %671 = vmatprep.subr.mxu1 %v106_v2 }
  0xca   :  { %768 = vmatprep.subr.mxu0 %v110_v63  ;;  %672 = vmatpush1.msra.mxu1 %v105_v3 }
  0xcb   :  { %769 = vmatpush1.msra.mxu0 %v109_v0  ;;  %673 = vmatprep.subr.mxu1 %v104_v6 }
  0xcc   :  { %770 = vmatprep.subr.mxu0 %v108_v5  ;;  %674 = vmatpush1.msra.mxu1 %v103_v7 }
  0xcd   :  { %771 = vmatpush1.msra.mxu0 %v107_v62  ;;  %675 = vmatprep.subr.mxu1 %v102_v8 }
  0xce   :  { %772 = vmatprep.subr.mxu0 %v106_v2  ;;  %676 = vmatpush1.msra.mxu1 %v101_v9 }
  0xcf   :  { %773 = vmatpush1.msra.mxu0 %v105_v3  ;;  %677 = vmatprep.subr.mxu1 %v100_v10 }
  0xd0   :  { %774 = vmatprep.subr.mxu0 %v104_v6  ;;  %678 = vmatpush1.msra.mxu1 %v99_v11 }
  0xd1   :  { %775 = vmatpush1.msra.mxu0 %v103_v7  ;;  %679 = vmatprep.subr.mxu1 %v98_v12 }
  0xd2   :  { %776 = vmatprep.subr.mxu0 %v102_v8  ;;  %680 = vmatpush1.msra.mxu1 %v97_v13 }
  0xd3   :  { %777 = vmatpush1.msra.mxu0 %v101_v9  ;;  %681 = vmatprep.subr.mxu1 %v96_v14 }
  0xd4   :  { %778 = vmatprep.subr.mxu0 %v100_v10  ;;  %682 = vmatpush1.msra.mxu1 %v95_v15 }
  0xd5   :  { %779 = vmatpush1.msra.mxu0 %v99_v11  ;;  %683 = vmatprep.subr.mxu1 %v94_v16 }
  0xd6   :  { %780 = vmatprep.subr.mxu0 %v98_v12  ;;  %684 = vmatpush1.msra.mxu1 %v93_v17 }
  0xd7   :  { %781 = vmatpush1.msra.mxu0 %v97_v13  ;;  %685 = vmatprep.subr.mxu1 %v92_v18 }
  0xd8   :  { %782 = vmatprep.subr.mxu0 %v96_v14  ;;  %686 = vmatpush1.msra.mxu1 %v91_v20 }
  0xd9   :  { %783 = vmatpush1.msra.mxu0 %v95_v15  ;;  %687 = vmatprep.subr.mxu1 %v90_v21 }
  0xda   :  { %784 = vmatprep.subr.mxu0 %v94_v16  ;;  %688 = vmatpush1.msra.mxu1 %v89_v22  ;;  %v1046_v16 = vld [vmem:[#allocation5 + $0x8f8] sm:$0xff] }
  0xdb   :  { %785 = vmatpush1.msra.mxu0 %v93_v17  ;;  %689 = vmatprep.subr.mxu1 %v152_v25  ;;  %v982_v17 = vld [vmem:[#allocation5 + $0x6f8] sm:$0xff] }
  0xdc   :  { %786 = vmatprep.subr.mxu0 %v92_v18  ;;  %690 = vmatpush2.msra.mxu1 %v151_v26  ;;  %v981_v18 = vld [vmem:[#allocation5 + $0x6f0] sm:$0xff] }
  0xdd   :  { %787 = vmatpush1.msra.mxu0 %v91_v20  ;;  %691 = vmatprep.subr.mxu1 %v150_v27  ;;  %v980_v20 = vld [vmem:[#allocation5 + $0x6e8] sm:$0xff] }
  0xde   :  { %788 = vmatprep.subr.mxu0 %v90_v21  ;;  %692 = vmatpush2.msra.mxu1 %v149_v28  ;;  %v979_v21 = vld [vmem:[#allocation5 + $0x6e0] sm:$0xff] }
  0xdf   :  { %789 = vmatpush1.msra.mxu0 %v89_v22  ;;  %693 = vmatprep.subr.mxu1 %v148_v31  ;;  %v978_v22 = vld [vmem:[#allocation5 + $0x6d8] sm:$0xff] }
  0xe0   :  { %790 = vmatprep.subr.mxu0 %v152_v25  ;;  %694 = vmatpush2.msra.mxu1 %v147_v32 }
  0xe1   :  { %791 = vmatpush2.msra.mxu0 %v151_v26  ;;  %695 = vmatprep.subr.mxu1 %v146_v33 }
  0xe2   :  { %792 = vmatprep.subr.mxu0 %v150_v27  ;;  %696 = vmatpush2.msra.mxu1 %v145_v35 }
  0xe3   :  { %793 = vmatpush2.msra.mxu0 %v149_v28  ;;  %697 = vmatprep.subr.mxu1 %v144_v38 }
  0xe4   :  { %794 = vmatprep.subr.mxu0 %v148_v31  ;;  %698 = vmatpush2.msra.mxu1 %v143_v39 }
  0xe5   :  { %795 = vmatpush2.msra.mxu0 %v147_v32  ;;  %699 = vmatprep.subr.mxu1 %v142_v41 }
  0xe6   :  { %796 = vmatprep.subr.mxu0 %v146_v33  ;;  %700 = vmatpush2.msra.mxu1 %v141_v24 }
  0xe7   :  { %797 = vmatpush2.msra.mxu0 %v145_v35  ;;  %701 = vmatprep.subr.mxu1 %v140_v40 }
  0xe8   :  { %798 = vmatprep.subr.mxu0 %v144_v38  ;;  %702 = vmatpush2.msra.mxu1 %v139_v42 }
  0xe9   :  { %799 = vmatpush2.msra.mxu0 %v143_v39  ;;  %703 = vmatprep.subr.mxu1 %v138_v43 }
  0xea   :  { %800 = vmatprep.subr.mxu0 %v142_v41  ;;  %704 = vmatpush2.msra.mxu1 %v137_v44 }
  0xeb   :  { %801 = vmatpush2.msra.mxu0 %v141_v24  ;;  %705 = vmatprep.subr.mxu1 %v136_v45 }
  0xec   :  { %802 = vmatprep.subr.mxu0 %v140_v40  ;;  %706 = vmatpush2.msra.mxu1 %v135_v46 }
  0xed   :  { %803 = vmatpush2.msra.mxu0 %v139_v42  ;;  %707 = vmatprep.subr.mxu1 %v134_v29 }
  0xee   :  { %804 = vmatprep.subr.mxu0 %v138_v43  ;;  %708 = vmatpush2.msra.mxu1 %v133_v34 }
  0xef   :  { %805 = vmatpush2.msra.mxu0 %v137_v44  ;;  %709 = vmatprep.subr.mxu1 %v132_v47 }
  0xf0   :  { %806 = vmatprep.subr.mxu0 %v136_v45  ;;  %710 = vmatpush2.msra.mxu1 %v131_v48 }
  0xf1   :  { %807 = vmatpush2.msra.mxu0 %v135_v46  ;;  %711 = vmatprep.subr.mxu1 %v130_v30 }
  0xf2   :  { %808 = vmatprep.subr.mxu0 %v134_v29  ;;  %712 = vmatpush2.msra.mxu1 %v129_v49 }
  0xf3   :  { %809 = vmatpush2.msra.mxu0 %v133_v34  ;;  %713 = vmatprep.subr.mxu1 %v128_v50 }
  0xf4   :  { %810 = vmatprep.subr.mxu0 %v132_v47  ;;  %714 = vmatpush2.msra.mxu1 %v127_v52 }
  0xf5   :  { %811 = vmatpush2.msra.mxu0 %v131_v48  ;;  %715 = vmatprep.subr.mxu1 %v126_v53 }
  0xf6   :  { %812 = vmatprep.subr.mxu0 %v130_v30  ;;  %716 = vmatpush2.msra.mxu1 %v125_v37 }
  0xf7   :  { %813 = vmatpush2.msra.mxu0 %v129_v49  ;;  %717 = vmatprep.subr.mxu1 %v124_v57 }
  0xf8   :  { %814 = vmatprep.subr.mxu0 %v128_v50  ;;  %718 = vmatpush2.msra.mxu1 %v123_v61 }
  0xf9   :  { %815 = vmatpush2.msra.mxu0 %v127_v52  ;;  %719 = vmatprep.subr.mxu1 %v122_v58 }
  0xfa   :  { %816 = vmatprep.subr.mxu0 %v126_v53  ;;  %720 = vmatpush2.msra.mxu1 %v121_v54  ;;  %v1045_v53 = vld [vmem:[#allocation5 + $0x8f0] sm:$0xff] }
  0xfb   :  { %817 = vmatpush2.msra.mxu0 %v125_v37  ;;  %1143 = vmatprep.subr.mxu1 %v982_v17  ;;  %v968_v17 = vld [vmem:[#allocation5 + $0x688] sm:$0xff] }
  0xfc   :  { %818 = vmatprep.subr.mxu0 %v124_v57  ;;  %v1044_v57 = vld [vmem:[#allocation5 + $0x8e8] sm:$0xff] }
  0xfd   :  { %819 = vmatpush2.msra.mxu0 %v123_v61  ;;  %v1043_v61 = vld [vmem:[#allocation5 + $0x8e0] sm:$0xff] }
  0xfe   :  { %820 = vmatprep.subr.mxu0 %v122_v58  ;;  %v1042_v58 = vld [vmem:[#allocation5 + $0x8d8] sm:$0xff] }
  0xff   :  { %821 = vmatpush2.msra.mxu0 %v121_v54 }
 0x100   :  { %1220 = vmatprep.subr.mxu0 %v1046_v16  ;;  %v1030_v16 = vld [vmem:[#allocation5 + $0x878] sm:$0xff] }
 0x13e   :  { %v492_v59 = vpop.f32.mrf.mxu0 }
 0x13f   :  { %v569_v60 = vpop.f32.mrf.mxu1 }
 0x140   :  { %v494_v1 = vpop.f32.mrf.mxu0  ;;  %v570_v3 = vadd.f32 %v569_v60, %v492_v59  ;;  %v1041_v59 = vld [vmem:[#allocation5 + $0x8d0] sm:$0xff]  ;;  %v1040_v60 = vld [vmem:[#allocation5 + $0x8c8] sm:$0xff] }
 0x141   :  { %v571_v63 = vpop.f32.mrf.mxu1 }
 0x142   :  { %v572_v2 = vadd.f32 %v571_v63, %v494_v1  ;;  %v1039_v1 = vld [vmem:[#allocation5 + $0x8c0] sm:$0xff]  ;;  %v1038_v63 = vld [vmem:[#allocation5 + $0x8b8] sm:$0xff] }
 0x143   :  { %v575_v0 = vpop.f32.mrf.mxu1 }
 0x144   :  { %v498_v4 = vpop.f32.mrf.mxu0 }
 0x145   :  { %v577_v6 = vpop.f32.mrf.mxu1  ;;  %v576_v12 = vadd.f32 %v575_v0, %v498_v4  ;;  %v977_v4 = vld [vmem:[#allocation5 + $0x6d0] sm:$0xff]  ;;  %v976_v0 = vld [vmem:[#allocation5 + $0x6c8] sm:$0xff] }
 0x146   :  { %v500_v5 = vpop.f32.mrf.mxu0 }
 0x147   :  { %v578_v11 = vadd.f32 %v577_v6, %v500_v5  ;;  %v1037_v5 = vld [vmem:[#allocation5 + $0x8b0] sm:$0xff]  ;;  %v1035_v6 = vld [vmem:[#allocation5 + $0x8a0] sm:$0xff] }
 0x180   :  { %v646_v62 = vpop.f32.mrf.mxu0 }
 0x181   :  { %v647_v9 = vadd.f32 %v646_v62, %v570_v3  ;;  %v975_v62 = vld [vmem:[#allocation5 + $0x6c0] sm:$0xff]  ;;  %v974_v3 = vld [vmem:[#allocation5 + $0x6b8] sm:$0xff] }
 0x182   :  { %v648_v7 = vpop.f32.mrf.mxu0 }
 0x183   :  { %v649_v8 = vadd.f32 %v648_v7, %v572_v2  ;;  %v1036_v2 = vld [vmem:[#allocation5 + $0x8a8] sm:$0xff]  ;;  %v973_v7 = vld [vmem:[#allocation5 + $0x6b0] sm:$0xff] }
 0x184   :  { %v652_v10 = vpop.f32.mrf.mxu0 }
 0x185   :  { %721 = vmatprep.mubr.f32.mxu1 %v649_v8  ;;  %v653_v15 = vadd.f32 %v652_v10, %v576_v12  ;;  %v1033_v10 = vld [vmem:[#allocation5 + $0x890] sm:$0xff]  ;;  %v1032_v12 = vld [vmem:[#allocation5 + $0x888] sm:$0xff] }
 0x186   :  { %v654_v13 = vpop.f32.mrf.mxu0  ;;  %722 = vmatmul.mubr.f32.vlgmr.msra.gmra.mxu1 %v647_v9 }
 0x187   :  { %v655_v14 = vadd.f32 %v654_v13, %v578_v11  ;;  %1144 = vmatpush1.msra.mxu1 %v981_v18  ;;  %v971_v11 = vld [vmem:[#allocation5 + $0x6a0] sm:$0xff]  ;;  %v970_v13 = vld [vmem:[#allocation5 + $0x698] sm:$0xff]  ;;  %v1029_v18 = vld [vmem:[#allocation5 + $0x870] sm:$0xff] }
 0x188   :  { %1145 = vmatprep.subr.mxu1 %v980_v20  ;;  %v967_v20 = vld [vmem:[#allocation5 + $0x680] sm:$0xff] }
 0x189   :  { %727 = vmatprep.mubr.f32.mxu1 %v655_v14  ;;  %1146 = vmatpush1.msra.mxu1 %v979_v21  ;;  %v1028_v21 = vld [vmem:[#allocation5 + $0x868] sm:$0xff] }
 0x18a   :  { %728 = vmatmul.mubr.f32.gmra.mxu1 %v653_v15  ;;  %1147 = vmatprep.subr.mxu1 %v978_v22  ;;  %v966_v22 = vld [vmem:[#allocation5 + $0x678] sm:$0xff] }
 0x18b   :  { %1148 = vmatpush1.msra.mxu1 %v977_v4  ;;  %v1014_v4 = vld [vmem:[#allocation5 + $0x7f8] sm:$0xff] }
 0x18c   :  { %1149 = vmatprep.subr.mxu1 %v976_v0  ;;  %v1013_v0 = vld [vmem:[#allocation5 + $0x7f0] sm:$0xff] }
 0x18d   :  { %1150 = vmatpush1.msra.mxu1 %v975_v62  ;;  %v1012_v62 = vld [vmem:[#allocation5 + $0x7e8] sm:$0xff] }
 0x18e   :  { %1151 = vmatprep.subr.mxu1 %v974_v3  ;;  %v1011_v3 = vld [vmem:[#allocation5 + $0x7e0] sm:$0xff] }
 0x18f   :  { %1152 = vmatpush1.msra.mxu1 %v973_v7  ;;  %v1010_v7 = vld [vmem:[#allocation5 + $0x7d8] sm:$0xff] }
 0x246   :  { %v723_v25 = vpop.f32.mrf.mxu1 }
 0x248   :  { %v725_v26 = vpop.f32.mrf.mxu1 }
 0x24a   :  { %v729_v27 = vpop.f32.mrf.mxu1 }
 0x24b   :  { %v734_v28 = vadd.f32 %v729_v27, %v723_v25  ;;  %v1027_v25 = vld [vmem:[#allocation5 + $0x860] sm:$0xff]  ;;  %v1026_v27 = vld [vmem:[#allocation5 + $0x858] sm:$0xff] }
 0x24c   :  { %v731_v31 = vpop.f32.mrf.mxu1 }
 0x24d   :  { %v735_v32 = vrot.slane %v734_v28, 4  ;;  %v741_v33 = vadd.f32 %v731_v31, %v725_v26  ;;  %v965_v26 = vld [vmem:[#allocation5 + $0x670] sm:$0xff] }
 0x24e   :  { %v1025_v31 = vld [vmem:[#allocation5 + $0x850] sm:$0xff] }
 0x24f   :  { %v736_v35 = vadd.f32 %v735_v32, %v734_v28  ;;  %v742_v38 = vrot.slane %v741_v33, 4  ;;  %v964_v28 = vld [vmem:[#allocation5 + $0x668] sm:$0xff]  ;;  %v963_v32 = vld [vmem:[#allocation5 + $0x660] sm:$0xff] }
 0x251   :  { %v737_v39 = vrot.slane %v736_v35, 2  ;;  %v743_v41 = vadd.f32 %v742_v38, %v741_v33  ;;  %v1024_v33 = vld [vmem:[#allocation5 + $0x848] sm:$0xff]  ;;  %v1023_v38 = vld [vmem:[#allocation5 + $0x840] sm:$0xff] }
 0x253   :  { %v738_v24 = vadd.f32 %v737_v39, %v736_v35  ;;  %v744_v40 = vrot.slane %v743_v41, 2  ;;  %v962_v35 = vld [vmem:[#allocation5 + $0x658] sm:$0xff]  ;;  %v961_v39 = vld [vmem:[#allocation5 + $0x650] sm:$0xff] }
 0x255   :  { %v739_v42 = vrot.slane %v738_v24, 1  ;;  %v745_v43 = vadd.f32 %v744_v40, %v743_v41  ;;  %v1022_v41 = vld [vmem:[#allocation5 + $0x838] sm:$0xff]  ;;  %v1021_v40 = vld [vmem:[#allocation5 + $0x830] sm:$0xff] }
 0x257   :  { %v740_v44 = vadd.f32 %v739_v42, %v738_v24  ;;  %v746_v45 = vrot.slane %v745_v43, 1  ;;  %v960_v24 = vld [vmem:[#allocation5 + $0x648] sm:$0xff]  ;;  %v959_v42 = vld [vmem:[#allocation5 + $0x640] sm:$0xff] }
 0x259   :  { %v748_v46 = vmul.f32 0.0078125, %v740_v44  ;;  %v747_v29 = vadd.f32 %v746_v45, %v745_v43  ;;  %v1020_v43 = vld [vmem:[#allocation5 + $0x828] sm:$0xff]  ;;  %v958_v44 = vld [vmem:[#allocation5 + $0x638] sm:$0xff]  ;;  %v1019_v45 = vld [vmem:[#allocation5 + $0x820] sm:$0xff] }
 0x25b   :  { %v749_v34 = vmul.f32 0.0078125, %v747_v29  ;;  %v5210_v47 = vsub.f32 %v647_v9, %v748_v46  ;;  %v5220_v52 = vsub.f32 %v653_v15, %v748_v46  ;;  %v972_v9 = vld [vmem:[#allocation5 + $0x6a8] sm:$0xff]  ;;  %v969_v15 = vld [vmem:[#allocation5 + $0x690] sm:$0xff]  ;;  %v1018_v29 = vld [vmem:[#allocation5 + $0x818] sm:$0xff] }
 0x25c   :  { %1153 = vmatprep.subr.mxu1 %v972_v9  ;;  %v957_v46 = vld [vmem:[#allocation5 + $0x630] sm:$0xff] }
 0x25d   :  { %v5212_v48 = vsub.f32 %v649_v8, %v749_v34  ;;  %v5214_v30 = vsub.f32 %v655_v14, %v749_v34  ;;  %v754_v50 = vmul.f32 %v5210_v47, %v5210_v47  ;;  %v756_v54 = vmul.f32 %v5220_v52, %v5220_v52  ;;  %v1034_v8 = vld [vmem:[#allocation5 + $0x898] sm:$0xff]  ;;  %1154 = vmatpush1.msra.mxu1 %v971_v11  ;;  %v1031_v14 = vld [vmem:[#allocation5 + $0x880] sm:$0xff]  ;;  %v956_v34 = vld [vmem:[#allocation5 + $0x628] sm:$0xff] }
 0x25e   :  { %1155 = vmatprep.subr.mxu1 %v970_v13  ;;  %v1009_v9 = vld [vmem:[#allocation5 + $0x7d0] sm:$0xff]  ;;  %v1008_v11 = vld [vmem:[#allocation5 + $0x7c8] sm:$0xff]  ;;  %v1007_v13 = vld [vmem:[#allocation5 + $0x7c0] sm:$0xff] }
 0x25f   :  { %v755_v49 = vmul.f32 %v5212_v48, %v5212_v48  ;;  %v757_v37 = vmul.f32 %v5214_v30, %v5214_v30  ;;  %1156 = vmatpush1.msra.mxu1 %v969_v15  ;;  %v1006_v15 = vld [vmem:[#allocation5 + $0x7b8] sm:$0xff] }
 0x260   :  { %1157 = vmatprep.subr.mxu1 %v968_v17  ;;  %v1005_v17 = vld [vmem:[#allocation5 + $0x7b0] sm:$0xff] }
 0x261   :  { %822 = vmatprep.mubr.f32.mxu0 %v755_v49  ;;  %1158 = vmatpush1.msra.mxu1 %v967_v20  ;;  %v1017_v49 = vld [vmem:[#allocation5 + $0x810] sm:$0xff]  ;;  %v1004_v20 = vld [vmem:[#allocation5 + $0x7a8] sm:$0xff] }
 0x262   :  { %823 = vmatmul.mubr.f32.vlgmr.msra.gmra.mxu0 %v754_v50  ;;  %1159 = vmatprep.subr.mxu1 %v966_v22  ;;  %v955_v50 = vld [vmem:[#allocation5 + $0x620] sm:$0xff] }
 0x263   :  { %828 = vmatprep.mubr.f32.mxu0 %v757_v37  ;;  %1221 = vmatpush1.msra.mxu0 %v1045_v53  ;;  %v1016_v53 = vld [vmem:[#allocation5 + $0x808] sm:$0xff]  ;;  %v954_v37 = vld [vmem:[#allocation5 + $0x618] sm:$0xff]  ;;  %v1003_v22 = vld [vmem:[#allocation5 + $0x7a0] sm:$0xff] }
 0x264   :  { %1222 = vmatprep.subr.mxu0 %v1044_v57  ;;  %1160 = vmatpush1.msra.mxu1 %v965_v26  ;;  %v1015_v57 = vld [vmem:[#allocation5 + $0x800] sm:$0xff]  ;;  %v1002_v26 = vld [vmem:[#allocation5 + $0x798] sm:$0xff] }
 0x265   :  { %1223 = vmatpush1.msra.mxu0 %v1043_v61  ;;  %1161 = vmatprep.subr.mxu1 %v964_v28  ;;  %v953_v61 = vld [vmem:[#allocation5 + $0x610] sm:$0xff] }
 0x266   :  { %829 = vmatmul.mubr.f32.gmra.mxu0 %v756_v54  ;;  %1224 = vmatprep.subr.mxu0 %v1042_v58  ;;  %v1078_v58 = vld [vmem:[#allocation5 + $0x9f8] sm:$0xff]  ;;  %v952_v54 = vld [vmem:[#allocation5 + $0x608] sm:$0xff]  ;;  %v1001_v28 = vld [vmem:[#allocation5 + $0x790] sm:$0xff] }
 0x267   :  { %1225 = vmatpush1.msra.mxu0 %v1041_v59  ;;  %1162 = vmatpush1.msra.mxu1 %v963_v32  ;;  %v1077_v59 = vld [vmem:[#allocation5 + $0x9f0] sm:$0xff]  ;;  %v1000_v32 = vld [vmem:[#allocation5 + $0x788] sm:$0xff] }
 0x268   :  { %1226 = vmatprep.subr.mxu0 %v1040_v60  ;;  %1163 = vmatprep.subr.mxu1 %v962_v35  ;;  %v951_v60 = vld [vmem:[#allocation5 + $0x600] sm:$0xff] }
 0x269   :  { %1227 = vmatpush1.msra.mxu0 %v1039_v1  ;;  %1164 = vmatpush1.msra.mxu1 %v961_v39  ;;  %v1076_v1 = vld [vmem:[#allocation5 + $0x9e8] sm:$0xff]  ;;  %v999_v35 = vld [vmem:[#allocation5 + $0x780] sm:$0xff]  ;;  %v998_v39 = vld [vmem:[#allocation5 + $0x778] sm:$0xff] }
 0x26a   :  { %1228 = vmatprep.subr.mxu0 %v1038_v63  ;;  %1165 = vmatprep.subr.mxu1 %v960_v24  ;;  %v1075_v63 = vld [vmem:[#allocation5 + $0x9e0] sm:$0xff]  ;;  %v997_v24 = vld [vmem:[#allocation5 + $0x770] sm:$0xff] }
 0x26b   :  { %1229 = vmatpush1.msra.mxu0 %v1037_v5  ;;  %1166 = vmatpush1.msra.mxu1 %v959_v42  ;;  %v1074_v5 = vld [vmem:[#allocation5 + $0x9d8] sm:$0xff]  ;;  %v996_v42 = vld [vmem:[#allocation5 + $0x768] sm:$0xff] }
 0x26c   :  { %1230 = vmatprep.subr.mxu0 %v1036_v2  ;;  %1167 = vmatprep.subr.mxu1 %v958_v44  ;;  %v1073_v2 = vld [vmem:[#allocation5 + $0x9d0] sm:$0xff]  ;;  %v995_v44 = vld [vmem:[#allocation5 + $0x760] sm:$0xff] }
 0x26d   :  { %1231 = vmatpush1.msra.mxu0 %v1035_v6  ;;  %1168 = vmatpush1.msra.mxu1 %v957_v46  ;;  %v1072_v6 = vld [vmem:[#allocation5 + $0x9c8] sm:$0xff]  ;;  %v994_v46 = vld [vmem:[#allocation5 + $0x758] sm:$0xff] }
 0x26e   :  { %1232 = vmatprep.subr.mxu0 %v1034_v8  ;;  %1169 = vmatprep.subr.mxu1 %v956_v34  ;;  %v1071_v8 = vld [vmem:[#allocation5 + $0x9c0] sm:$0xff]  ;;  %v993_v34 = vld [vmem:[#allocation5 + $0x750] sm:$0xff] }
 0x26f   :  { %1233 = vmatpush1.msra.mxu0 %v1033_v10  ;;  %1170 = vmatpush1.msra.mxu1 %v955_v50  ;;  %v1070_v10 = vld [vmem:[#allocation5 + $0x9b8] sm:$0xff]  ;;  %v992_v50 = vld [vmem:[#allocation5 + $0x748] sm:$0xff] }
 0x270   :  { %1234 = vmatprep.subr.mxu0 %v1032_v12  ;;  %1171 = vmatprep.subr.mxu1 %v954_v37  ;;  %v1069_v12 = vld [vmem:[#allocation5 + $0x9b0] sm:$0xff]  ;;  %v991_v37 = vld [vmem:[#allocation5 + $0x740] sm:$0xff] }
 0x271   :  { %1235 = vmatpush1.msra.mxu0 %v1031_v14  ;;  %1172 = vmatpush1.msra.mxu1 %v953_v61  ;;  %v1068_v14 = vld [vmem:[#allocation5 + $0x9a8] sm:$0xff]  ;;  %v990_v61 = vld [vmem:[#allocation5 + $0x738] sm:$0xff] }
 0x272   :  { %1236 = vmatprep.subr.mxu0 %v1030_v16  ;;  %1173 = vmatprep.subr.mxu1 %v952_v54  ;;  %v1067_v16 = vld [vmem:[#allocation5 + $0x9a0] sm:$0xff]  ;;  %v989_v54 = vld [vmem:[#allocation5 + $0x730] sm:$0xff] }
 0x273   :  { %1237 = vmatpush1.msra.mxu0 %v1029_v18  ;;  %1174 = vmatpush1.msra.mxu1 %v951_v60  ;;  %v1066_v18 = vld [vmem:[#allocation5 + $0x998] sm:$0xff]  ;;  %v988_v60 = vld [vmem:[#allocation5 + $0x728] sm:$0xff] }
 0x274   :  { %1238 = vmatprep.subr.mxu0 %v1028_v21  ;;  %1175 = vmatprep.subr.mxu1 %v1014_v4  ;;  %v1065_v21 = vld [vmem:[#allocation5 + $0x990] sm:$0xff]  ;;  %v987_v4 = vld [vmem:[#allocation5 + $0x720] sm:$0xff] }
 0x275   :  { %1239 = vmatpush1.msra.mxu0 %v1027_v25  ;;  %1176 = vmatpush2.msra.mxu1 %v1013_v0  ;;  %v1064_v25 = vld [vmem:[#allocation5 + $0x988] sm:$0xff]  ;;  %v986_v0 = vld [vmem:[#allocation5 + $0x718] sm:$0xff] }
 0x276   :  { %1240 = vmatprep.subr.mxu0 %v1026_v27  ;;  %1177 = vmatprep.subr.mxu1 %v1012_v62  ;;  %v1063_v27 = vld [vmem:[#allocation5 + $0x980] sm:$0xff]  ;;  %v985_v62 = vld [vmem:[#allocation5 + $0x710] sm:$0xff] }
 0x277   :  { %1241 = vmatpush1.msra.mxu0 %v1025_v31  ;;  %1178 = vmatpush2.msra.mxu1 %v1011_v3  ;;  %v1062_v31 = vld [vmem:[#allocation5 + $0x978] sm:$0xff]  ;;  %v983_v3 = vld [vmem:[#allocation5 + $0x700] sm:$0xff] }
 0x278   :  { %1242 = vmatprep.subr.mxu0 %v1024_v33  ;;  %1179 = vmatprep.subr.mxu1 %v1010_v7  ;;  %v1061_v33 = vld [vmem:[#allocation5 + $0x970] sm:$0xff] }
 0x279   :  { %1243 = vmatpush1.msra.mxu0 %v1023_v38  ;;  %1180 = vmatpush2.msra.mxu1 %v1009_v9  ;;  %v1060_v38 = vld [vmem:[#allocation5 + $0x968] sm:$0xff] }
 0x27a   :  { %1244 = vmatprep.subr.mxu0 %v1022_v41  ;;  %1181 = vmatprep.subr.mxu1 %v1008_v11  ;;  %v1059_v41 = vld [vmem:[#allocation5 + $0x960] sm:$0xff] }
 0x27b   :  { %1245 = vmatpush1.msra.mxu0 %v1021_v40  ;;  %1182 = vmatpush2.msra.mxu1 %v1007_v13  ;;  %v1058_v40 = vld [vmem:[#allocation5 + $0x958] sm:$0xff] }
 0x27c   :  { %1246 = vmatprep.subr.mxu0 %v1020_v43  ;;  %1183 = vmatprep.subr.mxu1 %v1006_v15  ;;  %v1057_v43 = vld [vmem:[#allocation5 + $0x950] sm:$0xff] }
 0x27d   :  { %1247 = vmatpush1.msra.mxu0 %v1019_v45  ;;  %1184 = vmatpush2.msra.mxu1 %v1005_v17  ;;  %v1056_v45 = vld [vmem:[#allocation5 + $0x948] sm:$0xff] }
 0x27e   :  { %1248 = vmatprep.subr.mxu0 %v1018_v29  ;;  %1185 = vmatprep.subr.mxu1 %v1004_v20  ;;  %v1055_v29 = vld [vmem:[#allocation5 + $0x940] sm:$0xff] }
 0x27f   :  { %1249 = vmatpush1.msra.mxu0 %v1017_v49  ;;  %1186 = vmatpush2.msra.mxu1 %v1003_v22  ;;  %v1054_v49 = vld [vmem:[#allocation5 + $0x938] sm:$0xff] }
 0x280   :  { %1250 = vmatprep.subr.mxu0 %v1016_v53  ;;  %1187 = vmatprep.subr.mxu1 %v1002_v26  ;;  %v1053_v53 = vld [vmem:[#allocation5 + $0x930] sm:$0xff] }
 0x281   :  { %1251 = vmatpush1.msra.mxu0 %v1015_v57  ;;  %1188 = vmatpush2.msra.mxu1 %v1001_v28  ;;  %v1052_v57 = vld [vmem:[#allocation5 + $0x928] sm:$0xff] }
 0x282   :  { %1252 = vmatprep.subr.mxu0 %v1078_v58  ;;  %1189 = vmatprep.subr.mxu1 %v1000_v32  ;;  %v1051_v58 = vld [vmem:[#allocation5 + $0x920] sm:$0xff] }
 0x283   :  { %1253 = vmatpush2.msra.mxu0 %v1077_v59  ;;  %1190 = vmatpush2.msra.mxu1 %v999_v35  ;;  %v1050_v59 = vld [vmem:[#allocation5 + $0x918] sm:$0xff] }
 0x284   :  { %1254 = vmatprep.subr.mxu0 %v1076_v1  ;;  %1191 = vmatprep.subr.mxu1 %v998_v39  ;;  %v1049_v1 = vld [vmem:[#allocation5 + $0x910] sm:$0xff] }
 0x285   :  { %1255 = vmatpush2.msra.mxu0 %v1075_v63  ;;  %1192 = vmatpush2.msra.mxu1 %v997_v24  ;;  %v1048_v63 = vld [vmem:[#allocation5 + $0x908] sm:$0xff] }
 0x286   :  { %1256 = vmatprep.subr.mxu0 %v1074_v5  ;;  %1193 = vmatprep.subr.mxu1 %v996_v42  ;;  %v1047_v5 = vld [vmem:[#allocation5 + $0x900] sm:$0xff] }
 0x287   :  { %1257 = vmatpush2.msra.mxu0 %v1073_v2  ;;  %1194 = vmatpush2.msra.mxu1 %v995_v44  ;;  %v984_v2 = vld [vmem:[#allocation5 + $0x708] sm:$0xff]  ;;  %v5232_v44 = vsub.s32 0, %v5076_v19 }
 0x288   :  { %1258 = vmatprep.subr.mxu0 %v1072_v6  ;;  %1195 = vmatprep.subr.mxu1 %v994_v46  ;;  %v1110_v6 = vld [vmem:[#allocation5 + $0xaf8] sm:$0xff] }
 0x289   :  { %1259 = vmatpush2.msra.mxu0 %v1071_v8  ;;  %1196 = vmatpush2.msra.mxu1 %v993_v34  ;;  %7104 = vst [vmem:[#allocation19_spill] sm:$0xff] %v5232_v44 }
 0x28a   :  { %1260 = vmatprep.subr.mxu0 %v1070_v10  ;;  %1197 = vmatprep.subr.mxu1 %v992_v50 }
 0x28b   :  { %1261 = vmatpush2.msra.mxu0 %v1069_v12  ;;  %1198 = vmatpush2.msra.mxu1 %v991_v37 }
 0x28c   :  { %1262 = vmatprep.subr.mxu0 %v1068_v14  ;;  %1199 = vmatprep.subr.mxu1 %v990_v61 }
 0x28d   :  { %1263 = vmatpush2.msra.mxu0 %v1067_v16  ;;  %1200 = vmatpush2.msra.mxu1 %v989_v54 }
 0x28e   :  { %1264 = vmatprep.subr.mxu0 %v1066_v18  ;;  %1201 = vmatprep.subr.mxu1 %v988_v60 }
 0x28f   :  { %1265 = vmatpush2.msra.mxu0 %v1065_v21  ;;  %1202 = vmatpush2.msra.mxu1 %v987_v4 }
 0x290   :  { %1266 = vmatprep.subr.mxu0 %v1064_v25  ;;  %1203 = vmatprep.subr.mxu1 %v986_v0 }
 0x291   :  { %1267 = vmatpush2.msra.mxu0 %v1063_v27  ;;  %1204 = vmatpush2.msra.mxu1 %v985_v62 }
 0x292   :  { %1268 = vmatprep.subr.mxu0 %v1062_v31  ;;  %1205 = vmatprep.subr.mxu1 %v984_v2 }
 0x293   :  { %1269 = vmatpush2.msra.mxu0 %v1061_v33  ;;  %1206 = vmatpush2.msra.mxu1 %v983_v3  ;;  %v5020_v33 = vmov 1966171168  }
 0x294   :  { %1270 = vmatprep.subr.mxu0 %v1060_v38  ;;  %1297 = vmatprep.subr.mxu1 %v1110_v6  ;;  %v860_v35 = vunpack.c.l.s4 %v5020_v33  ;;  %v1104_v33 = vld [vmem:[#allocation5 + $0xac8] sm:$0xff] }
 0x295   :  { %1271 = vmatpush2.msra.mxu0 %v1059_v41 }
 0x296   :  { %1272 = vmatprep.subr.mxu0 %v1058_v40  ;;  %v861_v38 = vunpack.c.0.s8 %v860_v35  ;;  %v5298_v35 = vld [vmem:[#allocation10 + $0xe0] sm:$0xff] }
 0x297   :  { %1273 = vmatpush2.msra.mxu0 %v1057_v43  ;;  %v851_v43 = vld [vmem:[#allocation7] ss:$8 sm:$0x3] }
 0x298   :  { %1274 = vmatprep.subr.mxu0 %v1056_v45  ;;  %v5228_v41 = vsub.s32 %v861_v38, %v5076_v19  ;;  %v5235_v45 = vsub.s32 1, %v5076_v19 }
 0x299   :  { %1275 = vmatpush2.msra.mxu0 %v1055_v29  ;;  %v890_v29 = vld [vmem:[#allocation8] ss:$8 sm:$0x3] }
 0x29a   :  { %1276 = vmatprep.subr.mxu0 %v1054_v49  ;;  %7103 = vst [vmem:[#allocation18_spill] sm:$0xff] %v5228_v41  ;;  %7105 = vst [vmem:[#allocation20_spill] sm:$0xff] %v5235_v45  ;;  %v899_v37 = vrot.slane %v890_v29, %v5235_v45 }
 0x29b   :  { %1277 = vmatpush2.msra.mxu0 %v1053_v53  ;;  %v895_v53 = vrot.slane %v890_v29, %v5232_v44  ;;  %v1099_v29 = vld [vmem:[#allocation5 + $0xaa0] sm:$0xff] }
 0x29c   :  { %1278 = vmatprep.subr.mxu0 %v1052_v57 }
 0x29d   :  { %1279 = vmatpush2.msra.mxu0 %v1051_v58 }
 0x29e   :  { %1280 = vmatprep.subr.mxu0 %v1050_v59 }
 0x29f   :  { %1281 = vmatpush2.msra.mxu0 %v1049_v1 }
 0x2a0   :  { %1282 = vmatprep.subr.mxu0 %v1048_v63 }
 0x2a1   :  { %1283 = vmatpush2.msra.mxu0 %v1047_v5 }
 0x2a2   :  { %1374 = vmatprep.subr.mxu0 %v5201_v56 }
 0x322   :  { %v824_v7 = vpop.f32.mrf.mxu0 }
 0x324   :  { %v826_v8 = vpop.f32.mrf.mxu0 }
 0x326   :  { %v830_v9 = vpop.f32.mrf.mxu0 }
 0x327   :  { %v835_v10 = vadd.f32 %v830_v9, %v824_v7 }
 0x328   :  { %v832_v11 = vpop.f32.mrf.mxu0 }
 0x329   :  { %v836_v12 = vrot.slane %v835_v10, 4  ;;  %v842_v13 = vadd.f32 %v832_v11, %v826_v8 }
 0x32b   :  { %v837_v14 = vadd.f32 %v836_v12, %v835_v10  ;;  %v843_v15 = vrot.slane %v842_v13, 4 }
 0x32d   :  { %v838_v16 = vrot.slane %v837_v14, 2  ;;  %v844_v17 = vadd.f32 %v843_v15, %v842_v13  ;;  %v5262_v15 = vld [vmem:[#allocation10 + $0xf0] sm:$0xff] }
 0x32f   :  { %v839_v18 = vadd.f32 %v838_v16, %v837_v14  ;;  %v845_v20 = vrot.slane %v844_v17, 2  ;;  %v1109_v14 = vld [vmem:[#allocation5 + $0xaf0] sm:$0xff] }
 0x331   :  { %v840_v21 = vrot.slane %v839_v18, 1  ;;  %v846_v56 = vadd.f32 %v845_v20, %v844_v17  ;;  %v1108_v17 = vld [vmem:[#allocation5 + $0xae8] sm:$0xff] }
 0x333   :  { %v841_v22 = vadd.f32 %v840_v21, %v839_v18  ;;  %v847_v25 = vrot.slane %v846_v56, 1 }
 0x335   :  { %v849_v26 = vmul.f32 0.0078125, %v841_v22  ;;  %v848_v27 = vadd.f32 %v847_v25, %v846_v56  ;;  %v1107_v56 = vld [vmem:[#allocation5 + $0xae0] sm:$0xff]  ;;  %v1125_v25 = vld [vmem:[#allocation5 + $0xb70] sm:$0xff]  ;;  %v1124_v22 = vld [vmem:[#allocation5 + $0xb68] sm:$0xff] }
 0x337   :  { %v852_v28 = vadd.f32 1e-05, %v849_v26  ;;  %v850_v31 = vmul.f32 0.0078125, %v848_v27  ;;  %v1106_v26 = vld [vmem:[#allocation5 + $0xad8] sm:$0xff] }
 0x338   :  { %v1126_v27 = vld [vmem:[#allocation5 + $0xb78] sm:$0xff] }
 0x339   :  { %v853_v32 = vadd.f32 1e-05, %v850_v31  ;;  %4537 = vrsqrt.f32 %v852_v28  ;;  %v1105_v28 = vld [vmem:[#allocation5 + $0xad0] sm:$0xff]  ;;  %v5291_v31 = vld [vmem:[#allocation10 + $0xe8] sm:$0xff] }
 0x33b   :  { %4539 = vrsqrt.f32 %v853_v32 }
 0x346   :  { %v4538_v39 = vpop.eup %4537 }
 0x348   :  { %v4540_v24 = vpop.eup %4539 }
 0x349   :  { %v858_v40 = vcombine.low %v4538_v39, %v4540_v24  ;;  %v1103_v39 = vld [vmem:[#allocation5 + $0xac0] sm:$0xff]  ;;  %v1102_v24 = vld [vmem:[#allocation5 + $0xab8] sm:$0xff] }
 0x34b   :  { %v865_v42 = vrot.slane %v858_v40, %v5228_v41  ;;  %v1101_v40 = vld [vmem:[#allocation5 + $0xab0] sm:$0xff] }
 0x34d   :  { %v872_v46 = vrot.slane %v865_v42, %v5228_v41  ;;  %v5303_v42 = vld [vmem:[#allocation10 + $0xd8] sm:$0xff]  ;;  %v1119_v41 = vld [vmem:[#allocation5 + $0xb40] sm:$0xff] }
 0x34f   :  { %v874_v34 = vmul.f32 %v872_v46, %v851_v43  ;;  %v1100_v43 = vld [vmem:[#allocation5 + $0xaa8] sm:$0xff]  ;;  %v5306_v46 = vld [vmem:[#allocation10 + $0xd0] sm:$0xff] }
 0x351   :  { %v879_v49 = vrot.slane %v874_v34, %v5232_v44  ;;  %v883_v50 = vrot.slane %v874_v34, %v5235_v45  ;;  %v5309_v34 = vld [vmem:[#allocation10 + $0xc8] sm:$0xff]  ;;  %v1121_v45 = vld [vmem:[#allocation5 + $0xb50] sm:$0xff] }
 0x352   :  { %v1120_v44 = vld [vmem:[#allocation5 + $0xb48] sm:$0xff] }
 0x353   :  { %v886_v57 = vmul.f32 %v879_v49, %v5210_v47  ;;  %v887_v61 = vmul.f32 %v883_v50, %v5212_v48  ;;  %v888_v58 = vmul.f32 %v879_v49, %v5220_v52  ;;  %v889_v19 = vmul.f32 %v883_v50, %v5214_v30  ;;  %v1098_v49 = vld [vmem:[#allocation5 + $0xa98] sm:$0xff]  ;;  %v5312_v50 = vld [vmem:[#allocation10 + $0xc0] sm:$0xff] }
 0x355   :  { %v902_v54 = vadd.f32 %v895_v53, %v886_v57  ;;  %v903_v59 = vadd.f32 %v899_v37, %v887_v61  ;;  %v904_v60 = vadd.f32 %v895_v53, %v888_v58  ;;  %v905_v1 = vadd.f32 %v899_v37, %v889_v19  ;;  %v1097_v53 = vld [vmem:[#allocation5 + $0xa90] sm:$0xff]  ;;  %v5315_v37 = vld [vmem:[#allocation10 + $0xb8] sm:$0xff]  ;;  %v1096_v57 = vld [vmem:[#allocation5 + $0xa88] sm:$0xff] }
 0x356   :  { %v5318_v61 = vld [vmem:[#allocation10 + $0xb0] sm:$0xff]  ;;  %v1095_v58 = vld [vmem:[#allocation5 + $0xa80] sm:$0xff]  ;;  %v5321_v19 = vld [vmem:[#allocation10 + $0xa8] sm:$0xff] }
 0x357   :  { %v906_v4 = vmax.f32 %v902_v54, 0.0  ;;  %v907_v63 = vmax.f32 %v903_v59, 0.0  ;;  %v908_v0 = vmax.f32 %v904_v60, 0.0  ;;  %v909_v5 = vmax.f32 %v905_v1, 0.0  ;;  %v1094_v54 = vld [vmem:[#allocation5 + $0xa78] sm:$0xff]  ;;  %v5324_v59 = vld [vmem:[#allocation10 + $0xa0] sm:$0xff] }
 0x358   :  { %v1093_v60 = vld [vmem:[#allocation5 + $0xa70] sm:$0xff]  ;;  %v5327_v1 = vld [vmem:[#allocation10 + $0x98] sm:$0xff] }
 0x359   :  { %1284 = vmatprep.mubr.f32.mxu0 %v907_v63  ;;  %v913_v62 = vrot.slane %v909_v5, 7  ;;  %v919_v2 = vrot.slane %v907_v63, 7  ;;  %v931_v3 = vrot.slane %v907_v63, 1  ;;  %v932_v6 = vrot.slane %v909_v5, 1  ;;  %v5330_v63 = vld [vmem:[#allocation10 + $0x90] sm:$0xff] }
 0x35a   :  { %1285 = vmatmul.mubr.f32.vlgmr.msra.gmra.mxu0 %v906_v4  ;;  %v912_v47 = vrot.slane %v908_v0, 7  ;;  %v918_v48 = vrot.slane %v906_v4, 7  ;;  %v928_v7 = vrot.slane %v906_v4, 1  ;;  %v929_v52 = vrot.slane %v908_v0, 1  ;;  %v1092_v4 = vld [vmem:[#allocation5 + $0xa68] sm:$0xff] }
 0x35b   :  { %1290 = vmatprep.mubr.f32.mxu0 %v909_v5  ;;  %v927_v30 = vsel %vm192_vm0, %v913_v62, %v919_v2  ;;  %v933_v8 = vsel %vm203_vm1, %v931_v3, %v932_v6  ;;  %v5249_v9 = vsel %vm192_vm0, %v919_v2, %v913_v62  ;;  %v5252_v10 = vsel %vm203_vm1, %v932_v6, %v931_v3  ;;  %v5333_v5 = vld [vmem:[#allocation10 + $0x88] sm:$0xff]  ;;  %v1090_v62 = vld [vmem:[#allocation5 + $0xa58] sm:$0xff]  ;;  %v5336_v2 = vld [vmem:[#allocation10 + $0x80] sm:$0xff] }
 0x35c   :  { %v943_v11 = vsel %vm5151_vm4, %v933_v8, %v927_v30  ;;  %v5257_v12 = vsel %vm192_vm0, %v912_v47, %v918_v48  ;;  %v5260_v13 = vsel %vm203_vm1, %v928_v7, %v929_v52  ;;  %1375 = vmatpush1.msra.mxu0 %v5262_v15  ;;  %v5270_v18 = vsel %vm192_vm0, %v918_v48, %v912_v47  ;;  %v1089_v3 = vld [vmem:[#allocation5 + $0xa50] sm:$0xff]  ;;  %v5339_v6 = vld [vmem:[#allocation10 + $0x78] sm:$0xff]  ;;  %v1088_v47 = vld [vmem:[#allocation5 + $0xa48] sm:$0xff] }
 0x35d   :  { %1207 = vmatprep.mubr.f32.mxu1 %v943_v11  ;;  %v942_v16 = vsel %vm5151_vm4, %v5260_v13, %v5257_v12  ;;  %v5273_v20 = vsel %vm203_vm1, %v929_v52, %v928_v7  ;;  %v945_v21 = vsel %vm5169_vm5, %v5252_v10, %v5249_v9  ;;  %1376 = vmatprep.subr.mxu0 %v5291_v31  ;;  %v5342_v48 = vld [vmem:[#allocation10 + $0x70] sm:$0xff]  ;;  %v1087_v7 = vld [vmem:[#allocation5 + $0xa40] sm:$0xff]  ;;  %v5345_v52 = vld [vmem:[#allocation10 + $0x68] sm:$0xff] }
 0x35e   :  { %1208 = vmatmul.mubr.f32.vlgmr.msra.gmra.mxu1 %v942_v16  ;;  %1291 = vmatmul.mubr.f32.gmra.mxu0 %v908_v0  ;;  %v944_v32 = vsel %vm5169_vm5, %v5273_v20, %v5270_v18  ;;  %v947_v38 = vsel %vm5101_vm2, %v927_v30, %v933_v8  ;;  %v1091_v0 = vld [vmem:[#allocation5 + $0xa60] sm:$0xff]  ;;  %v1086_v30 = vld [vmem:[#allocation5 + $0xa38] sm:$0xff]  ;;  %v1085_v11 = vld [vmem:[#allocation5 + $0xa30] sm:$0xff] }
 0x35f   :  { %1298 = vmatpush1.msra.mxu1 %v1109_v14  ;;  %1213 = vmatprep.mubr.f32.mxu1 %v945_v21  ;;  %v5348_v8 = vld [vmem:[#allocation10 + $0x60] sm:$0xff]  ;;  %v5351_v14 = vld [vmem:[#allocation10 + $0x58] sm:$0xff]  ;;  %v1084_v16 = vld [vmem:[#allocation5 + $0xa28] sm:$0xff] }
 0x360   :  { %1299 = vmatprep.subr.mxu1 %v1108_v17  ;;  %1377 = vmatpush1.msra.mxu0 %v5298_v35  ;;  %v5354_v17 = vld [vmem:[#allocation10 + $0x50] sm:$0xff]  ;;  %v1083_v21 = vld [vmem:[#allocation5 + $0xa20] sm:$0xff] }
 0x361   :  { %1300 = vmatpush1.msra.mxu1 %v1107_v56  ;;  %1378 = vmatprep.subr.mxu0 %v5303_v42  ;;  %v5357_v56 = vld [vmem:[#allocation10 + $0x48] sm:$0xff] }
 0x362   :  { %1301 = vmatprep.subr.mxu1 %v1106_v26  ;;  %1214 = vmatmul.mubr.f32.gmra.mxu1 %v944_v32  ;;  %v1082_v26 = vld [vmem:[#allocation5 + $0xa18] sm:$0xff]  ;;  %v1081_v32 = vld [vmem:[#allocation5 + $0xa10] sm:$0xff] }
 0x363   :  { %1302 = vmatpush1.msra.mxu1 %v1105_v28  ;;  %1361 = vmatprep.mubr.f32.mxu1 %v947_v38  ;;  %v5360_v28 = vld [vmem:[#allocation10 + $0x40] sm:$0xff]  ;;  %v1080_v38 = vld [vmem:[#allocation5 + $0xa08] sm:$0xff] }
 0x364   :  { %1303 = vmatprep.subr.mxu1 %v1104_v33  ;;  %1379 = vmatpush1.msra.mxu0 %v5306_v46  ;;  %v5363_v33 = vld [vmem:[#allocation10 + $0x38] sm:$0xff] }
 0x365   :  { %1304 = vmatpush1.msra.mxu1 %v1103_v39  ;;  %1380 = vmatprep.subr.mxu0 %v5309_v34  ;;  %v5366_v39 = vld [vmem:[#allocation10 + $0x30] sm:$0xff] }
 0x366   :  { %1305 = vmatprep.subr.mxu1 %v1102_v24  ;;  %1381 = vmatpush1.msra.mxu0 %v5312_v50  ;;  %v1079_v24 = vld [vmem:[#allocation5 + $0xa00] sm:$0xff] }
 0x367   :  { %1306 = vmatpush1.msra.mxu1 %v1101_v40  ;;  %1382 = vmatprep.subr.mxu0 %v5315_v37  ;;  %v5369_v40 = vld [vmem:[#allocation10 + $0x28] sm:$0xff] }
 0x368   :  { %1307 = vmatprep.subr.mxu1 %v1100_v43  ;;  %1383 = vmatpush1.msra.mxu0 %v5318_v61  ;;  %v1142_v43 = vld [vmem:[#allocation5 + $0xbf8] sm:$0xff] }
 0x369   :  { %1308 = vmatpush1.msra.mxu1 %v1099_v29  ;;  %1384 = vmatprep.subr.mxu0 %v5321_v19  ;;  %v5372_v29 = vld [vmem:[#allocation10 + $0x20] sm:$0xff] }
 0x36a   :  { %1309 = vmatprep.subr.mxu1 %v1098_v49  ;;  %1385 = vmatpush1.msra.mxu0 %v5324_v59  ;;  %v1141_v49 = vld [vmem:[#allocation5 + $0xbf0] sm:$0xff] }
 0x36b   :  { %1310 = vmatpush1.msra.mxu1 %v1097_v53  ;;  %1386 = vmatprep.subr.mxu0 %v5327_v1  ;;  %v5375_v53 = vld [vmem:[#allocation10 + $0x18] sm:$0xff] }
 0x36c   :  { %1311 = vmatprep.subr.mxu1 %v1096_v57  ;;  %1387 = vmatpush1.msra.mxu0 %v5330_v63  ;;  %v1140_v57 = vld [vmem:[#allocation5 + $0xbe8] sm:$0xff] }
 0x36d   :  { %1312 = vmatpush1.msra.mxu1 %v1095_v58  ;;  %1388 = vmatprep.subr.mxu0 %v5333_v5  ;;  %v5378_v58 = vld [vmem:[#allocation10 + $0x10] sm:$0xff] }
 0x36e   :  { %1313 = vmatprep.subr.mxu1 %v1094_v54  ;;  %1389 = vmatpush1.msra.mxu0 %v5336_v2  ;;  %v1139_v54 = vld [vmem:[#allocation5 + $0xbe0] sm:$0xff] }
 0x36f   :  { %1314 = vmatpush1.msra.mxu1 %v1093_v60  ;;  %1390 = vmatprep.subr.mxu0 %v5339_v6  ;;  %v5381_v60 = vld [vmem:[#allocation10 + $0x8] sm:$0xff] }
 0x370   :  { %1315 = vmatprep.subr.mxu1 %v1092_v4  ;;  %1391 = vmatpush1.msra.mxu0 %v5342_v48  ;;  %v1138_v4 = vld [vmem:[#allocation5 + $0xbd8] sm:$0xff] }
 0x371   :  { %1316 = vmatpush1.msra.mxu1 %v1091_v0  ;;  %1392 = vmatprep.subr.mxu0 %v5345_v52  ;;  %v5384_v0 = vld [vmem:[#allocation10] sm:$0xff] }
 0x372   :  { %1317 = vmatprep.subr.mxu1 %v1090_v62  ;;  %1393 = vmatpush1.msra.mxu0 %v5348_v8  ;;  %v1137_v62 = vld [vmem:[#allocation5 + $0xbd0] sm:$0xff] }
 0x373   :  { %1318 = vmatpush1.msra.mxu1 %v1089_v3  ;;  %1394 = vmatprep.subr.mxu0 %v5351_v14  ;;  %v5387_v3 = vld [vmem:[#allocation10 + $0x1f8] sm:$0xff] }
 0x374   :  { %1319 = vmatprep.subr.mxu1 %v1088_v47  ;;  %1395 = vmatpush1.msra.mxu0 %v5354_v17  ;;  %v1136_v47 = vld [vmem:[#allocation5 + $0xbc8] sm:$0xff] }
 0x375   :  { %1320 = vmatpush1.msra.mxu1 %v1087_v7  ;;  %1396 = vmatprep.subr.mxu0 %v5357_v56  ;;  %v5390_v7 = vld [vmem:[#allocation10 + $0x1f0] sm:$0xff] }
 0x376   :  { %1321 = vmatprep.subr.mxu1 %v1086_v30  ;;  %1397 = vmatpush1.msra.mxu0 %v5360_v28  ;;  %v1135_v30 = vld [vmem:[#allocation5 + $0xbc0] sm:$0xff] }
 0x377   :  { %1322 = vmatpush1.msra.mxu1 %v1085_v11  ;;  %1398 = vmatprep.subr.mxu0 %v5363_v33  ;;  %v5393_v11 = vld [vmem:[#allocation10 + $0x1e8] sm:$0xff] }
 0x378   :  { %1323 = vmatprep.subr.mxu1 %v1084_v16  ;;  %1399 = vmatpush1.msra.mxu0 %v5366_v39  ;;  %v1134_v16 = vld [vmem:[#allocation5 + $0xbb8] sm:$0xff] }
 0x379   :  { %1324 = vmatpush1.msra.mxu1 %v1083_v21  ;;  %1400 = vmatprep.subr.mxu0 %v5369_v40  ;;  %v5396_v21 = vld [vmem:[#allocation10 + $0x1e0] sm:$0xff] }
 0x37a   :  { %1325 = vmatprep.subr.mxu1 %v1082_v26  ;;  %1401 = vmatpush1.msra.mxu0 %v5372_v29  ;;  %v1133_v26 = vld [vmem:[#allocation5 + $0xbb0] sm:$0xff] }
 0x37b   :  { %1326 = vmatpush1.msra.mxu1 %v1081_v32  ;;  %1402 = vmatprep.subr.mxu0 %v5375_v53  ;;  %v5399_v32 = vld [vmem:[#allocation10 + $0x1d8] sm:$0xff] }
 0x37c   :  { %1327 = vmatprep.subr.mxu1 %v1080_v38  ;;  %1403 = vmatpush1.msra.mxu0 %v5378_v58  ;;  %v1132_v38 = vld [vmem:[#allocation5 + $0xba8] sm:$0xff] }
 0x37d   :  { %1328 = vmatpush1.msra.mxu1 %v1079_v24  ;;  %1404 = vmatprep.subr.mxu0 %v5381_v60  ;;  %v5402_v24 = vld [vmem:[#allocation10 + $0x1d0] sm:$0xff] }
 0x37e   :  { %1329 = vmatprep.subr.mxu1 %v1142_v43  ;;  %1405 = vmatpush1.msra.mxu0 %v5384_v0  ;;  %v1131_v43 = vld [vmem:[#allocation5 + $0xba0] sm:$0xff] }
 0x37f   :  { %1330 = vmatpush2.msra.mxu1 %v1141_v49  ;;  %1406 = vmatprep.subr.mxu0 %v5387_v3  ;;  %v5405_v49 = vld [vmem:[#allocation10 + $0x1c8] sm:$0xff] }
 0x380   :  { %1331 = vmatprep.subr.mxu1 %v1140_v57  ;;  %1407 = vmatpush2.msra.mxu0 %v5390_v7  ;;  %v1130_v57 = vld [vmem:[#allocation5 + $0xb98] sm:$0xff] }
 0x381   :  { %1332 = vmatpush2.msra.mxu1 %v1139_v54  ;;  %1408 = vmatprep.subr.mxu0 %v5393_v11  ;;  %v5408_v54 = vld [vmem:[#allocation10 + $0x1c0] sm:$0xff] }
 0x382   :  { %1333 = vmatprep.subr.mxu1 %v1138_v4  ;;  %1409 = vmatpush2.msra.mxu0 %v5396_v21  ;;  %v1129_v4 = vld [vmem:[#allocation5 + $0xb90] sm:$0xff] }
 0x383   :  { %1334 = vmatpush2.msra.mxu1 %v1137_v62  ;;  %1410 = vmatprep.subr.mxu0 %v5399_v32  ;;  %v5411_v62 = vld [vmem:[#allocation10 + $0x1b8] sm:$0xff] }
 0x384   :  { %1335 = vmatprep.subr.mxu1 %v1136_v47  ;;  %1411 = vmatpush2.msra.mxu0 %v5402_v24  ;;  %v1128_v47 = vld [vmem:[#allocation5 + $0xb88] sm:$0xff] }
 0x385   :  { %1336 = vmatpush2.msra.mxu1 %v1135_v30  ;;  %1412 = vmatprep.subr.mxu0 %v5405_v49  ;;  %v5414_v30 = vld [vmem:[#allocation10 + $0x1b0] sm:$0xff] }
 0x386   :  { %1337 = vmatprep.subr.mxu1 %v1134_v16  ;;  %1413 = vmatpush2.msra.mxu0 %v5408_v54  ;;  %v1127_v16 = vld [vmem:[#allocation5 + $0xb80] sm:$0xff] }
 0x387   :  { %1338 = vmatpush2.msra.mxu1 %v1133_v26  ;;  %1414 = vmatprep.subr.mxu0 %v5411_v62  ;;  %v5417_v26 = vld [vmem:[#allocation10 + $0x1a8] sm:$0xff] }
 0x388   :  { %1339 = vmatprep.subr.mxu1 %v1132_v38  ;;  %1415 = vmatpush2.msra.mxu0 %v5414_v30  ;;  %v5420_v38 = vld [vmem:[#allocation10 + $0x1a0] sm:$0xff] }
 0x389   :  { %1340 = vmatpush2.msra.mxu1 %v1131_v43  ;;  %1416 = vmatprep.subr.mxu0 %v5417_v26  ;;  %v5423_v43 = vld [vmem:[#allocation10 + $0x198] sm:$0xff] }
 0x38a   :  { %1341 = vmatprep.subr.mxu1 %v1130_v57  ;;  %1417 = vmatpush2.msra.mxu0 %v5420_v38  ;;  %v5426_v57 = vld [vmem:[#allocation10 + $0x190] sm:$0xff] }
 0x38b   :  { %1342 = vmatpush2.msra.mxu1 %v1129_v4  ;;  %1418 = vmatprep.subr.mxu0 %v5423_v43  ;;  %v5429_v4 = vld [vmem:[#allocation10 + $0x188] sm:$0xff] }
 0x38c   :  { %1343 = vmatprep.subr.mxu1 %v1128_v47  ;;  %1419 = vmatpush2.msra.mxu0 %v5426_v57  ;;  %v5432_v47 = vld [vmem:[#allocation10 + $0x180] sm:$0xff] }
 0x38d   :  { %1344 = vmatpush2.msra.mxu1 %v1127_v16  ;;  %1420 = vmatprep.subr.mxu0 %v5429_v4  ;;  %7106 = vst [vmem:[#allocation21_spill] sm:$0xff] %v5432_v47  ;;  %v5435_v16 = vld [vmem:[#allocation10 + $0x178] sm:$0xff] }
 0x38e   :  { %1345 = vmatprep.subr.mxu1 %v1126_v27  ;;  %1421 = vmatpush2.msra.mxu0 %v5432_v47  ;;  %7107 = vst [vmem:[#allocation22_spill] sm:$0xff] %v5435_v16  ;;  %v5438_v27 = vld [vmem:[#allocation10 + $0x170] sm:$0xff]  ;;  %v1118_v47 = vld [vmem:[#allocation5 + $0xb38] sm:$0xff] }
 0x38f   :  { %1346 = vmatpush2.msra.mxu1 %v1125_v25  ;;  %1422 = vmatprep.subr.mxu0 %v5435_v16  ;;  %7108 = vst [vmem:[#allocation23_spill] sm:$0xff] %v5438_v27  ;;  %v5441_v25 = vld [vmem:[#allocation10 + $0x168] sm:$0xff]  ;;  %v1117_v16 = vld [vmem:[#allocation5 + $0xb30] sm:$0xff] }
 0x390   :  { %1347 = vmatprep.subr.mxu1 %v1124_v22  ;;  %1423 = vmatpush2.msra.mxu0 %v5438_v27  ;;  %7109 = vst [vmem:[#allocation24_spill] sm:$0xff] %v5441_v25  ;;  %v5444_v22 = vld [vmem:[#allocation10 + $0x160] sm:$0xff]  ;;  %v1116_v27 = vld [vmem:[#allocation5 + $0xb28] sm:$0xff] }
 0x391   :  { %1348 = vmatpush2.msra.mxu1 %v1123_v36  ;;  %1424 = vmatprep.subr.mxu0 %v5441_v25  ;;  %7110 = vst [vmem:[#allocation25_spill] sm:$0xff] %v5444_v22  ;;  %v5447_v36 = vld [vmem:[#allocation10 + $0x158] sm:$0xff]  ;;  %v1115_v25 = vld [vmem:[#allocation5 + $0xb20] sm:$0xff] }
 0x392   :  { %1349 = vmatprep.subr.mxu1 %v1122_v23  ;;  %1425 = vmatpush2.msra.mxu0 %v5444_v22  ;;  %7111 = vst [vmem:[#allocation26_spill] sm:$0xff] %v5447_v36  ;;  %v5450_v23 = vld [vmem:[#allocation10 + $0x150] sm:$0xff]  ;;  %v1114_v22 = vld [vmem:[#allocation5 + $0xb18] sm:$0xff] }
 0x393   :  { %1350 = vmatpush2.msra.mxu1 %v1121_v45  ;;  %1426 = vmatprep.subr.mxu0 %v5447_v36  ;;  %7112 = vst [vmem:[#allocation27_spill] sm:$0xff] %v5450_v23  ;;  %v5453_v45 = vld [vmem:[#allocation10 + $0x148] sm:$0xff]  ;;  %v1113_v36 = vld [vmem:[#allocation5 + $0xb10] sm:$0xff] }
 0x394   :  { %1351 = vmatprep.subr.mxu1 %v1120_v44  ;;  %1427 = vmatpush2.msra.mxu0 %v5450_v23  ;;  %7113 = vst [vmem:[#allocation28_spill] sm:$0xff] %v5453_v45  ;;  %v5456_v44 = vld [vmem:[#allocation10 + $0x140] sm:$0xff]  ;;  %v1112_v23 = vld [vmem:[#allocation5 + $0xb08] sm:$0xff] }
 0x395   :  { %1352 = vmatpush2.msra.mxu1 %v1119_v41  ;;  %1428 = vmatprep.subr.mxu0 %v5453_v45  ;;  %7114 = vst [vmem:[#allocation29_spill] sm:$0xff] %v5456_v44  ;;  %v5459_v41 = vld [vmem:[#allocation10 + $0x138] sm:$0xff]  ;;  %v1111_v45 = vld [vmem:[#allocation5 + $0xb00] sm:$0xff] }
 0x396   :  { %1353 = vmatprep.subr.mxu1 %v1118_v47  ;;  %1429 = vmatpush2.msra.mxu0 %v5456_v44  ;;  %v5462_v47 = vld [vmem:[#allocation10 + $0x130] sm:$0xff]  ;;  %v5468_v44 = vld [vmem:[#allocation10 + $0x120] sm:$0xff] }
 0x397   :  { %1354 = vmatpush2.msra.mxu1 %v1117_v16  ;;  %1430 = vmatprep.subr.mxu0 %v5459_v41  ;;  %v5465_v16 = vld [vmem:[#allocation10 + $0x128] sm:$0xff] }
 0x398   :  { %1355 = vmatprep.subr.mxu1 %v1116_v27  ;;  %1431 = vmatpush2.msra.mxu0 %v5462_v47  ;;  %v5471_v27 = vld [vmem:[#allocation10 + $0x118] sm:$0xff] }
 0x399   :  { %1356 = vmatpush2.msra.mxu1 %v1115_v25  ;;  %1432 = vmatprep.subr.mxu0 %v5465_v16  ;;  %v5474_v25 = vld [vmem:[#allocation10 + $0x110] sm:$0xff] }
 0x39a   :  { %1357 = vmatprep.subr.mxu1 %v1114_v22  ;;  %1433 = vmatpush2.msra.mxu0 %v5468_v44  ;;  %7115 = vst [vmem:[#allocation30_spill] sm:$0xff] %v5474_v25  ;;  %v7116_v22 = vsel %vm5101_vm2, %v5257_v12, %v5260_v13  ;;  %v7118_v12 = vsel %vm5114_vm3, %v5270_v18, %v5273_v20  ;;  %v7121_v13 = vld [vmem:[#allocation23_spill] sm:$0xff]  ;;  %v7123_v18 = vld [vmem:[#allocation25_spill] sm:$0xff]  ;;  %v7124_v20 = vld [vmem:[#allocation26_spill] sm:$0xff] }
 0x39b   :  { %1358 = vmatpush2.msra.mxu1 %v1113_v36  ;;  %1434 = vmatprep.subr.mxu0 %v5471_v27  ;;  %v5482_v36 = vld [vmem:[#allocation10 + $0x108] sm:$0xff] }
 0x39c   :  { %1359 = vmatprep.subr.mxu1 %v1112_v23  ;;  %1435 = vmatpush2.msra.mxu0 %v5474_v25  ;;  %v7117_v23 = vsel %vm5114_vm3, %v5249_v9, %v5252_v10  ;;  %v5493_v25 = vld [vmem:[#allocation10 + $0xf8] sm:$0xff]  ;;  %v7119_v9 = vld [vmem:[#allocation21_spill] sm:$0xff]  ;;  %v7120_v10 = vld [vmem:[#allocation22_spill] sm:$0xff] }
 0x39d   :  { %1360 = vmatpush2.msra.mxu1 %v1111_v45  ;;  %1436 = vmatprep.subr.mxu0 %v5482_v36  ;;  %v5490_v45 = vld [vmem:[#allocation10 + $0x100] sm:$0xff] }
 0x39e   :  { %1362 = vmatmul.mubr.f32.vlgmr.msra.gmra.mxu1 %v7116_v22  ;;  %1437 = vmatpush2.msra.mxu0 %v5490_v45 }
 0x39f   :  { %1367 = vmatprep.mubr.f32.mxu1 %v7117_v23  ;;  %1475 = vmatprep.subr.mxu1 %v5493_v25 }
 0x3a0   :  { %1476 = vmatpush1.msra.mxu1 %v5262_v15  ;;  %v7122_v15 = vld [vmem:[#allocation24_spill] sm:$0xff] }
 0x3a1   :  { %1477 = vmatprep.subr.mxu1 %v5291_v31  ;;  %v7125_v31 = vld [vmem:[#allocation27_spill] sm:$0xff] }
 0x3a2   :  { %1368 = vmatmul.mubr.f32.gmra.mxu1 %v7118_v12 }
 0x3a3   :  { %1478 = vmatpush1.msra.mxu1 %v5298_v35  ;;  %v7126_v35 = vld [vmem:[#allocation28_spill] sm:$0xff] }
 0x3a4   :  { %1479 = vmatprep.subr.mxu1 %v5303_v42  ;;  %v7127_v42 = vld [vmem:[#allocation29_spill] sm:$0xff] }
 0x3a5   :  { %1480 = vmatpush1.msra.mxu1 %v5306_v46  ;;  %v7128_v46 = vld [vmem:[#allocation30_spill] sm:$0xff] }
 0x3a6   :  { %1481 = vmatprep.subr.mxu1 %v5309_v34 }
 0x3a7   :  { %1482 = vmatpush1.msra.mxu1 %v5312_v50 }
 0x3a8   :  { %1483 = vmatprep.subr.mxu1 %v5315_v37 }
 0x3a9   :  { %1484 = vmatpush1.msra.mxu1 %v5318_v61 }
 0x3aa   :  { %1485 = vmatprep.subr.mxu1 %v5321_v19 }
 0x3ab   :  { %1486 = vmatpush1.msra.mxu1 %v5324_v59 }
 0x3ac   :  { %1487 = vmatprep.subr.mxu1 %v5327_v1 }
 0x3ad   :  { %1488 = vmatpush1.msra.mxu1 %v5330_v63 }
 0x3ae   :  { %1489 = vmatprep.subr.mxu1 %v5333_v5 }
 0x3af   :  { %1490 = vmatpush1.msra.mxu1 %v5336_v2 }
 0x3b0   :  { %1491 = vmatprep.subr.mxu1 %v5339_v6 }
 0x3b1   :  { %1492 = vmatpush1.msra.mxu1 %v5342_v48 }
 0x3b2   :  { %1493 = vmatprep.subr.mxu1 %v5345_v52 }
 0x3b3   :  { %1494 = vmatpush1.msra.mxu1 %v5348_v8 }
 0x3b4   :  { %1495 = vmatprep.subr.mxu1 %v5351_v14 }
 0x3b5   :  { %1496 = vmatpush1.msra.mxu1 %v5354_v17 }
 0x3b6   :  { %1497 = vmatprep.subr.mxu1 %v5357_v56 }
 0x3b7   :  { %1498 = vmatpush1.msra.mxu1 %v5360_v28 }
 0x3b8   :  { %1499 = vmatprep.subr.mxu1 %v5363_v33 }
 0x3b9   :  { %1500 = vmatpush1.msra.mxu1 %v5366_v39 }
 0x3ba   :  { %1501 = vmatprep.subr.mxu1 %v5369_v40  ;;  %v1765_v40 = vld [vmem:[#allocation5 + $0xef8] sm:$0xff] }
 0x3bb   :  { %1502 = vmatpush1.msra.mxu1 %v5372_v29  ;;  %v1701_v29 = vld [vmem:[#allocation5 + $0xcf8] sm:$0xff] }
 0x3bc   :  { %1503 = vmatprep.subr.mxu1 %v5375_v53  ;;  %v1700_v53 = vld [vmem:[#allocation5 + $0xcf0] sm:$0xff]  ;;  %1862 = vmatprep.subr.mxu0 %v1701_v29  ;;  %v1747_v29 = vld [vmem:[#allocation5 + $0xe68] sm:$0xff] }
 0x3bd   :  { %1504 = vmatpush1.msra.mxu1 %v5378_v58  ;;  %v1699_v58 = vld [vmem:[#allocation5 + $0xce8] sm:$0xff] }
 0x3be   :  { %1505 = vmatprep.subr.mxu1 %v5381_v60  ;;  %v1698_v60 = vld [vmem:[#allocation5 + $0xce0] sm:$0xff] }
 0x3bf   :  { %1506 = vmatpush1.msra.mxu1 %v5384_v0  ;;  %v1697_v0 = vld [vmem:[#allocation5 + $0xcd8] sm:$0xff] }
 0x3c0   :  { %1507 = vmatprep.subr.mxu1 %v5387_v3 }
 0x3c1   :  { %1508 = vmatpush2.msra.mxu1 %v5390_v7 }
 0x3c2   :  { %1509 = vmatprep.subr.mxu1 %v5393_v11 }
 0x3c3   :  { %1510 = vmatpush2.msra.mxu1 %v5396_v21 }
 0x3c4   :  { %1511 = vmatprep.subr.mxu1 %v5399_v32 }
 0x3c5   :  { %1512 = vmatpush2.msra.mxu1 %v5402_v24 }
 0x3c6   :  { %1513 = vmatprep.subr.mxu1 %v5405_v49 }
 0x3c7   :  { %1514 = vmatpush2.msra.mxu1 %v5408_v54 }
 0x3c8   :  { %1515 = vmatprep.subr.mxu1 %v5411_v62 }
 0x3c9   :  { %1516 = vmatpush2.msra.mxu1 %v5414_v30 }
 0x3ca   :  { %1517 = vmatprep.subr.mxu1 %v5417_v26 }
 0x3cb   :  { %1518 = vmatpush2.msra.mxu1 %v5420_v38 }
 0x3cc   :  { %1519 = vmatprep.subr.mxu1 %v5423_v43 }
 0x3cd   :  { %1520 = vmatpush2.msra.mxu1 %v5426_v57 }
 0x3ce   :  { %1521 = vmatprep.subr.mxu1 %v5429_v4 }
 0x3cf   :  { %1522 = vmatpush2.msra.mxu1 %v7119_v9 }
 0x3d0   :  { %1523 = vmatprep.subr.mxu1 %v7120_v10  ;;  %v1764_v10 = vld [vmem:[#allocation5 + $0xef0] sm:$0xff] }
 0x3d1   :  { %1524 = vmatpush2.msra.mxu1 %v7121_v13 }
 0x3d2   :  { %1525 = vmatprep.subr.mxu1 %v7122_v15  ;;  %v1763_v15 = vld [vmem:[#allocation5 + $0xee8] sm:$0xff] }
 0x3d3   :  { %1526 = vmatpush2.msra.mxu1 %v7123_v18  ;;  %v1762_v18 = vld [vmem:[#allocation5 + $0xee0] sm:$0xff] }
 0x3d4   :  { %1527 = vmatprep.subr.mxu1 %v7124_v20  ;;  %v1761_v20 = vld [vmem:[#allocation5 + $0xed8] sm:$0xff] }
 0x3d5   :  { %1528 = vmatpush2.msra.mxu1 %v7125_v31 }
 0x3d6   :  { %1529 = vmatprep.subr.mxu1 %v7126_v35  ;;  %v1760_v35 = vld [vmem:[#allocation5 + $0xed0] sm:$0xff] }
 0x3d7   :  { %1530 = vmatpush2.msra.mxu1 %v7127_v42  ;;  %v1759_v42 = vld [vmem:[#allocation5 + $0xec8] sm:$0xff] }
 0x3d8   :  { %1531 = vmatprep.subr.mxu1 %v5459_v41 }
 0x3d9   :  { %1532 = vmatpush2.msra.mxu1 %v5462_v47 }
 0x3da   :  { %1533 = vmatprep.subr.mxu1 %v5465_v16 }
 0x3db   :  { %1534 = vmatpush2.msra.mxu1 %v5468_v44 }
 0x3dc   :  { %1535 = vmatprep.subr.mxu1 %v5471_v27 }
 0x3dd   :  { %1536 = vmatpush2.msra.mxu1 %v7128_v46  ;;  %v1758_v46 = vld [vmem:[#allocation5 + $0xec0] sm:$0xff] }
 0x3de   :  { %1537 = vmatprep.subr.mxu1 %v5482_v36 }
 0x3df   :  { %1538 = vmatpush2.msra.mxu1 %v5490_v45 }
 0x3e0   :  { %1939 = vmatprep.subr.mxu1 %v1765_v40  ;;  %v1686_v40 = vld [vmem:[#allocation5 + $0xc80] sm:$0xff] }
 0x41a   :  { %v1286_v37 = vpop.f32.mrf.mxu0 }
 0x41c   :  { %v1288_v19 = vpop.f32.mrf.mxu0 }
 0x41e   :  { %v1209_v34 = vpop.f32.mrf.mxu1  ;;  %v1292_v1 = vpop.f32.mrf.mxu0 }
 0x41f   :  { %v1287_v2 = vadd.f32 %v1286_v37, %v1209_v34  ;;  %v1696_v34 = vld [vmem:[#allocation5 + $0xcd0] sm:$0xff]  ;;  %v1695_v37 = vld [vmem:[#allocation5 + $0xcc8] sm:$0xff] }
 0x420   :  { %v1211_v50 = vpop.f32.mrf.mxu1  ;;  %v1294_v52 = vpop.f32.mrf.mxu0 }
 0x421   :  { %v1289_v5 = vadd.f32 %v1288_v19, %v1211_v50  ;;  %v1757_v50 = vld [vmem:[#allocation5 + $0xeb8] sm:$0xff]  ;;  %v1694_v19 = vld [vmem:[#allocation5 + $0xcc0] sm:$0xff] }
 0x422   :  { %v1215_v61 = vpop.f32.mrf.mxu1 }
 0x423   :  { %v1293_v56 = vadd.f32 %v1292_v1, %v1215_v61  ;;  %v1756_v61 = vld [vmem:[#allocation5 + $0xeb0] sm:$0xff]  ;;  %v1693_v1 = vld [vmem:[#allocation5 + $0xcb8] sm:$0xff] }
 0x424   :  { %v1217_v59 = vpop.f32.mrf.mxu1 }
 0x425   :  { %v1295_v17 = vadd.f32 %v1294_v52, %v1217_v59  ;;  %v1755_v59 = vld [vmem:[#allocation5 + $0xea8] sm:$0xff]  ;;  %v1690_v52 = vld [vmem:[#allocation5 + $0xca0] sm:$0xff] }
 0x45e   :  { %v1363_v63 = vpop.f32.mrf.mxu1 }
 0x45f   :  { %v1364_v8 = vadd.f32 %v1363_v63, %v1287_v2  ;;  %v1754_v63 = vld [vmem:[#allocation5 + $0xea0] sm:$0xff]  ;;  %v1753_v2 = vld [vmem:[#allocation5 + $0xe98] sm:$0xff] }
 0x460   :  { %v1365_v6 = vpop.f32.mrf.mxu1 }
 0x461   :  { %v1366_v48 = vadd.f32 %v1365_v6, %v1289_v5  ;;  %v1692_v5 = vld [vmem:[#allocation5 + $0xcb0] sm:$0xff]  ;;  %v1691_v6 = vld [vmem:[#allocation5 + $0xca8] sm:$0xff] }
 0x462   :  { %v1369_v14 = vpop.f32.mrf.mxu1 }
 0x463   :  { %1438 = vmatprep.mubr.f32.mxu0 %v1366_v48  ;;  %v1370_v39 = vadd.f32 %v1369_v14, %v1293_v56  ;;  %v1689_v14 = vld [vmem:[#allocation5 + $0xc98] sm:$0xff]  ;;  %v1688_v56 = vld [vmem:[#allocation5 + $0xc90] sm:$0xff] }
 0x464   :  { %v1371_v28 = vpop.f32.mrf.mxu1  ;;  %1439 = vmatmul.mubr.f32.vlgmr.msra.gmra.mxu0 %v1364_v8 }
 0x465   :  { %v1372_v33 = vadd.f32 %v1371_v28, %v1295_v17  ;;  %1863 = vmatpush1.msra.mxu0 %v1700_v53  ;;  %v1750_v17 = vld [vmem:[#allocation5 + $0xe80] sm:$0xff]  ;;  %v1749_v28 = vld [vmem:[#allocation5 + $0xe78] sm:$0xff] }
 0x466   :  { %1864 = vmatprep.subr.mxu0 %v1699_v58  ;;  %v1685_v53 = vld [vmem:[#allocation5 + $0xc78] sm:$0xff]  ;;  %v1746_v58 = vld [vmem:[#allocation5 + $0xe60] sm:$0xff] }
 0x467   :  { %1444 = vmatprep.mubr.f32.mxu0 %v1372_v33  ;;  %1865 = vmatpush1.msra.mxu0 %v1698_v60  ;;  %v1684_v60 = vld [vmem:[#allocation5 + $0xc70] sm:$0xff] }
 0x468   :  { %1445 = vmatmul.mubr.f32.gmra.mxu0 %v1370_v39  ;;  %1866 = vmatprep.subr.mxu0 %v1697_v0  ;;  %v1745_v0 = vld [vmem:[#allocation5 + $0xe58] sm:$0xff] }
 0x469   :  { %1867 = vmatpush1.msra.mxu0 %v1696_v34  ;;  %v1793_v34 = vld [vmem:[#allocation5 + $0xfd8] sm:$0xff] }
 0x46a   :  { %1868 = vmatprep.subr.mxu0 %v1695_v37  ;;  %v1792_v37 = vld [vmem:[#allocation5 + $0xfd0] sm:$0xff] }
 0x46b   :  { %1869 = vmatpush1.msra.mxu0 %v1694_v19  ;;  %v1791_v19 = vld [vmem:[#allocation5 + $0xfc8] sm:$0xff] }
 0x46c   :  { %1870 = vmatprep.subr.mxu0 %v1693_v1  ;;  %v1790_v1 = vld [vmem:[#allocation5 + $0xfc0] sm:$0xff] }
 0x46d   :  { %1871 = vmatpush1.msra.mxu0 %v1692_v5  ;;  %v1789_v5 = vld [vmem:[#allocation5 + $0xfb8] sm:$0xff] }
 0x46e   :  { %1872 = vmatprep.subr.mxu0 %v1691_v6  ;;  %v1788_v6 = vld [vmem:[#allocation5 + $0xfb0] sm:$0xff] }
 0x46f   :  { %1873 = vmatpush1.msra.mxu0 %v1690_v52  ;;  %v1787_v52 = vld [vmem:[#allocation5 + $0xfa8] sm:$0xff] }
 0x470   :  { %1874 = vmatprep.subr.mxu0 %v1689_v14  ;;  %v1786_v14 = vld [vmem:[#allocation5 + $0xfa0] sm:$0xff] }
 0x471   :  { %1875 = vmatpush1.msra.mxu0 %v1688_v56  ;;  %v1785_v56 = vld [vmem:[#allocation5 + $0xf98] sm:$0xff] }
 0x524   :  { %v1440_v3 = vpop.f32.mrf.mxu0 }
 0x526   :  { %v1442_v7 = vpop.f32.mrf.mxu0 }
 0x528   :  { %v1446_v11 = vpop.f32.mrf.mxu0 }
 0x529   :  { %v1451_v21 = vadd.f32 %v1446_v11, %v1440_v3  ;;  %v1683_v3 = vld [vmem:[#allocation5 + $0xc68] sm:$0xff]  ;;  %v1682_v11 = vld [vmem:[#allocation5 + $0xc60] sm:$0xff] }
 0x52a   :  { %v1448_v32 = vpop.f32.mrf.mxu0 }
 0x52b   :  { %v1452_v24 = vrot.slane %v1451_v21, 4  ;;  %v1458_v49 = vadd.f32 %v1448_v32, %v1442_v7  ;;  %v1744_v7 = vld [vmem:[#allocation5 + $0xe50] sm:$0xff]  ;;  %v1681_v32 = vld [vmem:[#allocation5 + $0xc58] sm:$0xff] }
 0x52d   :  { %v1453_v54 = vadd.f32 %v1452_v24, %v1451_v21  ;;  %v1459_v62 = vrot.slane %v1458_v49, 4  ;;  %v1743_v21 = vld [vmem:[#allocation5 + $0xe48] sm:$0xff]  ;;  %v1742_v24 = vld [vmem:[#allocation5 + $0xe40] sm:$0xff] }
 0x52f   :  { %v1454_v30 = vrot.slane %v1453_v54, 2  ;;  %v1460_v26 = vadd.f32 %v1459_v62, %v1458_v49  ;;  %v1680_v49 = vld [vmem:[#allocation5 + $0xc50] sm:$0xff]  ;;  %v1679_v62 = vld [vmem:[#allocation5 + $0xc48] sm:$0xff] }
 0x531   :  { %v1455_v38 = vadd.f32 %v1454_v30, %v1453_v54  ;;  %v1461_v43 = vrot.slane %v1460_v26, 2  ;;  %v1741_v54 = vld [vmem:[#allocation5 + $0xe38] sm:$0xff]  ;;  %v1740_v30 = vld [vmem:[#allocation5 + $0xe30] sm:$0xff] }
 0x533   :  { %v1456_v57 = vrot.slane %v1455_v38, 1  ;;  %v1462_v4 = vadd.f32 %v1461_v43, %v1460_v26  ;;  %v1678_v26 = vld [vmem:[#allocation5 + $0xc40] sm:$0xff]  ;;  %v1677_v43 = vld [vmem:[#allocation5 + $0xc38] sm:$0xff] }
 0x535   :  { %v1457_v44 = vadd.f32 %v1456_v57, %v1455_v38  ;;  %v1463_v41 = vrot.slane %v1462_v4, 1  ;;  %v1739_v38 = vld [vmem:[#allocation5 + $0xe28] sm:$0xff]  ;;  %v1738_v57 = vld [vmem:[#allocation5 + $0xe20] sm:$0xff] }
 0x537   :  { %v1465_v47 = vmul.f32 0.0078125, %v1457_v44  ;;  %v1464_v16 = vadd.f32 %v1463_v41, %v1462_v4  ;;  %v1676_v4 = vld [vmem:[#allocation5 + $0xc30] sm:$0xff]  ;;  %v1737_v44 = vld [vmem:[#allocation5 + $0xe18] sm:$0xff]  ;;  %v1675_v41 = vld [vmem:[#allocation5 + $0xc28] sm:$0xff] }
 0x539   :  { %v1466_v27 = vmul.f32 0.0078125, %v1464_v16  ;;  %v5564_v22 = vsub.f32 %v1364_v8, %v1465_v47  ;;  %v5574_v9 = vsub.f32 %v1370_v39, %v1465_v47  ;;  %v1751_v8 = vld [vmem:[#allocation5 + $0xe88] sm:$0xff]  ;;  %v1748_v39 = vld [vmem:[#allocation5 + $0xe70] sm:$0xff]  ;;  %v1674_v16 = vld [vmem:[#allocation5 + $0xc20] sm:$0xff] }
 0x53a   :  { %v1736_v47 = vld [vmem:[#allocation5 + $0xe10] sm:$0xff] }
 0x53b   :  { %v5566_v36 = vsub.f32 %v1366_v48, %v1466_v27  ;;  %v5568_v23 = vsub.f32 %v1372_v33, %v1466_v27  ;;  %v1471_v12 = vmul.f32 %v5564_v22, %v5564_v22  ;;  %v1473_v31 = vmul.f32 %v5574_v9, %v5574_v9  ;;  %v1752_v48 = vld [vmem:[#allocation5 + $0xe90] sm:$0xff]  ;;  %v1687_v33 = vld [vmem:[#allocation5 + $0xc88] sm:$0xff] }
 0x53c   :  { %1876 = vmatprep.subr.mxu0 %v1687_v33  ;;  %v1735_v27 = vld [vmem:[#allocation5 + $0xe08] sm:$0xff]  ;;  %v1784_v33 = vld [vmem:[#allocation5 + $0xf90] sm:$0xff] }
 0x53d   :  { %v1472_v45 = vmul.f32 %v5566_v36, %v5566_v36  ;;  %v1474_v13 = vmul.f32 %v5568_v23, %v5568_v23  ;;  %1877 = vmatpush1.msra.mxu0 %v1686_v40  ;;  %v1783_v40 = vld [vmem:[#allocation5 + $0xf88] sm:$0xff] }
 0x53e   :  { %1878 = vmatprep.subr.mxu0 %v1685_v53  ;;  %v1782_v53 = vld [vmem:[#allocation5 + $0xf80] sm:$0xff] }
 0x53f   :  { %1539 = vmatprep.mubr.f32.mxu1 %v1472_v45  ;;  %1879 = vmatpush1.msra.mxu0 %v1684_v60  ;;  %v1673_v45 = vld [vmem:[#allocation5 + $0xc18] sm:$0xff] }
 0x540   :  { %1540 = vmatmul.mubr.f32.vlgmr.msra.gmra.mxu1 %v1471_v12  ;;  %1880 = vmatprep.subr.mxu0 %v1683_v3  ;;  %v1734_v12 = vld [vmem:[#allocation5 + $0xe00] sm:$0xff]  ;;  %v1781_v60 = vld [vmem:[#allocation5 + $0xf78] sm:$0xff]  ;;  %v1780_v3 = vld [vmem:[#allocation5 + $0xf70] sm:$0xff] }
 0x541   :  { %1545 = vmatprep.mubr.f32.mxu1 %v1474_v13  ;;  %1940 = vmatpush1.msra.mxu1 %v1764_v10  ;;  %v1672_v10 = vld [vmem:[#allocation5 + $0xc10] sm:$0xff]  ;;  %v1797_v13 = vld [vmem:[#allocation5 + $0xff8] sm:$0xff] }
 0x542   :  { %1941 = vmatprep.subr.mxu1 %v1763_v15  ;;  %1881 = vmatpush1.msra.mxu0 %v1682_v11  ;;  %v1671_v15 = vld [vmem:[#allocation5 + $0xc08] sm:$0xff] }
 0x543   :  { %1942 = vmatpush1.msra.mxu1 %v1762_v18  ;;  %1882 = vmatprep.subr.mxu0 %v1681_v32  ;;  %v1796_v18 = vld [vmem:[#allocation5 + $0xff0] sm:$0xff]  ;;  %v1779_v11 = vld [vmem:[#allocation5 + $0xf68] sm:$0xff]  ;;  %v1778_v32 = vld [vmem:[#allocation5 + $0xf60] sm:$0xff] }
 0x544   :  { %1546 = vmatmul.mubr.f32.gmra.mxu1 %v1473_v31  ;;  %1943 = vmatprep.subr.mxu1 %v1761_v20  ;;  %v1670_v20 = vld [vmem:[#allocation5 + $0xc00] sm:$0xff]  ;;  %v1795_v31 = vld [vmem:[#allocation5 + $0xfe8] sm:$0xff] }
 0x545   :  { %1944 = vmatpush1.msra.mxu1 %v1760_v35  ;;  %1883 = vmatpush1.msra.mxu0 %v1680_v49  ;;  %v1733_v35 = vld [vmem:[#allocation5 + $0xdf8] sm:$0xff] }
 0x546   :  { %1945 = vmatprep.subr.mxu1 %v1759_v42  ;;  %1884 = vmatprep.subr.mxu0 %v1679_v62  ;;  %v1794_v42 = vld [vmem:[#allocation5 + $0xfe0] sm:$0xff]  ;;  %v1777_v49 = vld [vmem:[#allocation5 + $0xf58] sm:$0xff]  ;;  %v1776_v62 = vld [vmem:[#allocation5 + $0xf50] sm:$0xff] }
 0x547   :  { %1946 = vmatpush1.msra.mxu1 %v1758_v46  ;;  %1885 = vmatpush1.msra.mxu0 %v1678_v26  ;;  %v1732_v46 = vld [vmem:[#allocation5 + $0xdf0] sm:$0xff]  ;;  %v1775_v26 = vld [vmem:[#allocation5 + $0xf48] sm:$0xff] }
 0x548   :  { %1947 = vmatprep.subr.mxu1 %v1757_v50  ;;  %1886 = vmatprep.subr.mxu0 %v1677_v43  ;;  %v1731_v50 = vld [vmem:[#allocation5 + $0xde8] sm:$0xff]  ;;  %v1774_v43 = vld [vmem:[#allocation5 + $0xf40] sm:$0xff] }
 0x549   :  { %1948 = vmatpush1.msra.mxu1 %v1756_v61  ;;  %1887 = vmatpush1.msra.mxu0 %v1676_v4  ;;  %v1730_v61 = vld [vmem:[#allocation5 + $0xde0] sm:$0xff]  ;;  %v1773_v4 = vld [vmem:[#allocation5 + $0xf38] sm:$0xff] }
 0x54a   :  { %1949 = vmatprep.subr.mxu1 %v1755_v59  ;;  %1888 = vmatprep.subr.mxu0 %v1675_v41  ;;  %v1729_v59 = vld [vmem:[#allocation5 + $0xdd8] sm:$0xff]  ;;  %v1772_v41 = vld [vmem:[#allocation5 + $0xf30] sm:$0xff] }
 0x54b   :  { %1950 = vmatpush1.msra.mxu1 %v1754_v63  ;;  %1889 = vmatpush1.msra.mxu0 %v1674_v16  ;;  %v1728_v63 = vld [vmem:[#allocation5 + $0xdd0] sm:$0xff]  ;;  %v1771_v16 = vld [vmem:[#allocation5 + $0xf28] sm:$0xff] }
 0x54c   :  { %1951 = vmatprep.subr.mxu1 %v1753_v2  ;;  %1890 = vmatprep.subr.mxu0 %v1673_v45  ;;  %v1727_v2 = vld [vmem:[#allocation5 + $0xdc8] sm:$0xff]  ;;  %v1770_v45 = vld [vmem:[#allocation5 + $0xf20] sm:$0xff] }
 0x54d   :  { %1952 = vmatpush1.msra.mxu1 %v1752_v48  ;;  %1891 = vmatpush1.msra.mxu0 %v1672_v10  ;;  %v1726_v48 = vld [vmem:[#allocation5 + $0xdc0] sm:$0xff]  ;;  %v1769_v10 = vld [vmem:[#allocation5 + $0xf18] sm:$0xff] }
 0x54e   :  { %1953 = vmatprep.subr.mxu1 %v1751_v8  ;;  %1892 = vmatprep.subr.mxu0 %v1671_v15  ;;  %v1725_v8 = vld [vmem:[#allocation5 + $0xdb8] sm:$0xff]  ;;  %v1768_v15 = vld [vmem:[#allocation5 + $0xf10] sm:$0xff] }
 0x54f   :  { %1954 = vmatpush1.msra.mxu1 %v1750_v17  ;;  %1893 = vmatpush1.msra.mxu0 %v1670_v20  ;;  %v1724_v17 = vld [vmem:[#allocation5 + $0xdb0] sm:$0xff]  ;;  %v1767_v20 = vld [vmem:[#allocation5 + $0xf08] sm:$0xff] }
 0x550   :  { %1955 = vmatprep.subr.mxu1 %v1749_v28  ;;  %1894 = vmatprep.subr.mxu0 %v1733_v35  ;;  %v1723_v28 = vld [vmem:[#allocation5 + $0xda8] sm:$0xff]  ;;  %v1766_v35 = vld [vmem:[#allocation5 + $0xf00] sm:$0xff] }
 0x551   :  { %1956 = vmatpush1.msra.mxu1 %v1748_v39  ;;  %1895 = vmatpush2.msra.mxu0 %v1732_v46  ;;  %v1722_v39 = vld [vmem:[#allocation5 + $0xda0] sm:$0xff]  ;;  %v1703_v46 = vld [vmem:[#allocation5 + $0xd08] sm:$0xff] }
 0x552   :  { %1957 = vmatprep.subr.mxu1 %v1747_v29  ;;  %1896 = vmatprep.subr.mxu0 %v1731_v50  ;;  %v1721_v29 = vld [vmem:[#allocation5 + $0xd98] sm:$0xff] }
 0x553   :  { %1958 = vmatpush1.msra.mxu1 %v1746_v58  ;;  %1897 = vmatpush2.msra.mxu0 %v1730_v61  ;;  %v1720_v58 = vld [vmem:[#allocation5 + $0xd90] sm:$0xff]  ;;  %v1829_v50 = vld [vmem:[#allocation5 + $0x10f8] sm:$0xff] }
 0x554   :  { %1959 = vmatprep.subr.mxu1 %v1745_v0  ;;  %1898 = vmatprep.subr.mxu0 %v1729_v59  ;;  %v1719_v0 = vld [vmem:[#allocation5 + $0xd88] sm:$0xff] }
 0x555   :  { %1960 = vmatpush1.msra.mxu1 %v1744_v7  ;;  %1899 = vmatpush2.msra.mxu0 %v1728_v63  ;;  %v1718_v7 = vld [vmem:[#allocation5 + $0xd80] sm:$0xff] }
 0x556   :  { %1961 = vmatprep.subr.mxu1 %v1743_v21  ;;  %1900 = vmatprep.subr.mxu0 %v1727_v2  ;;  %v1717_v21 = vld [vmem:[#allocation5 + $0xd78] sm:$0xff] }
 0x557   :  { %1962 = vmatpush1.msra.mxu1 %v1742_v24  ;;  %1901 = vmatpush2.msra.mxu0 %v1726_v48  ;;  %v1716_v24 = vld [vmem:[#allocation5 + $0xd70] sm:$0xff] }
 0x558   :  { %1963 = vmatprep.subr.mxu1 %v1741_v54  ;;  %1902 = vmatprep.subr.mxu0 %v1725_v8  ;;  %v1715_v54 = vld [vmem:[#allocation5 + $0xd68] sm:$0xff] }
 0x559   :  { %1964 = vmatpush1.msra.mxu1 %v1740_v30  ;;  %1903 = vmatpush2.msra.mxu0 %v1724_v17  ;;  %v1714_v30 = vld [vmem:[#allocation5 + $0xd60] sm:$0xff] }
 0x55a   :  { %1965 = vmatprep.subr.mxu1 %v1739_v38  ;;  %1904 = vmatprep.subr.mxu0 %v1723_v28  ;;  %v1713_v38 = vld [vmem:[#allocation5 + $0xd58] sm:$0xff] }
 0x55b   :  { %1966 = vmatpush1.msra.mxu1 %v1738_v57  ;;  %1905 = vmatpush2.msra.mxu0 %v1722_v39  ;;  %v1712_v57 = vld [vmem:[#allocation5 + $0xd50] sm:$0xff] }
 0x55c   :  { %1967 = vmatprep.subr.mxu1 %v1737_v44  ;;  %1906 = vmatprep.subr.mxu0 %v1721_v29  ;;  %v1711_v44 = vld [vmem:[#allocation5 + $0xd48] sm:$0xff] }
 0x55d   :  { %1968 = vmatpush1.msra.mxu1 %v1736_v47  ;;  %1907 = vmatpush2.msra.mxu0 %v1720_v58  ;;  %v1710_v47 = vld [vmem:[#allocation5 + $0xd40] sm:$0xff] }
 0x55e   :  { %1969 = vmatprep.subr.mxu1 %v1735_v27  ;;  %1908 = vmatprep.subr.mxu0 %v1719_v0  ;;  %v1709_v27 = vld [vmem:[#allocation5 + $0xd38] sm:$0xff] }
 0x55f   :  { %1970 = vmatpush1.msra.mxu1 %v1734_v12  ;;  %1909 = vmatpush2.msra.mxu0 %v1718_v7  ;;  %v1708_v12 = vld [vmem:[#allocation5 + $0xd30] sm:$0xff] }
 0x560   :  { %1971 = vmatprep.subr.mxu1 %v1797_v13  ;;  %1910 = vmatprep.subr.mxu0 %v1717_v21  ;;  %v1707_v13 = vld [vmem:[#allocation5 + $0xd28] sm:$0xff] }
 0x561   :  { %1972 = vmatpush2.msra.mxu1 %v1796_v18  ;;  %1911 = vmatpush2.msra.mxu0 %v1716_v24  ;;  %v1706_v18 = vld [vmem:[#allocation5 + $0xd20] sm:$0xff] }
 0x562   :  { %1973 = vmatprep.subr.mxu1 %v1795_v31  ;;  %1912 = vmatprep.subr.mxu0 %v1715_v54  ;;  %v1705_v31 = vld [vmem:[#allocation5 + $0xd18] sm:$0xff] }
 0x563   :  { %1974 = vmatpush2.msra.mxu1 %v1794_v42  ;;  %1913 = vmatpush2.msra.mxu0 %v1714_v30  ;;  %v1704_v42 = vld [vmem:[#allocation5 + $0xd10] sm:$0xff] }
 0x564   :  { %1975 = vmatprep.subr.mxu1 %v1793_v34  ;;  %1914 = vmatprep.subr.mxu0 %v1713_v38  ;;  %v1702_v34 = vld [vmem:[#allocation5 + $0xd00] sm:$0xff] }
 0x565   :  { %1976 = vmatpush2.msra.mxu1 %v1792_v37  ;;  %1915 = vmatpush2.msra.mxu0 %v1712_v57 }
 0x566   :  { %1977 = vmatprep.subr.mxu1 %v1791_v19  ;;  %1916 = vmatprep.subr.mxu0 %v1711_v44 }
 0x567   :  { %1978 = vmatpush2.msra.mxu1 %v1790_v1  ;;  %1917 = vmatpush2.msra.mxu0 %v1710_v47 }
 0x568   :  { %1979 = vmatprep.subr.mxu1 %v1789_v5  ;;  %1918 = vmatprep.subr.mxu0 %v1709_v27 }
 0x569   :  { %1980 = vmatpush2.msra.mxu1 %v1788_v6  ;;  %1919 = vmatpush2.msra.mxu0 %v1708_v12 }
 0x56a   :  { %1981 = vmatprep.subr.mxu1 %v1787_v52  ;;  %1920 = vmatprep.subr.mxu0 %v1707_v13 }
 0x56b   :  { %1982 = vmatpush2.msra.mxu1 %v1786_v14  ;;  %1921 = vmatpush2.msra.mxu0 %v1706_v18 }
 0x56c   :  { %1983 = vmatprep.subr.mxu1 %v1785_v56  ;;  %1922 = vmatprep.subr.mxu0 %v1705_v31 }
 0x56d   :  { %1984 = vmatpush2.msra.mxu1 %v1784_v33  ;;  %1923 = vmatpush2.msra.mxu0 %v1704_v42 }
 0x56e   :  { %1985 = vmatprep.subr.mxu1 %v1783_v40  ;;  %1924 = vmatprep.subr.mxu0 %v1703_v46 }
 0x56f   :  { %1986 = vmatpush2.msra.mxu1 %v1782_v53  ;;  %1925 = vmatpush2.msra.mxu0 %v1702_v34 }
 0x570   :  { %1987 = vmatprep.subr.mxu1 %v1781_v60  ;;  %2016 = vmatprep.subr.mxu0 %v1829_v50 }
 0x571   :  { %1988 = vmatpush2.msra.mxu1 %v1780_v3  ;;  %v7129_v3 = vld [vmem:[#allocation18_spill] sm:$0xff] }
 0x572   :  { %1989 = vmatprep.subr.mxu1 %v1779_v11  ;;  %v1569_v11 = vld [vmem:[#allocation7 + $0x1] ss:$8 sm:$0x3] }
 0x573   :  { %1990 = vmatpush2.msra.mxu1 %v1778_v32  ;;  %v1609_v32 = vld [vmem:[#allocation8 + $0x1] ss:$8 sm:$0x3] }
 0x574   :  { %1991 = vmatprep.subr.mxu1 %v1777_v49  ;;  %v7130_v49 = vld [vmem:[#allocation19_spill] sm:$0xff] }
 0x575   :  { %1992 = vmatpush2.msra.mxu1 %v1776_v62  ;;  %v7131_v62 = vld [vmem:[#allocation20_spill] sm:$0xff] }
 0x576   :  { %1993 = vmatprep.subr.mxu1 %v1775_v26  ;;  %v1614_v26 = vrot.slane %v1609_v32, %v7130_v49  ;;  %v1618_v38 = vrot.slane %v1609_v32, %v7131_v62  ;;  %v1820_v32 = vld [vmem:[#allocation5 + $0x10b0] sm:$0xff] }
 0x577   :  { %1994 = vmatpush2.msra.mxu1 %v1774_v43 }
 0x578   :  { %1995 = vmatprep.subr.mxu1 %v1773_v4 }
 0x579   :  { %1996 = vmatpush2.msra.mxu1 %v1772_v41 }
 0x57a   :  { %1997 = vmatprep.subr.mxu1 %v1771_v16 }
 0x57b   :  { %1998 = vmatpush2.msra.mxu1 %v1770_v45  ;;  %v4625_v45 = vld [vmem:[#allocation2 + $0x8] sm:$0xff] }
 0x57c   :  { %1999 = vmatprep.subr.mxu1 %v1769_v10  ;;  %v4626_v10 = vld [vmem:[#allocation2 + $0x10] sm:$0xff] }
 0x57d   :  { %2000 = vmatpush2.msra.mxu1 %v1768_v15  ;;  %v4627_v15 = vld [vmem:[#allocation2] sm:$0xff] }
 0x57e   :  { %2001 = vmatprep.subr.mxu1 %v1767_v20 }
 0x57f   :  { %2002 = vmatpush2.msra.mxu1 %v1766_v35 }
 0x580   :  { %2093 = vmatprep.subr.mxu1 %v5493_v25 }
 0x600   :  { %v1541_v37 = vpop.f32.mrf.mxu1 }
 0x602   :  { %v1543_v61 = vpop.f32.mrf.mxu1 }
 0x604   :  { %v1547_v19 = vpop.f32.mrf.mxu1 }
 0x605   :  { %v1552_v59 = vadd.f32 %v1547_v19, %v1541_v37 }
 0x606   :  { %v1549_v1 = vpop.f32.mrf.mxu1 }
 0x607   :  { %v1553_v63 = vrot.slane %v1552_v59, 4  ;;  %v1559_v5 = vadd.f32 %v1549_v1, %v1543_v61 }
 0x609   :  { %v1554_v2 = vadd.f32 %v1553_v63, %v1552_v59  ;;  %v1560_v6 = vrot.slane %v1559_v5, 4  ;;  %v1841_v59 = vld [vmem:[#allocation5 + $0x1158] sm:$0xff] }
 0x60b   :  { %v1555_v48 = vrot.slane %v1554_v2, 2  ;;  %v1561_v52 = vadd.f32 %v1560_v6, %v1559_v5  ;;  %v5626_v6 = vld [vmem:[#allocation10 + $0xf0] sm:$0xff] }
 0x60d   :  { %v1556_v8 = vadd.f32 %v1555_v48, %v1554_v2  ;;  %v1562_v14 = vrot.slane %v1561_v52, 2  ;;  %v1828_v2 = vld [vmem:[#allocation5 + $0x10f0] sm:$0xff] }
 0x60f   :  { %v1557_v17 = vrot.slane %v1556_v8, 1  ;;  %v1563_v56 = vadd.f32 %v1562_v14, %v1561_v52  ;;  %v1827_v52 = vld [vmem:[#allocation5 + $0x10e8] sm:$0xff] }
 0x611   :  { %v1558_v25 = vadd.f32 %v1557_v17, %v1556_v8  ;;  %v1564_v28 = vrot.slane %v1563_v56, 1  ;;  %v1842_v17 = vld [vmem:[#allocation5 + $0x1160] sm:$0xff] }
 0x613   :  { %v1566_v33 = vmul.f32 0.0078125, %v1558_v25  ;;  %v1565_v39 = vadd.f32 %v1564_v28, %v1563_v56  ;;  %v1826_v25 = vld [vmem:[#allocation5 + $0x10e0] sm:$0xff]  ;;  %v1847_v28 = vld [vmem:[#allocation5 + $0x1188] sm:$0xff] }
 0x615   :  { %v1570_v40 = vadd.f32 1e-05, %v1566_v33  ;;  %v1567_v29 = vmul.f32 0.0078125, %v1565_v39  ;;  %v1825_v39 = vld [vmem:[#allocation5 + $0x10d8] sm:$0xff]  ;;  %v1848_v33 = vld [vmem:[#allocation5 + $0x1190] sm:$0xff] }
 0x617   :  { %v1571_v53 = vadd.f32 1e-05, %v1567_v29  ;;  %4541 = vrsqrt.f32 %v1570_v40  ;;  %v1824_v29 = vld [vmem:[#allocation5 + $0x10d0] sm:$0xff]  ;;  %v1849_v40 = vld [vmem:[#allocation5 + $0x1198] sm:$0xff] }
 0x619   :  { %4543 = vrsqrt.f32 %v1571_v53  ;;  %v5656_v53 = vld [vmem:[#allocation10 + $0xe8] sm:$0xff] }
 0x624   :  { %v4542_v58 = vpop.eup %4541 }
 0x626   :  { %v4544_v60 = vpop.eup %4543 }
 0x627   :  { %v1576_v0 = vcombine.low %v4542_v58, %v4544_v60  ;;  %v1823_v60 = vld [vmem:[#allocation5 + $0x10c8] sm:$0xff] }
 0x629   :  { %v1583_v7 = vrot.slane %v1576_v0, %v7129_v3  ;;  %v5663_v0 = vld [vmem:[#allocation10 + $0xe0] sm:$0xff] }
 0x62b   :  { %v1590_v21 = vrot.slane %v1583_v7, %v7129_v3  ;;  %v1838_v3 = vld [vmem:[#allocation5 + $0x1140] sm:$0xff] }
 0x62d   :  { %v1592_v24 = vmul.f32 %v1590_v21, %v1569_v11  ;;  %v1822_v11 = vld [vmem:[#allocation5 + $0x10c0] sm:$0xff]  ;;  %v1821_v21 = vld [vmem:[#allocation5 + $0x10b8] sm:$0xff] }
 0x62f   :  { %v1597_v54 = vrot.slane %v1592_v24, %v7130_v49  ;;  %v1601_v30 = vrot.slane %v1592_v24, %v7131_v62  ;;  %v5668_v24 = vld [vmem:[#allocation10 + $0xd8] sm:$0xff]  ;;  %v1840_v62 = vld [vmem:[#allocation5 + $0x1150] sm:$0xff]  ;;  %v1839_v49 = vld [vmem:[#allocation5 + $0x1148] sm:$0xff] }
 0x631   :  { %v1605_v43 = vmul.f32 %v1601_v30, %v5566_v36  ;;  %v1606_v57 = vmul.f32 %v1597_v54, %v5574_v9  ;;  %v1604_v4 = vmul.f32 %v1597_v54, %v5564_v22  ;;  %v1607_v44 = vmul.f32 %v1601_v30, %v5568_v23  ;;  %v4628_v36 = vld [vmem:[#allocation2 + $0x18] sm:$0xff]  ;;  %v1819_v54 = vld [vmem:[#allocation5 + $0x10a8] sm:$0xff]  ;;  %v5671_v30 = vld [vmem:[#allocation10 + $0xd0] sm:$0xff] }
 0x633   :  { %v1622_v41 = vadd.f32 %v1618_v38, %v1605_v43  ;;  %v1623_v47 = vadd.f32 %v1614_v26, %v1606_v57  ;;  %v1621_v16 = vadd.f32 %v1614_v26, %v1604_v4  ;;  %v1624_v27 = vadd.f32 %v1618_v38, %v1607_v44  ;;  %v1818_v26 = vld [vmem:[#allocation5 + $0x10a0] sm:$0xff]  ;;  %v5674_v38 = vld [vmem:[#allocation10 + $0xc8] sm:$0xff]  ;;  %v1817_v43 = vld [vmem:[#allocation5 + $0x1098] sm:$0xff] }
 0x634   :  { %v5677_v57 = vld [vmem:[#allocation10 + $0xc0] sm:$0xff]  ;;  %v1816_v4 = vld [vmem:[#allocation5 + $0x1090] sm:$0xff]  ;;  %v5680_v44 = vld [vmem:[#allocation10 + $0xb8] sm:$0xff] }
 0x635   :  { %v5591_v12 = vadd.f32 %v4625_v45, %v1622_v41  ;;  %v5593_v13 = vadd.f32 %v4626_v10, %v1623_v47  ;;  %v5595_v18 = vadd.f32 %v4627_v15, %v1621_v16  ;;  %v5597_v20 = vadd.f32 %v4628_v36, %v1624_v27  ;;  %v1815_v41 = vld [vmem:[#allocation5 + $0x1088] sm:$0xff]  ;;  %v5683_v47 = vld [vmem:[#allocation10 + $0xb0] sm:$0xff]  ;;  %v1814_v16 = vld [vmem:[#allocation5 + $0x1080] sm:$0xff] }
 0x636   :  { %v5686_v27 = vld [vmem:[#allocation10 + $0xa8] sm:$0xff]  ;;  %v1813_v45 = vld [vmem:[#allocation5 + $0x1078] sm:$0xff]  ;;  %v5689_v10 = vld [vmem:[#allocation10 + $0xa0] sm:$0xff] }
 0x637   :  { %7132 = vst [vmem:[#allocation21_spill] sm:$0xff] %v5591_v12  ;;  %7133 = vst [vmem:[#allocation22_spill] sm:$0xff] %v5593_v13  ;;  %2003 = vmatprep.mubr.f32.mxu1 %v5591_v12  ;;  %v1632_v22 = vrot.slane %v5597_v20, 7  ;;  %v1638_v23 = vrot.slane %v5591_v12, 7  ;;  %v1650_v9 = vrot.slane %v5591_v12, 1  ;;  %v1651_v31 = vrot.slane %v5597_v20, 1 }
 0x638   :  { %7134 = vst [vmem:[#allocation23_spill] sm:$0xff] %v5595_v18  ;;  %7135 = vst [vmem:[#allocation24_spill] sm:$0xff] %v5597_v20  ;;  %2004 = vmatmul.mubr.f32.vlgmr.msra.gmra.mxu1 %v5595_v18  ;;  %v1631_v35 = vrot.slane %v5593_v13, 7  ;;  %v1637_v42 = vrot.slane %v5595_v18, 7  ;;  %v1647_v46 = vrot.slane %v5595_v18, 1  ;;  %v1648_v34 = vrot.slane %v5593_v13, 1 }
 0x639   :  { %2009 = vmatprep.mubr.f32.mxu1 %v5597_v20  ;;  %v1646_v50 = vsel %vm192_vm0, %v1632_v22, %v1638_v23  ;;  %v1652_v37 = vsel %vm203_vm1, %v1650_v9, %v1651_v31  ;;  %v5613_v61 = vsel %vm192_vm0, %v1638_v23, %v1632_v22  ;;  %v5616_v19 = vsel %vm203_vm1, %v1651_v31, %v1650_v9  ;;  %v1812_v15 = vld [vmem:[#allocation5 + $0x1070] sm:$0xff]  ;;  %v5692_v36 = vld [vmem:[#allocation10 + $0x98] sm:$0xff]  ;;  %v1811_v22 = vld [vmem:[#allocation5 + $0x1068] sm:$0xff] }
 0x63a   :  { %v1662_v1 = vsel %vm5151_vm4, %v1652_v37, %v1646_v50  ;;  %v5621_v63 = vsel %vm192_vm0, %v1631_v35, %v1637_v42  ;;  %v5624_v5 = vsel %vm203_vm1, %v1647_v46, %v1648_v34  ;;  %2094 = vmatpush1.msra.mxu1 %v5626_v6  ;;  %v5634_v8 = vsel %vm192_vm0, %v1637_v42, %v1631_v35  ;;  %v5695_v23 = vld [vmem:[#allocation10 + $0x90] sm:$0xff]  ;;  %v1810_v9 = vld [vmem:[#allocation5 + $0x1060] sm:$0xff]  ;;  %v5698_v31 = vld [vmem:[#allocation10 + $0x88] sm:$0xff] }
 0x63b   :  { %1926 = vmatprep.mubr.f32.mxu0 %v1662_v1  ;;  %v1661_v48 = vsel %vm5151_vm4, %v5624_v5, %v5621_v63  ;;  %v5637_v14 = vsel %vm203_vm1, %v1648_v34, %v1647_v46  ;;  %v1664_v56 = vsel %vm5169_vm5, %v5616_v19, %v5613_v61  ;;  %2095 = vmatprep.subr.mxu1 %v5656_v53  ;;  %v1809_v35 = vld [vmem:[#allocation5 + $0x1058] sm:$0xff]  ;;  %v5701_v42 = vld [vmem:[#allocation10 + $0x80] sm:$0xff]  ;;  %v1808_v46 = vld [vmem:[#allocation5 + $0x1050] sm:$0xff] }
 0x63c   :  { %1927 = vmatmul.mubr.f32.vlgmr.msra.gmra.mxu0 %v1661_v48  ;;  %2010 = vmatmul.mubr.f32.gmra.mxu1 %v5593_v13  ;;  %v1663_v58 = vsel %vm5169_vm5, %v5637_v14, %v5634_v8  ;;  %v1666_v7 = vsel %vm5101_vm2, %v1646_v50, %v1652_v37  ;;  %v5704_v34 = vld [vmem:[#allocation10 + $0x78] sm:$0xff]  ;;  %v1807_v50 = vld [vmem:[#allocation5 + $0x1048] sm:$0xff]  ;;  %v5707_v37 = vld [vmem:[#allocation10 + $0x70] sm:$0xff] }
 0x63d   :  { %2017 = vmatpush1.msra.mxu0 %v1828_v2  ;;  %1932 = vmatprep.mubr.f32.mxu0 %v1664_v56  ;;  %v1806_v1 = vld [vmem:[#allocation5 + $0x1040] sm:$0xff]  ;;  %v5710_v2 = vld [vmem:[#allocation10 + $0x68] sm:$0xff]  ;;  %v1805_v48 = vld [vmem:[#allocation5 + $0x1038] sm:$0xff] }
 0x63e   :  { %2018 = vmatprep.subr.mxu0 %v1827_v52  ;;  %2096 = vmatpush1.msra.mxu1 %v5663_v0  ;;  %v5713_v52 = vld [vmem:[#allocation10 + $0x60] sm:$0xff]  ;;  %v1804_v56 = vld [vmem:[#allocation5 + $0x1030] sm:$0xff]  ;;  %v1845_v18 = vld [vmem:[#allocation5 + $0x1178] sm:$0xff] }
 0x63f   :  { %2019 = vmatpush1.msra.mxu0 %v1826_v25  ;;  %2097 = vmatprep.subr.mxu1 %v5668_v24  ;;  %v5716_v25 = vld [vmem:[#allocation10 + $0x58] sm:$0xff]  ;;  %v1846_v20 = vld [vmem:[#allocation5 + $0x1180] sm:$0xff]  ;;  %v1844_v13 = vld [vmem:[#allocation5 + $0x1170] sm:$0xff] }
 0x640   :  { %2020 = vmatprep.subr.mxu0 %v1825_v39  ;;  %1933 = vmatmul.mubr.f32.gmra.mxu0 %v1663_v58  ;;  %v1803_v39 = vld [vmem:[#allocation5 + $0x1028] sm:$0xff]  ;;  %v1802_v58 = vld [vmem:[#allocation5 + $0x1020] sm:$0xff] }
 0x641   :  { %2021 = vmatpush1.msra.mxu0 %v1824_v29  ;;  %2080 = vmatprep.mubr.f32.mxu0 %v1666_v7  ;;  %v5719_v29 = vld [vmem:[#allocation10 + $0x50] sm:$0xff]  ;;  %v1801_v7 = vld [vmem:[#allocation5 + $0x1018] sm:$0xff]  ;;  %v1843_v12 = vld [vmem:[#allocation5 + $0x1168] sm:$0xff] }
 0x642   :  { %2022 = vmatprep.subr.mxu0 %v1823_v60  ;;  %2098 = vmatpush1.msra.mxu1 %v5671_v30  ;;  %v5722_v60 = vld [vmem:[#allocation10 + $0x48] sm:$0xff] }
 0x643   :  { %2023 = vmatpush1.msra.mxu0 %v1822_v11  ;;  %2099 = vmatprep.subr.mxu1 %v5674_v38  ;;  %v5725_v11 = vld [vmem:[#allocation10 + $0x40] sm:$0xff] }
 0x644   :  { %2024 = vmatprep.subr.mxu0 %v1821_v21  ;;  %2100 = vmatpush1.msra.mxu1 %v5677_v57  ;;  %v1800_v21 = vld [vmem:[#allocation5 + $0x1010] sm:$0xff] }
 0x645   :  { %2025 = vmatpush1.msra.mxu0 %v1820_v32  ;;  %2101 = vmatprep.subr.mxu1 %v5680_v44  ;;  %v5728_v32 = vld [vmem:[#allocation10 + $0x38] sm:$0xff] }
 0x646   :  { %2026 = vmatprep.subr.mxu0 %v1819_v54  ;;  %2102 = vmatpush1.msra.mxu1 %v5683_v47  ;;  %v1799_v54 = vld [vmem:[#allocation5 + $0x1008] sm:$0xff] }
 0x647   :  { %2027 = vmatpush1.msra.mxu0 %v1818_v26  ;;  %2103 = vmatprep.subr.mxu1 %v5686_v27  ;;  %v5731_v26 = vld [vmem:[#allocation10 + $0x30] sm:$0xff] }
 0x648   :  { %2028 = vmatprep.subr.mxu0 %v1817_v43  ;;  %2104 = vmatpush1.msra.mxu1 %v5689_v10  ;;  %v1798_v43 = vld [vmem:[#allocation5 + $0x1000] sm:$0xff] }
 0x649   :  { %2029 = vmatpush1.msra.mxu0 %v1816_v4  ;;  %2105 = vmatprep.subr.mxu1 %v5692_v36  ;;  %v5734_v4 = vld [vmem:[#allocation10 + $0x28] sm:$0xff] }
 0x64a   :  { %2030 = vmatprep.subr.mxu0 %v1815_v41  ;;  %2106 = vmatpush1.msra.mxu1 %v5695_v23  ;;  %v1861_v41 = vld [vmem:[#allocation5 + $0x11f8] sm:$0xff] }
 0x64b   :  { %2031 = vmatpush1.msra.mxu0 %v1814_v16  ;;  %2107 = vmatprep.subr.mxu1 %v5698_v31  ;;  %v5737_v16 = vld [vmem:[#allocation10 + $0x20] sm:$0xff] }
 0x64c   :  { %2032 = vmatprep.subr.mxu0 %v1813_v45  ;;  %2108 = vmatpush1.msra.mxu1 %v5701_v42  ;;  %v1860_v45 = vld [vmem:[#allocation5 + $0x11f0] sm:$0xff] }
 0x64d   :  { %2033 = vmatpush1.msra.mxu0 %v1812_v15  ;;  %2109 = vmatprep.subr.mxu1 %v5704_v34  ;;  %v5740_v15 = vld [vmem:[#allocation10 + $0x18] sm:$0xff] }
 0x64e   :  { %2034 = vmatprep.subr.mxu0 %v1811_v22  ;;  %2110 = vmatpush1.msra.mxu1 %v5707_v37  ;;  %v1859_v22 = vld [vmem:[#allocation5 + $0x11e8] sm:$0xff] }
 0x64f   :  { %2035 = vmatpush1.msra.mxu0 %v1810_v9  ;;  %2111 = vmatprep.subr.mxu1 %v5710_v2  ;;  %v5743_v9 = vld [vmem:[#allocation10 + $0x10] sm:$0xff] }
 0x650   :  { %2036 = vmatprep.subr.mxu0 %v1809_v35  ;;  %2112 = vmatpush1.msra.mxu1 %v5713_v52  ;;  %v1858_v35 = vld [vmem:[#allocation5 + $0x11e0] sm:$0xff] }
 0x651   :  { %2037 = vmatpush1.msra.mxu0 %v1808_v46  ;;  %2113 = vmatprep.subr.mxu1 %v5716_v25  ;;  %v5746_v46 = vld [vmem:[#allocation10 + $0x8] sm:$0xff] }
 0x652   :  { %2038 = vmatprep.subr.mxu0 %v1807_v50  ;;  %2114 = vmatpush1.msra.mxu1 %v5719_v29  ;;  %v1857_v50 = vld [vmem:[#allocation5 + $0x11d8] sm:$0xff] }
 0x653   :  { %2039 = vmatpush1.msra.mxu0 %v1806_v1  ;;  %2115 = vmatprep.subr.mxu1 %v5722_v60  ;;  %v5749_v1 = vld [vmem:[#allocation10] sm:$0xff] }
 0x654   :  { %2040 = vmatprep.subr.mxu0 %v1805_v48  ;;  %2116 = vmatpush1.msra.mxu1 %v5725_v11  ;;  %v1856_v48 = vld [vmem:[#allocation5 + $0x11d0] sm:$0xff] }
 0x655   :  { %2041 = vmatpush1.msra.mxu0 %v1804_v56  ;;  %2117 = vmatprep.subr.mxu1 %v5728_v32  ;;  %v5752_v56 = vld [vmem:[#allocation10 + $0x1f8] sm:$0xff] }
 0x656   :  { %2042 = vmatprep.subr.mxu0 %v1803_v39  ;;  %2118 = vmatpush1.msra.mxu1 %v5731_v26  ;;  %v1855_v39 = vld [vmem:[#allocation5 + $0x11c8] sm:$0xff] }
 0x657   :  { %2043 = vmatpush1.msra.mxu0 %v1802_v58  ;;  %2119 = vmatprep.subr.mxu1 %v5734_v4  ;;  %v5755_v58 = vld [vmem:[#allocation10 + $0x1f0] sm:$0xff] }
 0x658   :  { %2044 = vmatprep.subr.mxu0 %v1801_v7  ;;  %2120 = vmatpush1.msra.mxu1 %v5737_v16  ;;  %v1854_v7 = vld [vmem:[#allocation5 + $0x11c0] sm:$0xff] }
 0x659   :  { %2045 = vmatpush1.msra.mxu0 %v1800_v21  ;;  %2121 = vmatprep.subr.mxu1 %v5740_v15  ;;  %v5758_v21 = vld [vmem:[#allocation10 + $0x1e8] sm:$0xff] }
 0x65a   :  { %2046 = vmatprep.subr.mxu0 %v1799_v54  ;;  %2122 = vmatpush1.msra.mxu1 %v5743_v9  ;;  %v1853_v54 = vld [vmem:[#allocation5 + $0x11b8] sm:$0xff] }
 0x65b   :  { %2047 = vmatpush1.msra.mxu0 %v1798_v43  ;;  %2123 = vmatprep.subr.mxu1 %v5746_v46  ;;  %v5761_v43 = vld [vmem:[#allocation10 + $0x1e0] sm:$0xff] }
 0x65c   :  { %2048 = vmatprep.subr.mxu0 %v1861_v41  ;;  %2124 = vmatpush1.msra.mxu1 %v5749_v1  ;;  %v1852_v41 = vld [vmem:[#allocation5 + $0x11b0] sm:$0xff] }
 0x65d   :  { %2049 = vmatpush2.msra.mxu0 %v1860_v45  ;;  %2125 = vmatprep.subr.mxu1 %v5752_v56  ;;  %v5764_v45 = vld [vmem:[#allocation10 + $0x1d8] sm:$0xff] }
 0x65e   :  { %2050 = vmatprep.subr.mxu0 %v1859_v22  ;;  %2126 = vmatpush2.msra.mxu1 %v5755_v58  ;;  %v1851_v22 = vld [vmem:[#allocation5 + $0x11a8] sm:$0xff] }
 0x65f   :  { %2051 = vmatpush2.msra.mxu0 %v1858_v35  ;;  %2127 = vmatprep.subr.mxu1 %v5758_v21  ;;  %v5767_v35 = vld [vmem:[#allocation10 + $0x1d0] sm:$0xff] }
 0x660   :  { %2052 = vmatprep.subr.mxu0 %v1857_v50  ;;  %2128 = vmatpush2.msra.mxu1 %v5761_v43  ;;  %v1850_v50 = vld [vmem:[#allocation5 + $0x11a0] sm:$0xff] }
 0x661   :  { %2053 = vmatpush2.msra.mxu0 %v1856_v48  ;;  %2129 = vmatprep.subr.mxu1 %v5764_v45  ;;  %v5770_v48 = vld [vmem:[#allocation10 + $0x1c8] sm:$0xff] }
 0x662   :  { %2054 = vmatprep.subr.mxu0 %v1855_v39  ;;  %2130 = vmatpush2.msra.mxu1 %v5767_v35  ;;  %v5773_v39 = vld [vmem:[#allocation10 + $0x1c0] sm:$0xff] }
 0x663   :  { %2055 = vmatpush2.msra.mxu0 %v1854_v7  ;;  %2131 = vmatprep.subr.mxu1 %v5770_v48  ;;  %v5776_v7 = vld [vmem:[#allocation10 + $0x1b8] sm:$0xff] }
 0x664   :  { %2056 = vmatprep.subr.mxu0 %v1853_v54  ;;  %2132 = vmatpush2.msra.mxu1 %v5773_v39  ;;  %v5779_v54 = vld [vmem:[#allocation10 + $0x1b0] sm:$0xff] }
 0x665   :  { %2057 = vmatpush2.msra.mxu0 %v1852_v41  ;;  %2133 = vmatprep.subr.mxu1 %v5776_v7  ;;  %v5782_v41 = vld [vmem:[#allocation10 + $0x1a8] sm:$0xff] }
 0x666   :  { %2058 = vmatprep.subr.mxu0 %v1851_v22  ;;  %2134 = vmatpush2.msra.mxu1 %v5779_v54  ;;  %v5785_v22 = vld [vmem:[#allocation10 + $0x1a0] sm:$0xff] }
 0x667   :  { %2059 = vmatpush2.msra.mxu0 %v1850_v50  ;;  %2135 = vmatprep.subr.mxu1 %v5782_v41  ;;  %v5788_v50 = vld [vmem:[#allocation10 + $0x198] sm:$0xff] }
 0x668   :  { %2060 = vmatprep.subr.mxu0 %v1849_v40  ;;  %2136 = vmatpush2.msra.mxu1 %v5785_v22  ;;  %v5791_v40 = vld [vmem:[#allocation10 + $0x190] sm:$0xff] }
 0x669   :  { %2061 = vmatpush2.msra.mxu0 %v1848_v33  ;;  %2137 = vmatprep.subr.mxu1 %v5788_v50  ;;  %v5794_v33 = vld [vmem:[#allocation10 + $0x188] sm:$0xff] }
 0x66a   :  { %2062 = vmatprep.subr.mxu0 %v1847_v28  ;;  %2138 = vmatpush2.msra.mxu1 %v5791_v40  ;;  %v5797_v28 = vld [vmem:[#allocation10 + $0x180] sm:$0xff] }
 0x66b   :  { %2063 = vmatpush2.msra.mxu0 %v1846_v20  ;;  %2139 = vmatprep.subr.mxu1 %v5794_v33  ;;  %7138 = vst [vmem:[#allocation25_spill] sm:$0xff] %v5797_v28  ;;  %v5800_v20 = vld [vmem:[#allocation10 + $0x178] sm:$0xff] }
 0x66c   :  { %2064 = vmatprep.subr.mxu0 %v1845_v18  ;;  %2140 = vmatpush2.msra.mxu1 %v5797_v28  ;;  %7139 = vst [vmem:[#allocation26_spill] sm:$0xff] %v5800_v20  ;;  %v5803_v18 = vld [vmem:[#allocation10 + $0x170] sm:$0xff]  ;;  %v1837_v28 = vld [vmem:[#allocation5 + $0x1138] sm:$0xff] }
 0x66d   :  { %2065 = vmatpush2.msra.mxu0 %v1844_v13  ;;  %2141 = vmatprep.subr.mxu1 %v5800_v20  ;;  %7140 = vst [vmem:[#allocation27_spill] sm:$0xff] %v5803_v18  ;;  %v5806_v13 = vld [vmem:[#allocation10 + $0x168] sm:$0xff]  ;;  %v1836_v20 = vld [vmem:[#allocation5 + $0x1130] sm:$0xff] }
 0x66e   :  { %2066 = vmatprep.subr.mxu0 %v1843_v12  ;;  %2142 = vmatpush2.msra.mxu1 %v5803_v18  ;;  %7141 = vst [vmem:[#allocation28_spill] sm:$0xff] %v5806_v13  ;;  %v5809_v12 = vld [vmem:[#allocation10 + $0x160] sm:$0xff]  ;;  %v1835_v18 = vld [vmem:[#allocation5 + $0x1128] sm:$0xff] }
 0x66f   :  { %2067 = vmatpush2.msra.mxu0 %v1842_v17  ;;  %2143 = vmatprep.subr.mxu1 %v5806_v13  ;;  %7142 = vst [vmem:[#allocation29_spill] sm:$0xff] %v5809_v12  ;;  %v5812_v17 = vld [vmem:[#allocation10 + $0x158] sm:$0xff]  ;;  %v1834_v13 = vld [vmem:[#allocation5 + $0x1120] sm:$0xff] }
 0x670   :  { %2068 = vmatprep.subr.mxu0 %v1841_v59  ;;  %2144 = vmatpush2.msra.mxu1 %v5809_v12  ;;  %7143 = vst [vmem:[#allocation30_spill] sm:$0xff] %v5812_v17  ;;  %v5815_v59 = vld [vmem:[#allocation10 + $0x150] sm:$0xff]  ;;  %v1833_v12 = vld [vmem:[#allocation5 + $0x1118] sm:$0xff] }
 0x671   :  { %2069 = vmatpush2.msra.mxu0 %v1840_v62  ;;  %2145 = vmatprep.subr.mxu1 %v5812_v17  ;;  %7144 = vst [vmem:[#allocation31_spill] sm:$0xff] %v5815_v59  ;;  %v5818_v62 = vld [vmem:[#allocation10 + $0x148] sm:$0xff]  ;;  %v1832_v17 = vld [vmem:[#allocation5 + $0x1110] sm:$0xff] }
 0x672   :  { %2070 = vmatprep.subr.mxu0 %v1839_v49  ;;  %2146 = vmatpush2.msra.mxu1 %v5815_v59  ;;  %7145 = vst [vmem:[#allocation32_spill] sm:$0xff] %v5818_v62  ;;  %v5821_v49 = vld [vmem:[#allocation10 + $0x140] sm:$0xff]  ;;  %v1831_v59 = vld [vmem:[#allocation5 + $0x1108] sm:$0xff] }
 0x673   :  { %2071 = vmatpush2.msra.mxu0 %v1838_v3  ;;  %2147 = vmatprep.subr.mxu1 %v5818_v62  ;;  %7146 = vst [vmem:[#allocation33_spill] sm:$0xff] %v5821_v49  ;;  %v5824_v3 = vld [vmem:[#allocation10 + $0x138] sm:$0xff]  ;;  %v1830_v62 = vld [vmem:[#allocation5 + $0x1100] sm:$0xff] }
 0x674   :  { %2072 = vmatprep.subr.mxu0 %v1837_v28  ;;  %2148 = vmatpush2.msra.mxu1 %v5821_v49  ;;  %v5827_v28 = vld [vmem:[#allocation10 + $0x130] sm:$0xff]  ;;  %v5833_v49 = vld [vmem:[#allocation10 + $0x120] sm:$0xff] }
 0x675   :  { %2073 = vmatpush2.msra.mxu0 %v1836_v20  ;;  %2149 = vmatprep.subr.mxu1 %v5824_v3  ;;  %v5830_v20 = vld [vmem:[#allocation10 + $0x128] sm:$0xff] }
 0x676   :  { %2074 = vmatprep.subr.mxu0 %v1835_v18  ;;  %2150 = vmatpush2.msra.mxu1 %v5827_v28  ;;  %v5836_v18 = vld [vmem:[#allocation10 + $0x118] sm:$0xff] }
 0x677   :  { %2075 = vmatpush2.msra.mxu0 %v1834_v13  ;;  %2151 = vmatprep.subr.mxu1 %v5830_v20  ;;  %v5839_v13 = vld [vmem:[#allocation10 + $0x110] sm:$0xff] }
 0x678   :  { %2076 = vmatprep.subr.mxu0 %v1833_v12  ;;  %2152 = vmatpush2.msra.mxu1 %v5833_v49  ;;  %7147 = vst [vmem:[#allocation34_spill] sm:$0xff] %v5839_v13  ;;  %v7148_v12 = vsel %vm5101_vm2, %v5621_v63, %v5624_v5  ;;  %v7150_v63 = vsel %vm5114_vm3, %v5634_v8, %v5637_v14  ;;  %v7153_v5 = vld [vmem:[#allocation27_spill] sm:$0xff]  ;;  %v7155_v8 = vld [vmem:[#allocation29_spill] sm:$0xff]  ;;  %v7156_v14 = vld [vmem:[#allocation30_spill] sm:$0xff] }
 0x679   :  { %2077 = vmatpush2.msra.mxu0 %v1832_v17  ;;  %2153 = vmatprep.subr.mxu1 %v5836_v18  ;;  %v5847_v17 = vld [vmem:[#allocation10 + $0x108] sm:$0xff] }
 0x67a   :  { %2078 = vmatprep.subr.mxu0 %v1831_v59  ;;  %2154 = vmatpush2.msra.mxu1 %v5839_v13  ;;  %v7149_v59 = vsel %vm5114_vm3, %v5613_v61, %v5616_v19  ;;  %v5858_v13 = vld [vmem:[#allocation10 + $0xf8] sm:$0xff]  ;;  %v7151_v61 = vld [vmem:[#allocation25_spill] sm:$0xff]  ;;  %v7152_v19 = vld [vmem:[#allocation26_spill] sm:$0xff] }
 0x67b   :  { %2079 = vmatpush2.msra.mxu0 %v1830_v62  ;;  %2155 = vmatprep.subr.mxu1 %v5847_v17  ;;  %v5855_v62 = vld [vmem:[#allocation10 + $0x100] sm:$0xff] }
 0x67c   :  { %2081 = vmatmul.mubr.f32.vlgmr.msra.gmra.mxu0 %v7148_v12  ;;  %2156 = vmatpush2.msra.mxu1 %v5855_v62 }
 0x67d   :  { %2086 = vmatprep.mubr.f32.mxu0 %v7149_v59  ;;  %2194 = vmatprep.subr.mxu0 %v5858_v13 }
 0x67e   :  { %2195 = vmatpush1.msra.mxu0 %v5626_v6  ;;  %v7154_v6 = vld [vmem:[#allocation28_spill] sm:$0xff] }
 0x67f   :  { %2196 = vmatprep.subr.mxu0 %v5656_v53  ;;  %v7157_v53 = vld [vmem:[#allocation31_spill] sm:$0xff] }
 0x680   :  { %2087 = vmatmul.mubr.f32.gmra.mxu0 %v7150_v63 }
 0x681   :  { %2197 = vmatpush1.msra.mxu0 %v5663_v0  ;;  %v7158_v0 = vld [vmem:[#allocation32_spill] sm:$0xff] }
 0x682   :  { %2198 = vmatprep.subr.mxu0 %v5668_v24  ;;  %v7159_v24 = vld [vmem:[#allocation33_spill] sm:$0xff] }
 0x683   :  { %2199 = vmatpush1.msra.mxu0 %v5671_v30  ;;  %v7160_v30 = vld [vmem:[#allocation34_spill] sm:$0xff] }
 0x684   :  { %2200 = vmatprep.subr.mxu0 %v5674_v38 }
 0x685   :  { %2201 = vmatpush1.msra.mxu0 %v5677_v57 }
 0x686   :  { %2202 = vmatprep.subr.mxu0 %v5680_v44 }
 0x687   :  { %2203 = vmatpush1.msra.mxu0 %v5683_v47 }
 0x688   :  { %2204 = vmatprep.subr.mxu0 %v5686_v27 }
 0x689   :  { %2205 = vmatpush1.msra.mxu0 %v5689_v10 }
 0x68a   :  { %2206 = vmatprep.subr.mxu0 %v5692_v36 }
 0x68b   :  { %2207 = vmatpush1.msra.mxu0 %v5695_v23 }
 0x68c   :  { %2208 = vmatprep.subr.mxu0 %v5698_v31 }
 0x68d   :  { %2209 = vmatpush1.msra.mxu0 %v5701_v42 }
 0x68e   :  { %2210 = vmatprep.subr.mxu0 %v5704_v34 }
 0x68f   :  { %2211 = vmatpush1.msra.mxu0 %v5707_v37 }
 0x690   :  { %2212 = vmatprep.subr.mxu0 %v5710_v2 }
 0x691   :  { %2213 = vmatpush1.msra.mxu0 %v5713_v52 }
 0x692   :  { %2214 = vmatprep.subr.mxu0 %v5716_v25 }
 0x693   :  { %2215 = vmatpush1.msra.mxu0 %v5719_v29 }
 0x694   :  { %2216 = vmatprep.subr.mxu0 %v5722_v60 }
 0x695   :  { %2217 = vmatpush1.msra.mxu0 %v5725_v11 }
 0x696   :  { %2218 = vmatprep.subr.mxu0 %v5728_v32 }
 0x697   :  { %2219 = vmatpush1.msra.mxu0 %v5731_v26 }
 0x698   :  { %2220 = vmatprep.subr.mxu0 %v5734_v4  ;;  %v2484_v4 = vld [vmem:[#allocation5 + $0x14f8] sm:$0xff] }
 0x699   :  { %2221 = vmatpush1.msra.mxu0 %v5737_v16  ;;  %v2420_v16 = vld [vmem:[#allocation5 + $0x12f8] sm:$0xff] }
 0x69a   :  { %2222 = vmatprep.subr.mxu0 %v5740_v15  ;;  %v2419_v15 = vld [vmem:[#allocation5 + $0x12f0] sm:$0xff]  ;;  %2581 = vmatprep.subr.mxu1 %v2420_v16  ;;  %v2466_v16 = vld [vmem:[#allocation5 + $0x1468] sm:$0xff] }
 0x69b   :  { %2223 = vmatpush1.msra.mxu0 %v5743_v9  ;;  %v2418_v9 = vld [vmem:[#allocation5 + $0x12e8] sm:$0xff] }
 0x69c   :  { %2224 = vmatprep.subr.mxu0 %v5746_v46  ;;  %v2417_v46 = vld [vmem:[#allocation5 + $0x12e0] sm:$0xff] }
 0x69d   :  { %2225 = vmatpush1.msra.mxu0 %v5749_v1  ;;  %v2416_v1 = vld [vmem:[#allocation5 + $0x12d8] sm:$0xff] }
 0x69e   :  { %2226 = vmatprep.subr.mxu0 %v5752_v56 }
 0x69f   :  { %2227 = vmatpush2.msra.mxu0 %v5755_v58 }
 0x6a0   :  { %2228 = vmatprep.subr.mxu0 %v5758_v21 }
 0x6a1   :  { %2229 = vmatpush2.msra.mxu0 %v5761_v43 }
 0x6a2   :  { %2230 = vmatprep.subr.mxu0 %v5764_v45 }
 0x6a3   :  { %2231 = vmatpush2.msra.mxu0 %v5767_v35 }
 0x6a4   :  { %2232 = vmatprep.subr.mxu0 %v5770_v48 }
 0x6a5   :  { %2233 = vmatpush2.msra.mxu0 %v5773_v39 }
 0x6a6   :  { %2234 = vmatprep.subr.mxu0 %v5776_v7 }
 0x6a7   :  { %2235 = vmatpush2.msra.mxu0 %v5779_v54 }
 0x6a8   :  { %2236 = vmatprep.subr.mxu0 %v5782_v41 }
 0x6a9   :  { %2237 = vmatpush2.msra.mxu0 %v5785_v22 }
 0x6aa   :  { %2238 = vmatprep.subr.mxu0 %v5788_v50 }
 0x6ab   :  { %2239 = vmatpush2.msra.mxu0 %v5791_v40 }
 0x6ac   :  { %2240 = vmatprep.subr.mxu0 %v5794_v33 }
 0x6ad   :  { %2241 = vmatpush2.msra.mxu0 %v7151_v61 }
 0x6ae   :  { %2242 = vmatprep.subr.mxu0 %v7152_v19  ;;  %v2483_v19 = vld [vmem:[#allocation5 + $0x14f0] sm:$0xff] }
 0x6af   :  { %2243 = vmatpush2.msra.mxu0 %v7153_v5 }
 0x6b0   :  { %2244 = vmatprep.subr.mxu0 %v7154_v6  ;;  %v2482_v6 = vld [vmem:[#allocation5 + $0x14e8] sm:$0xff] }
 0x6b1   :  { %2245 = vmatpush2.msra.mxu0 %v7155_v8  ;;  %v2481_v8 = vld [vmem:[#allocation5 + $0x14e0] sm:$0xff] }
 0x6b2   :  { %2246 = vmatprep.subr.mxu0 %v7156_v14  ;;  %v2480_v14 = vld [vmem:[#allocation5 + $0x14d8] sm:$0xff] }
 0x6b3   :  { %2247 = vmatpush2.msra.mxu0 %v7157_v53 }
 0x6b4   :  { %2248 = vmatprep.subr.mxu0 %v7158_v0  ;;  %v2479_v0 = vld [vmem:[#allocation5 + $0x14d0] sm:$0xff] }
 0x6b5   :  { %2249 = vmatpush2.msra.mxu0 %v7159_v24  ;;  %v2478_v24 = vld [vmem:[#allocation5 + $0x14c8] sm:$0xff] }
 0x6b6   :  { %2250 = vmatprep.subr.mxu0 %v5824_v3 }
 0x6b7   :  { %2251 = vmatpush2.msra.mxu0 %v5827_v28 }
 0x6b8   :  { %2252 = vmatprep.subr.mxu0 %v5830_v20 }
 0x6b9   :  { %2253 = vmatpush2.msra.mxu0 %v5833_v49 }
 0x6ba   :  { %2254 = vmatprep.subr.mxu0 %v5836_v18 }
 0x6bb   :  { %2255 = vmatpush2.msra.mxu0 %v7160_v30  ;;  %v2477_v30 = vld [vmem:[#allocation5 + $0x14c0] sm:$0xff] }
 0x6bc   :  { %2256 = vmatprep.subr.mxu0 %v5847_v17 }
 0x6bd   :  { %2257 = vmatpush2.msra.mxu0 %v5855_v62 }
 0x6be   :  { %2658 = vmatprep.subr.mxu0 %v2484_v4  ;;  %v2405_v4 = vld [vmem:[#allocation5 + $0x1280] sm:$0xff] }
 0x6f8   :  { %v2005_v44 = vpop.f32.mrf.mxu1 }
 0x6fa   :  { %v2007_v27 = vpop.f32.mrf.mxu1 }
 0x6fc   :  { %v1928_v38 = vpop.f32.mrf.mxu0  ;;  %v2011_v36 = vpop.f32.mrf.mxu1 }
 0x6fd   :  { %v2006_v42 = vadd.f32 %v2005_v44, %v1928_v38  ;;  %v2415_v38 = vld [vmem:[#allocation5 + $0x12d0] sm:$0xff]  ;;  %v2414_v44 = vld [vmem:[#allocation5 + $0x12c8] sm:$0xff] }
 0x6fe   :  { %v1930_v57 = vpop.f32.mrf.mxu0  ;;  %v2013_v2 = vpop.f32.mrf.mxu1 }
 0x6ff   :  { %v2008_v31 = vadd.f32 %v2007_v27, %v1930_v57  ;;  %v2476_v57 = vld [vmem:[#allocation5 + $0x14b8] sm:$0xff]  ;;  %v2413_v27 = vld [vmem:[#allocation5 + $0x12c0] sm:$0xff] }
 0x700   :  { %v1934_v47 = vpop.f32.mrf.mxu0 }
 0x701   :  { %v2012_v60 = vadd.f32 %v2011_v36, %v1934_v47  ;;  %v2475_v47 = vld [vmem:[#allocation5 + $0x14b0] sm:$0xff]  ;;  %v2412_v36 = vld [vmem:[#allocation5 + $0x12b8] sm:$0xff] }
 0x702   :  { %v1936_v10 = vpop.f32.mrf.mxu0 }
 0x703   :  { %v2014_v29 = vadd.f32 %v2013_v2, %v1936_v10  ;;  %v2474_v10 = vld [vmem:[#allocation5 + $0x14a8] sm:$0xff]  ;;  %v2409_v2 = vld [vmem:[#allocation5 + $0x12a0] sm:$0xff] }
 0x73c   :  { %v2082_v23 = vpop.f32.mrf.mxu0 }
 0x73d   :  { %v2083_v52 = vadd.f32 %v2082_v23, %v2006_v42  ;;  %v2473_v23 = vld [vmem:[#allocation5 + $0x14a0] sm:$0xff]  ;;  %v2472_v42 = vld [vmem:[#allocation5 + $0x1498] sm:$0xff] }
 0x73e   :  { %v2084_v34 = vpop.f32.mrf.mxu0 }
 0x73f   :  { %v2085_v37 = vadd.f32 %v2084_v34, %v2008_v31  ;;  %v2411_v31 = vld [vmem:[#allocation5 + $0x12b0] sm:$0xff]  ;;  %v2410_v34 = vld [vmem:[#allocation5 + $0x12a8] sm:$0xff] }
 0x740   :  { %v2088_v25 = vpop.f32.mrf.mxu0 }
 0x741   :  { %2157 = vmatprep.mubr.f32.mxu1 %v2085_v37  ;;  %v2089_v26 = vadd.f32 %v2088_v25, %v2012_v60  ;;  %v2408_v25 = vld [vmem:[#allocation5 + $0x1298] sm:$0xff]  ;;  %v2407_v60 = vld [vmem:[#allocation5 + $0x1290] sm:$0xff] }
 0x742   :  { %v2090_v11 = vpop.f32.mrf.mxu0  ;;  %2158 = vmatmul.mubr.f32.vlgmr.msra.gmra.mxu1 %v2083_v52 }
 0x743   :  { %v2091_v32 = vadd.f32 %v2090_v11, %v2014_v29  ;;  %2582 = vmatpush1.msra.mxu1 %v2419_v15  ;;  %v2469_v29 = vld [vmem:[#allocation5 + $0x1480] sm:$0xff]  ;;  %v2468_v11 = vld [vmem:[#allocation5 + $0x1478] sm:$0xff] }
 0x744   :  { %2583 = vmatprep.subr.mxu1 %v2418_v9  ;;  %v2404_v15 = vld [vmem:[#allocation5 + $0x1278] sm:$0xff]  ;;  %v2465_v9 = vld [vmem:[#allocation5 + $0x1460] sm:$0xff] }
 0x745   :  { %2163 = vmatprep.mubr.f32.mxu1 %v2091_v32  ;;  %2584 = vmatpush1.msra.mxu1 %v2417_v46  ;;  %v2403_v46 = vld [vmem:[#allocation5 + $0x1270] sm:$0xff] }
 0x746   :  { %2164 = vmatmul.mubr.f32.gmra.mxu1 %v2089_v26  ;;  %2585 = vmatprep.subr.mxu1 %v2416_v1  ;;  %v2464_v1 = vld [vmem:[#allocation5 + $0x1458] sm:$0xff] }
 0x747   :  { %2586 = vmatpush1.msra.mxu1 %v2415_v38  ;;  %v2512_v38 = vld [vmem:[#allocation5 + $0x15d8] sm:$0xff] }
 0x748   :  { %2587 = vmatprep.subr.mxu1 %v2414_v44  ;;  %v2511_v44 = vld [vmem:[#allocation5 + $0x15d0] sm:$0xff] }
 0x749   :  { %2588 = vmatpush1.msra.mxu1 %v2413_v27  ;;  %v2510_v27 = vld [vmem:[#allocation5 + $0x15c8] sm:$0xff] }
 0x74a   :  { %2589 = vmatprep.subr.mxu1 %v2412_v36  ;;  %v2509_v36 = vld [vmem:[#allocation5 + $0x15c0] sm:$0xff] }
 0x74b   :  { %2590 = vmatpush1.msra.mxu1 %v2411_v31  ;;  %v2508_v31 = vld [vmem:[#allocation5 + $0x15b8] sm:$0xff] }
 0x74c   :  { %2591 = vmatprep.subr.mxu1 %v2410_v34  ;;  %v2507_v34 = vld [vmem:[#allocation5 + $0x15b0] sm:$0xff] }
 0x74d   :  { %2592 = vmatpush1.msra.mxu1 %v2409_v2  ;;  %v2506_v2 = vld [vmem:[#allocation5 + $0x15a8] sm:$0xff] }
 0x74e   :  { %2593 = vmatprep.subr.mxu1 %v2408_v25  ;;  %v2505_v25 = vld [vmem:[#allocation5 + $0x15a0] sm:$0xff] }
 0x74f   :  { %2594 = vmatpush1.msra.mxu1 %v2407_v60  ;;  %v2504_v60 = vld [vmem:[#allocation5 + $0x1598] sm:$0xff] }
 0x802   :  { %v2159_v56 = vpop.f32.mrf.mxu1 }
 0x804   :  { %v2161_v58 = vpop.f32.mrf.mxu1 }
 0x806   :  { %v2165_v21 = vpop.f32.mrf.mxu1 }
 0x807   :  { %v2170_v43 = vadd.f32 %v2165_v21, %v2159_v56  ;;  %v2402_v56 = vld [vmem:[#allocation5 + $0x1268] sm:$0xff]  ;;  %v2401_v21 = vld [vmem:[#allocation5 + $0x1260] sm:$0xff] }
 0x808   :  { %v2167_v45 = vpop.f32.mrf.mxu1 }
 0x809   :  { %v2171_v35 = vrot.slane %v2170_v43, 4  ;;  %v2177_v48 = vadd.f32 %v2167_v45, %v2161_v58  ;;  %v2463_v58 = vld [vmem:[#allocation5 + $0x1450] sm:$0xff]  ;;  %v2400_v45 = vld [vmem:[#allocation5 + $0x1258] sm:$0xff] }
 0x80b   :  { %v2172_v39 = vadd.f32 %v2171_v35, %v2170_v43  ;;  %v2178_v7 = vrot.slane %v2177_v48, 4  ;;  %v2462_v43 = vld [vmem:[#allocation5 + $0x1448] sm:$0xff]  ;;  %v2461_v35 = vld [vmem:[#allocation5 + $0x1440] sm:$0xff] }
 0x80d   :  { %v2173_v54 = vrot.slane %v2172_v39, 2  ;;  %v2179_v41 = vadd.f32 %v2178_v7, %v2177_v48  ;;  %v2399_v48 = vld [vmem:[#allocation5 + $0x1250] sm:$0xff]  ;;  %v2398_v7 = vld [vmem:[#allocation5 + $0x1248] sm:$0xff] }
 0x80f   :  { %v2174_v22 = vadd.f32 %v2173_v54, %v2172_v39  ;;  %v2180_v50 = vrot.slane %v2179_v41, 2  ;;  %v2460_v39 = vld [vmem:[#allocation5 + $0x1438] sm:$0xff]  ;;  %v2459_v54 = vld [vmem:[#allocation5 + $0x1430] sm:$0xff] }
 0x811   :  { %v2175_v40 = vrot.slane %v2174_v22, 1  ;;  %v2181_v33 = vadd.f32 %v2180_v50, %v2179_v41  ;;  %v2397_v41 = vld [vmem:[#allocation5 + $0x1240] sm:$0xff]  ;;  %v2396_v50 = vld [vmem:[#allocation5 + $0x1238] sm:$0xff] }
 0x813   :  { %v2176_v49 = vadd.f32 %v2175_v40, %v2174_v22  ;;  %v2182_v3 = vrot.slane %v2181_v33, 1  ;;  %v2458_v22 = vld [vmem:[#allocation5 + $0x1428] sm:$0xff]  ;;  %v2457_v40 = vld [vmem:[#allocation5 + $0x1420] sm:$0xff] }
 0x815   :  { %v2184_v28 = vmul.f32 0.0078125, %v2176_v49  ;;  %v2183_v20 = vadd.f32 %v2182_v3, %v2181_v33  ;;  %v2395_v33 = vld [vmem:[#allocation5 + $0x1230] sm:$0xff]  ;;  %v2456_v49 = vld [vmem:[#allocation5 + $0x1418] sm:$0xff]  ;;  %v2394_v3 = vld [vmem:[#allocation5 + $0x1228] sm:$0xff] }
 0x817   :  { %v2185_v18 = vmul.f32 0.0078125, %v2183_v20  ;;  %v5929_v12 = vsub.f32 %v2083_v52, %v2184_v28  ;;  %v5939_v61 = vsub.f32 %v2089_v26, %v2184_v28  ;;  %v2470_v52 = vld [vmem:[#allocation5 + $0x1488] sm:$0xff]  ;;  %v2467_v26 = vld [vmem:[#allocation5 + $0x1470] sm:$0xff]  ;;  %v2393_v20 = vld [vmem:[#allocation5 + $0x1220] sm:$0xff] }
 0x818   :  { %v2455_v28 = vld [vmem:[#allocation5 + $0x1410] sm:$0xff] }
 0x819   :  { %v5931_v17 = vsub.f32 %v2085_v37, %v2185_v18  ;;  %v5933_v59 = vsub.f32 %v2091_v32, %v2185_v18  ;;  %v2190_v63 = vmul.f32 %v5929_v12, %v5929_v12  ;;  %v2192_v53 = vmul.f32 %v5939_v61, %v5939_v61  ;;  %v2471_v37 = vld [vmem:[#allocation5 + $0x1490] sm:$0xff]  ;;  %v2406_v32 = vld [vmem:[#allocation5 + $0x1288] sm:$0xff] }
 0x81a   :  { %2595 = vmatprep.subr.mxu1 %v2406_v32  ;;  %v2454_v18 = vld [vmem:[#allocation5 + $0x1408] sm:$0xff]  ;;  %v2503_v32 = vld [vmem:[#allocation5 + $0x1590] sm:$0xff] }
 0x81b   :  { %v2191_v62 = vmul.f32 %v5931_v17, %v5931_v17  ;;  %v2193_v5 = vmul.f32 %v5933_v59, %v5933_v59  ;;  %2596 = vmatpush1.msra.mxu1 %v2405_v4  ;;  %v2502_v4 = vld [vmem:[#allocation5 + $0x1588] sm:$0xff] }
 0x81c   :  { %2597 = vmatprep.subr.mxu1 %v2404_v15  ;;  %v2501_v15 = vld [vmem:[#allocation5 + $0x1580] sm:$0xff] }
 0x81d   :  { %2258 = vmatprep.mubr.f32.mxu0 %v2191_v62  ;;  %2598 = vmatpush1.msra.mxu1 %v2403_v46  ;;  %v2392_v62 = vld [vmem:[#allocation5 + $0x1218] sm:$0xff] }
 0x81e   :  { %2259 = vmatmul.mubr.f32.vlgmr.msra.gmra.mxu0 %v2190_v63  ;;  %2599 = vmatprep.subr.mxu1 %v2402_v56  ;;  %v2453_v63 = vld [vmem:[#allocation5 + $0x1400] sm:$0xff]  ;;  %v2500_v46 = vld [vmem:[#allocation5 + $0x1578] sm:$0xff]  ;;  %v2499_v56 = vld [vmem:[#allocation5 + $0x1570] sm:$0xff] }
 0x81f   :  { %2264 = vmatprep.mubr.f32.mxu0 %v2193_v5  ;;  %2659 = vmatpush1.msra.mxu0 %v2483_v19  ;;  %v2391_v19 = vld [vmem:[#allocation5 + $0x1210] sm:$0xff]  ;;  %v2516_v5 = vld [vmem:[#allocation5 + $0x15f8] sm:$0xff] }
 0x820   :  { %2660 = vmatprep.subr.mxu0 %v2482_v6  ;;  %2600 = vmatpush1.msra.mxu1 %v2401_v21  ;;  %v2390_v6 = vld [vmem:[#allocation5 + $0x1208] sm:$0xff] }
 0x821   :  { %2661 = vmatpush1.msra.mxu0 %v2481_v8  ;;  %2601 = vmatprep.subr.mxu1 %v2400_v45  ;;  %v2515_v8 = vld [vmem:[#allocation5 + $0x15f0] sm:$0xff]  ;;  %v2498_v21 = vld [vmem:[#allocation5 + $0x1568] sm:$0xff]  ;;  %v2497_v45 = vld [vmem:[#allocation5 + $0x1560] sm:$0xff] }
 0x822   :  { %2265 = vmatmul.mubr.f32.gmra.mxu0 %v2192_v53  ;;  %2662 = vmatprep.subr.mxu0 %v2480_v14  ;;  %v2389_v14 = vld [vmem:[#allocation5 + $0x1200] sm:$0xff]  ;;  %v2514_v53 = vld [vmem:[#allocation5 + $0x15e8] sm:$0xff] }
 0x823   :  { %2663 = vmatpush1.msra.mxu0 %v2479_v0  ;;  %2602 = vmatpush1.msra.mxu1 %v2399_v48  ;;  %v2452_v0 = vld [vmem:[#allocation5 + $0x13f8] sm:$0xff] }
 0x824   :  { %2664 = vmatprep.subr.mxu0 %v2478_v24  ;;  %2603 = vmatprep.subr.mxu1 %v2398_v7  ;;  %v2513_v24 = vld [vmem:[#allocation5 + $0x15e0] sm:$0xff]  ;;  %v2496_v48 = vld [vmem:[#allocation5 + $0x1558] sm:$0xff]  ;;  %v2495_v7 = vld [vmem:[#allocation5 + $0x1550] sm:$0xff] }
 0x825   :  { %2665 = vmatpush1.msra.mxu0 %v2477_v30  ;;  %2604 = vmatpush1.msra.mxu1 %v2397_v41  ;;  %v2451_v30 = vld [vmem:[#allocation5 + $0x13f0] sm:$0xff]  ;;  %v2494_v41 = vld [vmem:[#allocation5 + $0x1548] sm:$0xff] }
 0x826   :  { %2666 = vmatprep.subr.mxu0 %v2476_v57  ;;  %2605 = vmatprep.subr.mxu1 %v2396_v50  ;;  %v2450_v57 = vld [vmem:[#allocation5 + $0x13e8] sm:$0xff]  ;;  %v2493_v50 = vld [vmem:[#allocation5 + $0x1540] sm:$0xff] }
 0x827   :  { %2667 = vmatpush1.msra.mxu0 %v2475_v47  ;;  %2606 = vmatpush1.msra.mxu1 %v2395_v33  ;;  %v2449_v47 = vld [vmem:[#allocation5 + $0x13e0] sm:$0xff]  ;;  %v2492_v33 = vld [vmem:[#allocation5 + $0x1538] sm:$0xff] }
 0x828   :  { %2668 = vmatprep.subr.mxu0 %v2474_v10  ;;  %2607 = vmatprep.subr.mxu1 %v2394_v3  ;;  %v2448_v10 = vld [vmem:[#allocation5 + $0x13d8] sm:$0xff]  ;;  %v2491_v3 = vld [vmem:[#allocation5 + $0x1530] sm:$0xff] }
 0x829   :  { %2669 = vmatpush1.msra.mxu0 %v2473_v23  ;;  %2608 = vmatpush1.msra.mxu1 %v2393_v20  ;;  %v2447_v23 = vld [vmem:[#allocation5 + $0x13d0] sm:$0xff]  ;;  %v2490_v20 = vld [vmem:[#allocation5 + $0x1528] sm:$0xff] }
 0x82a   :  { %2670 = vmatprep.subr.mxu0 %v2472_v42  ;;  %2609 = vmatprep.subr.mxu1 %v2392_v62  ;;  %v2446_v42 = vld [vmem:[#allocation5 + $0x13c8] sm:$0xff]  ;;  %v2489_v62 = vld [vmem:[#allocation5 + $0x1520] sm:$0xff] }
 0x82b   :  { %2671 = vmatpush1.msra.mxu0 %v2471_v37  ;;  %2610 = vmatpush1.msra.mxu1 %v2391_v19  ;;  %v2445_v37 = vld [vmem:[#allocation5 + $0x13c0] sm:$0xff]  ;;  %v2488_v19 = vld [vmem:[#allocation5 + $0x1518] sm:$0xff] }
 0x82c   :  { %2672 = vmatprep.subr.mxu0 %v2470_v52  ;;  %2611 = vmatprep.subr.mxu1 %v2390_v6  ;;  %v2444_v52 = vld [vmem:[#allocation5 + $0x13b8] sm:$0xff]  ;;  %v2487_v6 = vld [vmem:[#allocation5 + $0x1510] sm:$0xff] }
 0x82d   :  { %2673 = vmatpush1.msra.mxu0 %v2469_v29  ;;  %2612 = vmatpush1.msra.mxu1 %v2389_v14  ;;  %v2443_v29 = vld [vmem:[#allocation5 + $0x13b0] sm:$0xff]  ;;  %v2486_v14 = vld [vmem:[#allocation5 + $0x1508] sm:$0xff] }
 0x82e   :  { %2674 = vmatprep.subr.mxu0 %v2468_v11  ;;  %2613 = vmatprep.subr.mxu1 %v2452_v0  ;;  %v2442_v11 = vld [vmem:[#allocation5 + $0x13a8] sm:$0xff]  ;;  %v2485_v0 = vld [vmem:[#allocation5 + $0x1500] sm:$0xff] }
 0x82f   :  { %2675 = vmatpush1.msra.mxu0 %v2467_v26  ;;  %2614 = vmatpush2.msra.mxu1 %v2451_v30  ;;  %v2441_v26 = vld [vmem:[#allocation5 + $0x13a0] sm:$0xff]  ;;  %v2422_v30 = vld [vmem:[#allocation5 + $0x1308] sm:$0xff] }
 0x830   :  { %2676 = vmatprep.subr.mxu0 %v2466_v16  ;;  %2615 = vmatprep.subr.mxu1 %v2450_v57  ;;  %v2440_v16 = vld [vmem:[#allocation5 + $0x1398] sm:$0xff] }
 0x831   :  { %2677 = vmatpush1.msra.mxu0 %v2465_v9  ;;  %2616 = vmatpush2.msra.mxu1 %v2449_v47  ;;  %v2439_v9 = vld [vmem:[#allocation5 + $0x1390] sm:$0xff]  ;;  %v2548_v57 = vld [vmem:[#allocation5 + $0x16f8] sm:$0xff] }
 0x832   :  { %2678 = vmatprep.subr.mxu0 %v2464_v1  ;;  %2617 = vmatprep.subr.mxu1 %v2448_v10  ;;  %v2438_v1 = vld [vmem:[#allocation5 + $0x1388] sm:$0xff] }
 0x833   :  { %2679 = vmatpush1.msra.mxu0 %v2463_v58  ;;  %2618 = vmatpush2.msra.mxu1 %v2447_v23  ;;  %v2437_v58 = vld [vmem:[#allocation5 + $0x1380] sm:$0xff] }
 0x834   :  { %2680 = vmatprep.subr.mxu0 %v2462_v43  ;;  %2619 = vmatprep.subr.mxu1 %v2446_v42  ;;  %v2436_v43 = vld [vmem:[#allocation5 + $0x1378] sm:$0xff] }
 0x835   :  { %2681 = vmatpush1.msra.mxu0 %v2461_v35  ;;  %2620 = vmatpush2.msra.mxu1 %v2445_v37  ;;  %v2435_v35 = vld [vmem:[#allocation5 + $0x1370] sm:$0xff] }
 0x836   :  { %2682 = vmatprep.subr.mxu0 %v2460_v39  ;;  %2621 = vmatprep.subr.mxu1 %v2444_v52  ;;  %v2434_v39 = vld [vmem:[#allocation5 + $0x1368] sm:$0xff] }
 0x837   :  { %2683 = vmatpush1.msra.mxu0 %v2459_v54  ;;  %2622 = vmatpush2.msra.mxu1 %v2443_v29  ;;  %v2433_v54 = vld [vmem:[#allocation5 + $0x1360] sm:$0xff] }
 0x838   :  { %2684 = vmatprep.subr.mxu0 %v2458_v22  ;;  %2623 = vmatprep.subr.mxu1 %v2442_v11  ;;  %v2432_v22 = vld [vmem:[#allocation5 + $0x1358] sm:$0xff] }
 0x839   :  { %2685 = vmatpush1.msra.mxu0 %v2457_v40  ;;  %2624 = vmatpush2.msra.mxu1 %v2441_v26  ;;  %v2431_v40 = vld [vmem:[#allocation5 + $0x1350] sm:$0xff] }
 0x83a   :  { %2686 = vmatprep.subr.mxu0 %v2456_v49  ;;  %2625 = vmatprep.subr.mxu1 %v2440_v16  ;;  %v2430_v49 = vld [vmem:[#allocation5 + $0x1348] sm:$0xff] }
 0x83b   :  { %2687 = vmatpush1.msra.mxu0 %v2455_v28  ;;  %2626 = vmatpush2.msra.mxu1 %v2439_v9  ;;  %v2429_v28 = vld [vmem:[#allocation5 + $0x1340] sm:$0xff] }
 0x83c   :  { %2688 = vmatprep.subr.mxu0 %v2454_v18  ;;  %2627 = vmatprep.subr.mxu1 %v2438_v1  ;;  %v2428_v18 = vld [vmem:[#allocation5 + $0x1338] sm:$0xff] }
 0x83d   :  { %2689 = vmatpush1.msra.mxu0 %v2453_v63  ;;  %2628 = vmatpush2.msra.mxu1 %v2437_v58  ;;  %v2427_v63 = vld [vmem:[#allocation5 + $0x1330] sm:$0xff] }
 0x83e   :  { %2690 = vmatprep.subr.mxu0 %v2516_v5  ;;  %2629 = vmatprep.subr.mxu1 %v2436_v43  ;;  %v2426_v5 = vld [vmem:[#allocation5 + $0x1328] sm:$0xff] }
 0x83f   :  { %2691 = vmatpush2.msra.mxu0 %v2515_v8  ;;  %2630 = vmatpush2.msra.mxu1 %v2435_v35  ;;  %v2425_v8 = vld [vmem:[#allocation5 + $0x1320] sm:$0xff] }
 0x840   :  { %2692 = vmatprep.subr.mxu0 %v2514_v53  ;;  %2631 = vmatprep.subr.mxu1 %v2434_v39  ;;  %v2424_v53 = vld [vmem:[#allocation5 + $0x1318] sm:$0xff] }
 0x841   :  { %2693 = vmatpush2.msra.mxu0 %v2513_v24  ;;  %2632 = vmatpush2.msra.mxu1 %v2433_v54  ;;  %v2423_v24 = vld [vmem:[#allocation5 + $0x1310] sm:$0xff] }
 0x842   :  { %2694 = vmatprep.subr.mxu0 %v2512_v38  ;;  %2633 = vmatprep.subr.mxu1 %v2432_v22  ;;  %v2421_v38 = vld [vmem:[#allocation5 + $0x1300] sm:$0xff] }
 0x843   :  { %2695 = vmatpush2.msra.mxu0 %v2511_v44  ;;  %2634 = vmatpush2.msra.mxu1 %v2431_v40 }
 0x844   :  { %2696 = vmatprep.subr.mxu0 %v2510_v27  ;;  %2635 = vmatprep.subr.mxu1 %v2430_v49 }
 0x845   :  { %2697 = vmatpush2.msra.mxu0 %v2509_v36  ;;  %2636 = vmatpush2.msra.mxu1 %v2429_v28 }
 0x846   :  { %2698 = vmatprep.subr.mxu0 %v2508_v31  ;;  %2637 = vmatprep.subr.mxu1 %v2428_v18 }
 0x847   :  { %2699 = vmatpush2.msra.mxu0 %v2507_v34  ;;  %2638 = vmatpush2.msra.mxu1 %v2427_v63 }
 0x848   :  { %2700 = vmatprep.subr.mxu0 %v2506_v2  ;;  %2639 = vmatprep.subr.mxu1 %v2426_v5 }
 0x849   :  { %2701 = vmatpush2.msra.mxu0 %v2505_v25  ;;  %2640 = vmatpush2.msra.mxu1 %v2425_v8 }
 0x84a   :  { %2702 = vmatprep.subr.mxu0 %v2504_v60  ;;  %2641 = vmatprep.subr.mxu1 %v2424_v53 }
 0x84b   :  { %2703 = vmatpush2.msra.mxu0 %v2503_v32  ;;  %2642 = vmatpush2.msra.mxu1 %v2423_v24 }
 0x84c   :  { %2704 = vmatprep.subr.mxu0 %v2502_v4  ;;  %2643 = vmatprep.subr.mxu1 %v2422_v30 }
 0x84d   :  { %2705 = vmatpush2.msra.mxu0 %v2501_v15  ;;  %2644 = vmatpush2.msra.mxu1 %v2421_v38 }
 0x84e   :  { %2706 = vmatprep.subr.mxu0 %v2500_v46  ;;  %2735 = vmatprep.subr.mxu1 %v2548_v57  ;;  %v2560_v57 = vld [vmem:[#allocation5 + $0x1758] sm:$0xff] }
 0x84f   :  { %2707 = vmatpush2.msra.mxu0 %v2499_v56  ;;  %v7161_v56 = vld [vmem:[#allocation18_spill] sm:$0xff] }
 0x850   :  { %2708 = vmatprep.subr.mxu0 %v2498_v21  ;;  %v2288_v21 = vld [vmem:[#allocation7 + $0x2] ss:$8 sm:$0x3] }
 0x851   :  { %2709 = vmatpush2.msra.mxu0 %v2497_v45  ;;  %v2328_v45 = vld [vmem:[#allocation8 + $0x2] ss:$8 sm:$0x3] }
 0x852   :  { %2710 = vmatprep.subr.mxu0 %v2496_v48  ;;  %v7162_v48 = vld [vmem:[#allocation19_spill] sm:$0xff] }
 0x853   :  { %2711 = vmatpush2.msra.mxu0 %v2495_v7  ;;  %v7163_v7 = vld [vmem:[#allocation20_spill] sm:$0xff] }
 0x854   :  { %2712 = vmatprep.subr.mxu0 %v2494_v41  ;;  %v2333_v41 = vrot.slane %v2328_v45, %v7162_v48  ;;  %v2337_v22 = vrot.slane %v2328_v45, %v7163_v7  ;;  %v2537_v45 = vld [vmem:[#allocation5 + $0x16a0] sm:$0xff] }
 0x855   :  { %2713 = vmatpush2.msra.mxu0 %v2493_v50 }
 0x856   :  { %2714 = vmatprep.subr.mxu0 %v2492_v33 }
 0x857   :  { %2715 = vmatpush2.msra.mxu0 %v2491_v3 }
 0x858   :  { %2716 = vmatprep.subr.mxu0 %v2490_v20 }
 0x859   :  { %2717 = vmatpush2.msra.mxu0 %v2489_v62 }
 0x85a   :  { %2718 = vmatprep.subr.mxu0 %v2488_v19 }
 0x85b   :  { %2719 = vmatpush2.msra.mxu0 %v2487_v6 }
 0x85c   :  { %2720 = vmatprep.subr.mxu0 %v2486_v14 }
 0x85d   :  { %2721 = vmatpush2.msra.mxu0 %v2485_v0 }
 0x85e   :  { %2812 = vmatprep.subr.mxu0 %v5858_v13 }
 0x8de   :  { %v2260_v44 = vpop.f32.mrf.mxu0 }
 0x8e0   :  { %v2262_v47 = vpop.f32.mrf.mxu0 }
 0x8e2   :  { %v2266_v27 = vpop.f32.mrf.mxu0 }
 0x8e3   :  { %v2271_v10 = vadd.f32 %v2266_v27, %v2260_v44 }
 0x8e4   :  { %v2268_v36 = vpop.f32.mrf.mxu0 }
 0x8e5   :  { %v2272_v23 = vrot.slane %v2271_v10, 4  ;;  %v2278_v31 = vadd.f32 %v2268_v36, %v2262_v47  ;;  %v5972_v36 = vld [vmem:[#allocation10 + $0xf0] sm:$0xff] }
 0x8e7   :  { %v2273_v42 = vadd.f32 %v2272_v23, %v2271_v10  ;;  %v2279_v34 = vrot.slane %v2278_v31, 4  ;;  %v2547_v10 = vld [vmem:[#allocation5 + $0x16f0] sm:$0xff] }
 0x8e9   :  { %v2274_v37 = vrot.slane %v2273_v42, 2  ;;  %v2280_v2 = vadd.f32 %v2279_v34, %v2278_v31  ;;  %v2546_v31 = vld [vmem:[#allocation5 + $0x16e8] sm:$0xff] }
 0x8eb   :  { %v2275_v52 = vadd.f32 %v2274_v37, %v2273_v42  ;;  %v2281_v25 = vrot.slane %v2280_v2, 2  ;;  %v2561_v37 = vld [vmem:[#allocation5 + $0x1760] sm:$0xff] }
 0x8ed   :  { %v2276_v29 = vrot.slane %v2275_v52, 1  ;;  %v2282_v60 = vadd.f32 %v2281_v25, %v2280_v2  ;;  %v2562_v25 = vld [vmem:[#allocation5 + $0x1768] sm:$0xff] }
 0x8ef   :  { %v2277_v13 = vadd.f32 %v2276_v29, %v2275_v52  ;;  %v2283_v11 = vrot.slane %v2282_v60, 1  ;;  %v2545_v52 = vld [vmem:[#allocation5 + $0x16e0] sm:$0xff]  ;;  %v2563_v29 = vld [vmem:[#allocation5 + $0x1770] sm:$0xff] }
 0x8f1   :  { %v2285_v32 = vmul.f32 0.0078125, %v2277_v13  ;;  %v2284_v26 = vadd.f32 %v2283_v11, %v2282_v60  ;;  %v2544_v60 = vld [vmem:[#allocation5 + $0x16d8] sm:$0xff]  ;;  %v2543_v11 = vld [vmem:[#allocation5 + $0x16d0] sm:$0xff] }
 0x8f2   :  { %v2564_v13 = vld [vmem:[#allocation5 + $0x1778] sm:$0xff] }
 0x8f3   :  { %v2289_v4 = vadd.f32 1e-05, %v2285_v32  ;;  %v2286_v16 = vmul.f32 0.0078125, %v2284_v26  ;;  %v6001_v32 = vld [vmem:[#allocation10 + $0xe8] sm:$0xff] }
 0x8f5   :  { %v2290_v15 = vadd.f32 1e-05, %v2286_v16  ;;  %4545 = vrsqrt.f32 %v2289_v4  ;;  %v2542_v4 = vld [vmem:[#allocation5 + $0x16c8] sm:$0xff]  ;;  %v6008_v16 = vld [vmem:[#allocation10 + $0xe0] sm:$0xff] }
 0x8f7   :  { %4547 = vrsqrt.f32 %v2290_v15 }
 0x902   :  { %v4546_v9 = vpop.eup %4545 }
 0x904   :  { %v4548_v46 = vpop.eup %4547 }
 0x905   :  { %v2295_v1 = vcombine.low %v4546_v9, %v4548_v46  ;;  %v2541_v9 = vld [vmem:[#allocation5 + $0x16c0] sm:$0xff]  ;;  %v2540_v46 = vld [vmem:[#allocation5 + $0x16b8] sm:$0xff] }
 0x907   :  { %v2302_v58 = vrot.slane %v2295_v1, %v7161_v56  ;;  %v2539_v1 = vld [vmem:[#allocation5 + $0x16b0] sm:$0xff] }
 0x909   :  { %v2309_v43 = vrot.slane %v2302_v58, %v7161_v56  ;;  %v6013_v58 = vld [vmem:[#allocation10 + $0xd8] sm:$0xff]  ;;  %v2557_v56 = vld [vmem:[#allocation5 + $0x1740] sm:$0xff] }
 0x90b   :  { %v2311_v35 = vmul.f32 %v2309_v43, %v2288_v21  ;;  %v2538_v21 = vld [vmem:[#allocation5 + $0x16a8] sm:$0xff]  ;;  %v6016_v43 = vld [vmem:[#allocation10 + $0xd0] sm:$0xff] }
 0x90d   :  { %v2316_v39 = vrot.slane %v2311_v35, %v7162_v48  ;;  %v2320_v54 = vrot.slane %v2311_v35, %v7163_v7  ;;  %v6019_v35 = vld [vmem:[#allocation10 + $0xc8] sm:$0xff]  ;;  %v2559_v7 = vld [vmem:[#allocation5 + $0x1750] sm:$0xff] }
 0x90e   :  { %v2558_v48 = vld [vmem:[#allocation5 + $0x1748] sm:$0xff] }
 0x90f   :  { %v2323_v50 = vmul.f32 %v2316_v39, %v5929_v12  ;;  %v2324_v40 = vmul.f32 %v2320_v54, %v5931_v17  ;;  %v2325_v33 = vmul.f32 %v2316_v39, %v5939_v61  ;;  %v2326_v49 = vmul.f32 %v2320_v54, %v5933_v59  ;;  %v2536_v39 = vld [vmem:[#allocation5 + $0x1698] sm:$0xff]  ;;  %v6022_v54 = vld [vmem:[#allocation10 + $0xc0] sm:$0xff] }
 0x911   :  { %v2340_v3 = vadd.f32 %v2333_v41, %v2323_v50  ;;  %v2341_v28 = vadd.f32 %v2337_v22, %v2324_v40  ;;  %v2342_v20 = vadd.f32 %v2333_v41, %v2325_v33  ;;  %v2343_v18 = vadd.f32 %v2337_v22, %v2326_v49  ;;  %v2535_v41 = vld [vmem:[#allocation5 + $0x1690] sm:$0xff]  ;;  %v6025_v22 = vld [vmem:[#allocation10 + $0xb8] sm:$0xff]  ;;  %v2534_v50 = vld [vmem:[#allocation5 + $0x1688] sm:$0xff] }
 0x912   :  { %v6028_v40 = vld [vmem:[#allocation10 + $0xb0] sm:$0xff]  ;;  %v2533_v33 = vld [vmem:[#allocation5 + $0x1680] sm:$0xff]  ;;  %v6031_v49 = vld [vmem:[#allocation10 + $0xa8] sm:$0xff] }
 0x913   :  { %v2344_v62 = vmax.f32 %v2340_v3, 0.0  ;;  %v2345_v63 = vmax.f32 %v2341_v28, 0.0  ;;  %v2346_v19 = vmax.f32 %v2342_v20, 0.0  ;;  %v2347_v5 = vmax.f32 %v2343_v18, 0.0  ;;  %v2532_v3 = vld [vmem:[#allocation5 + $0x1678] sm:$0xff]  ;;  %v6034_v28 = vld [vmem:[#allocation10 + $0xa0] sm:$0xff] }
 0x914   :  { %v2531_v20 = vld [vmem:[#allocation5 + $0x1670] sm:$0xff]  ;;  %v6037_v18 = vld [vmem:[#allocation10 + $0x98] sm:$0xff] }
 0x915   :  { %2722 = vmatprep.mubr.f32.mxu0 %v2345_v63  ;;  %v2351_v6 = vrot.slane %v2347_v5, 7  ;;  %v2357_v8 = vrot.slane %v2345_v63, 7  ;;  %v2369_v14 = vrot.slane %v2345_v63, 1  ;;  %v2370_v53 = vrot.slane %v2347_v5, 1  ;;  %v6040_v63 = vld [vmem:[#allocation10 + $0x90] sm:$0xff] }
 0x916   :  { %2723 = vmatmul.mubr.f32.vlgmr.msra.gmra.mxu0 %v2344_v62  ;;  %v2350_v12 = vrot.slane %v2346_v19, 7  ;;  %v2356_v17 = vrot.slane %v2344_v62, 7  ;;  %v2366_v0 = vrot.slane %v2344_v62, 1  ;;  %v2367_v61 = vrot.slane %v2346_v19, 1  ;;  %v2530_v62 = vld [vmem:[#allocation5 + $0x1668] sm:$0xff] }
 0x917   :  { %2728 = vmatprep.mubr.f32.mxu0 %v2347_v5  ;;  %v2365_v59 = vsel %vm192_vm0, %v2351_v6, %v2357_v8  ;;  %v2371_v24 = vsel %vm203_vm1, %v2369_v14, %v2370_v53  ;;  %v5959_v30 = vsel %vm192_vm0, %v2357_v8, %v2351_v6  ;;  %v5962_v38 = vsel %vm203_vm1, %v2370_v53, %v2369_v14  ;;  %v6043_v5 = vld [vmem:[#allocation10 + $0x88] sm:$0xff]  ;;  %v2528_v6 = vld [vmem:[#allocation5 + $0x1658] sm:$0xff]  ;;  %v6046_v8 = vld [vmem:[#allocation10 + $0x80] sm:$0xff] }
 0x918   :  { %v2381_v44 = vsel %vm5151_vm4, %v2371_v24, %v2365_v59  ;;  %v5967_v47 = vsel %vm192_vm0, %v2350_v12, %v2356_v17  ;;  %v5970_v27 = vsel %vm203_vm1, %v2366_v0, %v2367_v61  ;;  %2813 = vmatpush1.msra.mxu0 %v5972_v36  ;;  %v5980_v42 = vsel %vm192_vm0, %v2356_v17, %v2350_v12  ;;  %v2527_v14 = vld [vmem:[#allocation5 + $0x1650] sm:$0xff]  ;;  %v6049_v53 = vld [vmem:[#allocation10 + $0x78] sm:$0xff]  ;;  %v2526_v12 = vld [vmem:[#allocation5 + $0x1648] sm:$0xff] }
 0x919   :  { %2645 = vmatprep.mubr.f32.mxu1 %v2381_v44  ;;  %v2380_v23 = vsel %vm5151_vm4, %v5970_v27, %v5967_v47  ;;  %v5983_v34 = vsel %vm203_vm1, %v2367_v61, %v2366_v0  ;;  %v2383_v2 = vsel %vm5169_vm5, %v5962_v38, %v5959_v30  ;;  %2814 = vmatprep.subr.mxu0 %v6001_v32  ;;  %v6052_v17 = vld [vmem:[#allocation10 + $0x70] sm:$0xff]  ;;  %v2525_v0 = vld [vmem:[#allocation5 + $0x1640] sm:$0xff]  ;;  %v6055_v61 = vld [vmem:[#allocation10 + $0x68] sm:$0xff] }
 0x91a   :  { %2646 = vmatmul.mubr.f32.vlgmr.msra.gmra.mxu1 %v2380_v23  ;;  %2729 = vmatmul.mubr.f32.gmra.mxu0 %v2346_v19  ;;  %v2382_v26 = vsel %vm5169_vm5, %v5983_v34, %v5980_v42  ;;  %v2385_v15 = vsel %vm5101_vm2, %v2365_v59, %v2371_v24  ;;  %v2529_v19 = vld [vmem:[#allocation5 + $0x1660] sm:$0xff]  ;;  %v2524_v59 = vld [vmem:[#allocation5 + $0x1638] sm:$0xff]  ;;  %v2523_v44 = vld [vmem:[#allocation5 + $0x1630] sm:$0xff] }
 0x91b   :  { %2736 = vmatpush1.msra.mxu1 %v2547_v10  ;;  %2651 = vmatprep.mubr.f32.mxu1 %v2383_v2  ;;  %v6058_v24 = vld [vmem:[#allocation10 + $0x60] sm:$0xff]  ;;  %v6061_v10 = vld [vmem:[#allocation10 + $0x58] sm:$0xff]  ;;  %v2522_v23 = vld [vmem:[#allocation5 + $0x1628] sm:$0xff] }
 0x91c   :  { %2737 = vmatprep.subr.mxu1 %v2546_v31  ;;  %2815 = vmatpush1.msra.mxu0 %v6008_v16  ;;  %v6064_v31 = vld [vmem:[#allocation10 + $0x50] sm:$0xff]  ;;  %v2521_v2 = vld [vmem:[#allocation5 + $0x1620] sm:$0xff] }
 0x91d   :  { %2738 = vmatpush1.msra.mxu1 %v2545_v52  ;;  %2816 = vmatprep.subr.mxu0 %v6013_v58  ;;  %v6067_v52 = vld [vmem:[#allocation10 + $0x48] sm:$0xff] }
 0x91e   :  { %2739 = vmatprep.subr.mxu1 %v2544_v60  ;;  %2652 = vmatmul.mubr.f32.gmra.mxu1 %v2382_v26  ;;  %v2520_v60 = vld [vmem:[#allocation5 + $0x1618] sm:$0xff]  ;;  %v2519_v26 = vld [vmem:[#allocation5 + $0x1610] sm:$0xff] }
 0x91f   :  { %2740 = vmatpush1.msra.mxu1 %v2543_v11  ;;  %2799 = vmatprep.mubr.f32.mxu1 %v2385_v15  ;;  %v6070_v11 = vld [vmem:[#allocation10 + $0x40] sm:$0xff]  ;;  %v2518_v15 = vld [vmem:[#allocation5 + $0x1608] sm:$0xff] }
 0x920   :  { %2741 = vmatprep.subr.mxu1 %v2542_v4  ;;  %2817 = vmatpush1.msra.mxu0 %v6016_v43  ;;  %v6073_v4 = vld [vmem:[#allocation10 + $0x38] sm:$0xff] }
 0x921   :  { %2742 = vmatpush1.msra.mxu1 %v2541_v9  ;;  %2818 = vmatprep.subr.mxu0 %v6019_v35  ;;  %v6076_v9 = vld [vmem:[#allocation10 + $0x30] sm:$0xff] }
 0x922   :  { %2743 = vmatprep.subr.mxu1 %v2540_v46  ;;  %2819 = vmatpush1.msra.mxu0 %v6022_v54  ;;  %v2517_v46 = vld [vmem:[#allocation5 + $0x1600] sm:$0xff] }
 0x923   :  { %2744 = vmatpush1.msra.mxu1 %v2539_v1  ;;  %2820 = vmatprep.subr.mxu0 %v6025_v22  ;;  %v6079_v1 = vld [vmem:[#allocation10 + $0x28] sm:$0xff] }
 0x924   :  { %2745 = vmatprep.subr.mxu1 %v2538_v21  ;;  %2821 = vmatpush1.msra.mxu0 %v6028_v40  ;;  %v2580_v21 = vld [vmem:[#allocation5 + $0x17f8] sm:$0xff] }
 0x925   :  { %2746 = vmatpush1.msra.mxu1 %v2537_v45  ;;  %2822 = vmatprep.subr.mxu0 %v6031_v49  ;;  %v6082_v45 = vld [vmem:[#allocation10 + $0x20] sm:$0xff] }
 0x926   :  { %2747 = vmatprep.subr.mxu1 %v2536_v39  ;;  %2823 = vmatpush1.msra.mxu0 %v6034_v28  ;;  %v2579_v39 = vld [vmem:[#allocation5 + $0x17f0] sm:$0xff] }
 0x927   :  { %2748 = vmatpush1.msra.mxu1 %v2535_v41  ;;  %2824 = vmatprep.subr.mxu0 %v6037_v18  ;;  %v6085_v41 = vld [vmem:[#allocation10 + $0x18] sm:$0xff] }
 0x928   :  { %2749 = vmatprep.subr.mxu1 %v2534_v50  ;;  %2825 = vmatpush1.msra.mxu0 %v6040_v63  ;;  %v2578_v50 = vld [vmem:[#allocation5 + $0x17e8] sm:$0xff] }
 0x929   :  { %2750 = vmatpush1.msra.mxu1 %v2533_v33  ;;  %2826 = vmatprep.subr.mxu0 %v6043_v5  ;;  %v6088_v33 = vld [vmem:[#allocation10 + $0x10] sm:$0xff] }
 0x92a   :  { %2751 = vmatprep.subr.mxu1 %v2532_v3  ;;  %2827 = vmatpush1.msra.mxu0 %v6046_v8  ;;  %v2577_v3 = vld [vmem:[#allocation5 + $0x17e0] sm:$0xff] }
 0x92b   :  { %2752 = vmatpush1.msra.mxu1 %v2531_v20  ;;  %2828 = vmatprep.subr.mxu0 %v6049_v53  ;;  %v6091_v20 = vld [vmem:[#allocation10 + $0x8] sm:$0xff] }
 0x92c   :  { %2753 = vmatprep.subr.mxu1 %v2530_v62  ;;  %2829 = vmatpush1.msra.mxu0 %v6052_v17  ;;  %v2576_v62 = vld [vmem:[#allocation5 + $0x17d8] sm:$0xff] }
 0x92d   :  { %2754 = vmatpush1.msra.mxu1 %v2529_v19  ;;  %2830 = vmatprep.subr.mxu0 %v6055_v61  ;;  %v6094_v19 = vld [vmem:[#allocation10] sm:$0xff] }
 0x92e   :  { %2755 = vmatprep.subr.mxu1 %v2528_v6  ;;  %2831 = vmatpush1.msra.mxu0 %v6058_v24  ;;  %v2575_v6 = vld [vmem:[#allocation5 + $0x17d0] sm:$0xff] }
 0x92f   :  { %2756 = vmatpush1.msra.mxu1 %v2527_v14  ;;  %2832 = vmatprep.subr.mxu0 %v6061_v10  ;;  %v6097_v14 = vld [vmem:[#allocation10 + $0x1f8] sm:$0xff] }
 0x930   :  { %2757 = vmatprep.subr.mxu1 %v2526_v12  ;;  %2833 = vmatpush1.msra.mxu0 %v6064_v31  ;;  %v2574_v12 = vld [vmem:[#allocation5 + $0x17c8] sm:$0xff] }
 0x931   :  { %2758 = vmatpush1.msra.mxu1 %v2525_v0  ;;  %2834 = vmatprep.subr.mxu0 %v6067_v52  ;;  %v6100_v0 = vld [vmem:[#allocation10 + $0x1f0] sm:$0xff] }
 0x932   :  { %2759 = vmatprep.subr.mxu1 %v2524_v59  ;;  %2835 = vmatpush1.msra.mxu0 %v6070_v11  ;;  %v2573_v59 = vld [vmem:[#allocation5 + $0x17c0] sm:$0xff] }
 0x933   :  { %2760 = vmatpush1.msra.mxu1 %v2523_v44  ;;  %2836 = vmatprep.subr.mxu0 %v6073_v4  ;;  %v6103_v44 = vld [vmem:[#allocation10 + $0x1e8] sm:$0xff] }
 0x934   :  { %2761 = vmatprep.subr.mxu1 %v2522_v23  ;;  %2837 = vmatpush1.msra.mxu0 %v6076_v9  ;;  %v2572_v23 = vld [vmem:[#allocation5 + $0x17b8] sm:$0xff] }
 0x935   :  { %2762 = vmatpush1.msra.mxu1 %v2521_v2  ;;  %2838 = vmatprep.subr.mxu0 %v6079_v1  ;;  %v6106_v2 = vld [vmem:[#allocation10 + $0x1e0] sm:$0xff] }
 0x936   :  { %2763 = vmatprep.subr.mxu1 %v2520_v60  ;;  %2839 = vmatpush1.msra.mxu0 %v6082_v45  ;;  %v2571_v60 = vld [vmem:[#allocation5 + $0x17b0] sm:$0xff] }
 0x937   :  { %2764 = vmatpush1.msra.mxu1 %v2519_v26  ;;  %2840 = vmatprep.subr.mxu0 %v6085_v41  ;;  %v6109_v26 = vld [vmem:[#allocation10 + $0x1d8] sm:$0xff] }
 0x938   :  { %2765 = vmatprep.subr.mxu1 %v2518_v15  ;;  %2841 = vmatpush1.msra.mxu0 %v6088_v33  ;;  %v2570_v15 = vld [vmem:[#allocation5 + $0x17a8] sm:$0xff] }
 0x939   :  { %2766 = vmatpush1.msra.mxu1 %v2517_v46  ;;  %2842 = vmatprep.subr.mxu0 %v6091_v20  ;;  %v6112_v46 = vld [vmem:[#allocation10 + $0x1d0] sm:$0xff] }
 0x93a   :  { %2767 = vmatprep.subr.mxu1 %v2580_v21  ;;  %2843 = vmatpush1.msra.mxu0 %v6094_v19  ;;  %v2569_v21 = vld [vmem:[#allocation5 + $0x17a0] sm:$0xff] }
 0x93b   :  { %2768 = vmatpush2.msra.mxu1 %v2579_v39  ;;  %2844 = vmatprep.subr.mxu0 %v6097_v14  ;;  %v6115_v39 = vld [vmem:[#allocation10 + $0x1c8] sm:$0xff] }
 0x93c   :  { %2769 = vmatprep.subr.mxu1 %v2578_v50  ;;  %2845 = vmatpush2.msra.mxu0 %v6100_v0  ;;  %v2568_v50 = vld [vmem:[#allocation5 + $0x1798] sm:$0xff] }
 0x93d   :  { %2770 = vmatpush2.msra.mxu1 %v2577_v3  ;;  %2846 = vmatprep.subr.mxu0 %v6103_v44  ;;  %v6118_v3 = vld [vmem:[#allocation10 + $0x1c0] sm:$0xff] }
 0x93e   :  { %2771 = vmatprep.subr.mxu1 %v2576_v62  ;;  %2847 = vmatpush2.msra.mxu0 %v6106_v2  ;;  %v2567_v62 = vld [vmem:[#allocation5 + $0x1790] sm:$0xff] }
 0x93f   :  { %2772 = vmatpush2.msra.mxu1 %v2575_v6  ;;  %2848 = vmatprep.subr.mxu0 %v6109_v26  ;;  %v6121_v6 = vld [vmem:[#allocation10 + $0x1b8] sm:$0xff] }
 0x940   :  { %2773 = vmatprep.subr.mxu1 %v2574_v12  ;;  %2849 = vmatpush2.msra.mxu0 %v6112_v46  ;;  %v2566_v12 = vld [vmem:[#allocation5 + $0x1788] sm:$0xff] }
 0x941   :  { %2774 = vmatpush2.msra.mxu1 %v2573_v59  ;;  %2850 = vmatprep.subr.mxu0 %v6115_v39  ;;  %v6124_v59 = vld [vmem:[#allocation10 + $0x1b0] sm:$0xff] }
 0x942   :  { %2775 = vmatprep.subr.mxu1 %v2572_v23  ;;  %2851 = vmatpush2.msra.mxu0 %v6118_v3  ;;  %v2565_v23 = vld [vmem:[#allocation5 + $0x1780] sm:$0xff] }
 0x943   :  { %2776 = vmatpush2.msra.mxu1 %v2571_v60  ;;  %2852 = vmatprep.subr.mxu0 %v6121_v6  ;;  %v6127_v60 = vld [vmem:[#allocation10 + $0x1a8] sm:$0xff] }
 0x944   :  { %2777 = vmatprep.subr.mxu1 %v2570_v15  ;;  %2853 = vmatpush2.msra.mxu0 %v6124_v59  ;;  %v6130_v15 = vld [vmem:[#allocation10 + $0x1a0] sm:$0xff] }
 0x945   :  { %2778 = vmatpush2.msra.mxu1 %v2569_v21  ;;  %2854 = vmatprep.subr.mxu0 %v6127_v60  ;;  %v6133_v21 = vld [vmem:[#allocation10 + $0x198] sm:$0xff] }
 0x946   :  { %2779 = vmatprep.subr.mxu1 %v2568_v50  ;;  %2855 = vmatpush2.msra.mxu0 %v6130_v15  ;;  %v6136_v50 = vld [vmem:[#allocation10 + $0x190] sm:$0xff] }
 0x947   :  { %2780 = vmatpush2.msra.mxu1 %v2567_v62  ;;  %2856 = vmatprep.subr.mxu0 %v6133_v21  ;;  %v6139_v62 = vld [vmem:[#allocation10 + $0x188] sm:$0xff] }
 0x948   :  { %2781 = vmatprep.subr.mxu1 %v2566_v12  ;;  %2857 = vmatpush2.msra.mxu0 %v6136_v50  ;;  %v6142_v12 = vld [vmem:[#allocation10 + $0x180] sm:$0xff] }
 0x949   :  { %2782 = vmatpush2.msra.mxu1 %v2565_v23  ;;  %2858 = vmatprep.subr.mxu0 %v6139_v62  ;;  %7166 = vst [vmem:[#allocation25_spill] sm:$0xff] %v6142_v12  ;;  %v6145_v23 = vld [vmem:[#allocation10 + $0x178] sm:$0xff] }
 0x94a   :  { %2783 = vmatprep.subr.mxu1 %v2564_v13  ;;  %2859 = vmatpush2.msra.mxu0 %v6142_v12  ;;  %7167 = vst [vmem:[#allocation26_spill] sm:$0xff] %v6145_v23  ;;  %v6148_v13 = vld [vmem:[#allocation10 + $0x170] sm:$0xff]  ;;  %v2556_v12 = vld [vmem:[#allocation5 + $0x1738] sm:$0xff] }
 0x94b   :  { %2784 = vmatpush2.msra.mxu1 %v2563_v29  ;;  %2860 = vmatprep.subr.mxu0 %v6145_v23  ;;  %7168 = vst [vmem:[#allocation27_spill] sm:$0xff] %v6148_v13  ;;  %v6151_v29 = vld [vmem:[#allocation10 + $0x168] sm:$0xff]  ;;  %v2555_v23 = vld [vmem:[#allocation5 + $0x1730] sm:$0xff] }
 0x94c   :  { %2785 = vmatprep.subr.mxu1 %v2562_v25  ;;  %2861 = vmatpush2.msra.mxu0 %v6148_v13  ;;  %7169 = vst [vmem:[#allocation28_spill] sm:$0xff] %v6151_v29  ;;  %v6154_v25 = vld [vmem:[#allocation10 + $0x160] sm:$0xff]  ;;  %v2554_v13 = vld [vmem:[#allocation5 + $0x1728] sm:$0xff] }
 0x94d   :  { %2786 = vmatpush2.msra.mxu1 %v2561_v37  ;;  %2862 = vmatprep.subr.mxu0 %v6151_v29  ;;  %7170 = vst [vmem:[#allocation29_spill] sm:$0xff] %v6154_v25  ;;  %v6157_v37 = vld [vmem:[#allocation10 + $0x158] sm:$0xff]  ;;  %v2553_v29 = vld [vmem:[#allocation5 + $0x1720] sm:$0xff] }
 0x94e   :  { %2787 = vmatprep.subr.mxu1 %v2560_v57  ;;  %2863 = vmatpush2.msra.mxu0 %v6154_v25  ;;  %7171 = vst [vmem:[#allocation30_spill] sm:$0xff] %v6157_v37  ;;  %v6160_v57 = vld [vmem:[#allocation10 + $0x150] sm:$0xff]  ;;  %v2552_v25 = vld [vmem:[#allocation5 + $0x1718] sm:$0xff] }
 0x94f   :  { %2788 = vmatpush2.msra.mxu1 %v2559_v7  ;;  %2864 = vmatprep.subr.mxu0 %v6157_v37  ;;  %7172 = vst [vmem:[#allocation31_spill] sm:$0xff] %v6160_v57  ;;  %v6163_v7 = vld [vmem:[#allocation10 + $0x148] sm:$0xff]  ;;  %v2551_v37 = vld [vmem:[#allocation5 + $0x1710] sm:$0xff] }
 0x950   :  { %2789 = vmatprep.subr.mxu1 %v2558_v48  ;;  %2865 = vmatpush2.msra.mxu0 %v6160_v57  ;;  %7173 = vst [vmem:[#allocation32_spill] sm:$0xff] %v6163_v7  ;;  %v6166_v48 = vld [vmem:[#allocation10 + $0x140] sm:$0xff]  ;;  %v2550_v57 = vld [vmem:[#allocation5 + $0x1708] sm:$0xff] }
 0x951   :  { %2790 = vmatpush2.msra.mxu1 %v2557_v56  ;;  %2866 = vmatprep.subr.mxu0 %v6163_v7  ;;  %7174 = vst [vmem:[#allocation33_spill] sm:$0xff] %v6166_v48  ;;  %v6169_v56 = vld [vmem:[#allocation10 + $0x138] sm:$0xff]  ;;  %v2549_v7 = vld [vmem:[#allocation5 + $0x1700] sm:$0xff] }
 0x952   :  { %2791 = vmatprep.subr.mxu1 %v2556_v12  ;;  %2867 = vmatpush2.msra.mxu0 %v6166_v48  ;;  %v6172_v12 = vld [vmem:[#allocation10 + $0x130] sm:$0xff]  ;;  %v6178_v48 = vld [vmem:[#allocation10 + $0x120] sm:$0xff] }
 0x953   :  { %2792 = vmatpush2.msra.mxu1 %v2555_v23  ;;  %2868 = vmatprep.subr.mxu0 %v6169_v56  ;;  %v6175_v23 = vld [vmem:[#allocation10 + $0x128] sm:$0xff] }
 0x954   :  { %2793 = vmatprep.subr.mxu1 %v2554_v13  ;;  %2869 = vmatpush2.msra.mxu0 %v6172_v12  ;;  %v6181_v13 = vld [vmem:[#allocation10 + $0x118] sm:$0xff] }
 0x955   :  { %2794 = vmatpush2.msra.mxu1 %v2553_v29  ;;  %2870 = vmatprep.subr.mxu0 %v6175_v23  ;;  %v6184_v29 = vld [vmem:[#allocation10 + $0x110] sm:$0xff] }
 0x956   :  { %2795 = vmatprep.subr.mxu1 %v2552_v25  ;;  %2871 = vmatpush2.msra.mxu0 %v6178_v48  ;;  %7175 = vst [vmem:[#allocation34_spill] sm:$0xff] %v6184_v29  ;;  %v7176_v25 = vsel %vm5101_vm2, %v5967_v47, %v5970_v27  ;;  %v7178_v47 = vsel %vm5114_vm3, %v5980_v42, %v5983_v34  ;;  %v7181_v27 = vld [vmem:[#allocation27_spill] sm:$0xff]  ;;  %v7183_v42 = vld [vmem:[#allocation29_spill] sm:$0xff]  ;;  %v7184_v34 = vld [vmem:[#allocation30_spill] sm:$0xff] }
 0x957   :  { %2796 = vmatpush2.msra.mxu1 %v2551_v37  ;;  %2872 = vmatprep.subr.mxu0 %v6181_v13  ;;  %v6192_v37 = vld [vmem:[#allocation10 + $0x108] sm:$0xff] }
 0x958   :  { %2797 = vmatprep.subr.mxu1 %v2550_v57  ;;  %2873 = vmatpush2.msra.mxu0 %v6184_v29  ;;  %v7177_v57 = vsel %vm5114_vm3, %v5959_v30, %v5962_v38  ;;  %v6203_v29 = vld [vmem:[#allocation10 + $0xf8] sm:$0xff]  ;;  %v7179_v30 = vld [vmem:[#allocation25_spill] sm:$0xff]  ;;  %v7180_v38 = vld [vmem:[#allocation26_spill] sm:$0xff] }
 0x959   :  { %2798 = vmatpush2.msra.mxu1 %v2549_v7  ;;  %2874 = vmatprep.subr.mxu0 %v6192_v37  ;;  %v6200_v7 = vld [vmem:[#allocation10 + $0x100] sm:$0xff] }
 0x95a   :  { %2800 = vmatmul.mubr.f32.vlgmr.msra.gmra.mxu1 %v7176_v25  ;;  %2875 = vmatpush2.msra.mxu0 %v6200_v7 }
 0x95b   :  { %2805 = vmatprep.mubr.f32.mxu1 %v7177_v57  ;;  %2913 = vmatprep.subr.mxu1 %v6203_v29 }
 0x95c   :  { %2914 = vmatpush1.msra.mxu1 %v5972_v36  ;;  %v7182_v36 = vld [vmem:[#allocation28_spill] sm:$0xff] }
 0x95d   :  { %2915 = vmatprep.subr.mxu1 %v6001_v32  ;;  %v7185_v32 = vld [vmem:[#allocation31_spill] sm:$0xff] }
 0x95e   :  { %2806 = vmatmul.mubr.f32.gmra.mxu1 %v7178_v47 }
 0x95f   :  { %2916 = vmatpush1.msra.mxu1 %v6008_v16  ;;  %v7186_v16 = vld [vmem:[#allocation32_spill] sm:$0xff] }
 0x960   :  { %2917 = vmatprep.subr.mxu1 %v6013_v58  ;;  %v7187_v58 = vld [vmem:[#allocation33_spill] sm:$0xff] }
 0x961   :  { %2918 = vmatpush1.msra.mxu1 %v6016_v43  ;;  %v7188_v43 = vld [vmem:[#allocation34_spill] sm:$0xff] }
 0x962   :  { %2919 = vmatprep.subr.mxu1 %v6019_v35 }
 0x963   :  { %2920 = vmatpush1.msra.mxu1 %v6022_v54 }
 0x964   :  { %2921 = vmatprep.subr.mxu1 %v6025_v22 }
 0x965   :  { %2922 = vmatpush1.msra.mxu1 %v6028_v40 }
 0x966   :  { %2923 = vmatprep.subr.mxu1 %v6031_v49 }
 0x967   :  { %2924 = vmatpush1.msra.mxu1 %v6034_v28 }
 0x968   :  { %2925 = vmatprep.subr.mxu1 %v6037_v18 }
 0x969   :  { %2926 = vmatpush1.msra.mxu1 %v6040_v63 }
 0x96a   :  { %2927 = vmatprep.subr.mxu1 %v6043_v5 }
 0x96b   :  { %2928 = vmatpush1.msra.mxu1 %v6046_v8 }
 0x96c   :  { %2929 = vmatprep.subr.mxu1 %v6049_v53 }
 0x96d   :  { %2930 = vmatpush1.msra.mxu1 %v6052_v17 }
 0x96e   :  { %2931 = vmatprep.subr.mxu1 %v6055_v61 }
 0x96f   :  { %2932 = vmatpush1.msra.mxu1 %v6058_v24 }
 0x970   :  { %2933 = vmatprep.subr.mxu1 %v6061_v10 }
 0x971   :  { %2934 = vmatpush1.msra.mxu1 %v6064_v31 }
 0x972   :  { %2935 = vmatprep.subr.mxu1 %v6067_v52 }
 0x973   :  { %2936 = vmatpush1.msra.mxu1 %v6070_v11 }
 0x974   :  { %2937 = vmatprep.subr.mxu1 %v6073_v4 }
 0x975   :  { %2938 = vmatpush1.msra.mxu1 %v6076_v9 }
 0x976   :  { %2939 = vmatprep.subr.mxu1 %v6079_v1  ;;  %v3203_v1 = vld [vmem:[#allocation5 + $0x1af8] sm:$0xff] }
 0x977   :  { %2940 = vmatpush1.msra.mxu1 %v6082_v45  ;;  %v3139_v45 = vld [vmem:[#allocation5 + $0x18f8] sm:$0xff] }
 0x978   :  { %2941 = vmatprep.subr.mxu1 %v6085_v41  ;;  %v3138_v41 = vld [vmem:[#allocation5 + $0x18f0] sm:$0xff]  ;;  %3300 = vmatprep.subr.mxu0 %v3139_v45  ;;  %v3185_v45 = vld [vmem:[#allocation5 + $0x1a68] sm:$0xff] }
 0x979   :  { %2942 = vmatpush1.msra.mxu1 %v6088_v33  ;;  %v3137_v33 = vld [vmem:[#allocation5 + $0x18e8] sm:$0xff] }
 0x97a   :  { %2943 = vmatprep.subr.mxu1 %v6091_v20  ;;  %v3136_v20 = vld [vmem:[#allocation5 + $0x18e0] sm:$0xff] }
 0x97b   :  { %2944 = vmatpush1.msra.mxu1 %v6094_v19  ;;  %v3135_v19 = vld [vmem:[#allocation5 + $0x18d8] sm:$0xff] }
 0x97c   :  { %2945 = vmatprep.subr.mxu1 %v6097_v14 }
 0x97d   :  { %2946 = vmatpush2.msra.mxu1 %v6100_v0 }
 0x97e   :  { %2947 = vmatprep.subr.mxu1 %v6103_v44 }
 0x97f   :  { %2948 = vmatpush2.msra.mxu1 %v6106_v2 }
 0x980   :  { %2949 = vmatprep.subr.mxu1 %v6109_v26 }
 0x981   :  { %2950 = vmatpush2.msra.mxu1 %v6112_v46 }
 0x982   :  { %2951 = vmatprep.subr.mxu1 %v6115_v39 }
 0x983   :  { %2952 = vmatpush2.msra.mxu1 %v6118_v3 }
 0x984   :  { %2953 = vmatprep.subr.mxu1 %v6121_v6 }
 0x985   :  { %2954 = vmatpush2.msra.mxu1 %v6124_v59 }
 0x986   :  { %2955 = vmatprep.subr.mxu1 %v6127_v60 }
 0x987   :  { %2956 = vmatpush2.msra.mxu1 %v6130_v15 }
 0x988   :  { %2957 = vmatprep.subr.mxu1 %v6133_v21 }
 0x989   :  { %2958 = vmatpush2.msra.mxu1 %v6136_v50 }
 0x98a   :  { %2959 = vmatprep.subr.mxu1 %v6139_v62 }
 0x98b   :  { %2960 = vmatpush2.msra.mxu1 %v7179_v30 }
 0x98c   :  { %2961 = vmatprep.subr.mxu1 %v7180_v38  ;;  %v3202_v38 = vld [vmem:[#allocation5 + $0x1af0] sm:$0xff] }
 0x98d   :  { %2962 = vmatpush2.msra.mxu1 %v7181_v27 }
 0x98e   :  { %2963 = vmatprep.subr.mxu1 %v7182_v36  ;;  %v3201_v36 = vld [vmem:[#allocation5 + $0x1ae8] sm:$0xff] }
 0x98f   :  { %2964 = vmatpush2.msra.mxu1 %v7183_v42  ;;  %v3200_v42 = vld [vmem:[#allocation5 + $0x1ae0] sm:$0xff] }
 0x990   :  { %2965 = vmatprep.subr.mxu1 %v7184_v34  ;;  %v3199_v34 = vld [vmem:[#allocation5 + $0x1ad8] sm:$0xff] }
 0x991   :  { %2966 = vmatpush2.msra.mxu1 %v7185_v32 }
 0x992   :  { %2967 = vmatprep.subr.mxu1 %v7186_v16  ;;  %v3198_v16 = vld [vmem:[#allocation5 + $0x1ad0] sm:$0xff] }
 0x993   :  { %2968 = vmatpush2.msra.mxu1 %v7187_v58  ;;  %v3197_v58 = vld [vmem:[#allocation5 + $0x1ac8] sm:$0xff] }
 0x994   :  { %2969 = vmatprep.subr.mxu1 %v6169_v56 }
 0x995   :  { %2970 = vmatpush2.msra.mxu1 %v6172_v12 }
 0x996   :  { %2971 = vmatprep.subr.mxu1 %v6175_v23 }
 0x997   :  { %2972 = vmatpush2.msra.mxu1 %v6178_v48 }
 0x998   :  { %2973 = vmatprep.subr.mxu1 %v6181_v13 }
 0x999   :  { %2974 = vmatpush2.msra.mxu1 %v7188_v43  ;;  %v3196_v43 = vld [vmem:[#allocation5 + $0x1ac0] sm:$0xff] }
 0x99a   :  { %2975 = vmatprep.subr.mxu1 %v6192_v37 }
 0x99b   :  { %2976 = vmatpush2.msra.mxu1 %v6200_v7 }
 0x99c   :  { %3377 = vmatprep.subr.mxu1 %v3203_v1  ;;  %v3124_v1 = vld [vmem:[#allocation5 + $0x1880] sm:$0xff] }
 0x9d6   :  { %v2724_v22 = vpop.f32.mrf.mxu0 }
 0x9d8   :  { %v2726_v49 = vpop.f32.mrf.mxu0 }
 0x9da   :  { %v2647_v35 = vpop.f32.mrf.mxu1  ;;  %v2730_v18 = vpop.f32.mrf.mxu0 }
 0x9db   :  { %v2725_v8 = vadd.f32 %v2724_v22, %v2647_v35  ;;  %v3134_v35 = vld [vmem:[#allocation5 + $0x18d0] sm:$0xff]  ;;  %v3133_v22 = vld [vmem:[#allocation5 + $0x18c8] sm:$0xff] }
 0x9dc   :  { %v2649_v54 = vpop.f32.mrf.mxu1  ;;  %v2732_v61 = vpop.f32.mrf.mxu0 }
 0x9dd   :  { %v2727_v5 = vadd.f32 %v2726_v49, %v2649_v54  ;;  %v3195_v54 = vld [vmem:[#allocation5 + $0x1ab8] sm:$0xff]  ;;  %v3132_v49 = vld [vmem:[#allocation5 + $0x18c0] sm:$0xff] }
 0x9de   :  { %v2653_v40 = vpop.f32.mrf.mxu1 }
 0x9df   :  { %v2731_v52 = vadd.f32 %v2730_v18, %v2653_v40  ;;  %v3194_v40 = vld [vmem:[#allocation5 + $0x1ab0] sm:$0xff]  ;;  %v3131_v18 = vld [vmem:[#allocation5 + $0x18b8] sm:$0xff] }
 0x9e0   :  { %v2655_v28 = vpop.f32.mrf.mxu1 }
 0x9e1   :  { %v2733_v31 = vadd.f32 %v2732_v61, %v2655_v28  ;;  %v3193_v28 = vld [vmem:[#allocation5 + $0x1aa8] sm:$0xff]  ;;  %v3128_v61 = vld [vmem:[#allocation5 + $0x18a0] sm:$0xff] }
 0xa1a   :  { %v2801_v63 = vpop.f32.mrf.mxu1 }
 0xa1b   :  { %v2802_v24 = vadd.f32 %v2801_v63, %v2725_v8  ;;  %v3192_v63 = vld [vmem:[#allocation5 + $0x1aa0] sm:$0xff]  ;;  %v3191_v8 = vld [vmem:[#allocation5 + $0x1a98] sm:$0xff] }
 0xa1c   :  { %v2803_v53 = vpop.f32.mrf.mxu1 }
 0xa1d   :  { %v2804_v17 = vadd.f32 %v2803_v53, %v2727_v5  ;;  %v3130_v5 = vld [vmem:[#allocation5 + $0x18b0] sm:$0xff]  ;;  %v3129_v53 = vld [vmem:[#allocation5 + $0x18a8] sm:$0xff] }
 0xa1e   :  { %v2807_v10 = vpop.f32.mrf.mxu1 }
 0xa1f   :  { %2876 = vmatprep.mubr.f32.mxu0 %v2804_v17  ;;  %v2808_v9 = vadd.f32 %v2807_v10, %v2731_v52  ;;  %v3127_v10 = vld [vmem:[#allocation5 + $0x1898] sm:$0xff]  ;;  %v3126_v52 = vld [vmem:[#allocation5 + $0x1890] sm:$0xff] }
 0xa20   :  { %v2809_v11 = vpop.f32.mrf.mxu1  ;;  %2877 = vmatmul.mubr.f32.vlgmr.msra.gmra.mxu0 %v2802_v24 }
 0xa21   :  { %v2810_v4 = vadd.f32 %v2809_v11, %v2733_v31  ;;  %3301 = vmatpush1.msra.mxu0 %v3138_v41  ;;  %v3188_v31 = vld [vmem:[#allocation5 + $0x1a80] sm:$0xff]  ;;  %v3187_v11 = vld [vmem:[#allocation5 + $0x1a78] sm:$0xff] }
 0xa22   :  { %3302 = vmatprep.subr.mxu0 %v3137_v33  ;;  %v3123_v41 = vld [vmem:[#allocation5 + $0x1878] sm:$0xff]  ;;  %v3184_v33 = vld [vmem:[#allocation5 + $0x1a60] sm:$0xff] }
 0xa23   :  { %2882 = vmatprep.mubr.f32.mxu0 %v2810_v4  ;;  %3303 = vmatpush1.msra.mxu0 %v3136_v20  ;;  %v3122_v20 = vld [vmem:[#allocation5 + $0x1870] sm:$0xff] }
 0xa24   :  { %2883 = vmatmul.mubr.f32.gmra.mxu0 %v2808_v9  ;;  %3304 = vmatprep.subr.mxu0 %v3135_v19  ;;  %v3183_v19 = vld [vmem:[#allocation5 + $0x1a58] sm:$0xff] }
 0xa25   :  { %3305 = vmatpush1.msra.mxu0 %v3134_v35  ;;  %v3231_v35 = vld [vmem:[#allocation5 + $0x1bd8] sm:$0xff] }
 0xa26   :  { %3306 = vmatprep.subr.mxu0 %v3133_v22  ;;  %v3230_v22 = vld [vmem:[#allocation5 + $0x1bd0] sm:$0xff] }
 0xa27   :  { %3307 = vmatpush1.msra.mxu0 %v3132_v49  ;;  %v3229_v49 = vld [vmem:[#allocation5 + $0x1bc8] sm:$0xff] }
 0xa28   :  { %3308 = vmatprep.subr.mxu0 %v3131_v18  ;;  %v3228_v18 = vld [vmem:[#allocation5 + $0x1bc0] sm:$0xff] }
 0xa29   :  { %3309 = vmatpush1.msra.mxu0 %v3130_v5  ;;  %v3227_v5 = vld [vmem:[#allocation5 + $0x1bb8] sm:$0xff] }
 0xa2a   :  { %3310 = vmatprep.subr.mxu0 %v3129_v53  ;;  %v3226_v53 = vld [vmem:[#allocation5 + $0x1bb0] sm:$0xff] }
 0xa2b   :  { %3311 = vmatpush1.msra.mxu0 %v3128_v61  ;;  %v3225_v61 = vld [vmem:[#allocation5 + $0x1ba8] sm:$0xff] }
 0xa2c   :  { %3312 = vmatprep.subr.mxu0 %v3127_v10  ;;  %v3224_v10 = vld [vmem:[#allocation5 + $0x1ba0] sm:$0xff] }
 0xa2d   :  { %3313 = vmatpush1.msra.mxu0 %v3126_v52  ;;  %v3223_v52 = vld [vmem:[#allocation5 + $0x1b98] sm:$0xff] }
 0xae0   :  { %v2878_v14 = vpop.f32.mrf.mxu0 }
 0xae2   :  { %v2880_v0 = vpop.f32.mrf.mxu0 }
 0xae4   :  { %v2884_v44 = vpop.f32.mrf.mxu0 }
 0xae5   :  { %v2889_v2 = vadd.f32 %v2884_v44, %v2878_v14  ;;  %v3121_v14 = vld [vmem:[#allocation5 + $0x1868] sm:$0xff]  ;;  %v3120_v44 = vld [vmem:[#allocation5 + $0x1860] sm:$0xff] }
 0xae6   :  { %v2886_v26 = vpop.f32.mrf.mxu0 }
 0xae7   :  { %v2890_v46 = vrot.slane %v2889_v2, 4  ;;  %v2896_v39 = vadd.f32 %v2886_v26, %v2880_v0  ;;  %v3182_v0 = vld [vmem:[#allocation5 + $0x1a50] sm:$0xff]  ;;  %v3119_v26 = vld [vmem:[#allocation5 + $0x1858] sm:$0xff] }
 0xae9   :  { %v2891_v3 = vadd.f32 %v2890_v46, %v2889_v2  ;;  %v2897_v6 = vrot.slane %v2896_v39, 4  ;;  %v3181_v2 = vld [vmem:[#allocation5 + $0x1a48] sm:$0xff]  ;;  %v3180_v46 = vld [vmem:[#allocation5 + $0x1a40] sm:$0xff] }
 0xaeb   :  { %v2892_v59 = vrot.slane %v2891_v3, 2  ;;  %v2898_v60 = vadd.f32 %v2897_v6, %v2896_v39  ;;  %v3118_v39 = vld [vmem:[#allocation5 + $0x1850] sm:$0xff]  ;;  %v3117_v6 = vld [vmem:[#allocation5 + $0x1848] sm:$0xff] }
 0xaed   :  { %v2893_v15 = vadd.f32 %v2892_v59, %v2891_v3  ;;  %v2899_v21 = vrot.slane %v2898_v60, 2  ;;  %v3179_v3 = vld [vmem:[#allocation5 + $0x1a38] sm:$0xff]  ;;  %v3178_v59 = vld [vmem:[#allocation5 + $0x1a30] sm:$0xff] }
 0xaef   :  { %v2894_v50 = vrot.slane %v2893_v15, 1  ;;  %v2900_v62 = vadd.f32 %v2899_v21, %v2898_v60  ;;  %v3116_v60 = vld [vmem:[#allocation5 + $0x1840] sm:$0xff]  ;;  %v3115_v21 = vld [vmem:[#allocation5 + $0x1838] sm:$0xff] }
 0xaf1   :  { %v2895_v48 = vadd.f32 %v2894_v50, %v2893_v15  ;;  %v2901_v56 = vrot.slane %v2900_v62, 1  ;;  %v3177_v15 = vld [vmem:[#allocation5 + $0x1a28] sm:$0xff]  ;;  %v3176_v50 = vld [vmem:[#allocation5 + $0x1a20] sm:$0xff] }
 0xaf3   :  { %v2903_v12 = vmul.f32 0.0078125, %v2895_v48  ;;  %v2902_v23 = vadd.f32 %v2901_v56, %v2900_v62  ;;  %v3114_v62 = vld [vmem:[#allocation5 + $0x1830] sm:$0xff]  ;;  %v3175_v48 = vld [vmem:[#allocation5 + $0x1a18] sm:$0xff]  ;;  %v3113_v56 = vld [vmem:[#allocation5 + $0x1828] sm:$0xff] }
 0xaf5   :  { %v2904_v13 = vmul.f32 0.0078125, %v2902_v23  ;;  %v6274_v25 = vsub.f32 %v2802_v24, %v2903_v12  ;;  %v6284_v30 = vsub.f32 %v2808_v9, %v2903_v12  ;;  %v3189_v24 = vld [vmem:[#allocation5 + $0x1a88] sm:$0xff]  ;;  %v3186_v9 = vld [vmem:[#allocation5 + $0x1a70] sm:$0xff]  ;;  %v3112_v23 = vld [vmem:[#allocation5 + $0x1820] sm:$0xff] }
 0xaf6   :  { %v3174_v12 = vld [vmem:[#allocation5 + $0x1a10] sm:$0xff] }
 0xaf7   :  { %v6276_v37 = vsub.f32 %v2804_v17, %v2904_v13  ;;  %v6278_v57 = vsub.f32 %v2810_v4, %v2904_v13  ;;  %v2909_v47 = vmul.f32 %v6274_v25, %v6274_v25  ;;  %v2911_v32 = vmul.f32 %v6284_v30, %v6284_v30  ;;  %v3190_v17 = vld [vmem:[#allocation5 + $0x1a90] sm:$0xff]  ;;  %v3125_v4 = vld [vmem:[#allocation5 + $0x1888] sm:$0xff] }
 0xaf8   :  { %3314 = vmatprep.subr.mxu0 %v3125_v4  ;;  %v3173_v13 = vld [vmem:[#allocation5 + $0x1a08] sm:$0xff]  ;;  %v3222_v4 = vld [vmem:[#allocation5 + $0x1b90] sm:$0xff] }
 0xaf9   :  { %v2910_v7 = vmul.f32 %v6276_v37, %v6276_v37  ;;  %v2912_v27 = vmul.f32 %v6278_v57, %v6278_v57  ;;  %3315 = vmatpush1.msra.mxu0 %v3124_v1  ;;  %v3221_v1 = vld [vmem:[#allocation5 + $0x1b88] sm:$0xff] }
 0xafa   :  { %3316 = vmatprep.subr.mxu0 %v3123_v41  ;;  %v3220_v41 = vld [vmem:[#allocation5 + $0x1b80] sm:$0xff] }
 0xafb   :  { %2977 = vmatprep.mubr.f32.mxu1 %v2910_v7  ;;  %3317 = vmatpush1.msra.mxu0 %v3122_v20  ;;  %v3111_v7 = vld [vmem:[#allocation5 + $0x1818] sm:$0xff] }
 0xafc   :  { %2978 = vmatmul.mubr.f32.vlgmr.msra.gmra.mxu1 %v2909_v47  ;;  %3318 = vmatprep.subr.mxu0 %v3121_v14  ;;  %v3172_v47 = vld [vmem:[#allocation5 + $0x1a00] sm:$0xff]  ;;  %v3219_v20 = vld [vmem:[#allocation5 + $0x1b78] sm:$0xff]  ;;  %v3218_v14 = vld [vmem:[#allocation5 + $0x1b70] sm:$0xff] }
 0xafd   :  { %2983 = vmatprep.mubr.f32.mxu1 %v2912_v27  ;;  %3378 = vmatpush1.msra.mxu1 %v3202_v38  ;;  %v3110_v38 = vld [vmem:[#allocation5 + $0x1810] sm:$0xff]  ;;  %v3235_v27 = vld [vmem:[#allocation5 + $0x1bf8] sm:$0xff] }
 0xafe   :  { %3379 = vmatprep.subr.mxu1 %v3201_v36  ;;  %3319 = vmatpush1.msra.mxu0 %v3120_v44  ;;  %v3109_v36 = vld [vmem:[#allocation5 + $0x1808] sm:$0xff] }
 0xaff   :  { %3380 = vmatpush1.msra.mxu1 %v3200_v42  ;;  %3320 = vmatprep.subr.mxu0 %v3119_v26  ;;  %v3234_v42 = vld [vmem:[#allocation5 + $0x1bf0] sm:$0xff]  ;;  %v3217_v44 = vld [vmem:[#allocation5 + $0x1b68] sm:$0xff]  ;;  %v3216_v26 = vld [vmem:[#allocation5 + $0x1b60] sm:$0xff] }
 0xb00   :  { %2984 = vmatmul.mubr.f32.gmra.mxu1 %v2911_v32  ;;  %3381 = vmatprep.subr.mxu1 %v3199_v34  ;;  %v3108_v34 = vld [vmem:[#allocation5 + $0x1800] sm:$0xff]  ;;  %v3233_v32 = vld [vmem:[#allocation5 + $0x1be8] sm:$0xff] }
 0xb01   :  { %3382 = vmatpush1.msra.mxu1 %v3198_v16  ;;  %3321 = vmatpush1.msra.mxu0 %v3118_v39  ;;  %v3171_v16 = vld [vmem:[#allocation5 + $0x19f8] sm:$0xff] }
 0xb02   :  { %3383 = vmatprep.subr.mxu1 %v3197_v58  ;;  %3322 = vmatprep.subr.mxu0 %v3117_v6  ;;  %v3232_v58 = vld [vmem:[#allocation5 + $0x1be0] sm:$0xff]  ;;  %v3215_v39 = vld [vmem:[#allocation5 + $0x1b58] sm:$0xff]  ;;  %v3214_v6 = vld [vmem:[#allocation5 + $0x1b50] sm:$0xff] }
 0xb03   :  { %3384 = vmatpush1.msra.mxu1 %v3196_v43  ;;  %3323 = vmatpush1.msra.mxu0 %v3116_v60  ;;  %v3170_v43 = vld [vmem:[#allocation5 + $0x19f0] sm:$0xff]  ;;  %v3213_v60 = vld [vmem:[#allocation5 + $0x1b48] sm:$0xff] }
 0xb04   :  { %3385 = vmatprep.subr.mxu1 %v3195_v54  ;;  %3324 = vmatprep.subr.mxu0 %v3115_v21  ;;  %v3169_v54 = vld [vmem:[#allocation5 + $0x19e8] sm:$0xff]  ;;  %v3212_v21 = vld [vmem:[#allocation5 + $0x1b40] sm:$0xff] }
 0xb05   :  { %3386 = vmatpush1.msra.mxu1 %v3194_v40  ;;  %3325 = vmatpush1.msra.mxu0 %v3114_v62  ;;  %v3168_v40 = vld [vmem:[#allocation5 + $0x19e0] sm:$0xff]  ;;  %v3211_v62 = vld [vmem:[#allocation5 + $0x1b38] sm:$0xff] }
 0xb06   :  { %3387 = vmatprep.subr.mxu1 %v3193_v28  ;;  %3326 = vmatprep.subr.mxu0 %v3113_v56  ;;  %v3167_v28 = vld [vmem:[#allocation5 + $0x19d8] sm:$0xff]  ;;  %v3210_v56 = vld [vmem:[#allocation5 + $0x1b30] sm:$0xff] }
 0xb07   :  { %3388 = vmatpush1.msra.mxu1 %v3192_v63  ;;  %3327 = vmatpush1.msra.mxu0 %v3112_v23  ;;  %v3166_v63 = vld [vmem:[#allocation5 + $0x19d0] sm:$0xff]  ;;  %v3209_v23 = vld [vmem:[#allocation5 + $0x1b28] sm:$0xff] }
 0xb08   :  { %3389 = vmatprep.subr.mxu1 %v3191_v8  ;;  %3328 = vmatprep.subr.mxu0 %v3111_v7  ;;  %v3165_v8 = vld [vmem:[#allocation5 + $0x19c8] sm:$0xff]  ;;  %v3208_v7 = vld [vmem:[#allocation5 + $0x1b20] sm:$0xff] }
 0xb09   :  { %3390 = vmatpush1.msra.mxu1 %v3190_v17  ;;  %3329 = vmatpush1.msra.mxu0 %v3110_v38  ;;  %v3164_v17 = vld [vmem:[#allocation5 + $0x19c0] sm:$0xff]  ;;  %v3207_v38 = vld [vmem:[#allocation5 + $0x1b18] sm:$0xff] }
 0xb0a   :  { %3391 = vmatprep.subr.mxu1 %v3189_v24  ;;  %3330 = vmatprep.subr.mxu0 %v3109_v36  ;;  %v3163_v24 = vld [vmem:[#allocation5 + $0x19b8] sm:$0xff]  ;;  %v3206_v36 = vld [vmem:[#allocation5 + $0x1b10] sm:$0xff] }
 0xb0b   :  { %3392 = vmatpush1.msra.mxu1 %v3188_v31  ;;  %3331 = vmatpush1.msra.mxu0 %v3108_v34  ;;  %v3162_v31 = vld [vmem:[#allocation5 + $0x19b0] sm:$0xff]  ;;  %v3205_v34 = vld [vmem:[#allocation5 + $0x1b08] sm:$0xff] }
 0xb0c   :  { %3393 = vmatprep.subr.mxu1 %v3187_v11  ;;  %3332 = vmatprep.subr.mxu0 %v3171_v16  ;;  %v3161_v11 = vld [vmem:[#allocation5 + $0x19a8] sm:$0xff]  ;;  %v3204_v16 = vld [vmem:[#allocation5 + $0x1b00] sm:$0xff] }
 0xb0d   :  { %3394 = vmatpush1.msra.mxu1 %v3186_v9  ;;  %3333 = vmatpush2.msra.mxu0 %v3170_v43  ;;  %v3160_v9 = vld [vmem:[#allocation5 + $0x19a0] sm:$0xff]  ;;  %v3141_v43 = vld [vmem:[#allocation5 + $0x1908] sm:$0xff] }
 0xb0e   :  { %3395 = vmatprep.subr.mxu1 %v3185_v45  ;;  %3334 = vmatprep.subr.mxu0 %v3169_v54  ;;  %v3159_v45 = vld [vmem:[#allocation5 + $0x1998] sm:$0xff] }
 0xb0f   :  { %3396 = vmatpush1.msra.mxu1 %v3184_v33  ;;  %3335 = vmatpush2.msra.mxu0 %v3168_v40  ;;  %v3158_v33 = vld [vmem:[#allocation5 + $0x1990] sm:$0xff]  ;;  %v3267_v54 = vld [vmem:[#allocation5 + $0x1cf8] sm:$0xff] }
 0xb10   :  { %3397 = vmatprep.subr.mxu1 %v3183_v19  ;;  %3336 = vmatprep.subr.mxu0 %v3167_v28  ;;  %v3157_v19 = vld [vmem:[#allocation5 + $0x1988] sm:$0xff] }
 0xb11   :  { %3398 = vmatpush1.msra.mxu1 %v3182_v0  ;;  %3337 = vmatpush2.msra.mxu0 %v3166_v63  ;;  %v3156_v0 = vld [vmem:[#allocation5 + $0x1980] sm:$0xff] }
 0xb12   :  { %3399 = vmatprep.subr.mxu1 %v3181_v2  ;;  %3338 = vmatprep.subr.mxu0 %v3165_v8  ;;  %v3155_v2 = vld [vmem:[#allocation5 + $0x1978] sm:$0xff] }
 0xb13   :  { %3400 = vmatpush1.msra.mxu1 %v3180_v46  ;;  %3339 = vmatpush2.msra.mxu0 %v3164_v17  ;;  %v3154_v46 = vld [vmem:[#allocation5 + $0x1970] sm:$0xff] }
 0xb14   :  { %3401 = vmatprep.subr.mxu1 %v3179_v3  ;;  %3340 = vmatprep.subr.mxu0 %v3163_v24  ;;  %v3153_v3 = vld [vmem:[#allocation5 + $0x1968] sm:$0xff] }
 0xb15   :  { %3402 = vmatpush1.msra.mxu1 %v3178_v59  ;;  %3341 = vmatpush2.msra.mxu0 %v3162_v31  ;;  %v3152_v59 = vld [vmem:[#allocation5 + $0x1960] sm:$0xff] }
 0xb16   :  { %3403 = vmatprep.subr.mxu1 %v3177_v15  ;;  %3342 = vmatprep.subr.mxu0 %v3161_v11  ;;  %v3151_v15 = vld [vmem:[#allocation5 + $0x1958] sm:$0xff] }
 0xb17   :  { %3404 = vmatpush1.msra.mxu1 %v3176_v50  ;;  %3343 = vmatpush2.msra.mxu0 %v3160_v9  ;;  %v3150_v50 = vld [vmem:[#allocation5 + $0x1950] sm:$0xff] }
 0xb18   :  { %3405 = vmatprep.subr.mxu1 %v3175_v48  ;;  %3344 = vmatprep.subr.mxu0 %v3159_v45  ;;  %v3149_v48 = vld [vmem:[#allocation5 + $0x1948] sm:$0xff] }
 0xb19   :  { %3406 = vmatpush1.msra.mxu1 %v3174_v12  ;;  %3345 = vmatpush2.msra.mxu0 %v3158_v33  ;;  %v3148_v12 = vld [vmem:[#allocation5 + $0x1940] sm:$0xff] }
 0xb1a   :  { %3407 = vmatprep.subr.mxu1 %v3173_v13  ;;  %3346 = vmatprep.subr.mxu0 %v3157_v19  ;;  %v3147_v13 = vld [vmem:[#allocation5 + $0x1938] sm:$0xff] }
 0xb1b   :  { %3408 = vmatpush1.msra.mxu1 %v3172_v47  ;;  %3347 = vmatpush2.msra.mxu0 %v3156_v0  ;;  %v3146_v47 = vld [vmem:[#allocation5 + $0x1930] sm:$0xff] }
 0xb1c   :  { %3409 = vmatprep.subr.mxu1 %v3235_v27  ;;  %3348 = vmatprep.subr.mxu0 %v3155_v2  ;;  %v3145_v27 = vld [vmem:[#allocation5 + $0x1928] sm:$0xff] }
 0xb1d   :  { %3410 = vmatpush2.msra.mxu1 %v3234_v42  ;;  %3349 = vmatpush2.msra.mxu0 %v3154_v46  ;;  %v3144_v42 = vld [vmem:[#allocation5 + $0x1920] sm:$0xff] }
 0xb1e   :  { %3411 = vmatprep.subr.mxu1 %v3233_v32  ;;  %3350 = vmatprep.subr.mxu0 %v3153_v3  ;;  %v3143_v32 = vld [vmem:[#allocation5 + $0x1918] sm:$0xff] }
 0xb1f   :  { %3412 = vmatpush2.msra.mxu1 %v3232_v58  ;;  %3351 = vmatpush2.msra.mxu0 %v3152_v59  ;;  %v3142_v58 = vld [vmem:[#allocation5 + $0x1910] sm:$0xff] }
 0xb20   :  { %3413 = vmatprep.subr.mxu1 %v3231_v35  ;;  %3352 = vmatprep.subr.mxu0 %v3151_v15  ;;  %v3140_v35 = vld [vmem:[#allocation5 + $0x1900] sm:$0xff] }
 0xb21   :  { %3414 = vmatpush2.msra.mxu1 %v3230_v22  ;;  %3353 = vmatpush2.msra.mxu0 %v3150_v50 }
 0xb22   :  { %3415 = vmatprep.subr.mxu1 %v3229_v49  ;;  %3354 = vmatprep.subr.mxu0 %v3149_v48 }
 0xb23   :  { %3416 = vmatpush2.msra.mxu1 %v3228_v18  ;;  %3355 = vmatpush2.msra.mxu0 %v3148_v12 }
 0xb24   :  { %3417 = vmatprep.subr.mxu1 %v3227_v5  ;;  %3356 = vmatprep.subr.mxu0 %v3147_v13 }
 0xb25   :  { %3418 = vmatpush2.msra.mxu1 %v3226_v53  ;;  %3357 = vmatpush2.msra.mxu0 %v3146_v47 }
 0xb26   :  { %3419 = vmatprep.subr.mxu1 %v3225_v61  ;;  %3358 = vmatprep.subr.mxu0 %v3145_v27 }
 0xb27   :  { %3420 = vmatpush2.msra.mxu1 %v3224_v10  ;;  %3359 = vmatpush2.msra.mxu0 %v3144_v42 }
 0xb28   :  { %3421 = vmatprep.subr.mxu1 %v3223_v52  ;;  %3360 = vmatprep.subr.mxu0 %v3143_v32 }
 0xb29   :  { %3422 = vmatpush2.msra.mxu1 %v3222_v4  ;;  %3361 = vmatpush2.msra.mxu0 %v3142_v58 }
 0xb2a   :  { %3423 = vmatprep.subr.mxu1 %v3221_v1  ;;  %3362 = vmatprep.subr.mxu0 %v3141_v43 }
 0xb2b   :  { %3424 = vmatpush2.msra.mxu1 %v3220_v41  ;;  %3363 = vmatpush2.msra.mxu0 %v3140_v35 }
 0xb2c   :  { %3425 = vmatprep.subr.mxu1 %v3219_v20  ;;  %3454 = vmatprep.subr.mxu0 %v3267_v54 }
 0xb2d   :  { %3426 = vmatpush2.msra.mxu1 %v3218_v14  ;;  %v7189_v14 = vld [vmem:[#allocation18_spill] sm:$0xff] }
 0xb2e   :  { %3427 = vmatprep.subr.mxu1 %v3217_v44  ;;  %v3007_v44 = vld [vmem:[#allocation7 + $0x3] ss:$8 sm:$0x3] }
 0xb2f   :  { %3428 = vmatpush2.msra.mxu1 %v3216_v26  ;;  %v3047_v26 = vld [vmem:[#allocation8 + $0x3] ss:$8 sm:$0x3] }
 0xb30   :  { %3429 = vmatprep.subr.mxu1 %v3215_v39  ;;  %v7190_v39 = vld [vmem:[#allocation19_spill] sm:$0xff] }
 0xb31   :  { %3430 = vmatpush2.msra.mxu1 %v3214_v6  ;;  %v7191_v6 = vld [vmem:[#allocation20_spill] sm:$0xff] }
 0xb32   :  { %3431 = vmatprep.subr.mxu1 %v3213_v60  ;;  %v3052_v60 = vrot.slane %v3047_v26, %v7190_v39  ;;  %v3056_v15 = vrot.slane %v3047_v26, %v7191_v6  ;;  %v3258_v26 = vld [vmem:[#allocation5 + $0x1cb0] sm:$0xff] }
 0xb33   :  { %3432 = vmatpush2.msra.mxu1 %v3212_v21 }
 0xb34   :  { %3433 = vmatprep.subr.mxu1 %v3211_v62 }
 0xb35   :  { %3434 = vmatpush2.msra.mxu1 %v3210_v56 }
 0xb36   :  { %3435 = vmatprep.subr.mxu1 %v3209_v23 }
 0xb37   :  { %3436 = vmatpush2.msra.mxu1 %v3208_v7  ;;  %v7192_v7 = vld [vmem:[#allocation21_spill] sm:$0xff] }
 0xb38   :  { %3437 = vmatprep.subr.mxu1 %v3207_v38  ;;  %v7194_v38 = vld [vmem:[#allocation22_spill] sm:$0xff] }
 0xb39   :  { %3438 = vmatpush2.msra.mxu1 %v3206_v36  ;;  %v7196_v36 = vld [vmem:[#allocation23_spill] sm:$0xff] }
 0xb3a   :  { %3439 = vmatprep.subr.mxu1 %v3205_v34 }
 0xb3b   :  { %3440 = vmatpush2.msra.mxu1 %v3204_v16 }
 0xb3c   :  { %3531 = vmatprep.subr.mxu1 %v6203_v29 }
 0xbbc   :  { %v2979_v22 = vpop.f32.mrf.mxu1 }
 0xbbe   :  { %v2981_v40 = vpop.f32.mrf.mxu1 }
 0xbc0   :  { %v2985_v49 = vpop.f32.mrf.mxu1 }
 0xbc1   :  { %v2990_v28 = vadd.f32 %v2985_v49, %v2979_v22 }
 0xbc2   :  { %v2987_v18 = vpop.f32.mrf.mxu1 }
 0xbc3   :  { %v2991_v63 = vrot.slane %v2990_v28, 4  ;;  %v2997_v5 = vadd.f32 %v2987_v18, %v2981_v40 }
 0xbc5   :  { %v2992_v8 = vadd.f32 %v2991_v63, %v2990_v28  ;;  %v2998_v53 = vrot.slane %v2997_v5, 4  ;;  %v3279_v28 = vld [vmem:[#allocation5 + $0x1d58] sm:$0xff] }
 0xbc7   :  { %v2993_v17 = vrot.slane %v2992_v8, 2  ;;  %v2999_v61 = vadd.f32 %v2998_v53, %v2997_v5  ;;  %v6340_v53 = vld [vmem:[#allocation10 + $0xf0] sm:$0xff] }
 0xbc9   :  { %v2994_v24 = vadd.f32 %v2993_v17, %v2992_v8  ;;  %v3000_v10 = vrot.slane %v2999_v61, 2  ;;  %v3266_v8 = vld [vmem:[#allocation5 + $0x1cf0] sm:$0xff] }
 0xbcb   :  { %v2995_v31 = vrot.slane %v2994_v24, 1  ;;  %v3001_v52 = vadd.f32 %v3000_v10, %v2999_v61  ;;  %v3265_v61 = vld [vmem:[#allocation5 + $0x1ce8] sm:$0xff] }
 0xbcd   :  { %v2996_v29 = vadd.f32 %v2995_v31, %v2994_v24  ;;  %v3002_v11 = vrot.slane %v3001_v52, 1  ;;  %v3280_v31 = vld [vmem:[#allocation5 + $0x1d60] sm:$0xff] }
 0xbcf   :  { %v3004_v4 = vmul.f32 0.0078125, %v2996_v29  ;;  %v3003_v9 = vadd.f32 %v3002_v11, %v3001_v52  ;;  %v3264_v29 = vld [vmem:[#allocation5 + $0x1ce0] sm:$0xff]  ;;  %v3285_v11 = vld [vmem:[#allocation5 + $0x1d88] sm:$0xff] }
 0xbd1   :  { %v3008_v1 = vadd.f32 1e-05, %v3004_v4  ;;  %v3005_v45 = vmul.f32 0.0078125, %v3003_v9  ;;  %v3263_v9 = vld [vmem:[#allocation5 + $0x1cd8] sm:$0xff]  ;;  %v3286_v4 = vld [vmem:[#allocation5 + $0x1d90] sm:$0xff] }
 0xbd3   :  { %v3009_v41 = vadd.f32 1e-05, %v3005_v45  ;;  %4549 = vrsqrt.f32 %v3008_v1  ;;  %v3262_v45 = vld [vmem:[#allocation5 + $0x1cd0] sm:$0xff]  ;;  %v3287_v1 = vld [vmem:[#allocation5 + $0x1d98] sm:$0xff] }
 0xbd5   :  { %4551 = vrsqrt.f32 %v3009_v41  ;;  %v6370_v41 = vld [vmem:[#allocation10 + $0xe8] sm:$0xff] }
 0xbe0   :  { %v4550_v33 = vpop.eup %4549 }
 0xbe2   :  { %v4552_v20 = vpop.eup %4551 }
 0xbe3   :  { %v3014_v19 = vcombine.low %v4550_v33, %v4552_v20  ;;  %v3261_v20 = vld [vmem:[#allocation5 + $0x1cc8] sm:$0xff] }
 0xbe5   :  { %v3021_v0 = vrot.slane %v3014_v19, %v7189_v14  ;;  %v6377_v19 = vld [vmem:[#allocation10 + $0xe0] sm:$0xff] }
 0xbe7   :  { %v3028_v2 = vrot.slane %v3021_v0, %v7189_v14  ;;  %v3276_v14 = vld [vmem:[#allocation5 + $0x1d40] sm:$0xff] }
 0xbe9   :  { %v3030_v46 = vmul.f32 %v3028_v2, %v3007_v44  ;;  %v3260_v44 = vld [vmem:[#allocation5 + $0x1cc0] sm:$0xff]  ;;  %v3259_v2 = vld [vmem:[#allocation5 + $0x1cb8] sm:$0xff] }
 0xbeb   :  { %v3035_v3 = vrot.slane %v3030_v46, %v7190_v39  ;;  %v3039_v59 = vrot.slane %v3030_v46, %v7191_v6  ;;  %v6382_v46 = vld [vmem:[#allocation10 + $0xd8] sm:$0xff]  ;;  %v3278_v6 = vld [vmem:[#allocation5 + $0x1d50] sm:$0xff]  ;;  %v3277_v39 = vld [vmem:[#allocation5 + $0x1d48] sm:$0xff] }
 0xbed   :  { %v3043_v21 = vmul.f32 %v3039_v59, %v6276_v37  ;;  %v3044_v50 = vmul.f32 %v3035_v3, %v6284_v30  ;;  %v3042_v62 = vmul.f32 %v3035_v3, %v6274_v25  ;;  %v3045_v48 = vmul.f32 %v3039_v59, %v6278_v57  ;;  %v7198_v37 = vld [vmem:[#allocation24_spill] sm:$0xff]  ;;  %v3257_v3 = vld [vmem:[#allocation5 + $0x1ca8] sm:$0xff]  ;;  %v6385_v59 = vld [vmem:[#allocation10 + $0xd0] sm:$0xff] }
 0xbef   :  { %v3060_v56 = vadd.f32 %v3056_v15, %v3043_v21  ;;  %v3061_v12 = vadd.f32 %v3052_v60, %v3044_v50  ;;  %v3059_v23 = vadd.f32 %v3052_v60, %v3042_v62  ;;  %v3062_v13 = vadd.f32 %v3056_v15, %v3045_v48  ;;  %v3256_v60 = vld [vmem:[#allocation5 + $0x1ca0] sm:$0xff]  ;;  %v6388_v15 = vld [vmem:[#allocation10 + $0xc8] sm:$0xff]  ;;  %v3255_v21 = vld [vmem:[#allocation5 + $0x1c98] sm:$0xff] }
 0xbf0   :  { %v6391_v50 = vld [vmem:[#allocation10 + $0xc0] sm:$0xff]  ;;  %v3254_v62 = vld [vmem:[#allocation5 + $0x1c90] sm:$0xff]  ;;  %v6394_v48 = vld [vmem:[#allocation10 + $0xb8] sm:$0xff] }
 0xbf1   :  { %v6302_v47 = vadd.f32 %v3060_v56, %v7192_v7  ;;  %v6305_v27 = vadd.f32 %v3061_v12, %v7194_v38  ;;  %v6308_v42 = vadd.f32 %v3059_v23, %v7196_v36  ;;  %v6311_v34 = vadd.f32 %v3062_v13, %v7198_v37  ;;  %v3253_v56 = vld [vmem:[#allocation5 + $0x1c88] sm:$0xff]  ;;  %v6397_v12 = vld [vmem:[#allocation10 + $0xb0] sm:$0xff]  ;;  %v3252_v23 = vld [vmem:[#allocation5 + $0x1c80] sm:$0xff] }
 0xbf2   :  { %v6400_v13 = vld [vmem:[#allocation10 + $0xa8] sm:$0xff]  ;;  %v3251_v7 = vld [vmem:[#allocation5 + $0x1c78] sm:$0xff]  ;;  %v6403_v38 = vld [vmem:[#allocation10 + $0xa0] sm:$0xff] }
 0xbf3   :  { %7193 = vst [vmem:[#allocation25_spill] sm:$0xff] %v6302_v47  ;;  %7195 = vst [vmem:[#allocation26_spill] sm:$0xff] %v6305_v27  ;;  %3441 = vmatprep.mubr.f32.mxu1 %v6302_v47  ;;  %v3070_v25 = vrot.slane %v6311_v34, 7  ;;  %v3076_v57 = vrot.slane %v6302_v47, 7  ;;  %v3088_v30 = vrot.slane %v6302_v47, 1  ;;  %v3089_v32 = vrot.slane %v6311_v34, 1 }
 0xbf4   :  { %7197 = vst [vmem:[#allocation27_spill] sm:$0xff] %v6308_v42  ;;  %7199 = vst [vmem:[#allocation28_spill] sm:$0xff] %v6311_v34  ;;  %3442 = vmatmul.mubr.f32.vlgmr.msra.gmra.mxu1 %v6308_v42  ;;  %v3069_v16 = vrot.slane %v6305_v27, 7  ;;  %v3075_v58 = vrot.slane %v6308_v42, 7  ;;  %v3085_v43 = vrot.slane %v6308_v42, 1  ;;  %v3086_v35 = vrot.slane %v6305_v27, 1 }
 0xbf5   :  { %3447 = vmatprep.mubr.f32.mxu1 %v6311_v34  ;;  %v3084_v54 = vsel %vm192_vm0, %v3070_v25, %v3076_v57  ;;  %v3090_v22 = vsel %vm203_vm1, %v3088_v30, %v3089_v32  ;;  %v6327_v40 = vsel %vm192_vm0, %v3076_v57, %v3070_v25  ;;  %v6330_v49 = vsel %vm203_vm1, %v3089_v32, %v3088_v30  ;;  %v3250_v36 = vld [vmem:[#allocation5 + $0x1c70] sm:$0xff]  ;;  %v6406_v37 = vld [vmem:[#allocation10 + $0x98] sm:$0xff]  ;;  %v3249_v25 = vld [vmem:[#allocation5 + $0x1c68] sm:$0xff] }
 0xbf6   :  { %v3100_v18 = vsel %vm5151_vm4, %v3090_v22, %v3084_v54  ;;  %v6335_v63 = vsel %vm192_vm0, %v3069_v16, %v3075_v58  ;;  %v6338_v5 = vsel %vm203_vm1, %v3085_v43, %v3086_v35  ;;  %3532 = vmatpush1.msra.mxu1 %v6340_v53  ;;  %v6348_v24 = vsel %vm192_vm0, %v3075_v58, %v3069_v16  ;;  %v6409_v57 = vld [vmem:[#allocation10 + $0x90] sm:$0xff]  ;;  %v3248_v30 = vld [vmem:[#allocation5 + $0x1c60] sm:$0xff]  ;;  %v6412_v32 = vld [vmem:[#allocation10 + $0x88] sm:$0xff] }
 0xbf7   :  { %3364 = vmatprep.mubr.f32.mxu0 %v3100_v18  ;;  %v3099_v17 = vsel %vm5151_vm4, %v6338_v5, %v6335_v63  ;;  %v6351_v10 = vsel %vm203_vm1, %v3086_v35, %v3085_v43  ;;  %v3102_v52 = vsel %vm5169_vm5, %v6330_v49, %v6327_v40  ;;  %3533 = vmatprep.subr.mxu1 %v6370_v41  ;;  %v3247_v16 = vld [vmem:[#allocation5 + $0x1c58] sm:$0xff]  ;;  %v6415_v58 = vld [vmem:[#allocation10 + $0x80] sm:$0xff]  ;;  %v3246_v43 = vld [vmem:[#allocation5 + $0x1c50] sm:$0xff] }
 0xbf8   :  { %3365 = vmatmul.mubr.f32.vlgmr.msra.gmra.mxu0 %v3099_v17  ;;  %3448 = vmatmul.mubr.f32.gmra.mxu1 %v6305_v27  ;;  %v3101_v33 = vsel %vm5169_vm5, %v6351_v10, %v6348_v24  ;;  %v3104_v0 = vsel %vm5101_vm2, %v3084_v54, %v3090_v22  ;;  %v6418_v35 = vld [vmem:[#allocation10 + $0x78] sm:$0xff]  ;;  %v3245_v54 = vld [vmem:[#allocation5 + $0x1c48] sm:$0xff]  ;;  %v6421_v22 = vld [vmem:[#allocation10 + $0x70] sm:$0xff] }
 0xbf9   :  { %3455 = vmatpush1.msra.mxu0 %v3266_v8  ;;  %3370 = vmatprep.mubr.f32.mxu0 %v3102_v52  ;;  %v3244_v18 = vld [vmem:[#allocation5 + $0x1c40] sm:$0xff]  ;;  %v6424_v8 = vld [vmem:[#allocation10 + $0x68] sm:$0xff]  ;;  %v3243_v17 = vld [vmem:[#allocation5 + $0x1c38] sm:$0xff] }
 0xbfa   :  { %3456 = vmatprep.subr.mxu0 %v3265_v61  ;;  %3534 = vmatpush1.msra.mxu1 %v6377_v19  ;;  %v6427_v61 = vld [vmem:[#allocation10 + $0x60] sm:$0xff]  ;;  %v3242_v52 = vld [vmem:[#allocation5 + $0x1c30] sm:$0xff]  ;;  %v3283_v27 = vld [vmem:[#allocation5 + $0x1d78] sm:$0xff] }
 0xbfb   :  { %3457 = vmatpush1.msra.mxu0 %v3264_v29  ;;  %3535 = vmatprep.subr.mxu1 %v6382_v46  ;;  %v6430_v29 = vld [vmem:[#allocation10 + $0x58] sm:$0xff]  ;;  %v3284_v34 = vld [vmem:[#allocation5 + $0x1d80] sm:$0xff]  ;;  %v3282_v47 = vld [vmem:[#allocation5 + $0x1d70] sm:$0xff] }
 0xbfc   :  { %3458 = vmatprep.subr.mxu0 %v3263_v9  ;;  %3371 = vmatmul.mubr.f32.gmra.mxu0 %v3101_v33  ;;  %v3241_v9 = vld [vmem:[#allocation5 + $0x1c28] sm:$0xff]  ;;  %v3240_v33 = vld [vmem:[#allocation5 + $0x1c20] sm:$0xff] }
 0xbfd   :  { %3459 = vmatpush1.msra.mxu0 %v3262_v45  ;;  %3518 = vmatprep.mubr.f32.mxu0 %v3104_v0  ;;  %v6433_v45 = vld [vmem:[#allocation10 + $0x50] sm:$0xff]  ;;  %v3239_v0 = vld [vmem:[#allocation5 + $0x1c18] sm:$0xff]  ;;  %v3281_v42 = vld [vmem:[#allocation5 + $0x1d68] sm:$0xff] }
 0xbfe   :  { %3460 = vmatprep.subr.mxu0 %v3261_v20  ;;  %3536 = vmatpush1.msra.mxu1 %v6385_v59  ;;  %v6436_v20 = vld [vmem:[#allocation10 + $0x48] sm:$0xff] }
 0xbff   :  { %3461 = vmatpush1.msra.mxu0 %v3260_v44  ;;  %3537 = vmatprep.subr.mxu1 %v6388_v15  ;;  %v6439_v44 = vld [vmem:[#allocation10 + $0x40] sm:$0xff] }
 0xc00   :  { %3462 = vmatprep.subr.mxu0 %v3259_v2  ;;  %3538 = vmatpush1.msra.mxu1 %v6391_v50  ;;  %v3238_v2 = vld [vmem:[#allocation5 + $0x1c10] sm:$0xff] }
 0xc01   :  { %3463 = vmatpush1.msra.mxu0 %v3258_v26  ;;  %3539 = vmatprep.subr.mxu1 %v6394_v48  ;;  %v6442_v26 = vld [vmem:[#allocation10 + $0x38] sm:$0xff] }
 0xc02   :  { %3464 = vmatprep.subr.mxu0 %v3257_v3  ;;  %3540 = vmatpush1.msra.mxu1 %v6397_v12  ;;  %v3237_v3 = vld [vmem:[#allocation5 + $0x1c08] sm:$0xff] }
 0xc03   :  { %3465 = vmatpush1.msra.mxu0 %v3256_v60  ;;  %3541 = vmatprep.subr.mxu1 %v6400_v13  ;;  %v6445_v60 = vld [vmem:[#allocation10 + $0x30] sm:$0xff] }
 0xc04   :  { %3466 = vmatprep.subr.mxu0 %v3255_v21  ;;  %3542 = vmatpush1.msra.mxu1 %v6403_v38  ;;  %v3236_v21 = vld [vmem:[#allocation5 + $0x1c00] sm:$0xff] }
 0xc05   :  { %3467 = vmatpush1.msra.mxu0 %v3254_v62  ;;  %3543 = vmatprep.subr.mxu1 %v6406_v37  ;;  %v6448_v62 = vld [vmem:[#allocation10 + $0x28] sm:$0xff] }
 0xc06   :  { %3468 = vmatprep.subr.mxu0 %v3253_v56  ;;  %3544 = vmatpush1.msra.mxu1 %v6409_v57  ;;  %v3299_v56 = vld [vmem:[#allocation5 + $0x1df8] sm:$0xff] }
 0xc07   :  { %3469 = vmatpush1.msra.mxu0 %v3252_v23  ;;  %3545 = vmatprep.subr.mxu1 %v6412_v32  ;;  %v6451_v23 = vld [vmem:[#allocation10 + $0x20] sm:$0xff] }
 0xc08   :  { %3470 = vmatprep.subr.mxu0 %v3251_v7  ;;  %3546 = vmatpush1.msra.mxu1 %v6415_v58  ;;  %v3298_v7 = vld [vmem:[#allocation5 + $0x1df0] sm:$0xff] }
 0xc09   :  { %3471 = vmatpush1.msra.mxu0 %v3250_v36  ;;  %3547 = vmatprep.subr.mxu1 %v6418_v35  ;;  %v6454_v36 = vld [vmem:[#allocation10 + $0x18] sm:$0xff] }
 0xc0a   :  { %3472 = vmatprep.subr.mxu0 %v3249_v25  ;;  %3548 = vmatpush1.msra.mxu1 %v6421_v22  ;;  %v3297_v25 = vld [vmem:[#allocation5 + $0x1de8] sm:$0xff] }
 0xc0b   :  { %3473 = vmatpush1.msra.mxu0 %v3248_v30  ;;  %3549 = vmatprep.subr.mxu1 %v6424_v8  ;;  %v6457_v30 = vld [vmem:[#allocation10 + $0x10] sm:$0xff] }
 0xc0c   :  { %3474 = vmatprep.subr.mxu0 %v3247_v16  ;;  %3550 = vmatpush1.msra.mxu1 %v6427_v61  ;;  %v3296_v16 = vld [vmem:[#allocation5 + $0x1de0] sm:$0xff] }
 0xc0d   :  { %3475 = vmatpush1.msra.mxu0 %v3246_v43  ;;  %3551 = vmatprep.subr.mxu1 %v6430_v29  ;;  %v6460_v43 = vld [vmem:[#allocation10 + $0x8] sm:$0xff] }
 0xc0e   :  { %3476 = vmatprep.subr.mxu0 %v3245_v54  ;;  %3552 = vmatpush1.msra.mxu1 %v6433_v45  ;;  %v3295_v54 = vld [vmem:[#allocation5 + $0x1dd8] sm:$0xff] }
 0xc0f   :  { %3477 = vmatpush1.msra.mxu0 %v3244_v18  ;;  %3553 = vmatprep.subr.mxu1 %v6436_v20  ;;  %v6463_v18 = vld [vmem:[#allocation10] sm:$0xff] }
 0xc10   :  { %3478 = vmatprep.subr.mxu0 %v3243_v17  ;;  %3554 = vmatpush1.msra.mxu1 %v6439_v44  ;;  %v3294_v17 = vld [vmem:[#allocation5 + $0x1dd0] sm:$0xff] }
 0xc11   :  { %3479 = vmatpush1.msra.mxu0 %v3242_v52  ;;  %3555 = vmatprep.subr.mxu1 %v6442_v26  ;;  %v6466_v52 = vld [vmem:[#allocation10 + $0x1f8] sm:$0xff] }
 0xc12   :  { %3480 = vmatprep.subr.mxu0 %v3241_v9  ;;  %3556 = vmatpush1.msra.mxu1 %v6445_v60  ;;  %v3293_v9 = vld [vmem:[#allocation5 + $0x1dc8] sm:$0xff] }
 0xc13   :  { %3481 = vmatpush1.msra.mxu0 %v3240_v33  ;;  %3557 = vmatprep.subr.mxu1 %v6448_v62  ;;  %v6469_v33 = vld [vmem:[#allocation10 + $0x1f0] sm:$0xff] }
 0xc14   :  { %3482 = vmatprep.subr.mxu0 %v3239_v0  ;;  %3558 = vmatpush1.msra.mxu1 %v6451_v23  ;;  %v3292_v0 = vld [vmem:[#allocation5 + $0x1dc0] sm:$0xff] }
 0xc15   :  { %3483 = vmatpush1.msra.mxu0 %v3238_v2  ;;  %3559 = vmatprep.subr.mxu1 %v6454_v36  ;;  %v6472_v2 = vld [vmem:[#allocation10 + $0x1e8] sm:$0xff] }
 0xc16   :  { %3484 = vmatprep.subr.mxu0 %v3237_v3  ;;  %3560 = vmatpush1.msra.mxu1 %v6457_v30  ;;  %v3291_v3 = vld [vmem:[#allocation5 + $0x1db8] sm:$0xff] }
 0xc17   :  { %3485 = vmatpush1.msra.mxu0 %v3236_v21  ;;  %3561 = vmatprep.subr.mxu1 %v6460_v43  ;;  %v6475_v21 = vld [vmem:[#allocation10 + $0x1e0] sm:$0xff] }
 0xc18   :  { %3486 = vmatprep.subr.mxu0 %v3299_v56  ;;  %3562 = vmatpush1.msra.mxu1 %v6463_v18  ;;  %v3290_v56 = vld [vmem:[#allocation5 + $0x1db0] sm:$0xff] }
 0xc19   :  { %3487 = vmatpush2.msra.mxu0 %v3298_v7  ;;  %3563 = vmatprep.subr.mxu1 %v6466_v52  ;;  %v6478_v7 = vld [vmem:[#allocation10 + $0x1d8] sm:$0xff] }
 0xc1a   :  { %3488 = vmatprep.subr.mxu0 %v3297_v25  ;;  %3564 = vmatpush2.msra.mxu1 %v6469_v33  ;;  %v3289_v25 = vld [vmem:[#allocation5 + $0x1da8] sm:$0xff] }
 0xc1b   :  { %3489 = vmatpush2.msra.mxu0 %v3296_v16  ;;  %3565 = vmatprep.subr.mxu1 %v6472_v2  ;;  %v6481_v16 = vld [vmem:[#allocation10 + $0x1d0] sm:$0xff] }
 0xc1c   :  { %3490 = vmatprep.subr.mxu0 %v3295_v54  ;;  %3566 = vmatpush2.msra.mxu1 %v6475_v21  ;;  %v3288_v54 = vld [vmem:[#allocation5 + $0x1da0] sm:$0xff] }
 0xc1d   :  { %3491 = vmatpush2.msra.mxu0 %v3294_v17  ;;  %3567 = vmatprep.subr.mxu1 %v6478_v7  ;;  %v6484_v17 = vld [vmem:[#allocation10 + $0x1c8] sm:$0xff] }
 0xc1e   :  { %3492 = vmatprep.subr.mxu0 %v3293_v9  ;;  %3568 = vmatpush2.msra.mxu1 %v6481_v16  ;;  %v6487_v9 = vld [vmem:[#allocation10 + $0x1c0] sm:$0xff] }
 0xc1f   :  { %3493 = vmatpush2.msra.mxu0 %v3292_v0  ;;  %3569 = vmatprep.subr.mxu1 %v6484_v17  ;;  %v6490_v0 = vld [vmem:[#allocation10 + $0x1b8] sm:$0xff] }
 0xc20   :  { %3494 = vmatprep.subr.mxu0 %v3291_v3  ;;  %3570 = vmatpush2.msra.mxu1 %v6487_v9  ;;  %v6493_v3 = vld [vmem:[#allocation10 + $0x1b0] sm:$0xff] }
 0xc21   :  { %3495 = vmatpush2.msra.mxu0 %v3290_v56  ;;  %3571 = vmatprep.subr.mxu1 %v6490_v0  ;;  %v6496_v56 = vld [vmem:[#allocation10 + $0x1a8] sm:$0xff] }
 0xc22   :  { %3496 = vmatprep.subr.mxu0 %v3289_v25  ;;  %3572 = vmatpush2.msra.mxu1 %v6493_v3  ;;  %v6499_v25 = vld [vmem:[#allocation10 + $0x1a0] sm:$0xff] }
 0xc23   :  { %3497 = vmatpush2.msra.mxu0 %v3288_v54  ;;  %3573 = vmatprep.subr.mxu1 %v6496_v56  ;;  %v6502_v54 = vld [vmem:[#allocation10 + $0x198] sm:$0xff] }
 0xc24   :  { %3498 = vmatprep.subr.mxu0 %v3287_v1  ;;  %3574 = vmatpush2.msra.mxu1 %v6499_v25  ;;  %v6505_v1 = vld [vmem:[#allocation10 + $0x190] sm:$0xff] }
 0xc25   :  { %3499 = vmatpush2.msra.mxu0 %v3286_v4  ;;  %3575 = vmatprep.subr.mxu1 %v6502_v54  ;;  %v6508_v4 = vld [vmem:[#allocation10 + $0x188] sm:$0xff] }
 0xc26   :  { %3500 = vmatprep.subr.mxu0 %v3285_v11  ;;  %3576 = vmatpush2.msra.mxu1 %v6505_v1  ;;  %v6511_v11 = vld [vmem:[#allocation10 + $0x180] sm:$0xff] }
 0xc27   :  { %3501 = vmatpush2.msra.mxu0 %v3284_v34  ;;  %3577 = vmatprep.subr.mxu1 %v6508_v4  ;;  %7202 = vst [vmem:[#allocation29_spill] sm:$0xff] %v6511_v11  ;;  %v6514_v34 = vld [vmem:[#allocation10 + $0x178] sm:$0xff] }
 0xc28   :  { %3502 = vmatprep.subr.mxu0 %v3283_v27  ;;  %3578 = vmatpush2.msra.mxu1 %v6511_v11  ;;  %7203 = vst [vmem:[#allocation30_spill] sm:$0xff] %v6514_v34  ;;  %v6517_v27 = vld [vmem:[#allocation10 + $0x170] sm:$0xff]  ;;  %v3275_v11 = vld [vmem:[#allocation5 + $0x1d38] sm:$0xff] }
 0xc29   :  { %3503 = vmatpush2.msra.mxu0 %v3282_v47  ;;  %3579 = vmatprep.subr.mxu1 %v6514_v34  ;;  %7204 = vst [vmem:[#allocation31_spill] sm:$0xff] %v6517_v27  ;;  %v6520_v47 = vld [vmem:[#allocation10 + $0x168] sm:$0xff]  ;;  %v3274_v34 = vld [vmem:[#allocation5 + $0x1d30] sm:$0xff] }
 0xc2a   :  { %3504 = vmatprep.subr.mxu0 %v3281_v42  ;;  %3580 = vmatpush2.msra.mxu1 %v6517_v27  ;;  %7205 = vst [vmem:[#allocation32_spill] sm:$0xff] %v6520_v47  ;;  %v6523_v42 = vld [vmem:[#allocation10 + $0x160] sm:$0xff]  ;;  %v3273_v27 = vld [vmem:[#allocation5 + $0x1d28] sm:$0xff] }
 0xc2b   :  { %3505 = vmatpush2.msra.mxu0 %v3280_v31  ;;  %3581 = vmatprep.subr.mxu1 %v6520_v47  ;;  %7206 = vst [vmem:[#allocation33_spill] sm:$0xff] %v6523_v42  ;;  %v6526_v31 = vld [vmem:[#allocation10 + $0x158] sm:$0xff]  ;;  %v3272_v47 = vld [vmem:[#allocation5 + $0x1d20] sm:$0xff] }
 0xc2c   :  { %3506 = vmatprep.subr.mxu0 %v3279_v28  ;;  %3582 = vmatpush2.msra.mxu1 %v6523_v42  ;;  %7207 = vst [vmem:[#allocation34_spill] sm:$0xff] %v6526_v31  ;;  %v6529_v28 = vld [vmem:[#allocation10 + $0x150] sm:$0xff]  ;;  %v3271_v42 = vld [vmem:[#allocation5 + $0x1d18] sm:$0xff] }
 0xc2d   :  { %3507 = vmatpush2.msra.mxu0 %v3278_v6  ;;  %3583 = vmatprep.subr.mxu1 %v6526_v31  ;;  %7208 = vst [vmem:[#allocation21_spill] sm:$0xff] %v6529_v28  ;;  %v6532_v6 = vld [vmem:[#allocation10 + $0x148] sm:$0xff]  ;;  %v3270_v31 = vld [vmem:[#allocation5 + $0x1d10] sm:$0xff] }
 0xc2e   :  { %3508 = vmatprep.subr.mxu0 %v3277_v39  ;;  %3584 = vmatpush2.msra.mxu1 %v6529_v28  ;;  %7209 = vst [vmem:[#allocation22_spill] sm:$0xff] %v6532_v6  ;;  %v6535_v39 = vld [vmem:[#allocation10 + $0x140] sm:$0xff]  ;;  %v3269_v28 = vld [vmem:[#allocation5 + $0x1d08] sm:$0xff] }
 0xc2f   :  { %3509 = vmatpush2.msra.mxu0 %v3276_v14  ;;  %3585 = vmatprep.subr.mxu1 %v6532_v6  ;;  %7210 = vst [vmem:[#allocation23_spill] sm:$0xff] %v6535_v39  ;;  %v6538_v14 = vld [vmem:[#allocation10 + $0x138] sm:$0xff]  ;;  %v3268_v6 = vld [vmem:[#allocation5 + $0x1d00] sm:$0xff] }
 0xc30   :  { %3510 = vmatprep.subr.mxu0 %v3275_v11  ;;  %3586 = vmatpush2.msra.mxu1 %v6535_v39  ;;  %v6541_v11 = vld [vmem:[#allocation10 + $0x130] sm:$0xff]  ;;  %v6547_v39 = vld [vmem:[#allocation10 + $0x120] sm:$0xff] }
 0xc31   :  { %3511 = vmatpush2.msra.mxu0 %v3274_v34  ;;  %3587 = vmatprep.subr.mxu1 %v6538_v14  ;;  %v6544_v34 = vld [vmem:[#allocation10 + $0x128] sm:$0xff] }
 0xc32   :  { %3512 = vmatprep.subr.mxu0 %v3273_v27  ;;  %3588 = vmatpush2.msra.mxu1 %v6541_v11  ;;  %v6550_v27 = vld [vmem:[#allocation10 + $0x118] sm:$0xff] }
 0xc33   :  { %3513 = vmatpush2.msra.mxu0 %v3272_v47  ;;  %3589 = vmatprep.subr.mxu1 %v6544_v34  ;;  %v6553_v47 = vld [vmem:[#allocation10 + $0x110] sm:$0xff] }
 0xc34   :  { %3514 = vmatprep.subr.mxu0 %v3271_v42  ;;  %3590 = vmatpush2.msra.mxu1 %v6547_v39  ;;  %7211 = vst [vmem:[#allocation24_spill] sm:$0xff] %v6553_v47  ;;  %v7212_v42 = vsel %vm5101_vm2, %v6335_v63, %v6338_v5  ;;  %v7214_v63 = vsel %vm5114_vm3, %v6348_v24, %v6351_v10  ;;  %v7217_v5 = vld [vmem:[#allocation31_spill] sm:$0xff]  ;;  %v7219_v24 = vld [vmem:[#allocation33_spill] sm:$0xff]  ;;  %v7220_v10 = vld [vmem:[#allocation34_spill] sm:$0xff] }
 0xc35   :  { %3515 = vmatpush2.msra.mxu0 %v3270_v31  ;;  %3591 = vmatprep.subr.mxu1 %v6550_v27  ;;  %v6561_v31 = vld [vmem:[#allocation10 + $0x108] sm:$0xff] }
 0xc36   :  { %3516 = vmatprep.subr.mxu0 %v3269_v28  ;;  %3592 = vmatpush2.msra.mxu1 %v6553_v47  ;;  %v7213_v28 = vsel %vm5114_vm3, %v6327_v40, %v6330_v49  ;;  %v6572_v47 = vld [vmem:[#allocation10 + $0xf8] sm:$0xff]  ;;  %v7215_v40 = vld [vmem:[#allocation29_spill] sm:$0xff]  ;;  %v7216_v49 = vld [vmem:[#allocation30_spill] sm:$0xff] }
 0xc37   :  { %3517 = vmatpush2.msra.mxu0 %v3268_v6  ;;  %3593 = vmatprep.subr.mxu1 %v6561_v31  ;;  %v6569_v6 = vld [vmem:[#allocation10 + $0x100] sm:$0xff] }
 0xc38   :  { %3519 = vmatmul.mubr.f32.vlgmr.msra.gmra.mxu0 %v7212_v42  ;;  %3594 = vmatpush2.msra.mxu1 %v6569_v6 }
 0xc39   :  { %3524 = vmatprep.mubr.f32.mxu0 %v7213_v28  ;;  %3632 = vmatprep.subr.mxu0 %v6572_v47 }
 0xc3a   :  { %3633 = vmatpush1.msra.mxu0 %v6340_v53  ;;  %v7218_v53 = vld [vmem:[#allocation32_spill] sm:$0xff] }
 0xc3b   :  { %3634 = vmatprep.subr.mxu0 %v6370_v41  ;;  %v7221_v41 = vld [vmem:[#allocation21_spill] sm:$0xff] }
 0xc3c   :  { %3525 = vmatmul.mubr.f32.gmra.mxu0 %v7214_v63 }
 0xc3d   :  { %3635 = vmatpush1.msra.mxu0 %v6377_v19  ;;  %v7222_v19 = vld [vmem:[#allocation22_spill] sm:$0xff] }
 0xc3e   :  { %3636 = vmatprep.subr.mxu0 %v6382_v46  ;;  %v7223_v46 = vld [vmem:[#allocation23_spill] sm:$0xff] }
 0xc3f   :  { %3637 = vmatpush1.msra.mxu0 %v6385_v59  ;;  %v7224_v59 = vld [vmem:[#allocation24_spill] sm:$0xff] }
 0xc40   :  { %3638 = vmatprep.subr.mxu0 %v6388_v15 }
 0xc41   :  { %3639 = vmatpush1.msra.mxu0 %v6391_v50 }
 0xc42   :  { %3640 = vmatprep.subr.mxu0 %v6394_v48 }
 0xc43   :  { %3641 = vmatpush1.msra.mxu0 %v6397_v12 }
 0xc44   :  { %3642 = vmatprep.subr.mxu0 %v6400_v13 }
 0xc45   :  { %3643 = vmatpush1.msra.mxu0 %v6403_v38 }
 0xc46   :  { %3644 = vmatprep.subr.mxu0 %v6406_v37 }
 0xc47   :  { %3645 = vmatpush1.msra.mxu0 %v6409_v57 }
 0xc48   :  { %3646 = vmatprep.subr.mxu0 %v6412_v32 }
 0xc49   :  { %3647 = vmatpush1.msra.mxu0 %v6415_v58 }
 0xc4a   :  { %3648 = vmatprep.subr.mxu0 %v6418_v35 }
 0xc4b   :  { %3649 = vmatpush1.msra.mxu0 %v6421_v22 }
 0xc4c   :  { %3650 = vmatprep.subr.mxu0 %v6424_v8 }
 0xc4d   :  { %3651 = vmatpush1.msra.mxu0 %v6427_v61 }
 0xc4e   :  { %3652 = vmatprep.subr.mxu0 %v6430_v29 }
 0xc4f   :  { %3653 = vmatpush1.msra.mxu0 %v6433_v45 }
 0xc50   :  { %3654 = vmatprep.subr.mxu0 %v6436_v20 }
 0xc51   :  { %3655 = vmatpush1.msra.mxu0 %v6439_v44 }
 0xc52   :  { %3656 = vmatprep.subr.mxu0 %v6442_v26 }
 0xc53   :  { %3657 = vmatpush1.msra.mxu0 %v6445_v60 }
 0xc54   :  { %3658 = vmatprep.subr.mxu0 %v6448_v62  ;;  %v3922_v62 = vld [vmem:[#allocation5 + $0x20f8] sm:$0xff] }
 0xc55   :  { %3659 = vmatpush1.msra.mxu0 %v6451_v23  ;;  %v3858_v23 = vld [vmem:[#allocation5 + $0x1ef8] sm:$0xff] }
 0xc56   :  { %3660 = vmatprep.subr.mxu0 %v6454_v36  ;;  %v3857_v36 = vld [vmem:[#allocation5 + $0x1ef0] sm:$0xff]  ;;  %4019 = vmatprep.subr.mxu1 %v3858_v23  ;;  %v3904_v23 = vld [vmem:[#allocation5 + $0x2068] sm:$0xff] }
 0xc57   :  { %3661 = vmatpush1.msra.mxu0 %v6457_v30  ;;  %v3856_v30 = vld [vmem:[#allocation5 + $0x1ee8] sm:$0xff] }
 0xc58   :  { %3662 = vmatprep.subr.mxu0 %v6460_v43  ;;  %v3855_v43 = vld [vmem:[#allocation5 + $0x1ee0] sm:$0xff] }
 0xc59   :  { %3663 = vmatpush1.msra.mxu0 %v6463_v18  ;;  %v3854_v18 = vld [vmem:[#allocation5 + $0x1ed8] sm:$0xff] }
 0xc5a   :  { %3664 = vmatprep.subr.mxu0 %v6466_v52 }
 0xc5b   :  { %3665 = vmatpush2.msra.mxu0 %v6469_v33 }
 0xc5c   :  { %3666 = vmatprep.subr.mxu0 %v6472_v2 }
 0xc5d   :  { %3667 = vmatpush2.msra.mxu0 %v6475_v21 }
 0xc5e   :  { %3668 = vmatprep.subr.mxu0 %v6478_v7 }
 0xc5f   :  { %3669 = vmatpush2.msra.mxu0 %v6481_v16 }
 0xc60   :  { %3670 = vmatprep.subr.mxu0 %v6484_v17 }
 0xc61   :  { %3671 = vmatpush2.msra.mxu0 %v6487_v9 }
 0xc62   :  { %3672 = vmatprep.subr.mxu0 %v6490_v0 }
 0xc63   :  { %3673 = vmatpush2.msra.mxu0 %v6493_v3 }
 0xc64   :  { %3674 = vmatprep.subr.mxu0 %v6496_v56 }
 0xc65   :  { %3675 = vmatpush2.msra.mxu0 %v6499_v25 }
 0xc66   :  { %3676 = vmatprep.subr.mxu0 %v6502_v54 }
 0xc67   :  { %3677 = vmatpush2.msra.mxu0 %v6505_v1 }
 0xc68   :  { %3678 = vmatprep.subr.mxu0 %v6508_v4 }
 0xc69   :  { %3679 = vmatpush2.msra.mxu0 %v7215_v40 }
 0xc6a   :  { %3680 = vmatprep.subr.mxu0 %v7216_v49  ;;  %v3921_v49 = vld [vmem:[#allocation5 + $0x20f0] sm:$0xff] }
 0xc6b   :  { %3681 = vmatpush2.msra.mxu0 %v7217_v5 }
 0xc6c   :  { %3682 = vmatprep.subr.mxu0 %v7218_v53  ;;  %v3920_v53 = vld [vmem:[#allocation5 + $0x20e8] sm:$0xff] }
 0xc6d   :  { %3683 = vmatpush2.msra.mxu0 %v7219_v24  ;;  %v3919_v24 = vld [vmem:[#allocation5 + $0x20e0] sm:$0xff] }
 0xc6e   :  { %3684 = vmatprep.subr.mxu0 %v7220_v10  ;;  %v3918_v10 = vld [vmem:[#allocation5 + $0x20d8] sm:$0xff] }
 0xc6f   :  { %3685 = vmatpush2.msra.mxu0 %v7221_v41 }
 0xc70   :  { %3686 = vmatprep.subr.mxu0 %v7222_v19  ;;  %v3917_v19 = vld [vmem:[#allocation5 + $0x20d0] sm:$0xff] }
 0xc71   :  { %3687 = vmatpush2.msra.mxu0 %v7223_v46  ;;  %v3916_v46 = vld [vmem:[#allocation5 + $0x20c8] sm:$0xff] }
 0xc72   :  { %3688 = vmatprep.subr.mxu0 %v6538_v14 }
 0xc73   :  { %3689 = vmatpush2.msra.mxu0 %v6541_v11 }
 0xc74   :  { %3690 = vmatprep.subr.mxu0 %v6544_v34 }
 0xc75   :  { %3691 = vmatpush2.msra.mxu0 %v6547_v39 }
 0xc76   :  { %3692 = vmatprep.subr.mxu0 %v6550_v27 }
 0xc77   :  { %3693 = vmatpush2.msra.mxu0 %v7224_v59  ;;  %v3915_v59 = vld [vmem:[#allocation5 + $0x20c0] sm:$0xff] }
 0xc78   :  { %3694 = vmatprep.subr.mxu0 %v6561_v31 }
 0xc79   :  { %3695 = vmatpush2.msra.mxu0 %v6569_v6 }
 0xc7a   :  { %4096 = vmatprep.subr.mxu0 %v3922_v62  ;;  %v3843_v62 = vld [vmem:[#allocation5 + $0x1e80] sm:$0xff] }
 0xcb4   :  { %v3443_v48 = vpop.f32.mrf.mxu1 }
 0xcb6   :  { %v3445_v13 = vpop.f32.mrf.mxu1 }
 0xcb8   :  { %v3366_v15 = vpop.f32.mrf.mxu0  ;;  %v3449_v37 = vpop.f32.mrf.mxu1 }
 0xcb9   :  { %v3444_v58 = vadd.f32 %v3443_v48, %v3366_v15  ;;  %v3853_v15 = vld [vmem:[#allocation5 + $0x1ed0] sm:$0xff]  ;;  %v3852_v48 = vld [vmem:[#allocation5 + $0x1ec8] sm:$0xff] }
 0xcba   :  { %v3368_v50 = vpop.f32.mrf.mxu0  ;;  %v3451_v8 = vpop.f32.mrf.mxu1 }
 0xcbb   :  { %v3446_v32 = vadd.f32 %v3445_v13, %v3368_v50  ;;  %v3914_v50 = vld [vmem:[#allocation5 + $0x20b8] sm:$0xff]  ;;  %v3851_v13 = vld [vmem:[#allocation5 + $0x1ec0] sm:$0xff] }
 0xcbc   :  { %v3372_v12 = vpop.f32.mrf.mxu0 }
 0xcbd   :  { %v3450_v20 = vadd.f32 %v3449_v37, %v3372_v12  ;;  %v3913_v12 = vld [vmem:[#allocation5 + $0x20b0] sm:$0xff]  ;;  %v3850_v37 = vld [vmem:[#allocation5 + $0x1eb8] sm:$0xff] }
 0xcbe   :  { %v3374_v38 = vpop.f32.mrf.mxu0 }
 0xcbf   :  { %v3452_v45 = vadd.f32 %v3451_v8, %v3374_v38  ;;  %v3912_v38 = vld [vmem:[#allocation5 + $0x20a8] sm:$0xff]  ;;  %v3847_v8 = vld [vmem:[#allocation5 + $0x1ea0] sm:$0xff] }
 0xcf8   :  { %v3520_v57 = vpop.f32.mrf.mxu0 }
 0xcf9   :  { %v3521_v61 = vadd.f32 %v3520_v57, %v3444_v58  ;;  %v3911_v57 = vld [vmem:[#allocation5 + $0x20a0] sm:$0xff]  ;;  %v3910_v58 = vld [vmem:[#allocation5 + $0x2098] sm:$0xff] }
 0xcfa   :  { %v3522_v35 = vpop.f32.mrf.mxu0 }
 0xcfb   :  { %v3523_v22 = vadd.f32 %v3522_v35, %v3446_v32  ;;  %v3849_v32 = vld [vmem:[#allocation5 + $0x1eb0] sm:$0xff]  ;;  %v3848_v35 = vld [vmem:[#allocation5 + $0x1ea8] sm:$0xff] }
 0xcfc   :  { %v3526_v29 = vpop.f32.mrf.mxu0 }
 0xcfd   :  { %3595 = vmatprep.mubr.f32.mxu1 %v3523_v22  ;;  %v3527_v60 = vadd.f32 %v3526_v29, %v3450_v20  ;;  %v3846_v29 = vld [vmem:[#allocation5 + $0x1e98] sm:$0xff]  ;;  %v3845_v20 = vld [vmem:[#allocation5 + $0x1e90] sm:$0xff] }
 0xcfe   :  { %v3528_v44 = vpop.f32.mrf.mxu0  ;;  %3596 = vmatmul.mubr.f32.vlgmr.msra.gmra.mxu1 %v3521_v61 }
 0xcff   :  { %v3529_v26 = vadd.f32 %v3528_v44, %v3452_v45  ;;  %4020 = vmatpush1.msra.mxu1 %v3857_v36  ;;  %v3907_v45 = vld [vmem:[#allocation5 + $0x2080] sm:$0xff]  ;;  %v3906_v44 = vld [vmem:[#allocation5 + $0x2078] sm:$0xff] }
 0xd00   :  { %4021 = vmatprep.subr.mxu1 %v3856_v30  ;;  %v3842_v36 = vld [vmem:[#allocation5 + $0x1e78] sm:$0xff]  ;;  %v3903_v30 = vld [vmem:[#allocation5 + $0x2060] sm:$0xff] }
 0xd01   :  { %3601 = vmatprep.mubr.f32.mxu1 %v3529_v26  ;;  %4022 = vmatpush1.msra.mxu1 %v3855_v43  ;;  %v3841_v43 = vld [vmem:[#allocation5 + $0x1e70] sm:$0xff] }
 0xd02   :  { %3602 = vmatmul.mubr.f32.gmra.mxu1 %v3527_v60  ;;  %4023 = vmatprep.subr.mxu1 %v3854_v18  ;;  %v3902_v18 = vld [vmem:[#allocation5 + $0x2058] sm:$0xff] }
 0xd03   :  { %4024 = vmatpush1.msra.mxu1 %v3853_v15  ;;  %v3950_v15 = vld [vmem:[#allocation5 + $0x21d8] sm:$0xff] }
 0xd04   :  { %4025 = vmatprep.subr.mxu1 %v3852_v48  ;;  %v3949_v48 = vld [vmem:[#allocation5 + $0x21d0] sm:$0xff] }
 0xd05   :  { %4026 = vmatpush1.msra.mxu1 %v3851_v13  ;;  %v3948_v13 = vld [vmem:[#allocation5 + $0x21c8] sm:$0xff] }
 0xd06   :  { %4027 = vmatprep.subr.mxu1 %v3850_v37  ;;  %v3947_v37 = vld [vmem:[#allocation5 + $0x21c0] sm:$0xff] }
 0xd07   :  { %4028 = vmatpush1.msra.mxu1 %v3849_v32  ;;  %v3946_v32 = vld [vmem:[#allocation5 + $0x21b8] sm:$0xff] }
 0xd08   :  { %4029 = vmatprep.subr.mxu1 %v3848_v35  ;;  %v3945_v35 = vld [vmem:[#allocation5 + $0x21b0] sm:$0xff] }
 0xd09   :  { %4030 = vmatpush1.msra.mxu1 %v3847_v8  ;;  %v3944_v8 = vld [vmem:[#allocation5 + $0x21a8] sm:$0xff] }
 0xd0a   :  { %4031 = vmatprep.subr.mxu1 %v3846_v29  ;;  %v3943_v29 = vld [vmem:[#allocation5 + $0x21a0] sm:$0xff] }
 0xd0b   :  { %4032 = vmatpush1.msra.mxu1 %v3845_v20  ;;  %v3942_v20 = vld [vmem:[#allocation5 + $0x2198] sm:$0xff] }
 0xdbe   :  { %v3597_v52 = vpop.f32.mrf.mxu1 }
 0xdc0   :  { %v3599_v33 = vpop.f32.mrf.mxu1 }
 0xdc2   :  { %v3603_v2 = vpop.f32.mrf.mxu1 }
 0xdc3   :  { %v3608_v21 = vadd.f32 %v3603_v2, %v3597_v52  ;;  %v3840_v52 = vld [vmem:[#allocation5 + $0x1e68] sm:$0xff]  ;;  %v3839_v2 = vld [vmem:[#allocation5 + $0x1e60] sm:$0xff] }
 0xdc4   :  { %v3605_v7 = vpop.f32.mrf.mxu1 }
 0xdc5   :  { %v3609_v16 = vrot.slane %v3608_v21, 4  ;;  %v3615_v17 = vadd.f32 %v3605_v7, %v3599_v33  ;;  %v3901_v33 = vld [vmem:[#allocation5 + $0x2050] sm:$0xff]  ;;  %v3838_v7 = vld [vmem:[#allocation5 + $0x1e58] sm:$0xff] }
 0xdc7   :  { %v3610_v9 = vadd.f32 %v3609_v16, %v3608_v21  ;;  %v3616_v0 = vrot.slane %v3615_v17, 4  ;;  %v3900_v21 = vld [vmem:[#allocation5 + $0x2048] sm:$0xff]  ;;  %v3899_v16 = vld [vmem:[#allocation5 + $0x2040] sm:$0xff] }
 0xdc9   :  { %v3611_v3 = vrot.slane %v3610_v9, 2  ;;  %v3617_v56 = vadd.f32 %v3616_v0, %v3615_v17  ;;  %v3837_v17 = vld [vmem:[#allocation5 + $0x1e50] sm:$0xff]  ;;  %v3836_v0 = vld [vmem:[#allocation5 + $0x1e48] sm:$0xff] }
 0xdcb   :  { %v3612_v25 = vadd.f32 %v3611_v3, %v3610_v9  ;;  %v3618_v54 = vrot.slane %v3617_v56, 2  ;;  %v3898_v9 = vld [vmem:[#allocation5 + $0x2038] sm:$0xff]  ;;  %v3897_v3 = vld [vmem:[#allocation5 + $0x2030] sm:$0xff] }
 0xdcd   :  { %v3613_v1 = vrot.slane %v3612_v25, 1  ;;  %v3619_v4 = vadd.f32 %v3618_v54, %v3617_v56  ;;  %v3835_v56 = vld [vmem:[#allocation5 + $0x1e40] sm:$0xff]  ;;  %v3834_v54 = vld [vmem:[#allocation5 + $0x1e38] sm:$0xff] }
 0xdcf   :  { %v3614_v39 = vadd.f32 %v3613_v1, %v3612_v25  ;;  %v3620_v14 = vrot.slane %v3619_v4, 1  ;;  %v3896_v25 = vld [vmem:[#allocation5 + $0x2028] sm:$0xff]  ;;  %v3895_v1 = vld [vmem:[#allocation5 + $0x2020] sm:$0xff] }
 0xdd1   :  { %v3622_v11 = vmul.f32 0.0078125, %v3614_v39  ;;  %v3621_v34 = vadd.f32 %v3620_v14, %v3619_v4  ;;  %v3833_v4 = vld [vmem:[#allocation5 + $0x1e30] sm:$0xff]  ;;  %v3894_v39 = vld [vmem:[#allocation5 + $0x2018] sm:$0xff]  ;;  %v3832_v14 = vld [vmem:[#allocation5 + $0x1e28] sm:$0xff] }
 0xdd3   :  { %v3623_v27 = vmul.f32 0.0078125, %v3621_v34  ;;  %v6643_v42 = vsub.f32 %v3521_v61, %v3622_v11  ;;  %v6653_v40 = vsub.f32 %v3527_v60, %v3622_v11  ;;  %v3908_v61 = vld [vmem:[#allocation5 + $0x2088] sm:$0xff]  ;;  %v3905_v60 = vld [vmem:[#allocation5 + $0x2070] sm:$0xff]  ;;  %v3831_v34 = vld [vmem:[#allocation5 + $0x1e20] sm:$0xff] }
 0xdd4   :  { %v3893_v11 = vld [vmem:[#allocation5 + $0x2010] sm:$0xff] }
 0xdd5   :  { %v6645_v31 = vsub.f32 %v3523_v22, %v3623_v27  ;;  %v6647_v28 = vsub.f32 %v3529_v26, %v3623_v27  ;;  %v3628_v63 = vmul.f32 %v6643_v42, %v6643_v42  ;;  %v3630_v41 = vmul.f32 %v6653_v40, %v6653_v40  ;;  %v3909_v22 = vld [vmem:[#allocation5 + $0x2090] sm:$0xff]  ;;  %v3844_v26 = vld [vmem:[#allocation5 + $0x1e88] sm:$0xff] }
 0xdd6   :  { %4033 = vmatprep.subr.mxu1 %v3844_v26  ;;  %v3892_v27 = vld [vmem:[#allocation5 + $0x2008] sm:$0xff]  ;;  %v3941_v26 = vld [vmem:[#allocation5 + $0x2190] sm:$0xff] }
 0xdd7   :  { %v3629_v6 = vmul.f32 %v6645_v31, %v6645_v31  ;;  %v3631_v5 = vmul.f32 %v6647_v28, %v6647_v28  ;;  %4034 = vmatpush1.msra.mxu1 %v3843_v62  ;;  %v3940_v62 = vld [vmem:[#allocation5 + $0x2188] sm:$0xff] }
 0xdd8   :  { %4035 = vmatprep.subr.mxu1 %v3842_v36  ;;  %v3939_v36 = vld [vmem:[#allocation5 + $0x2180] sm:$0xff] }
 0xdd9   :  { %3696 = vmatprep.mubr.f32.mxu0 %v3629_v6  ;;  %4036 = vmatpush1.msra.mxu1 %v3841_v43  ;;  %v3830_v6 = vld [vmem:[#allocation5 + $0x1e18] sm:$0xff] }
 0xdda   :  { %3697 = vmatmul.mubr.f32.vlgmr.msra.gmra.mxu0 %v3628_v63  ;;  %4037 = vmatprep.subr.mxu1 %v3840_v52  ;;  %v3891_v63 = vld [vmem:[#allocation5 + $0x2000] sm:$0xff]  ;;  %v3938_v43 = vld [vmem:[#allocation5 + $0x2178] sm:$0xff]  ;;  %v3937_v52 = vld [vmem:[#allocation5 + $0x2170] sm:$0xff] }
 0xddb   :  { %3702 = vmatprep.mubr.f32.mxu0 %v3631_v5  ;;  %4097 = vmatpush1.msra.mxu0 %v3921_v49  ;;  %v3829_v49 = vld [vmem:[#allocation5 + $0x1e10] sm:$0xff]  ;;  %v3954_v5 = vld [vmem:[#allocation5 + $0x21f8] sm:$0xff] }
 0xddc   :  { %4098 = vmatprep.subr.mxu0 %v3920_v53  ;;  %4038 = vmatpush1.msra.mxu1 %v3839_v2  ;;  %v3828_v53 = vld [vmem:[#allocation5 + $0x1e08] sm:$0xff] }
 0xddd   :  { %4099 = vmatpush1.msra.mxu0 %v3919_v24  ;;  %4039 = vmatprep.subr.mxu1 %v3838_v7  ;;  %v3953_v24 = vld [vmem:[#allocation5 + $0x21f0] sm:$0xff]  ;;  %v3936_v2 = vld [vmem:[#allocation5 + $0x2168] sm:$0xff]  ;;  %v3935_v7 = vld [vmem:[#allocation5 + $0x2160] sm:$0xff] }
 0xdde   :  { %3703 = vmatmul.mubr.f32.gmra.mxu0 %v3630_v41  ;;  %4100 = vmatprep.subr.mxu0 %v3918_v10  ;;  %v3827_v10 = vld [vmem:[#allocation5 + $0x1e00] sm:$0xff]  ;;  %v3952_v41 = vld [vmem:[#allocation5 + $0x21e8] sm:$0xff] }
 0xddf   :  { %4101 = vmatpush1.msra.mxu0 %v3917_v19  ;;  %4040 = vmatpush1.msra.mxu1 %v3837_v17  ;;  %v3890_v19 = vld [vmem:[#allocation5 + $0x1ff8] sm:$0xff] }
 0xde0   :  { %4102 = vmatprep.subr.mxu0 %v3916_v46  ;;  %4041 = vmatprep.subr.mxu1 %v3836_v0  ;;  %v3951_v46 = vld [vmem:[#allocation5 + $0x21e0] sm:$0xff]  ;;  %v3934_v17 = vld [vmem:[#allocation5 + $0x2158] sm:$0xff]  ;;  %v3933_v0 = vld [vmem:[#allocation5 + $0x2150] sm:$0xff] }
 0xde1   :  { %4103 = vmatpush1.msra.mxu0 %v3915_v59  ;;  %4042 = vmatpush1.msra.mxu1 %v3835_v56  ;;  %v3889_v59 = vld [vmem:[#allocation5 + $0x1ff0] sm:$0xff]  ;;  %v3932_v56 = vld [vmem:[#allocation5 + $0x2148] sm:$0xff] }
 0xde2   :  { %4104 = vmatprep.subr.mxu0 %v3914_v50  ;;  %4043 = vmatprep.subr.mxu1 %v3834_v54  ;;  %v3888_v50 = vld [vmem:[#allocation5 + $0x1fe8] sm:$0xff]  ;;  %v3931_v54 = vld [vmem:[#allocation5 + $0x2140] sm:$0xff] }
 0xde3   :  { %4105 = vmatpush1.msra.mxu0 %v3913_v12  ;;  %4044 = vmatpush1.msra.mxu1 %v3833_v4  ;;  %v3887_v12 = vld [vmem:[#allocation5 + $0x1fe0] sm:$0xff]  ;;  %v3930_v4 = vld [vmem:[#allocation5 + $0x2138] sm:$0xff] }
 0xde4   :  { %4106 = vmatprep.subr.mxu0 %v3912_v38  ;;  %4045 = vmatprep.subr.mxu1 %v3832_v14  ;;  %v3886_v38 = vld [vmem:[#allocation5 + $0x1fd8] sm:$0xff]  ;;  %v3929_v14 = vld [vmem:[#allocation5 + $0x2130] sm:$0xff] }
 0xde5   :  { %4107 = vmatpush1.msra.mxu0 %v3911_v57  ;;  %4046 = vmatpush1.msra.mxu1 %v3831_v34  ;;  %v3885_v57 = vld [vmem:[#allocation5 + $0x1fd0] sm:$0xff]  ;;  %v3928_v34 = vld [vmem:[#allocation5 + $0x2128] sm:$0xff] }
 0xde6   :  { %4108 = vmatprep.subr.mxu0 %v3910_v58  ;;  %4047 = vmatprep.subr.mxu1 %v3830_v6  ;;  %v3884_v58 = vld [vmem:[#allocation5 + $0x1fc8] sm:$0xff]  ;;  %v3927_v6 = vld [vmem:[#allocation5 + $0x2120] sm:$0xff] }
 0xde7   :  { %4109 = vmatpush1.msra.mxu0 %v3909_v22  ;;  %4048 = vmatpush1.msra.mxu1 %v3829_v49  ;;  %v3883_v22 = vld [vmem:[#allocation5 + $0x1fc0] sm:$0xff]  ;;  %v3926_v49 = vld [vmem:[#allocation5 + $0x2118] sm:$0xff] }
 0xde8   :  { %4110 = vmatprep.subr.mxu0 %v3908_v61  ;;  %4049 = vmatprep.subr.mxu1 %v3828_v53  ;;  %v3882_v61 = vld [vmem:[#allocation5 + $0x1fb8] sm:$0xff]  ;;  %v3925_v53 = vld [vmem:[#allocation5 + $0x2110] sm:$0xff] }
 0xde9   :  { %4111 = vmatpush1.msra.mxu0 %v3907_v45  ;;  %4050 = vmatpush1.msra.mxu1 %v3827_v10  ;;  %v3881_v45 = vld [vmem:[#allocation5 + $0x1fb0] sm:$0xff]  ;;  %v3924_v10 = vld [vmem:[#allocation5 + $0x2108] sm:$0xff] }
 0xdea   :  { %4112 = vmatprep.subr.mxu0 %v3906_v44  ;;  %4051 = vmatprep.subr.mxu1 %v3890_v19  ;;  %v3880_v44 = vld [vmem:[#allocation5 + $0x1fa8] sm:$0xff]  ;;  %v3923_v19 = vld [vmem:[#allocation5 + $0x2100] sm:$0xff] }
 0xdeb   :  { %4113 = vmatpush1.msra.mxu0 %v3905_v60  ;;  %4052 = vmatpush2.msra.mxu1 %v3889_v59  ;;  %v3879_v60 = vld [vmem:[#allocation5 + $0x1fa0] sm:$0xff]  ;;  %v3860_v59 = vld [vmem:[#allocation5 + $0x1f08] sm:$0xff] }
 0xdec   :  { %4114 = vmatprep.subr.mxu0 %v3904_v23  ;;  %4053 = vmatprep.subr.mxu1 %v3888_v50  ;;  %v3878_v23 = vld [vmem:[#allocation5 + $0x1f98] sm:$0xff] }
 0xded   :  { %4115 = vmatpush1.msra.mxu0 %v3903_v30  ;;  %4054 = vmatpush2.msra.mxu1 %v3887_v12  ;;  %v3877_v30 = vld [vmem:[#allocation5 + $0x1f90] sm:$0xff]  ;;  %v3986_v50 = vld [vmem:[#allocation5 + $0x22f8] sm:$0xff] }
 0xdee   :  { %4116 = vmatprep.subr.mxu0 %v3902_v18  ;;  %4055 = vmatprep.subr.mxu1 %v3886_v38  ;;  %v3876_v18 = vld [vmem:[#allocation5 + $0x1f88] sm:$0xff] }
 0xdef   :  { %4117 = vmatpush1.msra.mxu0 %v3901_v33  ;;  %4056 = vmatpush2.msra.mxu1 %v3885_v57  ;;  %v3875_v33 = vld [vmem:[#allocation5 + $0x1f80] sm:$0xff] }
 0xdf0   :  { %4118 = vmatprep.subr.mxu0 %v3900_v21  ;;  %4057 = vmatprep.subr.mxu1 %v3884_v58  ;;  %v3874_v21 = vld [vmem:[#allocation5 + $0x1f78] sm:$0xff] }
 0xdf1   :  { %4119 = vmatpush1.msra.mxu0 %v3899_v16  ;;  %4058 = vmatpush2.msra.mxu1 %v3883_v22  ;;  %v3873_v16 = vld [vmem:[#allocation5 + $0x1f70] sm:$0xff] }
 0xdf2   :  { %4120 = vmatprep.subr.mxu0 %v3898_v9  ;;  %4059 = vmatprep.subr.mxu1 %v3882_v61  ;;  %v3872_v9 = vld [vmem:[#allocation5 + $0x1f68] sm:$0xff] }
 0xdf3   :  { %4121 = vmatpush1.msra.mxu0 %v3897_v3  ;;  %4060 = vmatpush2.msra.mxu1 %v3881_v45  ;;  %v3871_v3 = vld [vmem:[#allocation5 + $0x1f60] sm:$0xff] }
 0xdf4   :  { %4122 = vmatprep.subr.mxu0 %v3896_v25  ;;  %4061 = vmatprep.subr.mxu1 %v3880_v44  ;;  %v3870_v25 = vld [vmem:[#allocation5 + $0x1f58] sm:$0xff] }
 0xdf5   :  { %4123 = vmatpush1.msra.mxu0 %v3895_v1  ;;  %4062 = vmatpush2.msra.mxu1 %v3879_v60  ;;  %v3869_v1 = vld [vmem:[#allocation5 + $0x1f50] sm:$0xff] }
 0xdf6   :  { %4124 = vmatprep.subr.mxu0 %v3894_v39  ;;  %4063 = vmatprep.subr.mxu1 %v3878_v23  ;;  %v3868_v39 = vld [vmem:[#allocation5 + $0x1f48] sm:$0xff] }
 0xdf7   :  { %4125 = vmatpush1.msra.mxu0 %v3893_v11  ;;  %4064 = vmatpush2.msra.mxu1 %v3877_v30  ;;  %v3867_v11 = vld [vmem:[#allocation5 + $0x1f40] sm:$0xff] }
 0xdf8   :  { %4126 = vmatprep.subr.mxu0 %v3892_v27  ;;  %4065 = vmatprep.subr.mxu1 %v3876_v18  ;;  %v3866_v27 = vld [vmem:[#allocation5 + $0x1f38] sm:$0xff] }
 0xdf9   :  { %4127 = vmatpush1.msra.mxu0 %v3891_v63  ;;  %4066 = vmatpush2.msra.mxu1 %v3875_v33  ;;  %v3865_v63 = vld [vmem:[#allocation5 + $0x1f30] sm:$0xff] }
 0xdfa   :  { %4128 = vmatprep.subr.mxu0 %v3954_v5  ;;  %4067 = vmatprep.subr.mxu1 %v3874_v21  ;;  %v3864_v5 = vld [vmem:[#allocation5 + $0x1f28] sm:$0xff] }
 0xdfb   :  { %4129 = vmatpush2.msra.mxu0 %v3953_v24  ;;  %4068 = vmatpush2.msra.mxu1 %v3873_v16  ;;  %v3863_v24 = vld [vmem:[#allocation5 + $0x1f20] sm:$0xff] }
 0xdfc   :  { %4130 = vmatprep.subr.mxu0 %v3952_v41  ;;  %4069 = vmatprep.subr.mxu1 %v3872_v9  ;;  %v3862_v41 = vld [vmem:[#allocation5 + $0x1f18] sm:$0xff] }
 0xdfd   :  { %4131 = vmatpush2.msra.mxu0 %v3951_v46  ;;  %4070 = vmatpush2.msra.mxu1 %v3871_v3  ;;  %v3861_v46 = vld [vmem:[#allocation5 + $0x1f10] sm:$0xff] }
 0xdfe   :  { %4132 = vmatprep.subr.mxu0 %v3950_v15  ;;  %4071 = vmatprep.subr.mxu1 %v3870_v25  ;;  %v3859_v15 = vld [vmem:[#allocation5 + $0x1f00] sm:$0xff] }
 0xdff   :  { %4133 = vmatpush2.msra.mxu0 %v3949_v48  ;;  %4072 = vmatpush2.msra.mxu1 %v3869_v1 }
 0xe00   :  { %4134 = vmatprep.subr.mxu0 %v3948_v13  ;;  %4073 = vmatprep.subr.mxu1 %v3868_v39 }
 0xe01   :  { %4135 = vmatpush2.msra.mxu0 %v3947_v37  ;;  %4074 = vmatpush2.msra.mxu1 %v3867_v11 }
 0xe02   :  { %4136 = vmatprep.subr.mxu0 %v3946_v32  ;;  %4075 = vmatprep.subr.mxu1 %v3866_v27 }
 0xe03   :  { %4137 = vmatpush2.msra.mxu0 %v3945_v35  ;;  %4076 = vmatpush2.msra.mxu1 %v3865_v63 }
 0xe04   :  { %4138 = vmatprep.subr.mxu0 %v3944_v8  ;;  %4077 = vmatprep.subr.mxu1 %v3864_v5 }
 0xe05   :  { %4139 = vmatpush2.msra.mxu0 %v3943_v29  ;;  %4078 = vmatpush2.msra.mxu1 %v3863_v24 }
 0xe06   :  { %4140 = vmatprep.subr.mxu0 %v3942_v20  ;;  %4079 = vmatprep.subr.mxu1 %v3862_v41 }
 0xe07   :  { %4141 = vmatpush2.msra.mxu0 %v3941_v26  ;;  %4080 = vmatpush2.msra.mxu1 %v3861_v46 }
 0xe08   :  { %4142 = vmatprep.subr.mxu0 %v3940_v62  ;;  %4081 = vmatprep.subr.mxu1 %v3860_v59 }
 0xe09   :  { %4143 = vmatpush2.msra.mxu0 %v3939_v36  ;;  %4082 = vmatpush2.msra.mxu1 %v3859_v15 }
 0xe0a   :  { %4144 = vmatprep.subr.mxu0 %v3938_v43  ;;  %4173 = vmatprep.subr.mxu1 %v3986_v50  ;;  %v3961_v50 = vld [vmem:[#allocation5 + $0x2230] sm:$0xff] }
 0xe0b   :  { %4145 = vmatpush2.msra.mxu0 %v3937_v52  ;;  %v7225_v52 = vld [vmem:[#allocation18_spill] sm:$0xff] }
 0xe0c   :  { %4146 = vmatprep.subr.mxu0 %v3936_v2  ;;  %v3726_v2 = vld [vmem:[#allocation7 + $0x4] ss:$8 sm:$0x3] }
 0xe0d   :  { %4147 = vmatpush2.msra.mxu0 %v3935_v7  ;;  %v3766_v7 = vld [vmem:[#allocation8 + $0x4] ss:$8 sm:$0x3] }
 0xe0e   :  { %4148 = vmatprep.subr.mxu0 %v3934_v17  ;;  %v7226_v17 = vld [vmem:[#allocation19_spill] sm:$0xff] }
 0xe0f   :  { %4149 = vmatpush2.msra.mxu0 %v3933_v0  ;;  %v7227_v0 = vld [vmem:[#allocation20_spill] sm:$0xff] }
 0xe10   :  { %4150 = vmatprep.subr.mxu0 %v3932_v56  ;;  %v3771_v56 = vrot.slane %v3766_v7, %v7226_v17  ;;  %v3775_v25 = vrot.slane %v3766_v7, %v7227_v0  ;;  %v3975_v7 = vld [vmem:[#allocation5 + $0x22a0] sm:$0xff] }
 0xe11   :  { %4151 = vmatpush2.msra.mxu0 %v3931_v54 }
 0xe12   :  { %4152 = vmatprep.subr.mxu0 %v3930_v4 }
 0xe13   :  { %4153 = vmatpush2.msra.mxu0 %v3929_v14 }
 0xe14   :  { %4154 = vmatprep.subr.mxu0 %v3928_v34 }
 0xe15   :  { %4155 = vmatpush2.msra.mxu0 %v3927_v6 }
 0xe16   :  { %4156 = vmatprep.subr.mxu0 %v3926_v49 }
 0xe17   :  { %4157 = vmatpush2.msra.mxu0 %v3925_v53 }
 0xe18   :  { %4158 = vmatprep.subr.mxu0 %v3924_v10 }
 0xe19   :  { %4159 = vmatpush2.msra.mxu0 %v3923_v19 }
 0xe1a   :  { %4250 = vmatprep.subr.mxu0 %v6572_v47 }
 0xe9a   :  { %v3698_v48 = vpop.f32.mrf.mxu0 }
 0xe9c   :  { %v3700_v12 = vpop.f32.mrf.mxu0 }
 0xe9e   :  { %v3704_v13 = vpop.f32.mrf.mxu0 }
 0xe9f   :  { %v3709_v38 = vadd.f32 %v3704_v13, %v3698_v48 }
 0xea0   :  { %v3706_v37 = vpop.f32.mrf.mxu0 }
 0xea1   :  { %v3710_v57 = vrot.slane %v3709_v38, 4  ;;  %v3716_v32 = vadd.f32 %v3706_v37, %v3700_v12  ;;  %v6686_v37 = vld [vmem:[#allocation10 + $0xf0] sm:$0xff] }
 0xea3   :  { %v3711_v58 = vadd.f32 %v3710_v57, %v3709_v38  ;;  %v3717_v35 = vrot.slane %v3716_v32, 4  ;;  %v3985_v38 = vld [vmem:[#allocation5 + $0x22f0] sm:$0xff] }
 0xea5   :  { %v3712_v22 = vrot.slane %v3711_v58, 2  ;;  %v3718_v8 = vadd.f32 %v3717_v35, %v3716_v32  ;;  %v3984_v32 = vld [vmem:[#allocation5 + $0x22e8] sm:$0xff] }
 0xea7   :  { %v3713_v61 = vadd.f32 %v3712_v22, %v3711_v58  ;;  %v3719_v29 = vrot.slane %v3718_v8, 2  ;;  %v6781_v22 = vld [vmem:[#allocation10 + $0x48] sm:$0xff] }
 0xea9   :  { %v3714_v45 = vrot.slane %v3713_v61, 1  ;;  %v3720_v20 = vadd.f32 %v3719_v29, %v3718_v8  ;;  %v3998_v29 = vld [vmem:[#allocation5 + $0x2358] sm:$0xff] }
 0xeab   :  { %v3715_v47 = vadd.f32 %v3714_v45, %v3713_v61  ;;  %v3721_v44 = vrot.slane %v3720_v20, 1  ;;  %v3983_v61 = vld [vmem:[#allocation5 + $0x22e0] sm:$0xff] }
 0xeac   :  { %v3999_v45 = vld [vmem:[#allocation5 + $0x2360] sm:$0xff] }
 0xead   :  { %v3723_v26 = vmul.f32 0.0078125, %v3715_v47  ;;  %v3722_v60 = vadd.f32 %v3721_v44, %v3720_v20  ;;  %v3982_v20 = vld [vmem:[#allocation5 + $0x22d8] sm:$0xff]  ;;  %v3981_v44 = vld [vmem:[#allocation5 + $0x22d0] sm:$0xff]  ;;  %v4000_v47 = vld [vmem:[#allocation5 + $0x2368] sm:$0xff] }
 0xeaf   :  { %v3727_v62 = vadd.f32 1e-05, %v3723_v26  ;;  %v3724_v23 = vmul.f32 0.0078125, %v3722_v60  ;;  %v6715_v26 = vld [vmem:[#allocation10 + $0xe8] sm:$0xff] }
 0xeb1   :  { %v3728_v36 = vadd.f32 1e-05, %v3724_v23  ;;  %4553 = vrsqrt.f32 %v3727_v62  ;;  %v3980_v62 = vld [vmem:[#allocation5 + $0x22c8] sm:$0xff]  ;;  %v6722_v23 = vld [vmem:[#allocation10 + $0xe0] sm:$0xff] }
 0xeb3   :  { %4555 = vrsqrt.f32 %v3728_v36 }
 0xebe   :  { %v4554_v30 = vpop.eup %4553 }
 0xec0   :  { %v4556_v43 = vpop.eup %4555 }
 0xec1   :  { %v3733_v18 = vcombine.low %v4554_v30, %v4556_v43  ;;  %v3979_v30 = vld [vmem:[#allocation5 + $0x22c0] sm:$0xff]  ;;  %v3978_v43 = vld [vmem:[#allocation5 + $0x22b8] sm:$0xff] }
 0xec3   :  { %v3740_v33 = vrot.slane %v3733_v18, %v7225_v52  ;;  %v3977_v18 = vld [vmem:[#allocation5 + $0x22b0] sm:$0xff] }
 0xec5   :  { %v3747_v21 = vrot.slane %v3740_v33, %v7225_v52  ;;  %v6727_v33 = vld [vmem:[#allocation10 + $0xd8] sm:$0xff]  ;;  %v3995_v52 = vld [vmem:[#allocation5 + $0x2340] sm:$0xff] }
 0xec7   :  { %v3749_v16 = vmul.f32 %v3747_v21, %v3726_v2  ;;  %v3976_v2 = vld [vmem:[#allocation5 + $0x22a8] sm:$0xff]  ;;  %v6730_v21 = vld [vmem:[#allocation10 + $0xd0] sm:$0xff] }
 0xec9   :  { %v3754_v9 = vrot.slane %v3749_v16, %v7226_v17  ;;  %v3758_v3 = vrot.slane %v3749_v16, %v7227_v0  ;;  %v6733_v16 = vld [vmem:[#allocation10 + $0xc8] sm:$0xff]  ;;  %v3997_v0 = vld [vmem:[#allocation5 + $0x2350] sm:$0xff] }
 0xeca   :  { %v3996_v17 = vld [vmem:[#allocation5 + $0x2348] sm:$0xff] }
 0xecb   :  { %v3761_v54 = vmul.f32 %v3754_v9, %v6643_v42  ;;  %v3762_v1 = vmul.f32 %v3758_v3, %v6645_v31  ;;  %v3763_v4 = vmul.f32 %v3754_v9, %v6653_v40  ;;  %v3764_v39 = vmul.f32 %v3758_v3, %v6647_v28  ;;  %v3974_v9 = vld [vmem:[#allocation5 + $0x2298] sm:$0xff]  ;;  %v6736_v3 = vld [vmem:[#allocation10 + $0xc0] sm:$0xff] }
 0xecd   :  { %v3778_v14 = vadd.f32 %v3771_v56, %v3761_v54  ;;  %v3779_v11 = vadd.f32 %v3775_v25, %v3762_v1  ;;  %v3780_v34 = vadd.f32 %v3771_v56, %v3763_v4  ;;  %v3781_v27 = vadd.f32 %v3775_v25, %v3764_v39  ;;  %v3973_v56 = vld [vmem:[#allocation5 + $0x2290] sm:$0xff]  ;;  %v6739_v25 = vld [vmem:[#allocation10 + $0xb8] sm:$0xff]  ;;  %v3972_v54 = vld [vmem:[#allocation5 + $0x2288] sm:$0xff] }
 0xece   :  { %v6742_v1 = vld [vmem:[#allocation10 + $0xb0] sm:$0xff]  ;;  %v3971_v4 = vld [vmem:[#allocation5 + $0x2280] sm:$0xff]  ;;  %v6745_v39 = vld [vmem:[#allocation10 + $0xa8] sm:$0xff] }
 0xecf   :  { %v3782_v6 = vmax.f32 %v3778_v14, 0.0  ;;  %v3783_v63 = vmax.f32 %v3779_v11, 0.0  ;;  %v3784_v49 = vmax.f32 %v3780_v34, 0.0  ;;  %v3785_v5 = vmax.f32 %v3781_v27, 0.0  ;;  %v3970_v14 = vld [vmem:[#allocation5 + $0x2278] sm:$0xff]  ;;  %v6748_v11 = vld [vmem:[#allocation10 + $0xa0] sm:$0xff] }
 0xed0   :  { %v3969_v34 = vld [vmem:[#allocation5 + $0x2270] sm:$0xff]  ;;  %v6751_v27 = vld [vmem:[#allocation10 + $0x98] sm:$0xff] }
 0xed1   :  { %4160 = vmatprep.mubr.f32.mxu0 %v3783_v63  ;;  %v3789_v53 = vrot.slane %v3785_v5, 7  ;;  %v3795_v24 = vrot.slane %v3783_v63, 7  ;;  %v3807_v10 = vrot.slane %v3783_v63, 1  ;;  %v3808_v41 = vrot.slane %v3785_v5, 1  ;;  %v6754_v63 = vld [vmem:[#allocation10 + $0x90] sm:$0xff] }
 0xed2   :  { %4161 = vmatmul.mubr.f32.vlgmr.msra.gmra.mxu0 %v3782_v6  ;;  %v3788_v42 = vrot.slane %v3784_v49, 7  ;;  %v3794_v31 = vrot.slane %v3782_v6, 7  ;;  %v3804_v19 = vrot.slane %v3782_v6, 1  ;;  %v3805_v40 = vrot.slane %v3784_v49, 1  ;;  %v3968_v6 = vld [vmem:[#allocation5 + $0x2268] sm:$0xff] }
 0xed3   :  { %4166 = vmatprep.mubr.f32.mxu0 %v3785_v5  ;;  %v3803_v28 = vsel %vm192_vm0, %v3789_v53, %v3795_v24  ;;  %v3809_v46 = vsel %vm203_vm1, %v3807_v10, %v3808_v41  ;;  %v6673_v59 = vsel %vm192_vm0, %v3795_v24, %v3789_v53  ;;  %v6676_v15 = vsel %vm203_vm1, %v3808_v41, %v3807_v10  ;;  %v6757_v5 = vld [vmem:[#allocation10 + $0x88] sm:$0xff]  ;;  %v3966_v53 = vld [vmem:[#allocation5 + $0x2258] sm:$0xff]  ;;  %v6760_v24 = vld [vmem:[#allocation10 + $0x80] sm:$0xff] }
 0xed4   :  { %v3819_v48 = vsel %vm5151_vm4, %v3809_v46, %v3803_v28  ;;  %v6681_v12 = vsel %vm192_vm0, %v3788_v42, %v3794_v31  ;;  %v6684_v13 = vsel %vm203_vm1, %v3804_v19, %v3805_v40  ;;  %4251 = vmatpush1.msra.mxu0 %v6686_v37  ;;  %v6694_v58 = vsel %vm192_vm0, %v3794_v31, %v3788_v42  ;;  %v3965_v10 = vld [vmem:[#allocation5 + $0x2250] sm:$0xff]  ;;  %v6763_v41 = vld [vmem:[#allocation10 + $0x78] sm:$0xff]  ;;  %v3964_v42 = vld [vmem:[#allocation5 + $0x2248] sm:$0xff] }
 0xed5   :  { %4083 = vmatprep.mubr.f32.mxu1 %v3819_v48  ;;  %v3818_v57 = vsel %vm5151_vm4, %v6684_v13, %v6681_v12  ;;  %v6697_v35 = vsel %vm203_vm1, %v3805_v40, %v3804_v19  ;;  %v3821_v8 = vsel %vm5169_vm5, %v6676_v15, %v6673_v59  ;;  %4252 = vmatprep.subr.mxu0 %v6715_v26  ;;  %v6766_v31 = vld [vmem:[#allocation10 + $0x70] sm:$0xff]  ;;  %v3963_v19 = vld [vmem:[#allocation5 + $0x2240] sm:$0xff]  ;;  %v6769_v40 = vld [vmem:[#allocation10 + $0x68] sm:$0xff] }
 0xed6   :  { %4084 = vmatmul.mubr.f32.vlgmr.msra.gmra.mxu1 %v3818_v57  ;;  %4167 = vmatmul.mubr.f32.gmra.mxu0 %v3784_v49  ;;  %v3820_v60 = vsel %vm5169_vm5, %v6697_v35, %v6694_v58  ;;  %v3823_v36 = vsel %vm5101_vm2, %v3803_v28, %v3809_v46  ;;  %v3967_v49 = vld [vmem:[#allocation5 + $0x2260] sm:$0xff]  ;;  %v3962_v28 = vld [vmem:[#allocation5 + $0x2238] sm:$0xff]  ;;  %v6778_v57 = vld [vmem:[#allocation10 + $0x50] sm:$0xff]  ;;  %v7242_v51 = vsel %vm5114_vm3, %v6694_v58, %v6697_v35 }
 0xed7   :  { %4174 = vmatpush1.msra.mxu1 %v3985_v38  ;;  %4089 = vmatprep.mubr.f32.mxu1 %v3821_v8  ;;  %v6772_v46 = vld [vmem:[#allocation10 + $0x60] sm:$0xff]  ;;  %v6775_v48 = vld [vmem:[#allocation10 + $0x58] sm:$0xff]  ;;  %v3960_v38 = vld [vmem:[#allocation5 + $0x2228] sm:$0xff] }
 0xed8   :  { %4175 = vmatprep.subr.mxu1 %v3984_v32  ;;  %4253 = vmatpush1.msra.mxu0 %v6722_v23  ;;  %v3959_v32 = vld [vmem:[#allocation5 + $0x2220] sm:$0xff]  ;;  %v3958_v8 = vld [vmem:[#allocation5 + $0x2218] sm:$0xff] }
 0xed9   :  { %4176 = vmatpush1.msra.mxu1 %v3983_v61  ;;  %4254 = vmatprep.subr.mxu0 %v6727_v33  ;;  %v6784_v61 = vld [vmem:[#allocation10 + $0x40] sm:$0xff] }
 0xeda   :  { %4177 = vmatprep.subr.mxu1 %v3982_v20  ;;  %4090 = vmatmul.mubr.f32.gmra.mxu1 %v3820_v60  ;;  %v3957_v20 = vld [vmem:[#allocation5 + $0x2210] sm:$0xff]  ;;  %v3956_v60 = vld [vmem:[#allocation5 + $0x2208] sm:$0xff] }
 0xedb   :  { %4178 = vmatpush1.msra.mxu1 %v3981_v44  ;;  %4237 = vmatprep.mubr.f32.mxu1 %v3823_v36  ;;  %v6787_v44 = vld [vmem:[#allocation10 + $0x38] sm:$0xff]  ;;  %v3955_v36 = vld [vmem:[#allocation5 + $0x2200] sm:$0xff] }
 0xedc   :  { %4179 = vmatprep.subr.mxu1 %v3980_v62  ;;  %4255 = vmatpush1.msra.mxu0 %v6730_v21  ;;  %v6790_v62 = vld [vmem:[#allocation10 + $0x30] sm:$0xff] }
 0xedd   :  { %4180 = vmatpush1.msra.mxu1 %v3979_v30  ;;  %4256 = vmatprep.subr.mxu0 %v6733_v16  ;;  %v6793_v30 = vld [vmem:[#allocation10 + $0x28] sm:$0xff] }
 0xede   :  { %4181 = vmatprep.subr.mxu1 %v3978_v43  ;;  %4257 = vmatpush1.msra.mxu0 %v6736_v3  ;;  %v4018_v43 = vld [vmem:[#allocation5 + $0x23f8] sm:$0xff] }
 0xedf   :  { %4182 = vmatpush1.msra.mxu1 %v3977_v18  ;;  %4258 = vmatprep.subr.mxu0 %v6739_v25  ;;  %v6796_v18 = vld [vmem:[#allocation10 + $0x20] sm:$0xff] }
 0xee0   :  { %4183 = vmatprep.subr.mxu1 %v3976_v2  ;;  %4259 = vmatpush1.msra.mxu0 %v6742_v1  ;;  %v4017_v2 = vld [vmem:[#allocation5 + $0x23f0] sm:$0xff] }
 0xee1   :  { %4184 = vmatpush1.msra.mxu1 %v3975_v7  ;;  %4260 = vmatprep.subr.mxu0 %v6745_v39  ;;  %v6799_v7 = vld [vmem:[#allocation10 + $0x18] sm:$0xff] }
 0xee2   :  { %4185 = vmatprep.subr.mxu1 %v3974_v9  ;;  %4261 = vmatpush1.msra.mxu0 %v6748_v11  ;;  %v4016_v9 = vld [vmem:[#allocation5 + $0x23e8] sm:$0xff] }
 0xee3   :  { %4186 = vmatpush1.msra.mxu1 %v3973_v56  ;;  %4262 = vmatprep.subr.mxu0 %v6751_v27  ;;  %v6802_v56 = vld [vmem:[#allocation10 + $0x10] sm:$0xff] }
 0xee4   :  { %4187 = vmatprep.subr.mxu1 %v3972_v54  ;;  %4263 = vmatpush1.msra.mxu0 %v6754_v63  ;;  %v4015_v54 = vld [vmem:[#allocation5 + $0x23e0] sm:$0xff] }
 0xee5   :  { %4188 = vmatpush1.msra.mxu1 %v3971_v4  ;;  %4264 = vmatprep.subr.mxu0 %v6757_v5  ;;  %v6805_v4 = vld [vmem:[#allocation10 + $0x8] sm:$0xff] }
 0xee6   :  { %4189 = vmatprep.subr.mxu1 %v3970_v14  ;;  %4265 = vmatpush1.msra.mxu0 %v6760_v24  ;;  %v4014_v14 = vld [vmem:[#allocation5 + $0x23d8] sm:$0xff] }
 0xee7   :  { %4190 = vmatpush1.msra.mxu1 %v3969_v34  ;;  %4266 = vmatprep.subr.mxu0 %v6763_v41  ;;  %v6808_v34 = vld [vmem:[#allocation10] sm:$0xff] }
 0xee8   :  { %4191 = vmatprep.subr.mxu1 %v3968_v6  ;;  %4267 = vmatpush1.msra.mxu0 %v6766_v31  ;;  %v4013_v6 = vld [vmem:[#allocation5 + $0x23d0] sm:$0xff] }
 0xee9   :  { %4192 = vmatpush1.msra.mxu1 %v3967_v49  ;;  %4268 = vmatprep.subr.mxu0 %v6769_v40  ;;  %v6811_v49 = vld [vmem:[#allocation10 + $0x1f8] sm:$0xff] }
 0xeea   :  { %4193 = vmatprep.subr.mxu1 %v3966_v53  ;;  %4269 = vmatpush1.msra.mxu0 %v6772_v46  ;;  %v4012_v53 = vld [vmem:[#allocation5 + $0x23c8] sm:$0xff] }
 0xeeb   :  { %4194 = vmatpush1.msra.mxu1 %v3965_v10  ;;  %4270 = vmatprep.subr.mxu0 %v6775_v48  ;;  %v6814_v10 = vld [vmem:[#allocation10 + $0x1f0] sm:$0xff] }
 0xeec   :  { %4195 = vmatprep.subr.mxu1 %v3964_v42  ;;  %4271 = vmatpush1.msra.mxu0 %v6778_v57  ;;  %v4011_v42 = vld [vmem:[#allocation5 + $0x23c0] sm:$0xff] }
 0xeed   :  { %4196 = vmatpush1.msra.mxu1 %v3963_v19  ;;  %4272 = vmatprep.subr.mxu0 %v6781_v22  ;;  %v6817_v19 = vld [vmem:[#allocation10 + $0x1e8] sm:$0xff] }
 0xeee   :  { %4197 = vmatprep.subr.mxu1 %v3962_v28  ;;  %4273 = vmatpush1.msra.mxu0 %v6784_v61  ;;  %v4010_v28 = vld [vmem:[#allocation5 + $0x23b8] sm:$0xff] }
 0xeef   :  { %4198 = vmatpush1.msra.mxu1 %v3961_v50  ;;  %4274 = vmatprep.subr.mxu0 %v6787_v44  ;;  %v6820_v50 = vld [vmem:[#allocation10 + $0x1e0] sm:$0xff] }
 0xef0   :  { %4199 = vmatprep.subr.mxu1 %v3960_v38  ;;  %4275 = vmatpush1.msra.mxu0 %v6790_v62  ;;  %v4009_v38 = vld [vmem:[#allocation5 + $0x23b0] sm:$0xff] }
 0xef1   :  { %4200 = vmatpush1.msra.mxu1 %v3959_v32  ;;  %4276 = vmatprep.subr.mxu0 %v6793_v30  ;;  %v6823_v32 = vld [vmem:[#allocation10 + $0x1d8] sm:$0xff] }
 0xef2   :  { %4201 = vmatprep.subr.mxu1 %v3958_v8  ;;  %4277 = vmatpush1.msra.mxu0 %v6796_v18  ;;  %v4008_v8 = vld [vmem:[#allocation5 + $0x23a8] sm:$0xff] }
 0xef3   :  { %4202 = vmatpush1.msra.mxu1 %v3957_v20  ;;  %4278 = vmatprep.subr.mxu0 %v6799_v7  ;;  %v6826_v20 = vld [vmem:[#allocation10 + $0x1d0] sm:$0xff] }
 0xef4   :  { %4203 = vmatprep.subr.mxu1 %v3956_v60  ;;  %4279 = vmatpush1.msra.mxu0 %v6802_v56  ;;  %v4007_v60 = vld [vmem:[#allocation5 + $0x23a0] sm:$0xff] }
 0xef5   :  { %4204 = vmatpush1.msra.mxu1 %v3955_v36  ;;  %4280 = vmatprep.subr.mxu0 %v6805_v4  ;;  %v6829_v36 = vld [vmem:[#allocation10 + $0x1c8] sm:$0xff] }
 0xef6   :  { %4205 = vmatprep.subr.mxu1 %v4018_v43  ;;  %4281 = vmatpush1.msra.mxu0 %v6808_v34  ;;  %v4006_v43 = vld [vmem:[#allocation5 + $0x2398] sm:$0xff] }
 0xef7   :  { %4206 = vmatpush2.msra.mxu1 %v4017_v2  ;;  %4282 = vmatprep.subr.mxu0 %v6811_v49  ;;  %v6832_v2 = vld [vmem:[#allocation10 + $0x1c0] sm:$0xff] }
 0xef8   :  { %4207 = vmatprep.subr.mxu1 %v4016_v9  ;;  %4283 = vmatpush2.msra.mxu0 %v6814_v10  ;;  %v4005_v9 = vld [vmem:[#allocation5 + $0x2390] sm:$0xff] }
 0xef9   :  { %4208 = vmatpush2.msra.mxu1 %v4015_v54  ;;  %4284 = vmatprep.subr.mxu0 %v6817_v19  ;;  %v6835_v54 = vld [vmem:[#allocation10 + $0x1b8] sm:$0xff] }
 0xefa   :  { %4209 = vmatprep.subr.mxu1 %v4014_v14  ;;  %4285 = vmatpush2.msra.mxu0 %v6820_v50  ;;  %v4004_v14 = vld [vmem:[#allocation5 + $0x2388] sm:$0xff] }
 0xefb   :  { %4210 = vmatpush2.msra.mxu1 %v4013_v6  ;;  %4286 = vmatprep.subr.mxu0 %v6823_v32  ;;  %v6838_v6 = vld [vmem:[#allocation10 + $0x1b0] sm:$0xff] }
 0xefc   :  { %4211 = vmatprep.subr.mxu1 %v4012_v53  ;;  %4287 = vmatpush2.msra.mxu0 %v6826_v20  ;;  %v4003_v53 = vld [vmem:[#allocation5 + $0x2380] sm:$0xff] }
 0xefd   :  { %4212 = vmatpush2.msra.mxu1 %v4011_v42  ;;  %4288 = vmatprep.subr.mxu0 %v6829_v36  ;;  %v6841_v42 = vld [vmem:[#allocation10 + $0x1a8] sm:$0xff] }
 0xefe   :  { %4213 = vmatprep.subr.mxu1 %v4010_v28  ;;  %4289 = vmatpush2.msra.mxu0 %v6832_v2  ;;  %v4002_v28 = vld [vmem:[#allocation5 + $0x2378] sm:$0xff] }
 0xeff   :  { %4214 = vmatpush2.msra.mxu1 %v4009_v38  ;;  %4290 = vmatprep.subr.mxu0 %v6835_v54  ;;  %v6844_v38 = vld [vmem:[#allocation10 + $0x1a0] sm:$0xff] }
 0xf00   :  { %4215 = vmatprep.subr.mxu1 %v4008_v8  ;;  %4291 = vmatpush2.msra.mxu0 %v6838_v6  ;;  %v4001_v8 = vld [vmem:[#allocation5 + $0x2370] sm:$0xff] }
 0xf01   :  { %4216 = vmatpush2.msra.mxu1 %v4007_v60  ;;  %4292 = vmatprep.subr.mxu0 %v6841_v42  ;;  %v6847_v60 = vld [vmem:[#allocation10 + $0x198] sm:$0xff] }
 0xf02   :  { %4217 = vmatprep.subr.mxu1 %v4006_v43  ;;  %4293 = vmatpush2.msra.mxu0 %v6844_v38  ;;  %v6850_v43 = vld [vmem:[#allocation10 + $0x190] sm:$0xff] }
 0xf03   :  { %4218 = vmatpush2.msra.mxu1 %v4005_v9  ;;  %4294 = vmatprep.subr.mxu0 %v6847_v60  ;;  %v6853_v9 = vld [vmem:[#allocation10 + $0x188] sm:$0xff] }
 0xf04   :  { %4219 = vmatprep.subr.mxu1 %v4004_v14  ;;  %4295 = vmatpush2.msra.mxu0 %v6850_v43  ;;  %v6856_v14 = vld [vmem:[#allocation10 + $0x180] sm:$0xff] }
 0xf05   :  { %4220 = vmatpush2.msra.mxu1 %v4003_v53  ;;  %4296 = vmatprep.subr.mxu0 %v6853_v9  ;;  %7230 = vst [vmem:[#allocation29_spill] sm:$0xff] %v6856_v14  ;;  %v6859_v53 = vld [vmem:[#allocation10 + $0x178] sm:$0xff] }
 0xf06   :  { %4221 = vmatprep.subr.mxu1 %v4002_v28  ;;  %4297 = vmatpush2.msra.mxu0 %v6856_v14  ;;  %7231 = vst [vmem:[#allocation30_spill] sm:$0xff] %v6859_v53  ;;  %v6862_v28 = vld [vmem:[#allocation10 + $0x170] sm:$0xff]  ;;  %v3994_v14 = vld [vmem:[#allocation5 + $0x2338] sm:$0xff] }
 0xf07   :  { %4222 = vmatpush2.msra.mxu1 %v4001_v8  ;;  %4298 = vmatprep.subr.mxu0 %v6859_v53  ;;  %7232 = vst [vmem:[#allocation31_spill] sm:$0xff] %v6862_v28  ;;  %v6865_v8 = vld [vmem:[#allocation10 + $0x168] sm:$0xff]  ;;  %v3993_v53 = vld [vmem:[#allocation5 + $0x2330] sm:$0xff] }
 0xf08   :  { %4223 = vmatprep.subr.mxu1 %v4000_v47  ;;  %4299 = vmatpush2.msra.mxu0 %v6862_v28  ;;  %7233 = vst [vmem:[#allocation32_spill] sm:$0xff] %v6865_v8  ;;  %v6868_v47 = vld [vmem:[#allocation10 + $0x160] sm:$0xff]  ;;  %v3992_v28 = vld [vmem:[#allocation5 + $0x2328] sm:$0xff] }
 0xf09   :  { %4224 = vmatpush2.msra.mxu1 %v3999_v45  ;;  %4300 = vmatprep.subr.mxu0 %v6865_v8  ;;  %7234 = vst [vmem:[#allocation33_spill] sm:$0xff] %v6868_v47  ;;  %v6871_v45 = vld [vmem:[#allocation10 + $0x158] sm:$0xff]  ;;  %v3991_v8 = vld [vmem:[#allocation5 + $0x2320] sm:$0xff] }
 0xf0a   :  { %4225 = vmatprep.subr.mxu1 %v3998_v29  ;;  %4301 = vmatpush2.msra.mxu0 %v6868_v47  ;;  %7235 = vst [vmem:[#allocation34_spill] sm:$0xff] %v6871_v45  ;;  %v6874_v29 = vld [vmem:[#allocation10 + $0x150] sm:$0xff]  ;;  %v3990_v47 = vld [vmem:[#allocation5 + $0x2318] sm:$0xff] }
 0xf0b   :  { %4226 = vmatpush2.msra.mxu1 %v3997_v0  ;;  %4302 = vmatprep.subr.mxu0 %v6871_v45  ;;  %7236 = vst [vmem:[#allocation21_spill] sm:$0xff] %v6874_v29  ;;  %v6877_v0 = vld [vmem:[#allocation10 + $0x148] sm:$0xff]  ;;  %v3989_v45 = vld [vmem:[#allocation5 + $0x2310] sm:$0xff] }
 0xf0c   :  { %4227 = vmatprep.subr.mxu1 %v3996_v17  ;;  %4303 = vmatpush2.msra.mxu0 %v6874_v29  ;;  %7237 = vst [vmem:[#allocation22_spill] sm:$0xff] %v6877_v0  ;;  %v6880_v17 = vld [vmem:[#allocation10 + $0x140] sm:$0xff]  ;;  %v3988_v29 = vld [vmem:[#allocation5 + $0x2308] sm:$0xff] }
 0xf0d   :  { %4228 = vmatpush2.msra.mxu1 %v3995_v52  ;;  %4304 = vmatprep.subr.mxu0 %v6877_v0  ;;  %7238 = vst [vmem:[#allocation23_spill] sm:$0xff] %v6880_v17  ;;  %v6883_v52 = vld [vmem:[#allocation10 + $0x138] sm:$0xff]  ;;  %v3987_v0 = vld [vmem:[#allocation5 + $0x2300] sm:$0xff]  ;;  %v7243_v55 = vld [vmem:[#allocation29_spill] sm:$0xff] }
 0xf0e   :  { %4229 = vmatprep.subr.mxu1 %v3994_v14  ;;  %4305 = vmatpush2.msra.mxu0 %v6880_v17  ;;  %v6886_v14 = vld [vmem:[#allocation10 + $0x130] sm:$0xff]  ;;  %v6892_v17 = vld [vmem:[#allocation10 + $0x120] sm:$0xff] }
 0xf0f   :  { %4230 = vmatpush2.msra.mxu1 %v3993_v53  ;;  %4306 = vmatprep.subr.mxu0 %v6883_v52  ;;  %v6889_v53 = vld [vmem:[#allocation10 + $0x128] sm:$0xff] }
 0xf10   :  { %4231 = vmatprep.subr.mxu1 %v3992_v28  ;;  %4307 = vmatpush2.msra.mxu0 %v6886_v14  ;;  %v6895_v28 = vld [vmem:[#allocation10 + $0x118] sm:$0xff] }
 0xf11   :  { %4232 = vmatpush2.msra.mxu1 %v3991_v8  ;;  %4308 = vmatprep.subr.mxu0 %v6889_v53  ;;  %v6898_v8 = vld [vmem:[#allocation10 + $0x110] sm:$0xff] }
 0xf12   :  { %4233 = vmatprep.subr.mxu1 %v3990_v47  ;;  %4309 = vmatpush2.msra.mxu0 %v6892_v17  ;;  %7239 = vst [vmem:[#allocation24_spill] sm:$0xff] %v6898_v8  ;;  %v7240_v47 = vsel %vm5101_vm2, %v6681_v12, %v6684_v13  ;;  %v7246_v12 = vld [vmem:[#allocation32_spill] sm:$0xff]  ;;  %v7247_v13 = vld [vmem:[#allocation33_spill] sm:$0xff] }
 0xf13   :  { %4234 = vmatpush2.msra.mxu1 %v3989_v45  ;;  %4310 = vmatprep.subr.mxu0 %v6895_v28  ;;  %v6906_v45 = vld [vmem:[#allocation10 + $0x108] sm:$0xff]  ;;  %v7250_v35 = vld [vmem:[#allocation22_spill] sm:$0xff] }
 0xf14   :  { %4235 = vmatprep.subr.mxu1 %v3988_v29  ;;  %4311 = vmatpush2.msra.mxu0 %v6898_v8  ;;  %v7241_v29 = vsel %vm5114_vm3, %v6673_v59, %v6676_v15  ;;  %v4884_v8 = vld [vmem:[#allocation10 + $0xf8] sm:$0xff]  ;;  %v7244_v59 = vld [vmem:[#allocation30_spill] sm:$0xff]  ;;  %v7249_v58 = vld [vmem:[#allocation21_spill] sm:$0xff] }
 0xf15   :  { %4236 = vmatpush2.msra.mxu1 %v3987_v0  ;;  %4312 = vmatprep.subr.mxu0 %v6906_v45  ;;  %v6914_v0 = vld [vmem:[#allocation10 + $0x100] sm:$0xff]  ;;  %v7245_v15 = vld [vmem:[#allocation31_spill] sm:$0xff] }
 0xf16   :  { %4238 = vmatmul.mubr.f32.vlgmr.msra.gmra.mxu1 %v7240_v47  ;;  %4313 = vmatpush2.msra.mxu0 %v6914_v0 }
 0xf17   :  { %4243 = vmatprep.mubr.f32.mxu1 %v7241_v29  ;;  %4351 = vmatprep.subr.mxu1 %v4884_v8 }
 0xf18   :  { %4352 = vmatpush1.msra.mxu1 %v6686_v37  ;;  %v7248_v37 = vld [vmem:[#allocation34_spill] sm:$0xff] }
 0xf19   :  { %4353 = vmatprep.subr.mxu1 %v6715_v26  ;;  %v7251_v26 = vld [vmem:[#allocation23_spill] sm:$0xff] }
 0xf1a   :  { %4244 = vmatmul.mubr.f32.gmra.mxu1 %v7242_v51 }
 0xf1b   :  { %4354 = vmatpush1.msra.mxu1 %v6722_v23  ;;  %v7252_v23 = vld [vmem:[#allocation24_spill] sm:$0xff] }
 0xf1c   :  { %4355 = vmatprep.subr.mxu1 %v6727_v33 }
 0xf1d   :  { %4356 = vmatpush1.msra.mxu1 %v6730_v21 }
 0xf1e   :  { %4357 = vmatprep.subr.mxu1 %v6733_v16 }
 0xf1f   :  { %4358 = vmatpush1.msra.mxu1 %v6736_v3 }
 0xf20   :  { %4359 = vmatprep.subr.mxu1 %v6739_v25 }
 0xf21   :  { %4360 = vmatpush1.msra.mxu1 %v6742_v1 }
 0xf22   :  { %4361 = vmatprep.subr.mxu1 %v6745_v39 }
 0xf23   :  { %4362 = vmatpush1.msra.mxu1 %v6748_v11 }
 0xf24   :  { %4363 = vmatprep.subr.mxu1 %v6751_v27 }
 0xf25   :  { %4364 = vmatpush1.msra.mxu1 %v6754_v63 }
 0xf26   :  { %4365 = vmatprep.subr.mxu1 %v6757_v5 }
 0xf27   :  { %4366 = vmatpush1.msra.mxu1 %v6760_v24 }
 0xf28   :  { %4367 = vmatprep.subr.mxu1 %v6763_v41 }
 0xf29   :  { %4368 = vmatpush1.msra.mxu1 %v6766_v31 }
 0xf2a   :  { %4369 = vmatprep.subr.mxu1 %v6769_v40 }
 0xf2b   :  { %4370 = vmatpush1.msra.mxu1 %v6772_v46 }
 0xf2c   :  { %4371 = vmatprep.subr.mxu1 %v6775_v48 }
 0xf2d   :  { %4372 = vmatpush1.msra.mxu1 %v6778_v57 }
 0xf2e   :  { %4373 = vmatprep.subr.mxu1 %v6781_v22 }
 0xf2f   :  { %4374 = vmatpush1.msra.mxu1 %v6784_v61 }
 0xf30   :  { %4375 = vmatprep.subr.mxu1 %v6787_v44 }
 0xf31   :  { %4376 = vmatpush1.msra.mxu1 %v6790_v62 }
 0xf32   :  { %4377 = vmatprep.subr.mxu1 %v6793_v30 }
 0xf33   :  { %4378 = vmatpush1.msra.mxu1 %v6796_v18 }
 0xf34   :  { %4379 = vmatprep.subr.mxu1 %v6799_v7 }
 0xf35   :  { %4380 = vmatpush1.msra.mxu1 %v6802_v56 }
 0xf36   :  { %4381 = vmatprep.subr.mxu1 %v6805_v4 }
 0xf37   :  { %4382 = vmatpush1.msra.mxu1 %v6808_v34 }
 0xf38   :  { %4383 = vmatprep.subr.mxu1 %v6811_v49 }
 0xf39   :  { %4384 = vmatpush2.msra.mxu1 %v6814_v10 }
 0xf3a   :  { %4385 = vmatprep.subr.mxu1 %v6817_v19 }
 0xf3b   :  { %4386 = vmatpush2.msra.mxu1 %v6820_v50 }
 0xf3c   :  { %4387 = vmatprep.subr.mxu1 %v6823_v32 }
 0xf3d   :  { %4388 = vmatpush2.msra.mxu1 %v6826_v20 }
 0xf3e   :  { %4389 = vmatprep.subr.mxu1 %v6829_v36 }
 0xf3f   :  { %4390 = vmatpush2.msra.mxu1 %v6832_v2 }
 0xf40   :  { %4391 = vmatprep.subr.mxu1 %v6835_v54 }
 0xf41   :  { %4392 = vmatpush2.msra.mxu1 %v6838_v6 }
 0xf42   :  { %4393 = vmatprep.subr.mxu1 %v6841_v42 }
 0xf43   :  { %4394 = vmatpush2.msra.mxu1 %v6844_v38 }
 0xf44   :  { %4395 = vmatprep.subr.mxu1 %v6847_v60 }
 0xf45   :  { %4396 = vmatpush2.msra.mxu1 %v6850_v43 }
 0xf46   :  { %4397 = vmatprep.subr.mxu1 %v6853_v9 }
 0xf47   :  { %4398 = vmatpush2.msra.mxu1 %v7243_v55 }
 0xf48   :  { %4399 = vmatprep.subr.mxu1 %v7244_v59 }
 0xf49   :  { %4400 = vmatpush2.msra.mxu1 %v7245_v15 }
 0xf4a   :  { %4401 = vmatprep.subr.mxu1 %v7246_v12 }
 0xf4b   :  { %4402 = vmatpush2.msra.mxu1 %v7247_v13 }
 0xf4c   :  { %4403 = vmatprep.subr.mxu1 %v7248_v37 }
 0xf4d   :  { %4404 = vmatpush2.msra.mxu1 %v7249_v58 }
 0xf4e   :  { %4405 = vmatprep.subr.mxu1 %v7250_v35 }
 0xf4f   :  { %4406 = vmatpush2.msra.mxu1 %v7251_v26 }
 0xf50   :  { %4407 = vmatprep.subr.mxu1 %v6883_v52 }
 0xf51   :  { %4408 = vmatpush2.msra.mxu1 %v6886_v14 }
 0xf52   :  { %4409 = vmatprep.subr.mxu1 %v6889_v53 }
 0xf53   :  { %4410 = vmatpush2.msra.mxu1 %v6892_v17 }
 0xf54   :  { %4411 = vmatprep.subr.mxu1 %v6895_v28 }
 0xf55   :  { %4412 = vmatpush2.msra.mxu1 %v7252_v23 }
 0xf56   :  { %4413 = vmatprep.subr.mxu1 %v6906_v45 }
 0xf57   :  { %4414 = vmatpush2.msra.mxu1 %v6914_v0 }
 0xf92   :  { %v4162_v16 = vpop.f32.mrf.mxu0 }
 0xf94   :  { %v4164_v25 = vpop.f32.mrf.mxu0 }
 0xf96   :  { %v4085_v33 = vpop.f32.mrf.mxu1  ;;  %v4168_v39 = vpop.f32.mrf.mxu0 }
 0xf97   :  { %v4163_v63 = vadd.f32 %v4162_v16, %v4085_v33 }
 0xf98   :  { %v4087_v21 = vpop.f32.mrf.mxu1  ;;  %v4170_v41 = vpop.f32.mrf.mxu0 }
 0xf99   :  { %v4165_v27 = vadd.f32 %v4164_v25, %v4087_v21 }
 0xf9a   :  { %v4091_v3 = vpop.f32.mrf.mxu1 }
 0xf9b   :  { %v4169_v48 = vadd.f32 %v4168_v39, %v4091_v3 }
 0xf9c   :  { %v4093_v1 = vpop.f32.mrf.mxu1 }
 0xf9d   :  { %v4171_v46 = vadd.f32 %v4170_v41, %v4093_v1 }
 0xfd6   :  { %v4239_v11 = vpop.f32.mrf.mxu1 }
 0xfd7   :  { %v4240_v31 = vadd.f32 %v4239_v11, %v4163_v63  ;;  %v7253_v63 = vld [vmem:[#allocation18_spill] sm:$0xff] }
 0xfd8   :  { %v4241_v5 = vpop.f32.mrf.mxu1 }
 0xfd9   :  { %v4242_v24 = vadd.f32 %v4241_v5, %v4165_v27 }
 0xfda   :  { %v4245_v40 = vpop.f32.mrf.mxu1 }
 0xfdb   :  { %4314 = vmatprep.mubr.f32.mxu0 %v4242_v24  ;;  %v4246_v61 = vadd.f32 %v4245_v40, %v4169_v48 }
 0xfdc   :  { %v4247_v57 = vpop.f32.mrf.mxu1  ;;  %4315 = vmatmul.mubr.f32.vlgmr.msra.gmra.mxu0 %v4240_v31 }
 0xfdd   :  { %v4248_v22 = vadd.f32 %v4247_v57, %v4171_v46  ;;  %v7254_v46 = vld [vmem:[#allocation19_spill] sm:$0xff]  ;;  %v7255_v57 = vld [vmem:[#allocation20_spill] sm:$0xff] }
 0xfdf   :  { %4320 = vmatprep.mubr.f32.mxu0 %v4248_v22 }
 0xfe0   :  { %4321 = vmatmul.mubr.f32.gmra.mxu0 %v4246_v61 }
0x109c   :  { %v4316_v44 = vpop.f32.mrf.mxu0 }
0x109e   :  { %v4318_v62 = vpop.f32.mrf.mxu0 }
0x10a0   :  { %v4322_v30 = vpop.f32.mrf.mxu0 }
0x10a1   :  { %v4327_v18 = vadd.f32 %v4322_v30, %v4316_v44 }
0x10a2   :  { %v4324_v7 = vpop.f32.mrf.mxu0 }
0x10a3   :  { %v4328_v56 = vrot.slane %v4327_v18, 4  ;;  %v4334_v4 = vadd.f32 %v4324_v7, %v4318_v62 }
0x10a5   :  { %v4329_v34 = vadd.f32 %v4328_v56, %v4327_v18  ;;  %v4335_v49 = vrot.slane %v4334_v4, 4 }
0x10a7   :  { %v4330_v10 = vrot.slane %v4329_v34, 2  ;;  %v4336_v19 = vadd.f32 %v4335_v49, %v4334_v4 }
0x10a9   :  { %v4331_v50 = vadd.f32 %v4330_v10, %v4329_v34  ;;  %v4337_v32 = vrot.slane %v4336_v19, 2  ;;  %v7256_v10 = vld [vmem:[#allocation27_spill] sm:$0xff] }
0x10ab   :  { %v4332_v20 = vrot.slane %v4331_v50, 1  ;;  %v4338_v36 = vadd.f32 %v4337_v32, %v4336_v19 }
0x10ad   :  { %v4333_v2 = vadd.f32 %v4332_v20, %v4331_v50  ;;  %v4339_v54 = vrot.slane %v4338_v36, 1  ;;  %v7257_v50 = vld [vmem:[#allocation25_spill] sm:$0xff]  ;;  %v7258_v20 = vld [vmem:[#allocation26_spill] sm:$0xff] }
0x10af   :  { %v4341_v6 = vmul.f32 0.0078125, %v4333_v2  ;;  %v4340_v42 = vadd.f32 %v4339_v54, %v4338_v36  ;;  %v7259_v2 = vld [vmem:[#allocation28_spill] sm:$0xff] }
0x10b1   :  { %v4342_v38 = vmul.f32 0.0078125, %v4340_v42  ;;  %v4343_v60 = vsub.f32 %v4240_v31, %v4341_v6  ;;  %v4345_v14 = vsub.f32 %v4246_v61, %v4341_v6  ;;  %v4485_v31 = vld [vmem:[#allocation8 + $0x5] ss:$8 sm:$0x3] }
0x10b2   :  { %v4490_v61 = vrot.slane %v4485_v31, %v7254_v46  ;;  %v4494_v44 = vrot.slane %v4485_v31, %v7255_v57 }
0x10b3   :  { %v4344_v43 = vsub.f32 %v4242_v24, %v4342_v38  ;;  %v4346_v9 = vsub.f32 %v4248_v22, %v4342_v38  ;;  %v4347_v52 = vmul.f32 %v4343_v60, %v4343_v60  ;;  %v4349_v28 = vmul.f32 %v4345_v14, %v4345_v14  ;;  %v4445_v24 = vld [vmem:[#allocation7 + $0x5] ss:$8 sm:$0x3] }
0x10b5   :  { %v4348_v17 = vmul.f32 %v4344_v43, %v4344_v43  ;;  %v4350_v53 = vmul.f32 %v4346_v9, %v4346_v9 }
0x10b7   :  { %4415 = vmatprep.mubr.f32.mxu1 %v4348_v17 }
0x10b8   :  { %4416 = vmatmul.mubr.f32.vlgmr.msra.gmra.mxu1 %v4347_v52 }
0x10b9   :  { %4421 = vmatprep.mubr.f32.mxu1 %v4350_v53 }
0x10bc   :  { %4422 = vmatmul.mubr.f32.gmra.mxu1 %v4349_v28 }
0x1178   :  { %v4417_v8 = vpop.f32.mrf.mxu1 }
0x117a   :  { %v4419_v47 = vpop.f32.mrf.mxu1 }
0x117c   :  { %v4423_v45 = vpop.f32.mrf.mxu1 }
0x117d   :  { %v4428_v29 = vadd.f32 %v4423_v45, %v4417_v8 }
0x117e   :  { %v4425_v0 = vpop.f32.mrf.mxu1 }
0x117f   :  { %v4429_v51 = vrot.slane %v4428_v29, 4  ;;  %v4435_v55 = vadd.f32 %v4425_v0, %v4419_v47 }
0x1181   :  { %v4430_v59 = vadd.f32 %v4429_v51, %v4428_v29  ;;  %v4436_v15 = vrot.slane %v4435_v55, 4 }
0x1183   :  { %v4431_v12 = vrot.slane %v4430_v59, 2  ;;  %v4437_v13 = vadd.f32 %v4436_v15, %v4435_v55 }
0x1185   :  { %v4432_v37 = vadd.f32 %v4431_v12, %v4430_v59  ;;  %v4438_v58 = vrot.slane %v4437_v13, 2 }
0x1187   :  { %v4433_v35 = vrot.slane %v4432_v37, 1  ;;  %v4439_v26 = vadd.f32 %v4438_v58, %v4437_v13 }
0x1189   :  { %v4434_v23 = vadd.f32 %v4433_v35, %v4432_v37  ;;  %v4440_v33 = vrot.slane %v4439_v26, 1 }
0x118b   :  { %v4442_v21 = vmul.f32 0.0078125, %v4434_v23  ;;  %v4441_v16 = vadd.f32 %v4440_v33, %v4439_v26 }
0x118d   :  { %v4446_v3 = vadd.f32 1e-05, %v4442_v21  ;;  %v4443_v25 = vmul.f32 0.0078125, %v4441_v16 }
0x118f   :  { %v4447_v1 = vadd.f32 1e-05, %v4443_v25  ;;  %4557 = vrsqrt.f32 %v4446_v3 }
0x1191   :  { %4559 = vrsqrt.f32 %v4447_v1 }
0x119c   :  { %v4558_v39 = vpop.eup %4557 }
0x119e   :  { %v4560_v11 = vpop.eup %4559 }
0x119f   :  { %v4452_v27 = vcombine.low %v4558_v39, %v4560_v11 }
0x11a1   :  { %v4459_v5 = vrot.slane %v4452_v27, %v7253_v63 }
0x11a3   :  { %v4466_v41 = vrot.slane %v4459_v5, %v7253_v63 }
0x11a5   :  { %v4468_v40 = vmul.f32 %v4466_v41, %v4445_v24 }
0x11a7   :  { %v4473_v48 = vrot.slane %v4468_v40, %v7254_v46  ;;  %v4477_v22 = vrot.slane %v4468_v40, %v7255_v57 }
0x11a9   :  { %v4480_v62 = vmul.f32 %v4473_v48, %v4343_v60  ;;  %v4481_v30 = vmul.f32 %v4477_v22, %v4344_v43  ;;  %v4482_v18 = vmul.f32 %v4473_v48, %v4345_v14  ;;  %v4483_v7 = vmul.f32 %v4477_v22, %v4346_v9 }
0x11ab   :  { %v4497_v56 = vadd.f32 %v4490_v61, %v4480_v62  ;;  %v4498_v4 = vadd.f32 %v4494_v44, %v4481_v30  ;;  %v4499_v34 = vadd.f32 %v4490_v61, %v4482_v18  ;;  %v4500_v49 = vadd.f32 %v4494_v44, %v4483_v7 }
0x11ad   :  { %v4501_v19 = vadd.f32 %v4497_v56, %v7256_v10  ;;  %v4502_v32 = vadd.f32 %v4498_v4, %v7257_v50  ;;  %v4503_v36 = vadd.f32 %v4499_v34, %v7258_v20  ;;  %v4504_v54 = vadd.f32 %v4500_v49, %v7259_v2 }
0x11af   :  { %4505 = vst [vmem:[#allocation11] sm:$0xff] %v4501_v19  ;;  %4506 = vst [vmem:[#allocation11 + $0x8] sm:$0xff] %v4502_v32 }
0x11b0   :  { %4507 = vst [vmem:[#allocation11 + $0x10] sm:$0xff] %v4503_v36  ;;  %4508 = vst [vmem:[#allocation11 + $0x18] sm:$0xff] %v4504_v54 }
0x11b1   :  { %4996 = shalt.err (!%p4993_p1)
}
0x11b2   :  { %4520 = dma.vmem_to_hbm [thread:$0]  %s4515_s4, 512, %s7006_s5, [#allocation4], %s5015_s23, %s5015_s23, %s5016_s24  }
0x11b3   :  { %5011 = dma.done.wait [#allocation4], 512  }
0x11b4   :  { %5012 = vsyncadd [#allocation4], 4294966784 }
0x11b5   :  { %4524 = vsyncpa [#allocation3], 1 }
0x11b6   :  { %4525 = vsyncpa [#allocation6], 1 }
0x11b7   :  { %4526 = vsyncpa [#allocation9], 1 }
0x11b8   :  { %4527 = vsyncpa [#allocation4], 1 }

</bundles_post_ra>
